<compile_context>
chip_gen: v6e
topology: v6e:2x2x1
jax: 0.10.0
libtpu: 0.0.40
codegen_flags: <defaults>
</compile_context>

<pallas_src>
import jax
import jax.numpy as jnp
from jax.experimental import pallas as pl
from jax.experimental.pallas import tpu as pltpu

LANE = 128
EXPANSION = 4
LAYERS_CFG = [(64, 3, 1), (128, 4, 2), (256, 6, 2)]  # layer1..layer3 (layer4 cropped)


def _round_up(x, m):
    return pl.cdiv(x, m) * m


def _choose_tk(kp):
    """kp is a multiple of 128; pick a 128-multiple slab size that divides kp."""
    if kp <= 1024:
        return kp
    for tk in (1024, 896, 768, 640, 512, 384, 256, 128):
        if kp % tk == 0:
            return tk
    return 128


# ----------------------------------------------------------------------------
# Pallas kernels
# ----------------------------------------------------------------------------
def make_matmul_bn_kernel_single(relu: bool, has_res: bool):
    """Single-K-slab: bf16 matmul (f32 acc) + scale/bias (+ residual) (+ ReLU)."""

    def kernel(a_ref, b_ref, s_ref, c_ref, *rest):
        if has_res:
            r_ref, o_ref = rest
        else:
            (o_ref,) = rest
        acc = jnp.dot(a_ref[...], b_ref[...], preferred_element_type=jnp.float32)
        acc = acc * s_ref[...] + c_ref[...]
        if has_res:
            acc = acc + r_ref[...].astype(jnp.float32)
        if relu:
            acc = jnp.maximum(acc, 0.0)
        o_ref[...] = acc.astype(o_ref.dtype)

    return kernel


def make_matmul_bn_kernel_multi(relu: bool, has_res: bool):
    """Multi-K-slab version with VMEM f32 accumulator scratch."""

    def kernel(a_ref, b_ref, s_ref, c_ref, *rest):
        if has_res:
            r_ref, o_ref, acc_ref = rest
        else:
            o_ref, acc_ref = rest

        k = pl.program_id(2)

        @pl.when(k == 0)
        def _():
            acc_ref[...] = jnp.zeros_like(acc_ref)

        acc_ref[...] += jnp.dot(a_ref[...], b_ref[...],
                                preferred_element_type=jnp.float32)

        @pl.when(k == pl.num_programs(2) - 1)
        def _():
            acc = acc_ref[...] * s_ref[...] + c_ref[...]
            if has_res:
                acc = acc + r_ref[...].astype(jnp.float32)
            if relu:
                acc = jnp.maximum(acc, 0.0)
            o_ref[...] = acc.astype(o_ref.dtype)

    return kernel


def maxpool_kernel(x_ref, o_ref):
    # x_ref: (9, TM, C) stacked shifted windows -> max over the window axis.
    o_ref[...] = jnp.max(x_ref[...], axis=0)


# ----------------------------------------------------------------------------
# Pallas wrappers
# ----------------------------------------------------------------------------
def matmul_bn(a, b, scale, bias, *, relu, residual=None):
    """a: (M, K), b: (K, N), scale/bias: (N,). Returns (M, Np) bf16, Np = round_up(N, 128)."""
    M, K = a.shape
    N = b.shape[1]
    Np = _round_up(N, LANE)
    Kp = _round_up(K, LANE)

    a = a.astype(jnp.bfloat16)
    b = b.astype(jnp.bfloat16)
    scale = scale.astype(jnp.float32)
    bias = bias.astype(jnp.float32)

    if Kp != K:
        a = jnp.pad(a, ((0, 0), (0, Kp - K)))
        b = jnp.pad(b, ((0, Kp - K), (0, 0)))
    if Np != N:
        b = jnp.pad(b, ((0, 0), (0, Np - N)))
        scale = jnp.pad(scale, (0, Np - N))
        bias = jnp.pad(bias, (0, Np - N))
    scale2 = scale.reshape(1, Np)
    bias2 = bias.reshape(1, Np)

    has_res = residual is not None
    if has_res:
        residual = residual.astype(jnp.bfloat16)
        if residual.shape[1] != Np:
            residual = jnp.pad(residual, ((0, 0), (0, Np - residual.shape[1])))

    TM = 256 if M >= 256 else M
    TN = 256 if (Np >= 256 and Np % 256 == 0) else LANE
    TK = _choose_tk(Kp)
    n_k = Kp // TK
    single_k = n_k == 1

    bytes_accessed = 2 * (a.size + b.size + M * Np) + (2 * M * Np if has_res else 0)
    cost = pl.CostEstimate(flops=2 * M * Kp * Np, transcendentals=0,
                           bytes_accessed=bytes_accessed)

    args = [a, b, scale2, bias2]
    if has_res:
        args.append(residual)

    if single_k:
        grid = (pl.cdiv(M, TM), Np // TN)
        in_specs = [
            pl.BlockSpec((TM, Kp), lambda i, j: (i, 0)),
            pl.BlockSpec((Kp, TN), lambda i, j: (0, j)),
            pl.BlockSpec((1, TN), lambda i, j: (0, j)),
            pl.BlockSpec((1, TN), lambda i, j: (0, j)),
        ]
        if has_res:
            in_specs.append(pl.BlockSpec((TM, TN), lambda i, j: (i, j)))
        out = pl.pallas_call(
            make_matmul_bn_kernel_single(relu, has_res),
            out_shape=jax.ShapeDtypeStruct((M, Np), jnp.bfloat16),
            grid=grid,
            in_specs=in_specs,
            out_specs=pl.BlockSpec((TM, TN), lambda i, j: (i, j)),
            compiler_params=pltpu.CompilerParams(
                dimension_semantics=("parallel", "parallel"),
                vmem_limit_bytes=32 * 1024 * 1024,
            ),
            cost_estimate=cost,
        )(*args)
        return out

    grid = (pl.cdiv(M, TM), Np // TN, n_k)
    in_specs = [
        pl.BlockSpec((TM, TK), lambda i, j, k: (i, k)),
        pl.BlockSpec((TK, TN), lambda i, j, k: (k, j)),
        pl.BlockSpec((1, TN), lambda i, j, k: (0, j)),
        pl.BlockSpec((1, TN), lambda i, j, k: (0, j)),
    ]
    if has_res:
        in_specs.append(pl.BlockSpec((TM, TN), lambda i, j, k: (i, j)))

    out = pl.pallas_call(
        make_matmul_bn_kernel_multi(relu, has_res),
        out_shape=jax.ShapeDtypeStruct((M, Np), jnp.bfloat16),
        grid=grid,
        in_specs=in_specs,
        out_specs=pl.BlockSpec((TM, TN), lambda i, j, k: (i, j)),
        scratch_shapes=[pltpu.VMEM((TM, TN), jnp.float32)],
        compiler_params=pltpu.CompilerParams(
            dimension_semantics=("parallel", "parallel", "arbitrary"),
            vmem_limit_bytes=32 * 1024 * 1024,
        ),
        cost_estimate=cost,
    )(*args)
    return out


def im2col(x, kh, kw, stride, pad):
    """x: NHWC -> (N*Ho*Wo, kh*kw*C) patches ordered (di, dj, c), matching the weight."""
    N, H, W, C = x.shape
    Ho = (H + 2 * pad - kh) // stride + 1
    Wo = (W + 2 * pad - kw) // stride + 1
    if kh == 1 and kw == 1 and pad == 0:
        xs = x[:, ::stride, ::stride, :] if stride > 1 else x
        return xs.reshape(N * Ho * Wo, C), (N, Ho, Wo)
    # TODO(synk): replace materialized im2col for 3x3/7x7 convs with in-kernel tap
    # accumulation (manual DMA of shifted windows) to cut HBM traffic further.
    xp = jnp.pad(x, ((0, 0), (pad, pad), (pad, pad), (0, 0)))
    cols = []
    for di in range(kh):
        for dj in range(kw):
            cols.append(xp[:, di:di + stride * (Ho - 1) + 1:stride,
                              dj:dj + stride * (Wo - 1) + 1:stride, :])
    patches = jnp.concatenate(cols, axis=-1).reshape(N * Ho * Wo, kh * kw * C)
    return patches, (N, Ho, Wo)


def conv_bn(x, w, scale, bias, *, stride, pad, relu, residual=None):
    """Conv2d(bias=False) + folded BatchNorm (+ residual) (+ ReLU). x: NHWC bf16.

    The channel dim of x may be zero-padded beyond w's in_ch (lane-dense padding is kept
    end-to-end); the weight rows are zero-padded to match.
    """
    out_ch, in_ch, kh, kw = w.shape
    c_in = x.shape[-1]
    if c_in != in_ch:
        w = jnp.pad(w, ((0, 0), (0, c_in - in_ch), (0, 0), (0, 0)))
    patches, (N, Ho, Wo) = im2col(x, kh, kw, stride, pad)
    wm = jnp.transpose(w, (2, 3, 1, 0)).reshape(kh * kw * c_in, out_ch)
    res_flat = None
    if residual is not None:
        res_flat = residual.reshape(N * Ho * Wo, residual.shape[-1])
    out = matmul_bn(patches, wm, scale, bias, relu=relu, residual=res_flat)
    return out.reshape(N, Ho, Wo, out.shape[-1])


def maxpool2d_3x3_s2_p1(x):
    """x: NHWC, kernel 3, stride 2, padding 1 (PyTorch MaxPool2d semantics)."""
    N, H, W, C = x.shape
    Ho = (H + 2 - 3) // 2 + 1
    Wo = (W + 2 - 3) // 2 + 1
    pad_val = float(jnp.finfo(x.dtype).min)
    xp = jnp.pad(x, ((0, 0), (1, 1), (1, 1), (0, 0)), constant_values=pad_val)
    wins = []
    for di in range(3):
        for dj in range(3):
            wins.append(xp[:, di:di + 2 * (Ho - 1) + 1:2, dj:dj + 2 * (Wo - 1) + 1:2, :])
    M = N * Ho * Wo
    stacked = jnp.stack(wins, axis=0).reshape(9, M, C)
    TMP = 256 if M >= 256 else M
    out = pl.pallas_call(
        maxpool_kernel,
        out_shape=jax.ShapeDtypeStruct((M, C), x.dtype),
        grid=(pl.cdiv(M, TMP),),
        in_specs=[pl.BlockSpec((9, TMP, C), lambda i: (0, i, 0))],
        out_specs=pl.BlockSpec((TMP, C), lambda i: (i, 0)),
        compiler_params=pltpu.CompilerParams(
            dimension_semantics=("parallel",),
            vmem_limit_bytes=32 * 1024 * 1024,
        ),
    )(stacked)
    return out.reshape(N, Ho, Wo, C)


# ----------------------------------------------------------------------------
# Static architecture config (kept OUT of the jit-traced params pytree)
# ----------------------------------------------------------------------------
def resnet50_block_cfg():
    cfg = []
    in_planes = 64
    for planes, n_blocks, stride in LAYERS_CFG:
        blocks = []
        for b in range(n_blocks):
            s = stride if b == 0 else 1
            has_down = (b == 0) and (s != 1 or in_planes != planes * EXPANSION)
            blocks.append((s, has_down))
            in_planes = planes * EXPANSION
        cfg.append(blocks)
    return cfg


BLOCK_CFG = resnet50_block_cfg()


# ----------------------------------------------------------------------------
# Parameter construction (deterministic, resnet50 shapes, BN folded for eval)
# ----------------------------------------------------------------------------
def init_conv(key, out_ch, in_ch, kh, kw):
    fan_in = in_ch * kh * kw
    w = jax.random.normal(key, (out_ch, in_ch, kh, kw), jnp.float32)
    return w * jnp.sqrt(2.0 / fan_in).astype(jnp.float32)


def init_bn(key, ch):
    k1, k2, k3, k4 = jax.random.split(key, 4)
    gamma = 1.0 + 0.1 * jax.random.normal(k1, (ch,), jnp.float32)
    beta = 0.1 * jax.random.normal(k2, (ch,), jnp.float32)
    mean = 0.1 * jax.random.normal(k3, (ch,), jnp.float32)
    var = 1.0 + 0.1 * jax.random.uniform(k4, (ch,), jnp.float32)
    eps = 1e-5
    scale = gamma / jnp.sqrt(var + eps)
    bias = beta - mean * scale
    return scale, bias


def build_resnet50_params(key):
    params = {}
    key, k1, k2 = jax.random.split(key, 3)
    params["conv1_w"] = init_conv(k1, 64, 3, 7, 7)
    params["bn1_s"], params["bn1_b"] = init_bn(k2, 64)

    in_planes = 64
    layers = []
    for (planes, _, _), cfg_blocks in zip(LAYERS_CFG, BLOCK_CFG):
        blocks = []
        for (_, has_down) in cfg_blocks:
            key, kw1, kb1, kw2, kb2, kw3, kb3, kwd, kbd = jax.random.split(key, 9)
            blk = {
                "w1": init_conv(kw1, planes, in_planes, 1, 1),
                "w2": init_conv(kw2, planes, planes, 3, 3),
                "w3": init_conv(kw3, planes * EXPANSION, planes, 1, 1),
            }
            blk["s1"], blk["b1"] = init_bn(kb1, planes)
            blk["s2"], blk["b2"] = init_bn(kb2, planes)
            blk["s3"], blk["b3"] = init_bn(kb3, planes * EXPANSION)
            if has_down:
                blk["wd"] = init_conv(kwd, planes * EXPANSION, in_planes, 1, 1)
                blk["sd"], blk["bd"] = init_bn(kbd, planes * EXPANSION)
            blocks.append(blk)
            in_planes = planes * EXPANSION
        layers.append(blocks)
    params["layers"] = layers
    return params


# ----------------------------------------------------------------------------
# Forward pass (matches torchvision ResNet-50 Bottleneck, eval-mode BN)
# ----------------------------------------------------------------------------
def bottleneck(x, blk, stride, has_down):
    out = conv_bn(x, blk["w1"], blk["s1"], blk["b1"], stride=1, pad=0, relu=True)
    out = conv_bn(out, blk["w2"], blk["s2"], blk["b2"], stride=stride, pad=1, relu=True)
    if has_down:
        identity = conv_bn(x, blk["wd"], blk["sd"], blk["bd"], stride=stride, pad=0,
                           relu=False)
    else:
        identity = x
    # conv3 + bn3 + residual add + final relu, fused into one Pallas matmul kernel.
    return conv_bn(out, blk["w3"], blk["s3"], blk["b3"], stride=1, pad=0, relu=True,
                   residual=identity)


@jax.jit
def resnet_forward(x_nchw, params):
    # NCHW -> NHWC; carry activations in bf16 (MXU-friendly, halves HBM traffic).
    x = jnp.transpose(x_nchw, (0, 2, 3, 1)).astype(jnp.bfloat16)
    # stem: conv1 (7x7 s2 p3) + bn1 + relu, then maxpool 3x3 s2 p1
    x = conv_bn(x, params["conv1_w"], params["bn1_s"], params["bn1_b"],
                stride=2, pad=3, relu=True)
    x = maxpool2d_3x3_s2_p1(x)
    for blocks_p, blocks_c in zip(params["layers"], BLOCK_CFG):
        for blk, (s, has_down) in zip(blocks_p, blocks_c):
            x = bottleneck(x, blk, s, has_down)
    # layer3 output has exactly 1024 channels (lane-aligned) -> no slicing needed.
    return jnp.transpose(x, (0, 3, 1, 2)).astype(jnp.float32)  # back to NCHW, f32


# ----------------------------------------------------------------------------
if __name__ == "__main__":
    key = jax.random.PRNGKey(0)
    kx, kp = jax.random.split(key)
    # Small input consistent with the module: RGB images, NCHW.
    x = jax.random.normal(kx, (2, 3, 32, 32), jnp.float32)
    params = build_resnet50_params(kp)

    y = resnet_forward(x, params)
    y = jax.block_until_ready(y)

    # crop_last_block=True on resnet50 -> out_channels = 2048 // 2 = 1024, spatial /16
    assert y.shape == (2, 1024, 2, 2), y.shape
    assert bool(jnp.all(jnp.isfinite(y)))
    print("KERNEL_OK")
</pallas_src>

<mosaic_0001>
module attributes {stable_mosaic.version = 11 : i64} {
  func.func @kernel(%arg0: i32, %arg1: i32, %arg2: memref<256x256xbf16, #tpu.memory_space<vmem>>, %arg3: memref<256x128xbf16, #tpu.memory_space<vmem>>, %arg4: memref<1x128xf32, #tpu.memory_space<vmem>>, %arg5: memref<1x128xf32, #tpu.memory_space<vmem>>, %arg6: memref<256x128xbf16, #tpu.memory_space<vmem>>) attributes {dimension_semantics = [#tpu.dimension_semantics<parallel>, #tpu.dimension_semantics<parallel>], iteration_bounds = array<i64: 2, 1>, scalar_prefetch = 0 : i64, scratch_operands = 0 : i64, tpu.core_type = #tpu.core_type<tc>, window_params = [{transform_indices = @transform_0, window_bounds = array<i64: 256, 256>}, {transform_indices = @transform_1, window_bounds = array<i64: 256, 128>}, {transform_indices = @transform_2, window_bounds = array<i64: 1, 128>}, {transform_indices = @transform_3, window_bounds = array<i64: 1, 128>}, {transform_indices = @transform_4, window_bounds = array<i64: 256, 128>}]} {
    %c0 = arith.constant 0 : index
    %c0_0 = arith.constant 0 : index
    %0 = vector.load %arg2[%c0, %c0_0] : memref<256x256xbf16, #tpu.memory_space<vmem>>, vector<256x256xbf16>
    %c0_1 = arith.constant 0 : index
    %c0_2 = arith.constant 0 : index
    %1 = vector.load %arg3[%c0_1, %c0_2] : memref<256x128xbf16, #tpu.memory_space<vmem>>, vector<256x128xbf16>
    %cst = arith.constant dense<0.000000e+00> : vector<256x128xf32>
    %2 = tpu.matmul %0, %1, %cst {dimension_numbers = #tpu.dot_dimension_numbers<[1], [0], [0], [1], [0, 0, 1, 1], [], []>} : vector<256x256xbf16>, vector<256x128xbf16>, vector<256x128xf32> -> vector<256x128xf32>
    %c0_3 = arith.constant 0 : index
    %c0_4 = arith.constant 0 : index
    %3 = vector.load %arg4[%c0_3, %c0_4] : memref<1x128xf32, #tpu.memory_space<vmem>>, vector<1x128xf32>
    %4 = vector.broadcast %3 : vector<1x128xf32> to vector<256x128xf32>
    %5 = arith.mulf %2, %4 : vector<256x128xf32>
    %c0_5 = arith.constant 0 : index
    %c0_6 = arith.constant 0 : index
    %6 = vector.load %arg5[%c0_5, %c0_6] : memref<1x128xf32, #tpu.memory_space<vmem>>, vector<1x128xf32>
    %7 = vector.broadcast %6 : vector<1x128xf32> to vector<256x128xf32>
    %8 = arith.addf %5, %7 : vector<256x128xf32>
    %cst_7 = arith.constant 0.000000e+00 : f32
    %9 = vector.broadcast %cst_7 : f32 to vector<256x128xf32>
    %10 = arith.maximumf %8, %9 : vector<256x128xf32>
    %11 = arith.truncf %10 : vector<256x128xf32> to vector<256x128xbf16>
    %c0_8 = arith.constant 0 : index
    %c0_9 = arith.constant 0 : index
    %12 = vector.load %arg6[%c0_8, %c0_9] : memref<256x128xbf16, #tpu.memory_space<vmem>>, vector<256x128xbf16>
    tpu.vector_store %arg6[%c0_8, %c0_9], %11 {strides = array<i32>} : memref<256x128xbf16, #tpu.memory_space<vmem>>, vector<256x128xbf16>,
    return
  }
  func.func @transform_0(%arg0: i32, %arg1: i32) -> (i32, i32) {
    %c0_i32 = arith.constant 0 : i32
    %c0_i32_0 = arith.constant 0 : i32
    return %arg0, %c0_i32 : i32, i32
  }
  func.func @transform_1(%arg0: i32, %arg1: i32) -> (i32, i32) {
    %c0_i32 = arith.constant 0 : i32
    %c0_i32_0 = arith.constant 0 : i32
    return %c0_i32, %arg1 : i32, i32
  }
  func.func @transform_2(%arg0: i32, %arg1: i32) -> (i32, i32) {
    %c0_i32 = arith.constant 0 : i32
    %c0_i32_0 = arith.constant 0 : i32
    return %c0_i32, %arg1 : i32, i32
  }
  func.func @transform_3(%arg0: i32, %arg1: i32) -> (i32, i32) {
    %c0_i32 = arith.constant 0 : i32
    %c0_i32_0 = arith.constant 0 : i32
    return %c0_i32, %arg1 : i32, i32
  }
  func.func @transform_4(%arg0: i32, %arg1: i32) -> (i32, i32) {
    %c0_i32 = arith.constant 0 : i32
    return %arg0, %arg1 : i32, i32
  }
}

module attributes {stable_mosaic.version = 11 : i64} {
  func.func @maxpool_kernel(%arg0: i32, %arg1: memref<9x128x128xbf16, #tpu.memory_space<vmem>>, %arg2: memref<128x128xbf16, #tpu.memory_space<vmem>>) attributes {dimension_semantics = [#tpu.dimension_semantics<parallel>], iteration_bounds = array<i64: 1>, scalar_prefetch = 0 : i64, scratch_operands = 0 : i64, tpu.core_type = #tpu.core_type<tc>, window_params = [{transform_indices = @transform_0, window_bounds = array<i64: 9, 128, 128>}, {transform_indices = @transform_1, window_bounds = array<i64: 128, 128>}]} {
    %c0 = arith.constant 0 : index
    %c0_0 = arith.constant 0 : index
    %c0_1 = arith.constant 0 : index
    %0 = vector.load %arg1[%c0, %c0_0, %c0_1] : memref<9x128x128xbf16, #tpu.memory_space<vmem>>, vector<9x128x128xbf16>
    %cst = arith.constant dense<0xFF80> : vector<128x128xbf16>
    %1 = vector.multi_reduction <maximumf>, %0, %cst [0] : vector<9x128x128xbf16> to vector<128x128xbf16>
    %c0_2 = arith.constant 0 : index
    %c0_3 = arith.constant 0 : index
    %2 = vector.load %arg2[%c0_2, %c0_3] : memref<128x128xbf16, #tpu.memory_space<vmem>>, vector<128x128xbf16>
    tpu.vector_store %arg2[%c0_2, %c0_3], %1 {strides = array<i32>} : memref<128x128xbf16, #tpu.memory_space<vmem>>, vector<128x128xbf16>,
    return
  }
  func.func @transform_0(%arg0: i32) -> (i32, i32, i32) {
    %c0_i32 = arith.constant 0 : i32
    %c0_i32_0 = arith.constant 0 : i32
    %c0_i32_1 = arith.constant 0 : i32
    return %c0_i32, %arg0, %c0_i32_0 : i32, i32, i32
  }
  func.func @transform_1(%arg0: i32) -> (i32, i32) {
    %c0_i32 = arith.constant 0 : i32
    %c0_i32_0 = arith.constant 0 : i32
    return %arg0, %c0_i32 : i32, i32
  }
}

module attributes {stable_mosaic.version = 11 : i64} {
  func.func @kernel(%arg0: i32, %arg1: i32, %arg2: memref<128x128xbf16, #tpu.memory_space<vmem>>, %arg3: memref<128x128xbf16, #tpu.memory_space<vmem>>, %arg4: memref<1x128xf32, #tpu.memory_space<vmem>>, %arg5: memref<1x128xf32, #tpu.memory_space<vmem>>, %arg6: memref<128x128xbf16, #tpu.memory_space<vmem>>) attributes {dimension_semantics = [#tpu.dimension_semantics<parallel>, #tpu.dimension_semantics<parallel>], iteration_bounds = array<i64: 1, 1>, scalar_prefetch = 0 : i64, scratch_operands = 0 : i64, tpu.core_type = #tpu.core_type<tc>, window_params = [{transform_indices = @transform_0, window_bounds = array<i64: 128, 128>}, {transform_indices = @transform_1, window_bounds = array<i64: 128, 128>}, {transform_indices = @transform_2, window_bounds = array<i64: 1, 128>}, {transform_indices = @transform_3, window_bounds = array<i64: 1, 128>}, {transform_indices = @transform_4, window_bounds = array<i64: 128, 128>}]} {
    %c0 = arith.constant 0 : index
    %c0_0 = arith.constant 0 : index
    %0 = vector.load %arg2[%c0, %c0_0] : memref<128x128xbf16, #tpu.memory_space<vmem>>, vector<128x128xbf16>
    %c0_1 = arith.constant 0 : index
    %c0_2 = arith.constant 0 : index
    %1 = vector.load %arg3[%c0_1, %c0_2] : memref<128x128xbf16, #tpu.memory_space<vmem>>, vector<128x128xbf16>
    %cst = arith.constant dense<0.000000e+00> : vector<128x128xf32>
    %2 = tpu.matmul %0, %1, %cst {dimension_numbers = #tpu.dot_dimension_numbers<[1], [0], [0], [1], [0, 0, 1, 1], [], []>} : vector<128x128xbf16>, vector<128x128xbf16>, vector<128x128xf32> -> vector<128x128xf32>
    %c0_3 = arith.constant 0 : index
    %c0_4 = arith.constant 0 : index
    %3 = vector.load %arg4[%c0_3, %c0_4] : memref<1x128xf32, #tpu.memory_space<vmem>>, vector<1x128xf32>
    %4 = vector.broadcast %3 : vector<1x128xf32> to vector<128x128xf32>
    %5 = arith.mulf %2, %4 : vector<128x128xf32>
    %c0_5 = arith.constant 0 : index
    %c0_6 = arith.constant 0 : index
    %6 = vector.load %arg5[%c0_5, %c0_6] : memref<1x128xf32, #tpu.memory_space<vmem>>, vector<1x128xf32>
    %7 = vector.broadcast %6 : vector<1x128xf32> to vector<128x128xf32>
    %8 = arith.addf %5, %7 : vector<128x128xf32>
    %cst_7 = arith.constant 0.000000e+00 : f32
    %9 = vector.broadcast %cst_7 : f32 to vector<128x128xf32>
    %10 = arith.maximumf %8, %9 : vector<128x128xf32>
    %11 = arith.truncf %10 : vector<128x128xf32> to vector<128x128xbf16>
    %c0_8 = arith.constant 0 : index
    %c0_9 = arith.constant 0 : index
    %12 = vector.load %arg6[%c0_8, %c0_9] : memref<128x128xbf16, #tpu.memory_space<vmem>>, vector<128x128xbf16>
    tpu.vector_store %arg6[%c0_8, %c0_9], %11 {strides = array<i32>} : memref<128x128xbf16, #tpu.memory_space<vmem>>, vector<128x128xbf16>,
    return
  }
  func.func @transform_0(%arg0: i32, %arg1: i32) -> (i32, i32) {
    %c0_i32 = arith.constant 0 : i32
    %c0_i32_0 = arith.constant 0 : i32
    return %arg0, %c0_i32 : i32, i32
  }
  func.func @transform_1(%arg0: i32, %arg1: i32) -> (i32, i32) {
    %c0_i32 = arith.constant 0 : i32
    %c0_i32_0 = arith.constant 0 : i32
    return %c0_i32, %arg1 : i32, i32
  }
  func.func @transform_2(%arg0: i32, %arg1: i32) -> (i32, i32) {
    %c0_i32 = arith.constant 0 : i32
    %c0_i32_0 = arith.constant 0 : i32
    return %c0_i32, %arg1 : i32, i32
  }
  func.func @transform_3(%arg0: i32, %arg1: i32) -> (i32, i32) {
    %c0_i32 = arith.constant 0 : i32
    %c0_i32_0 = arith.constant 0 : i32
    return %c0_i32, %arg1 : i32, i32
  }
  func.func @transform_4(%arg0: i32, %arg1: i32) -> (i32, i32) {
    %c0_i32 = arith.constant 0 : i32
    return %arg0, %arg1 : i32, i32
  }
}

module attributes {stable_mosaic.version = 11 : i64} {
  func.func @kernel(%arg0: i32, %arg1: i32, %arg2: i32, %arg3: memref<128x384xbf16, #tpu.memory_space<vmem>>, %arg4: memref<384x128xbf16, #tpu.memory_space<vmem>>, %arg5: memref<1x128xf32, #tpu.memory_space<vmem>>, %arg6: memref<1x128xf32, #tpu.memory_space<vmem>>, %arg7: memref<128x128xbf16, #tpu.memory_space<vmem>>, %arg8: memref<128x128xf32, #tpu.memory_space<vmem>>) attributes {dimension_semantics = [#tpu.dimension_semantics<parallel>, #tpu.dimension_semantics<parallel>, #tpu.dimension_semantics<arbitrary>], iteration_bounds = array<i64: 1, 1, 3>, scalar_prefetch = 0 : i64, scratch_operands = 1 : i64, tpu.core_type = #tpu.core_type<tc>, window_params = [{transform_indices = @transform_0, window_bounds = array<i64: 128, 384>}, {transform_indices = @transform_1, window_bounds = array<i64: 384, 128>}, {transform_indices = @transform_2, window_bounds = array<i64: 1, 128>}, {transform_indices = @transform_3, window_bounds = array<i64: 1, 128>}, {transform_indices = @transform_4, window_bounds = array<i64: 128, 128>}]} {
    %c0_i32 = arith.constant 0 : i32
    %0 = arith.cmpi eq, %arg2, %c0_i32 : i32
    %1 = arith.extui %0 : i1 to i32
    %c0_i32_0 = arith.constant 0 : i32
    %2 = arith.cmpi ne, %1, %c0_i32_0 : i32
    scf.if %2 {
      %cst_9 = arith.constant 0.000000e+00 : f32
      %12 = vector.broadcast %cst_9 : f32 to vector<128x128xf32>
      %c0_10 = arith.constant 0 : index
      %c0_11 = arith.constant 0 : index
      %13 = vector.load %arg8[%c0_10, %c0_11] : memref<128x128xf32, #tpu.memory_space<vmem>>, vector<128x128xf32>
      tpu.vector_store %arg8[%c0_10, %c0_11], %12 {strides = array<i32>} : memref<128x128xf32, #tpu.memory_space<vmem>>, vector<128x128xf32>,
    } else {
    }
    %c0 = arith.constant 0 : index
    %c0_1 = arith.constant 0 : index
    %3 = vector.load %arg8[%c0, %c0_1] : memref<128x128xf32, #tpu.memory_space<vmem>>, vector<128x128xf32>
    %c0_2 = arith.constant 0 : index
    %c0_3 = arith.constant 0 : index
    %4 = vector.load %arg3[%c0_2, %c0_3] : memref<128x384xbf16, #tpu.memory_space<vmem>>, vector<128x384xbf16>
    %c0_4 = arith.constant 0 : index
    %c0_5 = arith.constant 0 : index
    %5 = vector.load %arg4[%c0_4, %c0_5] : memref<384x128xbf16, #tpu.memory_space<vmem>>, vector<384x128xbf16>
    %cst = arith.constant dense<0.000000e+00> : vector<128x128xf32>
    %6 = tpu.matmul %4, %5, %cst {dimension_numbers = #tpu.dot_dimension_numbers<[1], [0], [0], [1], [0, 0, 1, 1], [], []>} : vector<128x384xbf16>, vector<384x128xbf16>, vector<128x128xf32> -> vector<128x128xf32>
    %7 = arith.addf %3, %6 : vector<128x128xf32>
    %c0_6 = arith.constant 0 : index
    %c0_7 = arith.constant 0 : index
    %8 = vector.load %arg8[%c0_6, %c0_7] : memref<128x128xf32, #tpu.memory_space<vmem>>, vector<128x128xf32>
    tpu.vector_store %arg8[%c0_6, %c0_7], %7 {strides = array<i32>} : memref<128x128xf32, #tpu.memory_space<vmem>>, vector<128x128xf32>,
    %c2_i32 = arith.constant 2 : i32
    %9 = arith.cmpi eq, %arg2, %c2_i32 : i32
    %10 = arith.extui %9 : i1 to i32
    %c0_i32_8 = arith.constant 0 : i32
    %11 = arith.cmpi ne, %10, %c0_i32_8 : i32
    scf.if %11 {
      %c0_9 = arith.constant 0 : index
      %c0_10 = arith.constant 0 : index
      %12 = vector.load %arg8[%c0_9, %c0_10] : memref<128x128xf32, #tpu.memory_space<vmem>>, vector<128x128xf32>
      %c0_11 = arith.constant 0 : index
      %c0_12 = arith.constant 0 : index
      %13 = vector.load %arg5[%c0_11, %c0_12] : memref<1x128xf32, #tpu.memory_space<vmem>>, vector<1x128xf32>
      %14 = vector.broadcast %13 : vector<1x128xf32> to vector<128x128xf32>
      %15 = arith.mulf %12, %14 : vector<128x128xf32>
      %c0_13 = arith.constant 0 : index
      %c0_14 = arith.constant 0 : index
      %16 = vector.load %arg6[%c0_13, %c0_14] : memref<1x128xf32, #tpu.memory_space<vmem>>, vector<1x128xf32>
      %17 = vector.broadcast %16 : vector<1x128xf32> to vector<128x128xf32>
      %18 = arith.addf %15, %17 : vector<128x128xf32>
      %cst_15 = arith.constant 0.000000e+00 : f32
      %19 = vector.broadcast %cst_15 : f32 to vector<128x128xf32>
      %20 = arith.maximumf %18, %19 : vector<128x128xf32>
      %21 = arith.truncf %20 : vector<128x128xf32> to vector<128x128xbf16>
      %c0_16 = arith.constant 0 : index
      %c0_17 = arith.constant 0 : index
      %22 = vector.load %arg7[%c0_16, %c0_17] : memref<128x128xbf16, #tpu.memory_space<vmem>>, vector<128x128xbf16>
      tpu.vector_store %arg7[%c0_16, %c0_17], %21 {strides = array<i32>} : memref<128x128xbf16, #tpu.memory_space<vmem>>, vector<128x128xbf16>,
    } else {
    }
    return
  }
  func.func @transform_0(%arg0: i32, %arg1: i32, %arg2: i32) -> (i32, i32) {
    %c0_i32 = arith.constant 0 : i32
    return %arg0, %arg2 : i32, i32
  }
  func.func @transform_1(%arg0: i32, %arg1: i32, %arg2: i32) -> (i32, i32) {
    %c0_i32 = arith.constant 0 : i32
    return %arg2, %arg1 : i32, i32
  }
  func.func @transform_2(%arg0: i32, %arg1: i32, %arg2: i32) -> (i32, i32) {
    %c0_i32 = arith.constant 0 : i32
    %c0_i32_0 = arith.constant 0 : i32
    return %c0_i32, %arg1 : i32, i32
  }
  func.func @transform_3(%arg0: i32, %arg1: i32, %arg2: i32) -> (i32, i32) {
    %c0_i32 = arith.constant 0 : i32
    %c0_i32_0 = arith.constant 0 : i32
    return %c0_i32, %arg1 : i32, i32
  }
  func.func @transform_4(%arg0: i32, %arg1: i32, %arg2: i32) -> (i32, i32) {
    %c0_i32 = arith.constant 0 : i32
    return %arg0, %arg1 : i32, i32
  }
}

module attributes {stable_mosaic.version = 11 : i64} {
  func.func @kernel(%arg0: i32, %arg1: i32, %arg2: memref<128x128xbf16, #tpu.memory_space<vmem>>, %arg3: memref<128x256xbf16, #tpu.memory_space<vmem>>, %arg4: memref<1x256xf32, #tpu.memory_space<vmem>>, %arg5: memref<1x256xf32, #tpu.memory_space<vmem>>, %arg6: memref<128x256xbf16, #tpu.memory_space<vmem>>) attributes {dimension_semantics = [#tpu.dimension_semantics<parallel>, #tpu.dimension_semantics<parallel>], iteration_bounds = array<i64: 1, 1>, scalar_prefetch = 0 : i64, scratch_operands = 0 : i64, tpu.core_type = #tpu.core_type<tc>, window_params = [{transform_indices = @transform_0, window_bounds = array<i64: 128, 128>}, {transform_indices = @transform_1, window_bounds = array<i64: 128, 256>}, {transform_indices = @transform_2, window_bounds = array<i64: 1, 256>}, {transform_indices = @transform_3, window_bounds = array<i64: 1, 256>}, {transform_indices = @transform_4, window_bounds = array<i64: 128, 256>}]} {
    %c0 = arith.constant 0 : index
    %c0_0 = arith.constant 0 : index
    %0 = vector.load %arg2[%c0, %c0_0] : memref<128x128xbf16, #tpu.memory_space<vmem>>, vector<128x128xbf16>
    %c0_1 = arith.constant 0 : index
    %c0_2 = arith.constant 0 : index
    %1 = vector.load %arg3[%c0_1, %c0_2] : memref<128x256xbf16, #tpu.memory_space<vmem>>, vector<128x256xbf16>
    %cst = arith.constant dense<0.000000e+00> : vector<128x256xf32>
    %2 = tpu.matmul %0, %1, %cst {dimension_numbers = #tpu.dot_dimension_numbers<[1], [0], [0], [1], [0, 0, 1, 1], [], []>} : vector<128x128xbf16>, vector<128x256xbf16>, vector<128x256xf32> -> vector<128x256xf32>
    %c0_3 = arith.constant 0 : index
    %c0_4 = arith.constant 0 : index
    %3 = vector.load %arg4[%c0_3, %c0_4] : memref<1x256xf32, #tpu.memory_space<vmem>>, vector<1x256xf32>
    %4 = vector.broadcast %3 : vector<1x256xf32> to vector<128x256xf32>
    %5 = arith.mulf %2, %4 : vector<128x256xf32>
    %c0_5 = arith.constant 0 : index
    %c0_6 = arith.constant 0 : index
    %6 = vector.load %arg5[%c0_5, %c0_6] : memref<1x256xf32, #tpu.memory_space<vmem>>, vector<1x256xf32>
    %7 = vector.broadcast %6 : vector<1x256xf32> to vector<128x256xf32>
    %8 = arith.addf %5, %7 : vector<128x256xf32>
    %9 = arith.truncf %8 : vector<128x256xf32> to vector<128x256xbf16>
    %c0_7 = arith.constant 0 : index
    %c0_8 = arith.constant 0 : index
    %10 = vector.load %arg6[%c0_7, %c0_8] : memref<128x256xbf16, #tpu.memory_space<vmem>>, vector<128x256xbf16>
    tpu.vector_store %arg6[%c0_7, %c0_8], %9 {strides = array<i32>} : memref<128x256xbf16, #tpu.memory_space<vmem>>, vector<128x256xbf16>,
    return
  }
  func.func @transform_0(%arg0: i32, %arg1: i32) -> (i32, i32) {
    %c0_i32 = arith.constant 0 : i32
    %c0_i32_0 = arith.constant 0 : i32
    return %arg0, %c0_i32 : i32, i32
  }
  func.func @transform_1(%arg0: i32, %arg1: i32) -> (i32, i32) {
    %c0_i32 = arith.constant 0 : i32
    %c0_i32_0 = arith.constant 0 : i32
    return %c0_i32, %arg1 : i32, i32
  }
  func.func @transform_2(%arg0: i32, %arg1: i32) -> (i32, i32) {
    %c0_i32 = arith.constant 0 : i32
    %c0_i32_0 = arith.constant 0 : i32
    return %c0_i32, %arg1 : i32, i32
  }
  func.func @transform_3(%arg0: i32, %arg1: i32) -> (i32, i32) {
    %c0_i32 = arith.constant 0 : i32
    %c0_i32_0 = arith.constant 0 : i32
    return %c0_i32, %arg1 : i32, i32
  }
  func.func @transform_4(%arg0: i32, %arg1: i32) -> (i32, i32) {
    %c0_i32 = arith.constant 0 : i32
    return %arg0, %arg1 : i32, i32
  }
}

module attributes {stable_mosaic.version = 11 : i64} {
  func.func @kernel(%arg0: i32, %arg1: i32, %arg2: memref<128x128xbf16, #tpu.memory_space<vmem>>, %arg3: memref<128x256xbf16, #tpu.memory_space<vmem>>, %arg4: memref<1x256xf32, #tpu.memory_space<vmem>>, %arg5: memref<1x256xf32, #tpu.memory_space<vmem>>, %arg6: memref<128x256xbf16, #tpu.memory_space<vmem>>, %arg7: memref<128x256xbf16, #tpu.memory_space<vmem>>) attributes {dimension_semantics = [#tpu.dimension_semantics<parallel>, #tpu.dimension_semantics<parallel>], iteration_bounds = array<i64: 1, 1>, scalar_prefetch = 0 : i64, scratch_operands = 0 : i64, tpu.core_type = #tpu.core_type<tc>, window_params = [{transform_indices = @transform_0, window_bounds = array<i64: 128, 128>}, {transform_indices = @transform_1, window_bounds = array<i64: 128, 256>}, {transform_indices = @transform_2, window_bounds = array<i64: 1, 256>}, {transform_indices = @transform_3, window_bounds = array<i64: 1, 256>}, {transform_indices = @transform_4, window_bounds = array<i64: 128, 256>}, {transform_indices = @transform_5, window_bounds = array<i64: 128, 256>}]} {
    %c0 = arith.constant 0 : index
    %c0_0 = arith.constant 0 : index
    %0 = vector.load %arg2[%c0, %c0_0] : memref<128x128xbf16, #tpu.memory_space<vmem>>, vector<128x128xbf16>
    %c0_1 = arith.constant 0 : index
    %c0_2 = arith.constant 0 : index
    %1 = vector.load %arg3[%c0_1, %c0_2] : memref<128x256xbf16, #tpu.memory_space<vmem>>, vector<128x256xbf16>
    %cst = arith.constant dense<0.000000e+00> : vector<128x256xf32>
    %2 = tpu.matmul %0, %1, %cst {dimension_numbers = #tpu.dot_dimension_numbers<[1], [0], [0], [1], [0, 0, 1, 1], [], []>} : vector<128x128xbf16>, vector<128x256xbf16>, vector<128x256xf32> -> vector<128x256xf32>
    %c0_3 = arith.constant 0 : index
    %c0_4 = arith.constant 0 : index
    %3 = vector.load %arg4[%c0_3, %c0_4] : memref<1x256xf32, #tpu.memory_space<vmem>>, vector<1x256xf32>
    %4 = vector.broadcast %3 : vector<1x256xf32> to vector<128x256xf32>
    %5 = arith.mulf %2, %4 : vector<128x256xf32>
    %c0_5 = arith.constant 0 : index
    %c0_6 = arith.constant 0 : index
    %6 = vector.load %arg5[%c0_5, %c0_6] : memref<1x256xf32, #tpu.memory_space<vmem>>, vector<1x256xf32>
    %7 = vector.broadcast %6 : vector<1x256xf32> to vector<128x256xf32>
    %8 = arith.addf %5, %7 : vector<128x256xf32>
    %c0_7 = arith.constant 0 : index
    %c0_8 = arith.constant 0 : index
    %9 = vector.load %arg6[%c0_7, %c0_8] : memref<128x256xbf16, #tpu.memory_space<vmem>>, vector<128x256xbf16>
    %10 = arith.extf %9 : vector<128x256xbf16> to vector<128x256xf32>
    %11 = arith.addf %8, %10 : vector<128x256xf32>
    %cst_9 = arith.constant 0.000000e+00 : f32
    %12 = vector.broadcast %cst_9 : f32 to vector<128x256xf32>
    %13 = arith.maximumf %11, %12 : vector<128x256xf32>
    %14 = arith.truncf %13 : vector<128x256xf32> to vector<128x256xbf16>
    %c0_10 = arith.constant 0 : index
    %c0_11 = arith.constant 0 : index
    %15 = vector.load %arg7[%c0_10, %c0_11] : memref<128x256xbf16, #tpu.memory_space<vmem>>, vector<128x256xbf16>
    tpu.vector_store %arg7[%c0_10, %c0_11], %14 {strides = array<i32>} : memref<128x256xbf16, #tpu.memory_space<vmem>>, vector<128x256xbf16>,
    return
  }
  func.func @transform_0(%arg0: i32, %arg1: i32) -> (i32, i32) {
    %c0_i32 = arith.constant 0 : i32
    %c0_i32_0 = arith.constant 0 : i32
    return %arg0, %c0_i32 : i32, i32
  }
  func.func @transform_1(%arg0: i32, %arg1: i32) -> (i32, i32) {
    %c0_i32 = arith.constant 0 : i32
    %c0_i32_0 = arith.constant 0 : i32
    return %c0_i32, %arg1 : i32, i32
  }
  func.func @transform_2(%arg0: i32, %arg1: i32) -> (i32, i32) {
    %c0_i32 = arith.constant 0 : i32
    %c0_i32_0 = arith.constant 0 : i32
    return %c0_i32, %arg1 : i32, i32
  }
  func.func @transform_3(%arg0: i32, %arg1: i32) -> (i32, i32) {
    %c0_i32 = arith.constant 0 : i32
    %c0_i32_0 = arith.constant 0 : i32
    return %c0_i32, %arg1 : i32, i32
  }
  func.func @transform_4(%arg0: i32, %arg1: i32) -> (i32, i32) {
    %c0_i32 = arith.constant 0 : i32
    return %arg0, %arg1 : i32, i32
  }
  func.func @transform_5(%arg0: i32, %arg1: i32) -> (i32, i32) {
    %c0_i32 = arith.constant 0 : i32
    return %arg0, %arg1 : i32, i32
  }
}

module attributes {stable_mosaic.version = 11 : i64} {
  func.func @kernel(%arg0: i32, %arg1: i32, %arg2: memref<128x256xbf16, #tpu.memory_space<vmem>>, %arg3: memref<256x128xbf16, #tpu.memory_space<vmem>>, %arg4: memref<1x128xf32, #tpu.memory_space<vmem>>, %arg5: memref<1x128xf32, #tpu.memory_space<vmem>>, %arg6: memref<128x128xbf16, #tpu.memory_space<vmem>>) attributes {dimension_semantics = [#tpu.dimension_semantics<parallel>, #tpu.dimension_semantics<parallel>], iteration_bounds = array<i64: 1, 1>, scalar_prefetch = 0 : i64, scratch_operands = 0 : i64, tpu.core_type = #tpu.core_type<tc>, window_params = [{transform_indices = @transform_0, window_bounds = array<i64: 128, 256>}, {transform_indices = @transform_1, window_bounds = array<i64: 256, 128>}, {transform_indices = @transform_2, window_bounds = array<i64: 1, 128>}, {transform_indices = @transform_3, window_bounds = array<i64: 1, 128>}, {transform_indices = @transform_4, window_bounds = array<i64: 128, 128>}]} {
    %c0 = arith.constant 0 : index
    %c0_0 = arith.constant 0 : index
    %0 = vector.load %arg2[%c0, %c0_0] : memref<128x256xbf16, #tpu.memory_space<vmem>>, vector<128x256xbf16>
    %c0_1 = arith.constant 0 : index
    %c0_2 = arith.constant 0 : index
    %1 = vector.load %arg3[%c0_1, %c0_2] : memref<256x128xbf16, #tpu.memory_space<vmem>>, vector<256x128xbf16>
    %cst = arith.constant dense<0.000000e+00> : vector<128x128xf32>
    %2 = tpu.matmul %0, %1, %cst {dimension_numbers = #tpu.dot_dimension_numbers<[1], [0], [0], [1], [0, 0, 1, 1], [], []>} : vector<128x256xbf16>, vector<256x128xbf16>, vector<128x128xf32> -> vector<128x128xf32>
    %c0_3 = arith.constant 0 : index
    %c0_4 = arith.constant 0 : index
    %3 = vector.load %arg4[%c0_3, %c0_4] : memref<1x128xf32, #tpu.memory_space<vmem>>, vector<1x128xf32>
    %4 = vector.broadcast %3 : vector<1x128xf32> to vector<128x128xf32>
    %5 = arith.mulf %2, %4 : vector<128x128xf32>
    %c0_5 = arith.constant 0 : index
    %c0_6 = arith.constant 0 : index
    %6 = vector.load %arg5[%c0_5, %c0_6] : memref<1x128xf32, #tpu.memory_space<vmem>>, vector<1x128xf32>
    %7 = vector.broadcast %6 : vector<1x128xf32> to vector<128x128xf32>
    %8 = arith.addf %5, %7 : vector<128x128xf32>
    %cst_7 = arith.constant 0.000000e+00 : f32
    %9 = vector.broadcast %cst_7 : f32 to vector<128x128xf32>
    %10 = arith.maximumf %8, %9 : vector<128x128xf32>
    %11 = arith.truncf %10 : vector<128x128xf32> to vector<128x128xbf16>
    %c0_8 = arith.constant 0 : index
    %c0_9 = arith.constant 0 : index
    %12 = vector.load %arg6[%c0_8, %c0_9] : memref<128x128xbf16, #tpu.memory_space<vmem>>, vector<128x128xbf16>
    tpu.vector_store %arg6[%c0_8, %c0_9], %11 {strides = array<i32>} : memref<128x128xbf16, #tpu.memory_space<vmem>>, vector<128x128xbf16>,
    return
  }
  func.func @transform_0(%arg0: i32, %arg1: i32) -> (i32, i32) {
    %c0_i32 = arith.constant 0 : i32
    %c0_i32_0 = arith.constant 0 : i32
    return %arg0, %c0_i32 : i32, i32
  }
  func.func @transform_1(%arg0: i32, %arg1: i32) -> (i32, i32) {
    %c0_i32 = arith.constant 0 : i32
    %c0_i32_0 = arith.constant 0 : i32
    return %c0_i32, %arg1 : i32, i32
  }
  func.func @transform_2(%arg0: i32, %arg1: i32) -> (i32, i32) {
    %c0_i32 = arith.constant 0 : i32
    %c0_i32_0 = arith.constant 0 : i32
    return %c0_i32, %arg1 : i32, i32
  }
  func.func @transform_3(%arg0: i32, %arg1: i32) -> (i32, i32) {
    %c0_i32 = arith.constant 0 : i32
    %c0_i32_0 = arith.constant 0 : i32
    return %c0_i32, %arg1 : i32, i32
  }
  func.func @transform_4(%arg0: i32, %arg1: i32) -> (i32, i32) {
    %c0_i32 = arith.constant 0 : i32
    return %arg0, %arg1 : i32, i32
  }
}

module attributes {stable_mosaic.version = 11 : i64} {
  func.func @kernel(%arg0: i32, %arg1: i32, %arg2: i32, %arg3: memref<32x384xbf16, #tpu.memory_space<vmem>>, %arg4: memref<384x128xbf16, #tpu.memory_space<vmem>>, %arg5: memref<1x128xf32, #tpu.memory_space<vmem>>, %arg6: memref<1x128xf32, #tpu.memory_space<vmem>>, %arg7: memref<32x128xbf16, #tpu.memory_space<vmem>>, %arg8: memref<32x128xf32, #tpu.memory_space<vmem>>) attributes {dimension_semantics = [#tpu.dimension_semantics<parallel>, #tpu.dimension_semantics<parallel>, #tpu.dimension_semantics<arbitrary>], iteration_bounds = array<i64: 1, 1, 3>, scalar_prefetch = 0 : i64, scratch_operands = 1 : i64, tpu.core_type = #tpu.core_type<tc>, window_params = [{transform_indices = @transform_0, window_bounds = array<i64: 32, 384>}, {transform_indices = @transform_1, window_bounds = array<i64: 384, 128>}, {transform_indices = @transform_2, window_bounds = array<i64: 1, 128>}, {transform_indices = @transform_3, window_bounds = array<i64: 1, 128>}, {transform_indices = @transform_4, window_bounds = array<i64: 32, 128>}]} {
    %c0_i32 = arith.constant 0 : i32
    %0 = arith.cmpi eq, %arg2, %c0_i32 : i32
    %1 = arith.extui %0 : i1 to i32
    %c0_i32_0 = arith.constant 0 : i32
    %2 = arith.cmpi ne, %1, %c0_i32_0 : i32
    scf.if %2 {
      %cst_9 = arith.constant 0.000000e+00 : f32
      %12 = vector.broadcast %cst_9 : f32 to vector<32x128xf32>
      %c0_10 = arith.constant 0 : index
      %c0_11 = arith.constant 0 : index
      %13 = vector.load %arg8[%c0_10, %c0_11] : memref<32x128xf32, #tpu.memory_space<vmem>>, vector<32x128xf32>
      tpu.vector_store %arg8[%c0_10, %c0_11], %12 {strides = array<i32>} : memref<32x128xf32, #tpu.memory_space<vmem>>, vector<32x128xf32>,
    } else {
    }
    %c0 = arith.constant 0 : index
    %c0_1 = arith.constant 0 : index
    %3 = vector.load %arg8[%c0, %c0_1] : memref<32x128xf32, #tpu.memory_space<vmem>>, vector<32x128xf32>
    %c0_2 = arith.constant 0 : index
    %c0_3 = arith.constant 0 : index
    %4 = vector.load %arg3[%c0_2, %c0_3] : memref<32x384xbf16, #tpu.memory_space<vmem>>, vector<32x384xbf16>
    %c0_4 = arith.constant 0 : index
    %c0_5 = arith.constant 0 : index
    %5 = vector.load %arg4[%c0_4, %c0_5] : memref<384x128xbf16, #tpu.memory_space<vmem>>, vector<384x128xbf16>
    %cst = arith.constant dense<0.000000e+00> : vector<32x128xf32>
    %6 = tpu.matmul %4, %5, %cst {dimension_numbers = #tpu.dot_dimension_numbers<[1], [0], [0], [1], [0, 0, 1, 1], [], []>} : vector<32x384xbf16>, vector<384x128xbf16>, vector<32x128xf32> -> vector<32x128xf32>
    %7 = arith.addf %3, %6 : vector<32x128xf32>
    %c0_6 = arith.constant 0 : index
    %c0_7 = arith.constant 0 : index
    %8 = vector.load %arg8[%c0_6, %c0_7] : memref<32x128xf32, #tpu.memory_space<vmem>>, vector<32x128xf32>
    tpu.vector_store %arg8[%c0_6, %c0_7], %7 {strides = array<i32>} : memref<32x128xf32, #tpu.memory_space<vmem>>, vector<32x128xf32>,
    %c2_i32 = arith.constant 2 : i32
    %9 = arith.cmpi eq, %arg2, %c2_i32 : i32
    %10 = arith.extui %9 : i1 to i32
    %c0_i32_8 = arith.constant 0 : i32
    %11 = arith.cmpi ne, %10, %c0_i32_8 : i32
    scf.if %11 {
      %c0_9 = arith.constant 0 : index
      %c0_10 = arith.constant 0 : index
      %12 = vector.load %arg8[%c0_9, %c0_10] : memref<32x128xf32, #tpu.memory_space<vmem>>, vector<32x128xf32>
      %c0_11 = arith.constant 0 : index
      %c0_12 = arith.constant 0 : index
      %13 = vector.load %arg5[%c0_11, %c0_12] : memref<1x128xf32, #tpu.memory_space<vmem>>, vector<1x128xf32>
      %14 = vector.broadcast %13 : vector<1x128xf32> to vector<32x128xf32>
      %15 = arith.mulf %12, %14 : vector<32x128xf32>
      %c0_13 = arith.constant 0 : index
      %c0_14 = arith.constant 0 : index
      %16 = vector.load %arg6[%c0_13, %c0_14] : memref<1x128xf32, #tpu.memory_space<vmem>>, vector<1x128xf32>
      %17 = vector.broadcast %16 : vector<1x128xf32> to vector<32x128xf32>
      %18 = arith.addf %15, %17 : vector<32x128xf32>
      %cst_15 = arith.constant 0.000000e+00 : f32
      %19 = vector.broadcast %cst_15 : f32 to vector<32x128xf32>
      %20 = arith.maximumf %18, %19 : vector<32x128xf32>
      %21 = arith.truncf %20 : vector<32x128xf32> to vector<32x128xbf16>
      %c0_16 = arith.constant 0 : index
      %c0_17 = arith.constant 0 : index
      %22 = vector.load %arg7[%c0_16, %c0_17] : memref<32x128xbf16, #tpu.memory_space<vmem>>, vector<32x128xbf16>
      tpu.vector_store %arg7[%c0_16, %c0_17], %21 {strides = array<i32>} : memref<32x128xbf16, #tpu.memory_space<vmem>>, vector<32x128xbf16>,
    } else {
    }
    return
  }
  func.func @transform_0(%arg0: i32, %arg1: i32, %arg2: i32) -> (i32, i32) {
    %c0_i32 = arith.constant 0 : i32
    return %arg0, %arg2 : i32, i32
  }
  func.func @transform_1(%arg0: i32, %arg1: i32, %arg2: i32) -> (i32, i32) {
    %c0_i32 = arith.constant 0 : i32
    return %arg2, %arg1 : i32, i32
  }
  func.func @transform_2(%arg0: i32, %arg1: i32, %arg2: i32) -> (i32, i32) {
    %c0_i32 = arith.constant 0 : i32
    %c0_i32_0 = arith.constant 0 : i32
    return %c0_i32, %arg1 : i32, i32
  }
  func.func @transform_3(%arg0: i32, %arg1: i32, %arg2: i32) -> (i32, i32) {
    %c0_i32 = arith.constant 0 : i32
    %c0_i32_0 = arith.constant 0 : i32
    return %c0_i32, %arg1 : i32, i32
  }
  func.func @transform_4(%arg0: i32, %arg1: i32, %arg2: i32) -> (i32, i32) {
    %c0_i32 = arith.constant 0 : i32
    return %arg0, %arg1 : i32, i32
  }
}

module attributes {stable_mosaic.version = 11 : i64} {
  func.func @kernel(%arg0: i32, %arg1: i32, %arg2: memref<32x256xbf16, #tpu.memory_space<vmem>>, %arg3: memref<256x256xbf16, #tpu.memory_space<vmem>>, %arg4: memref<1x256xf32, #tpu.memory_space<vmem>>, %arg5: memref<1x256xf32, #tpu.memory_space<vmem>>, %arg6: memref<32x256xbf16, #tpu.memory_space<vmem>>) attributes {dimension_semantics = [#tpu.dimension_semantics<parallel>, #tpu.dimension_semantics<parallel>], iteration_bounds = array<i64: 1, 2>, scalar_prefetch = 0 : i64, scratch_operands = 0 : i64, tpu.core_type = #tpu.core_type<tc>, window_params = [{transform_indices = @transform_0, window_bounds = array<i64: 32, 256>}, {transform_indices = @transform_1, window_bounds = array<i64: 256, 256>}, {transform_indices = @transform_2, window_bounds = array<i64: 1, 256>}, {transform_indices = @transform_3, window_bounds = array<i64: 1, 256>}, {transform_indices = @transform_4, window_bounds = array<i64: 32, 256>}]} {
    %c0 = arith.constant 0 : index
    %c0_0 = arith.constant 0 : index
    %0 = vector.load %arg2[%c0, %c0_0] : memref<32x256xbf16, #tpu.memory_space<vmem>>, vector<32x256xbf16>
    %c0_1 = arith.constant 0 : index
    %c0_2 = arith.constant 0 : index
    %1 = vector.load %arg3[%c0_1, %c0_2] : memref<256x256xbf16, #tpu.memory_space<vmem>>, vector<256x256xbf16>
    %cst = arith.constant dense<0.000000e+00> : vector<32x256xf32>
    %2 = tpu.matmul %0, %1, %cst {dimension_numbers = #tpu.dot_dimension_numbers<[1], [0], [0], [1], [0, 0, 1, 1], [], []>} : vector<32x256xbf16>, vector<256x256xbf16>, vector<32x256xf32> -> vector<32x256xf32>
    %c0_3 = arith.constant 0 : index
    %c0_4 = arith.constant 0 : index
    %3 = vector.load %arg4[%c0_3, %c0_4] : memref<1x256xf32, #tpu.memory_space<vmem>>, vector<1x256xf32>
    %4 = vector.broadcast %3 : vector<1x256xf32> to vector<32x256xf32>
    %5 = arith.mulf %2, %4 : vector<32x256xf32>
    %c0_5 = arith.constant 0 : index
    %c0_6 = arith.constant 0 : index
    %6 = vector.load %arg5[%c0_5, %c0_6] : memref<1x256xf32, #tpu.memory_space<vmem>>, vector<1x256xf32>
    %7 = vector.broadcast %6 : vector<1x256xf32> to vector<32x256xf32>
    %8 = arith.addf %5, %7 : vector<32x256xf32>
    %9 = arith.truncf %8 : vector<32x256xf32> to vector<32x256xbf16>
    %c0_7 = arith.constant 0 : index
    %c0_8 = arith.constant 0 : index
    %10 = vector.load %arg6[%c0_7, %c0_8] : memref<32x256xbf16, #tpu.memory_space<vmem>>, vector<32x256xbf16>
    tpu.vector_store %arg6[%c0_7, %c0_8], %9 {strides = array<i32>} : memref<32x256xbf16, #tpu.memory_space<vmem>>, vector<32x256xbf16>,
    return
  }
  func.func @transform_0(%arg0: i32, %arg1: i32) -> (i32, i32) {
    %c0_i32 = arith.constant 0 : i32
    %c0_i32_0 = arith.constant 0 : i32
    return %arg0, %c0_i32 : i32, i32
  }
  func.func @transform_1(%arg0: i32, %arg1: i32) -> (i32, i32) {
    %c0_i32 = arith.constant 0 : i32
    %c0_i32_0 = arith.constant 0 : i32
    return %c0_i32, %arg1 : i32, i32
  }
  func.func @transform_2(%arg0: i32, %arg1: i32) -> (i32, i32) {
    %c0_i32 = arith.constant 0 : i32
    %c0_i32_0 = arith.constant 0 : i32
    return %c0_i32, %arg1 : i32, i32
  }
  func.func @transform_3(%arg0: i32, %arg1: i32) -> (i32, i32) {
    %c0_i32 = arith.constant 0 : i32
    %c0_i32_0 = arith.constant 0 : i32
    return %c0_i32, %arg1 : i32, i32
  }
  func.func @transform_4(%arg0: i32, %arg1: i32) -> (i32, i32) {
    %c0_i32 = arith.constant 0 : i32
    return %arg0, %arg1 : i32, i32
  }
}

module attributes {stable_mosaic.version = 11 : i64} {
  func.func @kernel(%arg0: i32, %arg1: i32, %arg2: memref<32x128xbf16, #tpu.memory_space<vmem>>, %arg3: memref<128x256xbf16, #tpu.memory_space<vmem>>, %arg4: memref<1x256xf32, #tpu.memory_space<vmem>>, %arg5: memref<1x256xf32, #tpu.memory_space<vmem>>, %arg6: memref<32x256xbf16, #tpu.memory_space<vmem>>, %arg7: memref<32x256xbf16, #tpu.memory_space<vmem>>) attributes {dimension_semantics = [#tpu.dimension_semantics<parallel>, #tpu.dimension_semantics<parallel>], iteration_bounds = array<i64: 1, 2>, scalar_prefetch = 0 : i64, scratch_operands = 0 : i64, tpu.core_type = #tpu.core_type<tc>, window_params = [{transform_indices = @transform_0, window_bounds = array<i64: 32, 128>}, {transform_indices = @transform_1, window_bounds = array<i64: 128, 256>}, {transform_indices = @transform_2, window_bounds = array<i64: 1, 256>}, {transform_indices = @transform_3, window_bounds = array<i64: 1, 256>}, {transform_indices = @transform_4, window_bounds = array<i64: 32, 256>}, {transform_indices = @transform_5, window_bounds = array<i64: 32, 256>}]} {
    %c0 = arith.constant 0 : index
    %c0_0 = arith.constant 0 : index
    %0 = vector.load %arg2[%c0, %c0_0] : memref<32x128xbf16, #tpu.memory_space<vmem>>, vector<32x128xbf16>
    %c0_1 = arith.constant 0 : index
    %c0_2 = arith.constant 0 : index
    %1 = vector.load %arg3[%c0_1, %c0_2] : memref<128x256xbf16, #tpu.memory_space<vmem>>, vector<128x256xbf16>
    %cst = arith.constant dense<0.000000e+00> : vector<32x256xf32>
    %2 = tpu.matmul %0, %1, %cst {dimension_numbers = #tpu.dot_dimension_numbers<[1], [0], [0], [1], [0, 0, 1, 1], [], []>} : vector<32x128xbf16>, vector<128x256xbf16>, vector<32x256xf32> -> vector<32x256xf32>
    %c0_3 = arith.constant 0 : index
    %c0_4 = arith.constant 0 : index
    %3 = vector.load %arg4[%c0_3, %c0_4] : memref<1x256xf32, #tpu.memory_space<vmem>>, vector<1x256xf32>
    %4 = vector.broadcast %3 : vector<1x256xf32> to vector<32x256xf32>
    %5 = arith.mulf %2, %4 : vector<32x256xf32>
    %c0_5 = arith.constant 0 : index
    %c0_6 = arith.constant 0 : index
    %6 = vector.load %arg5[%c0_5, %c0_6] : memref<1x256xf32, #tpu.memory_space<vmem>>, vector<1x256xf32>
    %7 = vector.broadcast %6 : vector<1x256xf32> to vector<32x256xf32>
    %8 = arith.addf %5, %7 : vector<32x256xf32>
    %c0_7 = arith.constant 0 : index
    %c0_8 = arith.constant 0 : index
    %9 = vector.load %arg6[%c0_7, %c0_8] : memref<32x256xbf16, #tpu.memory_space<vmem>>, vector<32x256xbf16>
    %10 = arith.extf %9 : vector<32x256xbf16> to vector<32x256xf32>
    %11 = arith.addf %8, %10 : vector<32x256xf32>
    %cst_9 = arith.constant 0.000000e+00 : f32
    %12 = vector.broadcast %cst_9 : f32 to vector<32x256xf32>
    %13 = arith.maximumf %11, %12 : vector<32x256xf32>
    %14 = arith.truncf %13 : vector<32x256xf32> to vector<32x256xbf16>
    %c0_10 = arith.constant 0 : index
    %c0_11 = arith.constant 0 : index
    %15 = vector.load %arg7[%c0_10, %c0_11] : memref<32x256xbf16, #tpu.memory_space<vmem>>, vector<32x256xbf16>
    tpu.vector_store %arg7[%c0_10, %c0_11], %14 {strides = array<i32>} : memref<32x256xbf16, #tpu.memory_space<vmem>>, vector<32x256xbf16>,
    return
  }
  func.func @transform_0(%arg0: i32, %arg1: i32) -> (i32, i32) {
    %c0_i32 = arith.constant 0 : i32
    %c0_i32_0 = arith.constant 0 : i32
    return %arg0, %c0_i32 : i32, i32
  }
  func.func @transform_1(%arg0: i32, %arg1: i32) -> (i32, i32) {
    %c0_i32 = arith.constant 0 : i32
    %c0_i32_0 = arith.constant 0 : i32
    return %c0_i32, %arg1 : i32, i32
  }
  func.func @transform_2(%arg0: i32, %arg1: i32) -> (i32, i32) {
    %c0_i32 = arith.constant 0 : i32
    %c0_i32_0 = arith.constant 0 : i32
    return %c0_i32, %arg1 : i32, i32
  }
  func.func @transform_3(%arg0: i32, %arg1: i32) -> (i32, i32) {
    %c0_i32 = arith.constant 0 : i32
    %c0_i32_0 = arith.constant 0 : i32
    return %c0_i32, %arg1 : i32, i32
  }
  func.func @transform_4(%arg0: i32, %arg1: i32) -> (i32, i32) {
    %c0_i32 = arith.constant 0 : i32
    return %arg0, %arg1 : i32, i32
  }
  func.func @transform_5(%arg0: i32, %arg1: i32) -> (i32, i32) {
    %c0_i32 = arith.constant 0 : i32
    return %arg0, %arg1 : i32, i32
  }
}

module attributes {stable_mosaic.version = 11 : i64} {
  func.func @kernel(%arg0: i32, %arg1: i32, %arg2: memref<32x512xbf16, #tpu.memory_space<vmem>>, %arg3: memref<512x128xbf16, #tpu.memory_space<vmem>>, %arg4: memref<1x128xf32, #tpu.memory_space<vmem>>, %arg5: memref<1x128xf32, #tpu.memory_space<vmem>>, %arg6: memref<32x128xbf16, #tpu.memory_space<vmem>>) attributes {dimension_semantics = [#tpu.dimension_semantics<parallel>, #tpu.dimension_semantics<parallel>], iteration_bounds = array<i64: 1, 1>, scalar_prefetch = 0 : i64, scratch_operands = 0 : i64, tpu.core_type = #tpu.core_type<tc>, window_params = [{transform_indices = @transform_0, window_bounds = array<i64: 32, 512>}, {transform_indices = @transform_1, window_bounds = array<i64: 512, 128>}, {transform_indices = @transform_2, window_bounds = array<i64: 1, 128>}, {transform_indices = @transform_3, window_bounds = array<i64: 1, 128>}, {transform_indices = @transform_4, window_bounds = array<i64: 32, 128>}]} {
    %c0 = arith.constant 0 : index
    %c0_0 = arith.constant 0 : index
    %0 = vector.load %arg2[%c0, %c0_0] : memref<32x512xbf16, #tpu.memory_space<vmem>>, vector<32x512xbf16>
    %c0_1 = arith.constant 0 : index
    %c0_2 = arith.constant 0 : index
    %1 = vector.load %arg3[%c0_1, %c0_2] : memref<512x128xbf16, #tpu.memory_space<vmem>>, vector<512x128xbf16>
    %cst = arith.constant dense<0.000000e+00> : vector<32x128xf32>
    %2 = tpu.matmul %0, %1, %cst {dimension_numbers = #tpu.dot_dimension_numbers<[1], [0], [0], [1], [0, 0, 1, 1], [], []>} : vector<32x512xbf16>, vector<512x128xbf16>, vector<32x128xf32> -> vector<32x128xf32>
    %c0_3 = arith.constant 0 : index
    %c0_4 = arith.constant 0 : index
    %3 = vector.load %arg4[%c0_3, %c0_4] : memref<1x128xf32, #tpu.memory_space<vmem>>, vector<1x128xf32>
    %4 = vector.broadcast %3 : vector<1x128xf32> to vector<32x128xf32>
    %5 = arith.mulf %2, %4 : vector<32x128xf32>
    %c0_5 = arith.constant 0 : index
    %c0_6 = arith.constant 0 : index
    %6 = vector.load %arg5[%c0_5, %c0_6] : memref<1x128xf32, #tpu.memory_space<vmem>>, vector<1x128xf32>
    %7 = vector.broadcast %6 : vector<1x128xf32> to vector<32x128xf32>
    %8 = arith.addf %5, %7 : vector<32x128xf32>
    %cst_7 = arith.constant 0.000000e+00 : f32
    %9 = vector.broadcast %cst_7 : f32 to vector<32x128xf32>
    %10 = arith.maximumf %8, %9 : vector<32x128xf32>
    %11 = arith.truncf %10 : vector<32x128xf32> to vector<32x128xbf16>
    %c0_8 = arith.constant 0 : index
    %c0_9 = arith.constant 0 : index
    %12 = vector.load %arg6[%c0_8, %c0_9] : memref<32x128xbf16, #tpu.memory_space<vmem>>, vector<32x128xbf16>
    tpu.vector_store %arg6[%c0_8, %c0_9], %11 {strides = array<i32>} : memref<32x128xbf16, #tpu.memory_space<vmem>>, vector<32x128xbf16>,
    return
  }
  func.func @transform_0(%arg0: i32, %arg1: i32) -> (i32, i32) {
    %c0_i32 = arith.constant 0 : i32
    %c0_i32_0 = arith.constant 0 : i32
    return %arg0, %c0_i32 : i32, i32
  }
  func.func @transform_1(%arg0: i32, %arg1: i32) -> (i32, i32) {
    %c0_i32 = arith.constant 0 : i32
    %c0_i32_0 = arith.constant 0 : i32
    return %c0_i32, %arg1 : i32, i32
  }
  func.func @transform_2(%arg0: i32, %arg1: i32) -> (i32, i32) {
    %c0_i32 = arith.constant 0 : i32
    %c0_i32_0 = arith.constant 0 : i32
    return %c0_i32, %arg1 : i32, i32
  }
  func.func @transform_3(%arg0: i32, %arg1: i32) -> (i32, i32) {
    %c0_i32 = arith.constant 0 : i32
    %c0_i32_0 = arith.constant 0 : i32
    return %c0_i32, %arg1 : i32, i32
  }
  func.func @transform_4(%arg0: i32, %arg1: i32) -> (i32, i32) {
    %c0_i32 = arith.constant 0 : i32
    return %arg0, %arg1 : i32, i32
  }
}

module attributes {stable_mosaic.version = 11 : i64} {
  func.func @kernel(%arg0: i32, %arg1: i32, %arg2: memref<32x512xbf16, #tpu.memory_space<vmem>>, %arg3: memref<512x256xbf16, #tpu.memory_space<vmem>>, %arg4: memref<1x256xf32, #tpu.memory_space<vmem>>, %arg5: memref<1x256xf32, #tpu.memory_space<vmem>>, %arg6: memref<32x256xbf16, #tpu.memory_space<vmem>>) attributes {dimension_semantics = [#tpu.dimension_semantics<parallel>, #tpu.dimension_semantics<parallel>], iteration_bounds = array<i64: 1, 1>, scalar_prefetch = 0 : i64, scratch_operands = 0 : i64, tpu.core_type = #tpu.core_type<tc>, window_params = [{transform_indices = @transform_0, window_bounds = array<i64: 32, 512>}, {transform_indices = @transform_1, window_bounds = array<i64: 512, 256>}, {transform_indices = @transform_2, window_bounds = array<i64: 1, 256>}, {transform_indices = @transform_3, window_bounds = array<i64: 1, 256>}, {transform_indices = @transform_4, window_bounds = array<i64: 32, 256>}]} {
    %c0 = arith.constant 0 : index
    %c0_0 = arith.constant 0 : index
    %0 = vector.load %arg2[%c0, %c0_0] : memref<32x512xbf16, #tpu.memory_space<vmem>>, vector<32x512xbf16>
    %c0_1 = arith.constant 0 : index
    %c0_2 = arith.constant 0 : index
    %1 = vector.load %arg3[%c0_1, %c0_2] : memref<512x256xbf16, #tpu.memory_space<vmem>>, vector<512x256xbf16>
    %cst = arith.constant dense<0.000000e+00> : vector<32x256xf32>
    %2 = tpu.matmul %0, %1, %cst {dimension_numbers = #tpu.dot_dimension_numbers<[1], [0], [0], [1], [0, 0, 1, 1], [], []>} : vector<32x512xbf16>, vector<512x256xbf16>, vector<32x256xf32> -> vector<32x256xf32>
    %c0_3 = arith.constant 0 : index
    %c0_4 = arith.constant 0 : index
    %3 = vector.load %arg4[%c0_3, %c0_4] : memref<1x256xf32, #tpu.memory_space<vmem>>, vector<1x256xf32>
    %4 = vector.broadcast %3 : vector<1x256xf32> to vector<32x256xf32>
    %5 = arith.mulf %2, %4 : vector<32x256xf32>
    %c0_5 = arith.constant 0 : index
    %c0_6 = arith.constant 0 : index
    %6 = vector.load %arg5[%c0_5, %c0_6] : memref<1x256xf32, #tpu.memory_space<vmem>>, vector<1x256xf32>
    %7 = vector.broadcast %6 : vector<1x256xf32> to vector<32x256xf32>
    %8 = arith.addf %5, %7 : vector<32x256xf32>
    %cst_7 = arith.constant 0.000000e+00 : f32
    %9 = vector.broadcast %cst_7 : f32 to vector<32x256xf32>
    %10 = arith.maximumf %8, %9 : vector<32x256xf32>
    %11 = arith.truncf %10 : vector<32x256xf32> to vector<32x256xbf16>
    %c0_8 = arith.constant 0 : index
    %c0_9 = arith.constant 0 : index
    %12 = vector.load %arg6[%c0_8, %c0_9] : memref<32x256xbf16, #tpu.memory_space<vmem>>, vector<32x256xbf16>
    tpu.vector_store %arg6[%c0_8, %c0_9], %11 {strides = array<i32>} : memref<32x256xbf16, #tpu.memory_space<vmem>>, vector<32x256xbf16>,
    return
  }
  func.func @transform_0(%arg0: i32, %arg1: i32) -> (i32, i32) {
    %c0_i32 = arith.constant 0 : i32
    %c0_i32_0 = arith.constant 0 : i32
    return %arg0, %c0_i32 : i32, i32
  }
  func.func @transform_1(%arg0: i32, %arg1: i32) -> (i32, i32) {
    %c0_i32 = arith.constant 0 : i32
    %c0_i32_0 = arith.constant 0 : i32
    return %c0_i32, %arg1 : i32, i32
  }
  func.func @transform_2(%arg0: i32, %arg1: i32) -> (i32, i32) {
    %c0_i32 = arith.constant 0 : i32
    %c0_i32_0 = arith.constant 0 : i32
    return %c0_i32, %arg1 : i32, i32
  }
  func.func @transform_3(%arg0: i32, %arg1: i32) -> (i32, i32) {
    %c0_i32 = arith.constant 0 : i32
    %c0_i32_0 = arith.constant 0 : i32
    return %c0_i32, %arg1 : i32, i32
  }
  func.func @transform_4(%arg0: i32, %arg1: i32) -> (i32, i32) {
    %c0_i32 = arith.constant 0 : i32
    return %arg0, %arg1 : i32, i32
  }
}

module attributes {stable_mosaic.version = 11 : i64} {
  func.func @kernel(%arg0: i32, %arg1: i32, %arg2: i32, %arg3: memref<8x768xbf16, #tpu.memory_space<vmem>>, %arg4: memref<768x256xbf16, #tpu.memory_space<vmem>>, %arg5: memref<1x256xf32, #tpu.memory_space<vmem>>, %arg6: memref<1x256xf32, #tpu.memory_space<vmem>>, %arg7: memref<8x256xbf16, #tpu.memory_space<vmem>>, %arg8: memref<8x256xf32, #tpu.memory_space<vmem>>) attributes {dimension_semantics = [#tpu.dimension_semantics<parallel>, #tpu.dimension_semantics<parallel>, #tpu.dimension_semantics<arbitrary>], iteration_bounds = array<i64: 1, 1, 3>, scalar_prefetch = 0 : i64, scratch_operands = 1 : i64, tpu.core_type = #tpu.core_type<tc>, window_params = [{transform_indices = @transform_0, window_bounds = array<i64: 8, 768>}, {transform_indices = @transform_1, window_bounds = array<i64: 768, 256>}, {transform_indices = @transform_2, window_bounds = array<i64: 1, 256>}, {transform_indices = @transform_3, window_bounds = array<i64: 1, 256>}, {transform_indices = @transform_4, window_bounds = array<i64: 8, 256>}]} {
    %c0_i32 = arith.constant 0 : i32
    %0 = arith.cmpi eq, %arg2, %c0_i32 : i32
    %1 = arith.extui %0 : i1 to i32
    %c0_i32_0 = arith.constant 0 : i32
    %2 = arith.cmpi ne, %1, %c0_i32_0 : i32
    scf.if %2 {
      %cst_9 = arith.constant 0.000000e+00 : f32
      %12 = vector.broadcast %cst_9 : f32 to vector<8x256xf32>
      %c0_10 = arith.constant 0 : index
      %c0_11 = arith.constant 0 : index
      %13 = vector.load %arg8[%c0_10, %c0_11] : memref<8x256xf32, #tpu.memory_space<vmem>>, vector<8x256xf32>
      tpu.vector_store %arg8[%c0_10, %c0_11], %12 {strides = array<i32>} : memref<8x256xf32, #tpu.memory_space<vmem>>, vector<8x256xf32>,
    } else {
    }
    %c0 = arith.constant 0 : index
    %c0_1 = arith.constant 0 : index
    %3 = vector.load %arg8[%c0, %c0_1] : memref<8x256xf32, #tpu.memory_space<vmem>>, vector<8x256xf32>
    %c0_2 = arith.constant 0 : index
    %c0_3 = arith.constant 0 : index
    %4 = vector.load %arg3[%c0_2, %c0_3] : memref<8x768xbf16, #tpu.memory_space<vmem>>, vector<8x768xbf16>
    %c0_4 = arith.constant 0 : index
    %c0_5 = arith.constant 0 : index
    %5 = vector.load %arg4[%c0_4, %c0_5] : memref<768x256xbf16, #tpu.memory_space<vmem>>, vector<768x256xbf16>
    %cst = arith.constant dense<0.000000e+00> : vector<8x256xf32>
    %6 = tpu.matmul %4, %5, %cst {dimension_numbers = #tpu.dot_dimension_numbers<[1], [0], [0], [1], [0, 0, 1, 1], [], []>} : vector<8x768xbf16>, vector<768x256xbf16>, vector<8x256xf32> -> vector<8x256xf32>
    %7 = arith.addf %3, %6 : vector<8x256xf32>
    %c0_6 = arith.constant 0 : index
    %c0_7 = arith.constant 0 : index
    %8 = vector.load %arg8[%c0_6, %c0_7] : memref<8x256xf32, #tpu.memory_space<vmem>>, vector<8x256xf32>
    tpu.vector_store %arg8[%c0_6, %c0_7], %7 {strides = array<i32>} : memref<8x256xf32, #tpu.memory_space<vmem>>, vector<8x256xf32>,
    %c2_i32 = arith.constant 2 : i32
    %9 = arith.cmpi eq, %arg2, %c2_i32 : i32
    %10 = arith.extui %9 : i1 to i32
    %c0_i32_8 = arith.constant 0 : i32
    %11 = arith.cmpi ne, %10, %c0_i32_8 : i32
    scf.if %11 {
      %c0_9 = arith.constant 0 : index
      %c0_10 = arith.constant 0 : index
      %12 = vector.load %arg8[%c0_9, %c0_10] : memref<8x256xf32, #tpu.memory_space<vmem>>, vector<8x256xf32>
      %c0_11 = arith.constant 0 : index
      %c0_12 = arith.constant 0 : index
      %13 = vector.load %arg5[%c0_11, %c0_12] : memref<1x256xf32, #tpu.memory_space<vmem>>, vector<1x256xf32>
      %14 = vector.broadcast %13 : vector<1x256xf32> to vector<8x256xf32>
      %15 = arith.mulf %12, %14 : vector<8x256xf32>
      %c0_13 = arith.constant 0 : index
      %c0_14 = arith.constant 0 : index
      %16 = vector.load %arg6[%c0_13, %c0_14] : memref<1x256xf32, #tpu.memory_space<vmem>>, vector<1x256xf32>
      %17 = vector.broadcast %16 : vector<1x256xf32> to vector<8x256xf32>
      %18 = arith.addf %15, %17 : vector<8x256xf32>
      %cst_15 = arith.constant 0.000000e+00 : f32
      %19 = vector.broadcast %cst_15 : f32 to vector<8x256xf32>
      %20 = arith.maximumf %18, %19 : vector<8x256xf32>
      %21 = arith.truncf %20 : vector<8x256xf32> to vector<8x256xbf16>
      %c0_16 = arith.constant 0 : index
      %c0_17 = arith.constant 0 : index
      %22 = vector.load %arg7[%c0_16, %c0_17] : memref<8x256xbf16, #tpu.memory_space<vmem>>, vector<8x256xbf16>
      tpu.vector_store %arg7[%c0_16, %c0_17], %21 {strides = array<i32>} : memref<8x256xbf16, #tpu.memory_space<vmem>>, vector<8x256xbf16>,
    } else {
    }
    return
  }
  func.func @transform_0(%arg0: i32, %arg1: i32, %arg2: i32) -> (i32, i32) {
    %c0_i32 = arith.constant 0 : i32
    return %arg0, %arg2 : i32, i32
  }
  func.func @transform_1(%arg0: i32, %arg1: i32, %arg2: i32) -> (i32, i32) {
    %c0_i32 = arith.constant 0 : i32
    return %arg2, %arg1 : i32, i32
  }
  func.func @transform_2(%arg0: i32, %arg1: i32, %arg2: i32) -> (i32, i32) {
    %c0_i32 = arith.constant 0 : i32
    %c0_i32_0 = arith.constant 0 : i32
    return %c0_i32, %arg1 : i32, i32
  }
  func.func @transform_3(%arg0: i32, %arg1: i32, %arg2: i32) -> (i32, i32) {
    %c0_i32 = arith.constant 0 : i32
    %c0_i32_0 = arith.constant 0 : i32
    return %c0_i32, %arg1 : i32, i32
  }
  func.func @transform_4(%arg0: i32, %arg1: i32, %arg2: i32) -> (i32, i32) {
    %c0_i32 = arith.constant 0 : i32
    return %arg0, %arg1 : i32, i32
  }
}

module attributes {stable_mosaic.version = 11 : i64} {
  func.func @kernel(%arg0: i32, %arg1: i32, %arg2: memref<8x512xbf16, #tpu.memory_space<vmem>>, %arg3: memref<512x256xbf16, #tpu.memory_space<vmem>>, %arg4: memref<1x256xf32, #tpu.memory_space<vmem>>, %arg5: memref<1x256xf32, #tpu.memory_space<vmem>>, %arg6: memref<8x256xbf16, #tpu.memory_space<vmem>>) attributes {dimension_semantics = [#tpu.dimension_semantics<parallel>, #tpu.dimension_semantics<parallel>], iteration_bounds = array<i64: 1, 4>, scalar_prefetch = 0 : i64, scratch_operands = 0 : i64, tpu.core_type = #tpu.core_type<tc>, window_params = [{transform_indices = @transform_0, window_bounds = array<i64: 8, 512>}, {transform_indices = @transform_1, window_bounds = array<i64: 512, 256>}, {transform_indices = @transform_2, window_bounds = array<i64: 1, 256>}, {transform_indices = @transform_3, window_bounds = array<i64: 1, 256>}, {transform_indices = @transform_4, window_bounds = array<i64: 8, 256>}]} {
    %c0 = arith.constant 0 : index
    %c0_0 = arith.constant 0 : index
    %0 = vector.load %arg2[%c0, %c0_0] : memref<8x512xbf16, #tpu.memory_space<vmem>>, vector<8x512xbf16>
    %c0_1 = arith.constant 0 : index
    %c0_2 = arith.constant 0 : index
    %1 = vector.load %arg3[%c0_1, %c0_2] : memref<512x256xbf16, #tpu.memory_space<vmem>>, vector<512x256xbf16>
    %cst = arith.constant dense<0.000000e+00> : vector<8x256xf32>
    %2 = tpu.matmul %0, %1, %cst {dimension_numbers = #tpu.dot_dimension_numbers<[1], [0], [0], [1], [0, 0, 1, 1], [], []>} : vector<8x512xbf16>, vector<512x256xbf16>, vector<8x256xf32> -> vector<8x256xf32>
    %c0_3 = arith.constant 0 : index
    %c0_4 = arith.constant 0 : index
    %3 = vector.load %arg4[%c0_3, %c0_4] : memref<1x256xf32, #tpu.memory_space<vmem>>, vector<1x256xf32>
    %4 = vector.broadcast %3 : vector<1x256xf32> to vector<8x256xf32>
    %5 = arith.mulf %2, %4 : vector<8x256xf32>
    %c0_5 = arith.constant 0 : index
    %c0_6 = arith.constant 0 : index
    %6 = vector.load %arg5[%c0_5, %c0_6] : memref<1x256xf32, #tpu.memory_space<vmem>>, vector<1x256xf32>
    %7 = vector.broadcast %6 : vector<1x256xf32> to vector<8x256xf32>
    %8 = arith.addf %5, %7 : vector<8x256xf32>
    %9 = arith.truncf %8 : vector<8x256xf32> to vector<8x256xbf16>
    %c0_7 = arith.constant 0 : index
    %c0_8 = arith.constant 0 : index
    %10 = vector.load %arg6[%c0_7, %c0_8] : memref<8x256xbf16, #tpu.memory_space<vmem>>, vector<8x256xbf16>
    tpu.vector_store %arg6[%c0_7, %c0_8], %9 {strides = array<i32>} : memref<8x256xbf16, #tpu.memory_space<vmem>>, vector<8x256xbf16>,
    return
  }
  func.func @transform_0(%arg0: i32, %arg1: i32) -> (i32, i32) {
    %c0_i32 = arith.constant 0 : i32
    %c0_i32_0 = arith.constant 0 : i32
    return %arg0, %c0_i32 : i32, i32
  }
  func.func @transform_1(%arg0: i32, %arg1: i32) -> (i32, i32) {
    %c0_i32 = arith.constant 0 : i32
    %c0_i32_0 = arith.constant 0 : i32
    return %c0_i32, %arg1 : i32, i32
  }
  func.func @transform_2(%arg0: i32, %arg1: i32) -> (i32, i32) {
    %c0_i32 = arith.constant 0 : i32
    %c0_i32_0 = arith.constant 0 : i32
    return %c0_i32, %arg1 : i32, i32
  }
  func.func @transform_3(%arg0: i32, %arg1: i32) -> (i32, i32) {
    %c0_i32 = arith.constant 0 : i32
    %c0_i32_0 = arith.constant 0 : i32
    return %c0_i32, %arg1 : i32, i32
  }
  func.func @transform_4(%arg0: i32, %arg1: i32) -> (i32, i32) {
    %c0_i32 = arith.constant 0 : i32
    return %arg0, %arg1 : i32, i32
  }
}

module attributes {stable_mosaic.version = 11 : i64} {
  func.func @kernel(%arg0: i32, %arg1: i32, %arg2: memref<8x256xbf16, #tpu.memory_space<vmem>>, %arg3: memref<256x256xbf16, #tpu.memory_space<vmem>>, %arg4: memref<1x256xf32, #tpu.memory_space<vmem>>, %arg5: memref<1x256xf32, #tpu.memory_space<vmem>>, %arg6: memref<8x256xbf16, #tpu.memory_space<vmem>>, %arg7: memref<8x256xbf16, #tpu.memory_space<vmem>>) attributes {dimension_semantics = [#tpu.dimension_semantics<parallel>, #tpu.dimension_semantics<parallel>], iteration_bounds = array<i64: 1, 4>, scalar_prefetch = 0 : i64, scratch_operands = 0 : i64, tpu.core_type = #tpu.core_type<tc>, window_params = [{transform_indices = @transform_0, window_bounds = array<i64: 8, 256>}, {transform_indices = @transform_1, window_bounds = array<i64: 256, 256>}, {transform_indices = @transform_2, window_bounds = array<i64: 1, 256>}, {transform_indices = @transform_3, window_bounds = array<i64: 1, 256>}, {transform_indices = @transform_4, window_bounds = array<i64: 8, 256>}, {transform_indices = @transform_5, window_bounds = array<i64: 8, 256>}]} {
    %c0 = arith.constant 0 : index
    %c0_0 = arith.constant 0 : index
    %0 = vector.load %arg2[%c0, %c0_0] : memref<8x256xbf16, #tpu.memory_space<vmem>>, vector<8x256xbf16>
    %c0_1 = arith.constant 0 : index
    %c0_2 = arith.constant 0 : index
    %1 = vector.load %arg3[%c0_1, %c0_2] : memref<256x256xbf16, #tpu.memory_space<vmem>>, vector<256x256xbf16>
    %cst = arith.constant dense<0.000000e+00> : vector<8x256xf32>
    %2 = tpu.matmul %0, %1, %cst {dimension_numbers = #tpu.dot_dimension_numbers<[1], [0], [0], [1], [0, 0, 1, 1], [], []>} : vector<8x256xbf16>, vector<256x256xbf16>, vector<8x256xf32> -> vector<8x256xf32>
    %c0_3 = arith.constant 0 : index
    %c0_4 = arith.constant 0 : index
    %3 = vector.load %arg4[%c0_3, %c0_4] : memref<1x256xf32, #tpu.memory_space<vmem>>, vector<1x256xf32>
    %4 = vector.broadcast %3 : vector<1x256xf32> to vector<8x256xf32>
    %5 = arith.mulf %2, %4 : vector<8x256xf32>
    %c0_5 = arith.constant 0 : index
    %c0_6 = arith.constant 0 : index
    %6 = vector.load %arg5[%c0_5, %c0_6] : memref<1x256xf32, #tpu.memory_space<vmem>>, vector<1x256xf32>
    %7 = vector.broadcast %6 : vector<1x256xf32> to vector<8x256xf32>
    %8 = arith.addf %5, %7 : vector<8x256xf32>
    %c0_7 = arith.constant 0 : index
    %c0_8 = arith.constant 0 : index
    %9 = vector.load %arg6[%c0_7, %c0_8] : memref<8x256xbf16, #tpu.memory_space<vmem>>, vector<8x256xbf16>
    %10 = arith.extf %9 : vector<8x256xbf16> to vector<8x256xf32>
    %11 = arith.addf %8, %10 : vector<8x256xf32>
    %cst_9 = arith.constant 0.000000e+00 : f32
    %12 = vector.broadcast %cst_9 : f32 to vector<8x256xf32>
    %13 = arith.maximumf %11, %12 : vector<8x256xf32>
    %14 = arith.truncf %13 : vector<8x256xf32> to vector<8x256xbf16>
    %c0_10 = arith.constant 0 : index
    %c0_11 = arith.constant 0 : index
    %15 = vector.load %arg7[%c0_10, %c0_11] : memref<8x256xbf16, #tpu.memory_space<vmem>>, vector<8x256xbf16>
    tpu.vector_store %arg7[%c0_10, %c0_11], %14 {strides = array<i32>} : memref<8x256xbf16, #tpu.memory_space<vmem>>, vector<8x256xbf16>,
    return
  }
  func.func @transform_0(%arg0: i32, %arg1: i32) -> (i32, i32) {
    %c0_i32 = arith.constant 0 : i32
    %c0_i32_0 = arith.constant 0 : i32
    return %arg0, %c0_i32 : i32, i32
  }
  func.func @transform_1(%arg0: i32, %arg1: i32) -> (i32, i32) {
    %c0_i32 = arith.constant 0 : i32
    %c0_i32_0 = arith.constant 0 : i32
    return %c0_i32, %arg1 : i32, i32
  }
  func.func @transform_2(%arg0: i32, %arg1: i32) -> (i32, i32) {
    %c0_i32 = arith.constant 0 : i32
    %c0_i32_0 = arith.constant 0 : i32
    return %c0_i32, %arg1 : i32, i32
  }
  func.func @transform_3(%arg0: i32, %arg1: i32) -> (i32, i32) {
    %c0_i32 = arith.constant 0 : i32
    %c0_i32_0 = arith.constant 0 : i32
    return %c0_i32, %arg1 : i32, i32
  }
  func.func @transform_4(%arg0: i32, %arg1: i32) -> (i32, i32) {
    %c0_i32 = arith.constant 0 : i32
    return %arg0, %arg1 : i32, i32
  }
  func.func @transform_5(%arg0: i32, %arg1: i32) -> (i32, i32) {
    %c0_i32 = arith.constant 0 : i32
    return %arg0, %arg1 : i32, i32
  }
}

module attributes {stable_mosaic.version = 11 : i64} {
  func.func @kernel(%arg0: i32, %arg1: i32, %arg2: memref<8x1024xbf16, #tpu.memory_space<vmem>>, %arg3: memref<1024x256xbf16, #tpu.memory_space<vmem>>, %arg4: memref<1x256xf32, #tpu.memory_space<vmem>>, %arg5: memref<1x256xf32, #tpu.memory_space<vmem>>, %arg6: memref<8x256xbf16, #tpu.memory_space<vmem>>) attributes {dimension_semantics = [#tpu.dimension_semantics<parallel>, #tpu.dimension_semantics<parallel>], iteration_bounds = array<i64: 1, 1>, scalar_prefetch = 0 : i64, scratch_operands = 0 : i64, tpu.core_type = #tpu.core_type<tc>, window_params = [{transform_indices = @transform_0, window_bounds = array<i64: 8, 1024>}, {transform_indices = @transform_1, window_bounds = array<i64: 1024, 256>}, {transform_indices = @transform_2, window_bounds = array<i64: 1, 256>}, {transform_indices = @transform_3, window_bounds = array<i64: 1, 256>}, {transform_indices = @transform_4, window_bounds = array<i64: 8, 256>}]} {
    %c0 = arith.constant 0 : index
    %c0_0 = arith.constant 0 : index
    %0 = vector.load %arg2[%c0, %c0_0] : memref<8x1024xbf16, #tpu.memory_space<vmem>>, vector<8x1024xbf16>
    %c0_1 = arith.constant 0 : index
    %c0_2 = arith.constant 0 : index
    %1 = vector.load %arg3[%c0_1, %c0_2] : memref<1024x256xbf16, #tpu.memory_space<vmem>>, vector<1024x256xbf16>
    %cst = arith.constant dense<0.000000e+00> : vector<8x256xf32>
    %2 = tpu.matmul %0, %1, %cst {dimension_numbers = #tpu.dot_dimension_numbers<[1], [0], [0], [1], [0, 0, 1, 1], [], []>} : vector<8x1024xbf16>, vector<1024x256xbf16>, vector<8x256xf32> -> vector<8x256xf32>
    %c0_3 = arith.constant 0 : index
    %c0_4 = arith.constant 0 : index
    %3 = vector.load %arg4[%c0_3, %c0_4] : memref<1x256xf32, #tpu.memory_space<vmem>>, vector<1x256xf32>
    %4 = vector.broadcast %3 : vector<1x256xf32> to vector<8x256xf32>
    %5 = arith.mulf %2, %4 : vector<8x256xf32>
    %c0_5 = arith.constant 0 : index
    %c0_6 = arith.constant 0 : index
    %6 = vector.load %arg5[%c0_5, %c0_6] : memref<1x256xf32, #tpu.memory_space<vmem>>, vector<1x256xf32>
    %7 = vector.broadcast %6 : vector<1x256xf32> to vector<8x256xf32>
    %8 = arith.addf %5, %7 : vector<8x256xf32>
    %cst_7 = arith.constant 0.000000e+00 : f32
    %9 = vector.broadcast %cst_7 : f32 to vector<8x256xf32>
    %10 = arith.maximumf %8, %9 : vector<8x256xf32>
    %11 = arith.truncf %10 : vector<8x256xf32> to vector<8x256xbf16>
    %c0_8 = arith.constant 0 : index
    %c0_9 = arith.constant 0 : index
    %12 = vector.load %arg6[%c0_8, %c0_9] : memref<8x256xbf16, #tpu.memory_space<vmem>>, vector<8x256xbf16>
    tpu.vector_store %arg6[%c0_8, %c0_9], %11 {strides = array<i32>} : memref<8x256xbf16, #tpu.memory_space<vmem>>, vector<8x256xbf16>,
    return
  }
  func.func @transform_0(%arg0: i32, %arg1: i32) -> (i32, i32) {
    %c0_i32 = arith.constant 0 : i32
    %c0_i32_0 = arith.constant 0 : i32
    return %arg0, %c0_i32 : i32, i32
  }
  func.func @transform_1(%arg0: i32, %arg1: i32) -> (i32, i32) {
    %c0_i32 = arith.constant 0 : i32
    %c0_i32_0 = arith.constant 0 : i32
    return %c0_i32, %arg1 : i32, i32
  }
  func.func @transform_2(%arg0: i32, %arg1: i32) -> (i32, i32) {
    %c0_i32 = arith.constant 0 : i32
    %c0_i32_0 = arith.constant 0 : i32
    return %c0_i32, %arg1 : i32, i32
  }
  func.func @transform_3(%arg0: i32, %arg1: i32) -> (i32, i32) {
    %c0_i32 = arith.constant 0 : i32
    %c0_i32_0 = arith.constant 0 : i32
    return %c0_i32, %arg1 : i32, i32
  }
  func.func @transform_4(%arg0: i32, %arg1: i32) -> (i32, i32) {
    %c0_i32 = arith.constant 0 : i32
    return %arg0, %arg1 : i32, i32
  }
}

</mosaic_0001>

<bundles_post_ra>
// kernel: resnet_forward.44
= control target key start
LH: loop header
LB: loop body
LE: loop exit
PB: predicated region body
PF: predicated region fallthrough
CT: control target
= control target key end

     0   :  { %s1625_s15 = smov 0   ;;  %s1627_s16 = smov 0   ;;  %s1836_s0 = inlined_call_operand.vmem [shape: bf16[512,256], index: 0, kind: input, shape index: {}]   ;;  %s1837_s1 = inlined_call_operand.vmem [shape: bf16[256,128], index: 1, kind: input, shape index: {}]   ;;  %s1838_s2 = inlined_call_operand.vmem [shape: f32[1,128], index: 2, kind: input, shape index: {}]   ;;  %s1839_s3 = inlined_call_operand.vmem [shape: f32[1,128], index: 3, kind: input, shape index: {}]   ;;  %s1840_s4 = inlined_call_operand.vmem [shape: bf16[512,128], index: 4, kind: output, shape index: {}]  }
   0x1   :  { %s1629_s17 = smov 0  }
   0x2 LB: > { %s26_s18 = sadd.s32 1, %s1594_s16  ;;  %p1142_p0 = scmp.ge.s32.totalorder %s1598_s17, 1  ;;  %s1598_s17 = sphi %s1629_s17, %s14_s17   ;;  %s1594_s16 = sphi %s1627_s16, %s1842_s16   ;;  %s1590_s15 = sphi %s1625_s15, %s1841_s15  }
   0x3   : > { %p28_p1 = scmp.ge.s32.totalorder %s26_s18, 2  ;;  %p203_p2 = scmp.lt.s32.totalorder %s1598_s17, 3 }
   0x5   : > { %s1844_s18 = smov (%p28_p1, %s26_s18), 0  ;;  %p204_p3 = pnand %p1142_p0, %p203_p2 }
   0x6   : > { %s1143_s21 = sshll.u32 (!%p204_p3), %s1590_s15, 5 }
   0x7   : > { %207 = sbr.rel (%p204_p3) target bundleno = 311 (0x137), region = 36  ;;  %p244_p4 = scmp.lt.s32.totalorder (!%p204_p3), %s1143_s21, 63 }
   0xc   : > { %v1512_v0 = vld [vmem:[%s1837_s1 + $0x78] sm:$0xff]   ;;  %v1514_v2 = vld [vmem:[%s1837_s1 + $0x70] sm:$0xff]   ;;  %v1516_v4 = vld [vmem:[%s1837_s1 + $0x68] sm:$0xff]   ;;  %s1846_s21 = smov (!%p244_p4, %s1143_s21), 63 }
   0xd   : > { %v1513_v1 = vld [vmem:[%s1837_s1 + $0x38] sm:$0xff]   ;;  %1360 = vmatprep.subr.bf16.mxu0 %v1512_v0  ;;  %1472 = vmatprep.subr.bf16.mxu1 %v1512_v0  ;;  %v1515_v3 = vld [vmem:[%s1837_s1 + $0x30] sm:$0xff]   ;;  %v1517_v5 = vld [vmem:[%s1837_s1 + $0x28] sm:$0xff]   ;;  %s1232_s10 = sshll.u32 %s1846_s21, 3  ;;  %s1147_s12 = sshll.u32 %s1846_s21, 2 }
   0xe   : > { %1361 = vmatpush3.bf16.msra.mxu0 %v1513_v1  ;;  %1480 = vmatpush3.bf16.msra.mxu1 %v1513_v1  ;;  %v1518_v6 = vld [vmem:[%s1837_s1 + $0x60] sm:$0xff]   ;;  %v1520_v8 = vld [vmem:[%s1837_s1 + $0x58] sm:$0xff]   ;;  %s1676_s15 = scalar_lea.vmem %s1836_s0, %s1232_s10  ;;  %v1522_v10 = vld [vmem:[%s1837_s1 + $0x50] sm:$0xff]  }
   0xf   : > { %1362 = vmatprep.subr.bf16.mxu0 %v1514_v2  ;;  %1473 = vmatprep.subr.bf16.mxu1 %v1514_v2  ;;  %v1519_v7 = vld [vmem:[%s1837_s1 + $0x20] sm:$0xff]   ;;  %v1521_v9 = vld [vmem:[%s1837_s1 + $0x18] sm:$0xff]   ;;  %v1523_v13 = vld [vmem:[%s1837_s1 + $0x10] sm:$0xff]  }
  0x10   : > { %v1530_v11 = vld [vmem:[%s1676_s15 + $0x4] ss:$8 sps:$4 sm:$0xff]   ;;  %v1528_v18 = vld [vmem:[%s1676_s15] ss:$8 sps:$4 sm:$0xff]   ;;  %v1534_v20 = vld [vmem:[%s1676_s15 + $0x14] ss:$8 sps:$4 sm:$0xff]  }
  0x11   : > { %v1533_v12 = vld [vmem:[%s1676_s15 + $0x84] ss:$8 sps:$4 sm:$0xff]   ;;  %622 = vmatprep.mubr.bf16.mxu0 %v1530_v11  ;;  %v1531_v19 = vld [vmem:[%s1676_s15 + $0x80] ss:$8 sps:$4 sm:$0xff]   ;;  %v1536_v21 = vld [vmem:[%s1676_s15 + $0x94] ss:$8 sps:$4 sm:$0xff]  }
  0x12   : > { %1363 = vmatpush3.bf16.msra.mxu0 %v1515_v3  ;;  %1481 = vmatpush3.bf16.msra.mxu1 %v1515_v3  ;;  %v1524_v14 = vld [vmem:[%s1837_s1 + $0x48] sm:$0xff]   ;;  %v1526_v16 = vld [vmem:[%s1837_s1 + $0x40] sm:$0xff]   ;;  %v1538_v22 = vld [vmem:[%s1676_s15 + $0x10] ss:$8 sps:$4 sm:$0xff]  }
  0x13   : > { %1364 = vmatprep.subr.bf16.mxu0 %v1516_v4  ;;  %1474 = vmatprep.subr.bf16.mxu1 %v1516_v4  ;;  %v1525_v15 = vld [vmem:[%s1837_s1 + $0x8] sm:$0xff]   ;;  %v1527_v17 = vld [vmem:[%s1837_s1] sm:$0xff]   ;;  %v1539_v23 = vld [vmem:[%s1676_s15 + $0x90] ss:$8 sps:$4 sm:$0xff]  }
  0x14   : > { %686 = vmatprep.mubr.bf16.mxu1 %v1533_v12  ;;  %v1540_v24 = vld [vmem:[%s1676_s15 + $0x24] ss:$8 sps:$4 sm:$0xff]   ;;  %v1544_v26 = vld [vmem:[%s1676_s15 + $0x20] ss:$8 sps:$4 sm:$0xff]   ;;  %v1546_v28 = vld [vmem:[%s1676_s15 + $0x34] ss:$8 sps:$4 sm:$0xff]  }
  0x15   : > { %v1542_v25 = vld [vmem:[%s1676_s15 + $0xa4] ss:$8 sps:$4 sm:$0xff]   ;;  %v1545_v27 = vld [vmem:[%s1676_s15 + $0xa0] ss:$8 sps:$4 sm:$0xff]   ;;  %v1548_v29 = vld [vmem:[%s1676_s15 + $0xb4] ss:$8 sps:$4 sm:$0xff]  }
  0x16   : > { %1365 = vmatpush3.bf16.msra.mxu0 %v1517_v5  ;;  %1482 = vmatpush3.bf16.msra.mxu1 %v1517_v5  ;;  %v1550_v30 = vld [vmem:[%s1676_s15 + $0x30] ss:$8 sps:$4 sm:$0xff]   ;;  %v1552_v32 = vld [vmem:[%s1676_s15 + $0x44] ss:$8 sps:$4 sm:$0xff]   ;;  %v1556_v34 = vld [vmem:[%s1676_s15 + $0x40] ss:$8 sps:$4 sm:$0xff]  }
  0x17   : > { %1366 = vmatprep.subr.bf16.mxu0 %v1518_v6  ;;  %1475 = vmatprep.subr.bf16.mxu1 %v1518_v6  ;;  %v1551_v31 = vld [vmem:[%s1676_s15 + $0xb0] ss:$8 sps:$4 sm:$0xff]   ;;  %v1554_v33 = vld [vmem:[%s1676_s15 + $0xc4] ss:$8 sps:$4 sm:$0xff]   ;;  %v1557_v35 = vld [vmem:[%s1676_s15 + $0xc0] ss:$8 sps:$4 sm:$0xff]  }
  0x18   : > { %v1558_v36 = vld [vmem:[%s1676_s15 + $0x54] ss:$8 sps:$4 sm:$0xff]   ;;  %v1562_v38 = vld [vmem:[%s1676_s15 + $0x50] ss:$8 sps:$4 sm:$0xff]   ;;  %v1564_v40 = vld [vmem:[%s1676_s15 + $0x64] ss:$8 sps:$4 sm:$0xff]  }
  0x19   : > { %v1560_v37 = vld [vmem:[%s1676_s15 + $0xd4] ss:$8 sps:$4 sm:$0xff]   ;;  %v1563_v39 = vld [vmem:[%s1676_s15 + $0xd0] ss:$8 sps:$4 sm:$0xff]   ;;  %v1566_v41 = vld [vmem:[%s1676_s15 + $0xe4] ss:$8 sps:$4 sm:$0xff]  }
  0x1a   : > { %1367 = vmatpush3.bf16.msra.mxu0 %v1519_v7  ;;  %1483 = vmatpush3.bf16.msra.mxu1 %v1519_v7  ;;  %v1568_v42 = vld [vmem:[%s1676_s15 + $0x60] ss:$8 sps:$4 sm:$0xff]   ;;  %v1570_v44 = vld [vmem:[%s1676_s15 + $0x74] ss:$8 sps:$4 sm:$0xff]   ;;  %v1574_v46 = vld [vmem:[%s1676_s15 + $0x70] ss:$8 sps:$4 sm:$0xff]  }
  0x1b   : > { %1368 = vmatprep.subr.bf16.mxu0 %v1520_v8  ;;  %1476 = vmatprep.subr.bf16.mxu1 %v1520_v8  ;;  %v1569_v43 = vld [vmem:[%s1676_s15 + $0xe0] ss:$8 sps:$4 sm:$0xff]   ;;  %v1572_v45 = vld [vmem:[%s1676_s15 + $0xf4] ss:$8 sps:$4 sm:$0xff]   ;;  %v1575_v47 = vld [vmem:[%s1676_s15 + $0xf0] ss:$8 sps:$4 sm:$0xff]   ;;  %s1753_s15 = scalar_lea.vmem %s1840_s4, %s1147_s12 }
  0x1c   : > { %v1734_v51 = vld [vmem:[%s1838_s2] ss:$0 sm:$0xff] }
  0x1d   : > { %v1741_v59 = vld [vmem:[%s1839_s3] ss:$0 sm:$0xff] }
  0x1e   : > { %1369 = vmatpush3.bf16.msra.mxu0 %v1521_v9  ;;  %1484 = vmatpush3.bf16.msra.mxu1 %v1521_v9 }
  0x1f   : > { %1370 = vmatprep.subr.bf16.mxu0 %v1522_v10  ;;  %1477 = vmatprep.subr.bf16.mxu1 %v1522_v10 }
  0x22   : > { %1371 = vmatpush3.bf16.msra.mxu0 %v1523_v13  ;;  %1485 = vmatpush3.bf16.msra.mxu1 %v1523_v13 }
  0x23   : > { %1372 = vmatprep.subr.bf16.mxu0 %v1524_v14  ;;  %1478 = vmatprep.subr.bf16.mxu1 %v1524_v14 }
  0x26   : > { %1373 = vmatpush3.bf16.msra.mxu0 %v1525_v15  ;;  %1486 = vmatpush3.bf16.msra.mxu1 %v1525_v15 }
  0x27   : > { %1374 = vmatprep.subr.bf16.mxu0 %v1526_v16  ;;  %1479 = vmatprep.subr.bf16.mxu1 %v1526_v16 }
  0x2a   : > { %1375 = vmatpush3.bf16.msra.mxu0 %v1527_v17  ;;  %1487 = vmatpush3.bf16.msra.mxu1 %v1527_v17 }
  0x2d   : > { %623 = vmatmul.mubr.bf16.vlgmr.msra.gmra.mxu0 %v1528_v18  ;;  %687 = vmatmul.mubr.bf16.vlgmr.msra.gmra.mxu1 %v1531_v19 }
  0x2e   : > { %630 = vmatprep.mubr.bf16.mxu0 %v1534_v20  ;;  %694 = vmatprep.mubr.bf16.mxu1 %v1536_v21 }
  0x35   : > { %631 = vmatmul.mubr.bf16.gmra.mxu0 %v1538_v22  ;;  %695 = vmatmul.mubr.bf16.gmra.mxu1 %v1539_v23 }
  0x36   : > { %638 = vmatprep.mubr.bf16.mxu0 %v1540_v24  ;;  %702 = vmatprep.mubr.bf16.mxu1 %v1542_v25 }
  0x3d   : > { %639 = vmatmul.mubr.bf16.gmra.mxu0 %v1544_v26  ;;  %703 = vmatmul.mubr.bf16.gmra.mxu1 %v1545_v27 }
  0x3e   : > { %646 = vmatprep.mubr.bf16.mxu0 %v1546_v28  ;;  %710 = vmatprep.mubr.bf16.mxu1 %v1548_v29 }
  0x45   : > { %647 = vmatmul.mubr.bf16.gmra.mxu0 %v1550_v30  ;;  %711 = vmatmul.mubr.bf16.gmra.mxu1 %v1551_v31 }
  0x46   : > { %654 = vmatprep.mubr.bf16.mxu0 %v1552_v32  ;;  %718 = vmatprep.mubr.bf16.mxu1 %v1554_v33 }
  0x4d   : > { %655 = vmatmul.mubr.bf16.gmra.mxu0 %v1556_v34  ;;  %719 = vmatmul.mubr.bf16.gmra.mxu1 %v1557_v35 }
  0x4e   : > { %662 = vmatprep.mubr.bf16.mxu0 %v1558_v36  ;;  %726 = vmatprep.mubr.bf16.mxu1 %v1560_v37 }
  0x55   : > { %663 = vmatmul.mubr.bf16.gmra.mxu0 %v1562_v38  ;;  %727 = vmatmul.mubr.bf16.gmra.mxu1 %v1563_v39 }
  0x56   : > { %670 = vmatprep.mubr.bf16.mxu0 %v1564_v40  ;;  %734 = vmatprep.mubr.bf16.mxu1 %v1566_v41 }
  0x5d   : > { %671 = vmatmul.mubr.bf16.gmra.mxu0 %v1568_v42  ;;  %735 = vmatmul.mubr.bf16.gmra.mxu1 %v1569_v43 }
  0x5e   : > { %678 = vmatprep.mubr.bf16.mxu0 %v1570_v44  ;;  %742 = vmatprep.mubr.bf16.mxu1 %v1572_v45 }
  0x65   : > { %679 = vmatmul.mubr.bf16.gmra.mxu0 %v1574_v46  ;;  %743 = vmatmul.mubr.bf16.gmra.mxu1 %v1575_v47 }
  0xed   : > { %v1376_v48 = vpop.f32.mrf.mxu0  ;;  %v1424_v49 = vpop.f32.mrf.mxu1 }
  0xef   : > { %v1377_v50 = vpop.f32.mrf.mxu0  ;;  %v1425_v52 = vpop.f32.mrf.mxu1 }
  0xf0   : > { %v1378_v53 = vadd.f32 %v1377_v50, %v1376_v48  ;;  %v1426_v54 = vadd.f32 %v1425_v52, %v1424_v49 }
  0xf1   : > { %v1379_v55 = vpop.f32.mrf.mxu0  ;;  %v1427_v56 = vpop.f32.mrf.mxu1 }
  0xf2   : > { %v758_v57 = vmul.f32 %v1378_v53, %v1734_v51  ;;  %v774_v58 = vmul.f32 %v1426_v54, %v1734_v51 }
  0xf3   : > { %v1380_v60 = vpop.f32.mrf.mxu0  ;;  %v1428_v61 = vpop.f32.mrf.mxu1 }
  0xf4   : > { %v1381_v62 = vadd.f32 %v1380_v60, %v1379_v55  ;;  %v1429_v63 = vadd.f32 %v1428_v61, %v1427_v56  ;;  %v797_v2 = vadd.f32 %v1741_v59, %v758_v57  ;;  %v813_v3 = vadd.f32 %v1741_v59, %v774_v58 }
  0xf5   : > { %v1382_v0 = vpop.f32.mrf.mxu0  ;;  %v1430_v1 = vpop.f32.mrf.mxu1 }
  0xf6   : > { %v759_v4 = vmul.f32 %v1381_v62, %v1734_v51  ;;  %v775_v5 = vmul.f32 %v1429_v63, %v1734_v51  ;;  %v829_v14 = vmax.f32 %v797_v2, 0.0  ;;  %v845_v15 = vmax.f32 %v813_v3, 0.0 }
  0xf7   : > { %v1383_v6 = vpop.f32.mrf.mxu0  ;;  %v1431_v7 = vpop.f32.mrf.mxu1 }
  0xf8   : > { %v798_v8 = vadd.f32 %v1741_v59, %v759_v4  ;;  %v814_v9 = vadd.f32 %v1741_v59, %v775_v5  ;;  %v1384_v10 = vadd.f32 %v1383_v6, %v1382_v0  ;;  %v1432_v11 = vadd.f32 %v1431_v7, %v1430_v1 }
  0xf9   : > { %v1385_v12 = vpop.f32.mrf.mxu0  ;;  %v1433_v13 = vpop.f32.mrf.mxu1 }
  0xfa   : > { %v830_v16 = vmax.f32 %v798_v8, 0.0  ;;  %v846_v17 = vmax.f32 %v814_v9, 0.0  ;;  %v760_v18 = vmul.f32 %v1384_v10, %v1734_v51  ;;  %v776_v19 = vmul.f32 %v1432_v11, %v1734_v51 }
  0xfb   : > { %v1386_v20 = vpop.f32.mrf.mxu0  ;;  %v1434_v21 = vpop.f32.mrf.mxu1 }
  0xfc   : > { %v1268_v22 = vpack.c.bf16 %v830_v16, %v829_v14  ;;  %v1308_v23 = vpack.c.bf16 %v846_v17, %v845_v15  ;;  %v1387_v24 = vadd.f32 %v1386_v20, %v1385_v12  ;;  %v1435_v25 = vadd.f32 %v1434_v21, %v1433_v13 }
  0xfd   : > { %v1388_v26 = vpop.f32.mrf.mxu0  ;;  %v1436_v27 = vpop.f32.mrf.mxu1  ;;  %v799_v28 = vadd.f32 %v1741_v59, %v760_v18  ;;  %v815_v29 = vadd.f32 %v1741_v59, %v776_v19 }
  0xfe   : > { %1269 = vst [vmem:[%s1753_s15] sm:$0xff] %v1268_v22   ;;  %1352 = vst [vmem:[%s1753_s15 + $0x40] sm:$0xff] %v1308_v23   ;;  %v761_v30 = vmul.f32 %v1387_v24, %v1734_v51  ;;  %v777_v31 = vmul.f32 %v1435_v25, %v1734_v51 }
  0xff   : > { %v1389_v32 = vpop.f32.mrf.mxu0  ;;  %v1437_v33 = vpop.f32.mrf.mxu1  ;;  %v831_v42 = vmax.f32 %v799_v28, 0.0  ;;  %v847_v43 = vmax.f32 %v815_v29, 0.0 }
 0x100   : > { %v1390_v34 = vadd.f32 %v1389_v32, %v1388_v26  ;;  %v1438_v35 = vadd.f32 %v1437_v33, %v1436_v27  ;;  %v800_v36 = vadd.f32 %v1741_v59, %v761_v30  ;;  %v816_v37 = vadd.f32 %v1741_v59, %v777_v31 }
 0x101   : > { %v1391_v38 = vpop.f32.mrf.mxu0  ;;  %v1439_v39 = vpop.f32.mrf.mxu1 }
 0x102   : > { %v762_v40 = vmul.f32 %v1390_v34, %v1734_v51  ;;  %v778_v41 = vmul.f32 %v1438_v35, %v1734_v51  ;;  %v832_v44 = vmax.f32 %v800_v36, 0.0  ;;  %v848_v45 = vmax.f32 %v816_v37, 0.0 }
 0x103   : > { %v1392_v46 = vpop.f32.mrf.mxu0  ;;  %v1440_v47 = vpop.f32.mrf.mxu1 }
 0x104   : > { %v1393_v48 = vadd.f32 %v1392_v46, %v1391_v38  ;;  %v1441_v49 = vadd.f32 %v1440_v47, %v1439_v39  ;;  %v1273_v50 = vpack.c.bf16 %v832_v44, %v831_v42  ;;  %v1313_v52 = vpack.c.bf16 %v848_v45, %v847_v43 }
 0x105   : > { %v1394_v53 = vpop.f32.mrf.mxu0  ;;  %v1442_v54 = vpop.f32.mrf.mxu1  ;;  %v801_v55 = vadd.f32 %v1741_v59, %v762_v40  ;;  %v817_v56 = vadd.f32 %v1741_v59, %v778_v41 }
 0x106   : > { %v763_v57 = vmul.f32 %v1393_v48, %v1734_v51  ;;  %v779_v58 = vmul.f32 %v1441_v49, %v1734_v51  ;;  %1345 = vst [vmem:[%s1753_s15 + $0x8] sm:$0xff] %v1273_v50   ;;  %1353 = vst [vmem:[%s1753_s15 + $0x48] sm:$0xff] %v1313_v52  }
 0x107   : > { %v1395_v60 = vpop.f32.mrf.mxu0  ;;  %v1443_v61 = vpop.f32.mrf.mxu1  ;;  %v833_v4 = vmax.f32 %v801_v55, 0.0  ;;  %v849_v5 = vmax.f32 %v817_v56, 0.0 }
 0x108   : > { %v802_v62 = vadd.f32 %v1741_v59, %v763_v57  ;;  %v818_v63 = vadd.f32 %v1741_v59, %v779_v58  ;;  %v1396_v0 = vadd.f32 %v1395_v60, %v1394_v53  ;;  %v1444_v1 = vadd.f32 %v1443_v61, %v1442_v54 }
 0x109   : > { %v1397_v2 = vpop.f32.mrf.mxu0  ;;  %v1445_v3 = vpop.f32.mrf.mxu1 }
 0x10a   : > { %v834_v6 = vmax.f32 %v802_v62, 0.0  ;;  %v850_v7 = vmax.f32 %v818_v63, 0.0  ;;  %v764_v8 = vmul.f32 %v1396_v0, %v1734_v51  ;;  %v780_v9 = vmul.f32 %v1444_v1, %v1734_v51 }
 0x10b   : > { %v1398_v10 = vpop.f32.mrf.mxu0  ;;  %v1446_v11 = vpop.f32.mrf.mxu1 }
 0x10c   : > { %v1278_v12 = vpack.c.bf16 %v834_v6, %v833_v4  ;;  %v1318_v13 = vpack.c.bf16 %v850_v7, %v849_v5  ;;  %v1399_v14 = vadd.f32 %v1398_v10, %v1397_v2  ;;  %v1447_v15 = vadd.f32 %v1446_v11, %v1445_v3 }
 0x10d   : > { %v1400_v16 = vpop.f32.mrf.mxu0  ;;  %v1448_v17 = vpop.f32.mrf.mxu1  ;;  %v803_v18 = vadd.f32 %v1741_v59, %v764_v8  ;;  %v819_v19 = vadd.f32 %v1741_v59, %v780_v9 }
 0x10e   : > { %1346 = vst [vmem:[%s1753_s15 + $0x10] sm:$0xff] %v1278_v12   ;;  %1354 = vst [vmem:[%s1753_s15 + $0x50] sm:$0xff] %v1318_v13   ;;  %v765_v20 = vmul.f32 %v1399_v14, %v1734_v51  ;;  %v781_v21 = vmul.f32 %v1447_v15, %v1734_v51 }
 0x10f   : > { %v1401_v22 = vpop.f32.mrf.mxu0  ;;  %v1449_v23 = vpop.f32.mrf.mxu1  ;;  %v835_v32 = vmax.f32 %v803_v18, 0.0  ;;  %v851_v33 = vmax.f32 %v819_v19, 0.0 }
 0x110   : > { %v1402_v24 = vadd.f32 %v1401_v22, %v1400_v16  ;;  %v1450_v25 = vadd.f32 %v1449_v23, %v1448_v17  ;;  %v804_v26 = vadd.f32 %v1741_v59, %v765_v20  ;;  %v820_v27 = vadd.f32 %v1741_v59, %v781_v21 }
 0x111   : > { %v1403_v28 = vpop.f32.mrf.mxu0  ;;  %v1451_v29 = vpop.f32.mrf.mxu1 }
 0x112   : > { %v766_v30 = vmul.f32 %v1402_v24, %v1734_v51  ;;  %v782_v31 = vmul.f32 %v1450_v25, %v1734_v51  ;;  %v836_v34 = vmax.f32 %v804_v26, 0.0  ;;  %v852_v35 = vmax.f32 %v820_v27, 0.0 }
 0x113   : > { %v1404_v36 = vpop.f32.mrf.mxu0  ;;  %v1452_v37 = vpop.f32.mrf.mxu1 }
 0x114   : > { %v1405_v38 = vadd.f32 %v1404_v36, %v1403_v28  ;;  %v1453_v39 = vadd.f32 %v1452_v37, %v1451_v29  ;;  %v1283_v40 = vpack.c.bf16 %v836_v34, %v835_v32  ;;  %v1323_v41 = vpack.c.bf16 %v852_v35, %v851_v33 }
 0x115   : > { %v1406_v42 = vpop.f32.mrf.mxu0  ;;  %v1454_v43 = vpop.f32.mrf.mxu1  ;;  %v805_v44 = vadd.f32 %v1741_v59, %v766_v30  ;;  %v821_v45 = vadd.f32 %v1741_v59, %v782_v31 }
 0x116   : > { %v767_v46 = vmul.f32 %v1405_v38, %v1734_v51  ;;  %v783_v47 = vmul.f32 %v1453_v39, %v1734_v51  ;;  %1347 = vst [vmem:[%s1753_s15 + $0x18] sm:$0xff] %v1283_v40   ;;  %1355 = vst [vmem:[%s1753_s15 + $0x58] sm:$0xff] %v1323_v41  }
 0x117   : > { %v1407_v48 = vpop.f32.mrf.mxu0  ;;  %v1455_v49 = vpop.f32.mrf.mxu1  ;;  %v837_v57 = vmax.f32 %v805_v44, 0.0  ;;  %v853_v58 = vmax.f32 %v821_v45, 0.0 }
 0x118   : > { %v806_v50 = vadd.f32 %v1741_v59, %v767_v46  ;;  %v822_v52 = vadd.f32 %v1741_v59, %v783_v47  ;;  %v1408_v53 = vadd.f32 %v1407_v48, %v1406_v42  ;;  %v1456_v54 = vadd.f32 %v1455_v49, %v1454_v43 }
 0x119   : > { %v1409_v55 = vpop.f32.mrf.mxu0  ;;  %v1457_v56 = vpop.f32.mrf.mxu1 }
 0x11a   : > { %v838_v60 = vmax.f32 %v806_v50, 0.0  ;;  %v854_v61 = vmax.f32 %v822_v52, 0.0  ;;  %v768_v62 = vmul.f32 %v1408_v53, %v1734_v51  ;;  %v784_v63 = vmul.f32 %v1456_v54, %v1734_v51 }
 0x11b   : > { %v1410_v0 = vpop.f32.mrf.mxu0  ;;  %v1458_v1 = vpop.f32.mrf.mxu1 }
 0x11c   : > { %v1288_v2 = vpack.c.bf16 %v838_v60, %v837_v57  ;;  %v1328_v3 = vpack.c.bf16 %v854_v61, %v853_v58  ;;  %v1411_v4 = vadd.f32 %v1410_v0, %v1409_v55  ;;  %v1459_v5 = vadd.f32 %v1458_v1, %v1457_v56 }
 0x11d   : > { %v1412_v6 = vpop.f32.mrf.mxu0  ;;  %v1460_v7 = vpop.f32.mrf.mxu1  ;;  %v807_v8 = vadd.f32 %v1741_v59, %v768_v62  ;;  %v823_v9 = vadd.f32 %v1741_v59, %v784_v63 }
 0x11e   : > { %1348 = vst [vmem:[%s1753_s15 + $0x20] sm:$0xff] %v1288_v2   ;;  %1356 = vst [vmem:[%s1753_s15 + $0x60] sm:$0xff] %v1328_v3   ;;  %v769_v10 = vmul.f32 %v1411_v4, %v1734_v51  ;;  %v785_v11 = vmul.f32 %v1459_v5, %v1734_v51 }
 0x11f   : > { %v1413_v12 = vpop.f32.mrf.mxu0  ;;  %v1461_v13 = vpop.f32.mrf.mxu1  ;;  %v839_v22 = vmax.f32 %v807_v8, 0.0  ;;  %v855_v23 = vmax.f32 %v823_v9, 0.0 }
 0x120   : > { %v1414_v14 = vadd.f32 %v1413_v12, %v1412_v6  ;;  %v1462_v15 = vadd.f32 %v1461_v13, %v1460_v7  ;;  %v808_v16 = vadd.f32 %v1741_v59, %v769_v10  ;;  %v824_v17 = vadd.f32 %v1741_v59, %v785_v11 }
 0x121   : > { %v1415_v18 = vpop.f32.mrf.mxu0  ;;  %v1463_v19 = vpop.f32.mrf.mxu1 }
 0x122   : > { %v770_v20 = vmul.f32 %v1414_v14, %v1734_v51  ;;  %v786_v21 = vmul.f32 %v1462_v15, %v1734_v51  ;;  %v840_v24 = vmax.f32 %v808_v16, 0.0  ;;  %v856_v25 = vmax.f32 %v824_v17, 0.0 }
 0x123   : > { %v1416_v26 = vpop.f32.mrf.mxu0  ;;  %v1464_v27 = vpop.f32.mrf.mxu1 }
 0x124   : > { %v1417_v28 = vadd.f32 %v1416_v26, %v1415_v18  ;;  %v1465_v29 = vadd.f32 %v1464_v27, %v1463_v19  ;;  %v1293_v30 = vpack.c.bf16 %v840_v24, %v839_v22  ;;  %v1333_v31 = vpack.c.bf16 %v856_v25, %v855_v23 }
 0x125   : > { %v1418_v32 = vpop.f32.mrf.mxu0  ;;  %v1466_v33 = vpop.f32.mrf.mxu1  ;;  %v809_v34 = vadd.f32 %v1741_v59, %v770_v20  ;;  %v825_v35 = vadd.f32 %v1741_v59, %v786_v21 }
 0x126   : > { %v771_v36 = vmul.f32 %v1417_v28, %v1734_v51  ;;  %v787_v37 = vmul.f32 %v1465_v29, %v1734_v51  ;;  %1349 = vst [vmem:[%s1753_s15 + $0x28] sm:$0xff] %v1293_v30   ;;  %1357 = vst [vmem:[%s1753_s15 + $0x68] sm:$0xff] %v1333_v31  }
 0x127   : > { %v1419_v38 = vpop.f32.mrf.mxu0  ;;  %v1467_v39 = vpop.f32.mrf.mxu1  ;;  %v841_v46 = vmax.f32 %v809_v34, 0.0  ;;  %v857_v47 = vmax.f32 %v825_v35, 0.0 }
 0x128   : > { %v810_v40 = vadd.f32 %v1741_v59, %v771_v36  ;;  %v826_v41 = vadd.f32 %v1741_v59, %v787_v37  ;;  %v1420_v42 = vadd.f32 %v1419_v38, %v1418_v32  ;;  %v1468_v43 = vadd.f32 %v1467_v39, %v1466_v33 }
 0x129   : > { %v1421_v44 = vpop.f32.mrf.mxu0  ;;  %v1469_v45 = vpop.f32.mrf.mxu1 }
 0x12a   : > { %v842_v48 = vmax.f32 %v810_v40, 0.0  ;;  %v858_v49 = vmax.f32 %v826_v41, 0.0  ;;  %v772_v50 = vmul.f32 %v1420_v42, %v1734_v51  ;;  %v788_v52 = vmul.f32 %v1468_v43, %v1734_v51 }
 0x12b   : > { %v1422_v53 = vpop.f32.mrf.mxu0  ;;  %v1470_v54 = vpop.f32.mrf.mxu1 }
 0x12c   : > { %v1298_v55 = vpack.c.bf16 %v842_v48, %v841_v46  ;;  %v1338_v56 = vpack.c.bf16 %v858_v49, %v857_v47  ;;  %v1423_v57 = vadd.f32 %v1422_v53, %v1421_v44  ;;  %v1471_v58 = vadd.f32 %v1470_v54, %v1469_v45 }
 0x12d   : > { %v811_v60 = vadd.f32 %v1741_v59, %v772_v50  ;;  %v827_v61 = vadd.f32 %v1741_v59, %v788_v52 }
 0x12e   : > { %1350 = vst [vmem:[%s1753_s15 + $0x30] sm:$0xff] %v1298_v55   ;;  %1358 = vst [vmem:[%s1753_s15 + $0x70] sm:$0xff] %v1338_v56   ;;  %v773_v62 = vmul.f32 %v1423_v57, %v1734_v51  ;;  %v789_v63 = vmul.f32 %v1471_v58, %v1734_v51 }
 0x12f   : > { %v843_v2 = vmax.f32 %v811_v60, 0.0  ;;  %v859_v3 = vmax.f32 %v827_v61, 0.0 }
 0x130   : > { %v812_v0 = vadd.f32 %v1741_v59, %v773_v62  ;;  %v828_v1 = vadd.f32 %v1741_v59, %v789_v63 }
 0x132   : > { %v844_v4 = vmax.f32 %v812_v0, 0.0  ;;  %v860_v5 = vmax.f32 %v828_v1, 0.0 }
 0x134   : > { %v1303_v6 = vpack.c.bf16 %v844_v4, %v843_v2  ;;  %v1343_v7 = vpack.c.bf16 %v860_v5, %v859_v3 }
 0x136   : > { %1351 = vst [vmem:[%s1753_s15 + $0x38] sm:$0xff] %v1303_v6   ;;  %1359 = vst [vmem:[%s1753_s15 + $0x78] sm:$0xff] %v1343_v7  }
 0x137 PF: > { %s14_s17 = sadd.s32 1, %s1598_s17   ;;  %s1841_s15 = smov %s1594_s16 }
 0x138   : > { %p11_p5 = scmp.ge.s32.totalorder %s14_s17, 4   ;;  %s1842_s16 = smov %s1844_s18 }
 0x13a   :  { %13 = sbr.rel (!%p11_p5) target bundleno = 2 (0x2), region = 75 }

// kernel: resnet_forward.46
= control target key start
LH: loop header
LB: loop body
LE: loop exit
PB: predicated region body
PF: predicated region fallthrough
CT: control target
= control target key end

     0   :  { %s687_s1 = inlined_call_operand.vmem [shape: bf16[128,128], index: 1, kind: input, shape index: {}]   ;;  %s688_s0 = inlined_call_operand.vmem [shape: bf16[128,128], index: 0, kind: input, shape index: {}]   ;;  %s689_s2 = inlined_call_operand.vmem [shape: f32[1,128], index: 2, kind: input, shape index: {}]   ;;  %s690_s3 = inlined_call_operand.vmem [shape: f32[1,128], index: 3, kind: input, shape index: {}]   ;;  %s691_s4 = inlined_call_operand.vmem [shape: bf16[128,128], index: 4, kind: output, shape index: {}]  }
   0x1   :  { %v550_v0 = vld [vmem:[%s687_s1 + $0x38] sm:$0xff]   ;;  %v551_v1 = vld [vmem:[%s687_s1 + $0x30] sm:$0xff]   ;;  %v552_v2 = vld [vmem:[%s687_s1 + $0x28] sm:$0xff]  }
   0x2   :  { %502 = vmatprep.subr.bf16.mxu0 %v550_v0  ;;  %534 = vmatprep.subr.bf16.mxu1 %v550_v0  ;;  %v553_v3 = vld [vmem:[%s687_s1 + $0x20] sm:$0xff]   ;;  %v554_v6 = vld [vmem:[%s687_s1 + $0x18] sm:$0xff]   ;;  %v555_v7 = vld [vmem:[%s687_s1 + $0x10] sm:$0xff]  }
   0x3   :  { %503 = vmatpush3.bf16.msra.mxu0 %v550_v0  ;;  %542 = vmatpush3.bf16.msra.mxu1 %v550_v0  ;;  %v558_v4 = vld [vmem:[%s688_s0] sm:$0xff]   ;;  %v556_v8 = vld [vmem:[%s687_s1 + $0x8] sm:$0xff]   ;;  %v562_v12 = vld [vmem:[%s688_s0 + $0x10] sm:$0xff]  }
   0x4   :  { %504 = vmatprep.subr.bf16.mxu0 %v551_v1  ;;  %535 = vmatprep.subr.bf16.mxu1 %v551_v1  ;;  %v559_v5 = vld [vmem:[%s688_s0 + $0x20] sm:$0xff]   ;;  %v560_v10 = vld [vmem:[%s688_s0 + $0x8] sm:$0xff]   ;;  %v563_v13 = vld [vmem:[%s688_s0 + $0x30] sm:$0xff]  }
   0x5   :  { %518 = vmatprep.mubr.bf16.mxu0 %v558_v4  ;;  %526 = vmatprep.mubr.bf16.mxu1 %v559_v5  ;;  %v557_v9 = vld [vmem:[%s687_s1] sm:$0xff]   ;;  %v561_v11 = vld [vmem:[%s688_s0 + $0x28] sm:$0xff]   ;;  %v564_v14 = vld [vmem:[%s688_s0 + $0x18] sm:$0xff]  }
   0x6   :  { %v565_v15 = vld [vmem:[%s688_s0 + $0x38] sm:$0xff]   ;;  %v642_v16 = vld [vmem:[%s689_s2] ss:$0 sm:$0xff] }
   0x7   :  { %505 = vmatpush3.bf16.msra.mxu0 %v551_v1  ;;  %543 = vmatpush3.bf16.msra.mxu1 %v551_v1  ;;  %v406_v21 = vld [vmem:[%s690_s3] ss:$0 sm:$0xff] }
   0x8   :  { %506 = vmatprep.subr.bf16.mxu0 %v552_v2  ;;  %536 = vmatprep.subr.bf16.mxu1 %v552_v2 }
   0xb   :  { %507 = vmatpush3.bf16.msra.mxu0 %v552_v2  ;;  %544 = vmatpush3.bf16.msra.mxu1 %v552_v2 }
   0xc   :  { %508 = vmatprep.subr.bf16.mxu0 %v553_v3  ;;  %537 = vmatprep.subr.bf16.mxu1 %v553_v3 }
   0xf   :  { %509 = vmatpush3.bf16.msra.mxu0 %v553_v3  ;;  %545 = vmatpush3.bf16.msra.mxu1 %v553_v3 }
  0x10   :  { %510 = vmatprep.subr.bf16.mxu0 %v554_v6  ;;  %538 = vmatprep.subr.bf16.mxu1 %v554_v6 }
  0x13   :  { %511 = vmatpush3.bf16.msra.mxu0 %v554_v6  ;;  %546 = vmatpush3.bf16.msra.mxu1 %v554_v6 }
  0x14   :  { %512 = vmatprep.subr.bf16.mxu0 %v555_v7  ;;  %539 = vmatprep.subr.bf16.mxu1 %v555_v7 }
  0x17   :  { %513 = vmatpush3.bf16.msra.mxu0 %v555_v7  ;;  %547 = vmatpush3.bf16.msra.mxu1 %v555_v7 }
  0x18   :  { %514 = vmatprep.subr.bf16.mxu0 %v556_v8  ;;  %540 = vmatprep.subr.bf16.mxu1 %v556_v8 }
  0x1b   :  { %515 = vmatpush3.bf16.msra.mxu0 %v556_v8  ;;  %548 = vmatpush3.bf16.msra.mxu1 %v556_v8 }
  0x1c   :  { %516 = vmatprep.subr.bf16.mxu0 %v557_v9  ;;  %541 = vmatprep.subr.bf16.mxu1 %v557_v9 }
  0x1f   :  { %517 = vmatpush3.bf16.msra.mxu0 %v557_v9  ;;  %549 = vmatpush3.bf16.msra.mxu1 %v557_v9 }
  0x22   :  { %519 = vmatmul.mubr.bf16.vlgmr.msra.gmra.mxu0 %v560_v10  ;;  %527 = vmatmul.mubr.bf16.vlgmr.msra.gmra.mxu1 %v561_v11 }
  0x23   :  { %522 = vmatprep.mubr.bf16.mxu0 %v562_v12  ;;  %530 = vmatprep.mubr.bf16.mxu1 %v563_v13 }
  0x2a   :  { %523 = vmatmul.mubr.bf16.gmra.mxu0 %v564_v14  ;;  %531 = vmatmul.mubr.bf16.gmra.mxu1 %v565_v15 }
  0xe2   :  { %v520_v17 = vpop.f32.mrf.mxu0  ;;  %v528_v18 = vpop.f32.mrf.mxu1 }
  0xe3   :  { %v252_v19 = vmul.f32 %v520_v17, %v642_v16  ;;  %v260_v20 = vmul.f32 %v528_v18, %v642_v16 }
  0xe4   :  { %v180_v22 = vpop.f32.mrf.mxu0  ;;  %v212_v23 = vpop.f32.mrf.mxu1 }
  0xe5   :  { %v250_v24 = vmul.f32 %v642_v16, %v180_v22  ;;  %v258_v25 = vmul.f32 %v642_v16, %v212_v23  ;;  %v275_v28 = vadd.f32 %v406_v21, %v252_v19  ;;  %v283_v29 = vadd.f32 %v406_v21, %v260_v20 }
  0xe6   :  { %v521_v26 = vpop.f32.mrf.mxu0  ;;  %v529_v27 = vpop.f32.mrf.mxu1 }
  0xe7   :  { %v253_v30 = vmul.f32 %v521_v26, %v642_v16  ;;  %v261_v31 = vmul.f32 %v529_v27, %v642_v16  ;;  %v273_v34 = vadd.f32 %v406_v21, %v250_v24  ;;  %v281_v35 = vadd.f32 %v406_v21, %v258_v25 }
  0xe8   :  { %v183_v32 = vpop.f32.mrf.mxu0  ;;  %v215_v33 = vpop.f32.mrf.mxu1  ;;  %v291_v42 = vmax.f32 %v275_v28, 0.0  ;;  %v299_v43 = vmax.f32 %v283_v29, 0.0 }
  0xe9   :  { %v251_v36 = vmul.f32 %v642_v16, %v183_v32  ;;  %v259_v37 = vmul.f32 %v642_v16, %v215_v33  ;;  %v276_v38 = vadd.f32 %v406_v21, %v253_v30  ;;  %v284_v39 = vadd.f32 %v406_v21, %v261_v31 }
  0xea   :  { %v524_v40 = vpop.f32.mrf.mxu0  ;;  %v532_v41 = vpop.f32.mrf.mxu1  ;;  %v289_v52 = vmax.f32 %v273_v34, 0.0  ;;  %v297_v53 = vmax.f32 %v281_v35, 0.0 }
  0xeb   :  { %v274_v44 = vadd.f32 %v406_v21, %v251_v36  ;;  %v282_v45 = vadd.f32 %v406_v21, %v259_v37  ;;  %v292_v46 = vmax.f32 %v276_v38, 0.0  ;;  %v300_v47 = vmax.f32 %v284_v39, 0.0 }
  0xec   :  { %v256_v48 = vmul.f32 %v524_v40, %v642_v16  ;;  %v264_v49 = vmul.f32 %v532_v41, %v642_v16  ;;  %v196_v50 = vpop.f32.mrf.mxu0  ;;  %v228_v51 = vpop.f32.mrf.mxu1 }
  0xed   :  { %v290_v54 = vmax.f32 %v274_v44, 0.0  ;;  %v298_v55 = vmax.f32 %v282_v45, 0.0  ;;  %v447_v56 = vpack.c.bf16 %v292_v46, %v291_v42  ;;  %v467_v57 = vpack.c.bf16 %v300_v47, %v299_v43 }
  0xee   :  { %v254_v58 = vmul.f32 %v642_v16, %v196_v50  ;;  %v262_v59 = vmul.f32 %v642_v16, %v228_v51  ;;  %v525_v60 = vpop.f32.mrf.mxu0  ;;  %v533_v61 = vpop.f32.mrf.mxu1  ;;  %v279_v0 = vadd.f32 %v406_v21, %v256_v48  ;;  %v287_v1 = vadd.f32 %v406_v21, %v264_v49 }
  0xef   :  { %v442_v62 = vpack.c.bf16 %v290_v54, %v289_v52  ;;  %v462_v63 = vpack.c.bf16 %v298_v55, %v297_v53  ;;  %479 = vst [vmem:[%s691_s4 + $0x8] sm:$0xff] %v447_v56   ;;  %483 = vst [vmem:[%s691_s4 + $0x28] sm:$0xff] %v467_v57   ;;  %v257_v2 = vmul.f32 %v525_v60, %v642_v16 }
  0xf0   :  { %v265_v3 = vmul.f32 %v533_v61, %v642_v16  ;;  %v199_v4 = vpop.f32.mrf.mxu0  ;;  %v231_v5 = vpop.f32.mrf.mxu1  ;;  %v277_v6 = vadd.f32 %v406_v21, %v254_v58  ;;  %v285_v7 = vadd.f32 %v406_v21, %v262_v59  ;;  %v295_v14 = vmax.f32 %v279_v0, 0.0 }
  0xf1   :  { %443 = vst [vmem:[%s691_s4] sm:$0xff] %v442_v62   ;;  %482 = vst [vmem:[%s691_s4 + $0x20] sm:$0xff] %v462_v63   ;;  %v255_v8 = vmul.f32 %v642_v16, %v199_v4  ;;  %v263_v9 = vmul.f32 %v642_v16, %v231_v5  ;;  %v280_v10 = vadd.f32 %v406_v21, %v257_v2  ;;  %v303_v15 = vmax.f32 %v287_v1, 0.0 }
  0xf2   :  { %v288_v11 = vadd.f32 %v406_v21, %v265_v3  ;;  %v293_v19 = vmax.f32 %v277_v6, 0.0  ;;  %v301_v20 = vmax.f32 %v285_v7, 0.0 }
  0xf3   :  { %v278_v12 = vadd.f32 %v406_v21, %v255_v8  ;;  %v286_v13 = vadd.f32 %v406_v21, %v263_v9  ;;  %v296_v17 = vmax.f32 %v280_v10, 0.0 }
  0xf4   :  { %v304_v18 = vmax.f32 %v288_v11, 0.0 }
  0xf5   :  { %v294_v22 = vmax.f32 %v278_v12, 0.0  ;;  %v302_v23 = vmax.f32 %v286_v13, 0.0  ;;  %v457_v24 = vpack.c.bf16 %v296_v17, %v295_v14 }
  0xf6   :  { %v477_v25 = vpack.c.bf16 %v304_v18, %v303_v15 }
  0xf7   :  { %v452_v26 = vpack.c.bf16 %v294_v22, %v293_v19  ;;  %v472_v27 = vpack.c.bf16 %v302_v23, %v301_v20  ;;  %481 = vst [vmem:[%s691_s4 + $0x18] sm:$0xff] %v457_v24  }
  0xf8   :  { %485 = vst [vmem:[%s691_s4 + $0x38] sm:$0xff] %v477_v25  }
  0xf9   :  { %480 = vst [vmem:[%s691_s4 + $0x10] sm:$0xff] %v452_v26   ;;  %484 = vst [vmem:[%s691_s4 + $0x30] sm:$0xff] %v472_v27  }

// kernel: resnet_forward.45
= control target key start
LH: loop header
LB: loop body
LE: loop exit
PB: predicated region body
PF: predicated region fallthrough
CT: control target
= control target key end

     0   :  { %vm153_vm0 = vcmask 1043456   ;;  %s1400_s0 = inlined_call_operand.vmem [shape: bf16[9,128,128], index: 0, kind: input, shape index: {}]   ;;  %s1401_s1 = inlined_call_operand.vmem [shape: bf16[128,128], index: 1, kind: output, shape index: {}]  }
   0x1   :  { %v9_v0 = vld [vmem:[%s1400_s0] sm:$0xf]  ;;  %v10_v3 = vld [vmem:[%s1400_s0 + $0x4] sm:$0xf]  ;;  %v11_v39 = vld [vmem:[%s1400_s0 + $0x8] sm:$0xf] }
   0x2   :  { %v25_v1 = vld [vmem:[%s1400_s0 + $0x40] sm:$0xf]  ;;  %v26_v4 = vld [vmem:[%s1400_s0 + $0x44] sm:$0xf]  ;;  %v156_v7 = vsel %vm153_vm0, %v9_v0, 4286644096 }
   0x3   :  { %v41_v2 = vld [vmem:[%s1400_s0 + $0x80] sm:$0xf]  ;;  %v42_v5 = vld [vmem:[%s1400_s0 + $0x84] sm:$0xf]  ;;  %v159_v8 = vsel %vm153_vm0, %v25_v1, 4286644096 }
   0x4   :  { %v57_v6 = vld [vmem:[%s1400_s0 + $0xc0] sm:$0xf]  ;;  %v163_v9 = vsel %vm153_vm0, %v41_v2, 4286644096  ;;  %v161_v11 = vmax.bf16 %v159_v8, %v156_v7  ;;  %v58_v12 = vld [vmem:[%s1400_s0 + $0xc4] sm:$0xf] }
   0x5   :  { %v73_v10 = vld [vmem:[%s1400_s0 + $0x100] sm:$0xf]  ;;  %v167_v14 = vsel %vm153_vm0, %v57_v6, 4286644096  ;;  %v191_v16 = vsel %vm153_vm0, %v10_v3, 4286644096 }
   0x6   :  { %v89_v13 = vld [vmem:[%s1400_s0 + $0x140] sm:$0xf]  ;;  %v165_v15 = vmax.bf16 %v163_v9, %v161_v11  ;;  %v194_v17 = vsel %vm153_vm0, %v26_v4, 4286644096  ;;  %v198_v18 = vsel %vm153_vm0, %v42_v5, 4286644096 }
   0x7   :  { %v74_v19 = vld [vmem:[%s1400_s0 + $0x104] sm:$0xf]  ;;  %v171_v20 = vsel %vm153_vm0, %v73_v10, 4286644096  ;;  %v196_v21 = vmax.bf16 %v194_v17, %v191_v16  ;;  %v105_v23 = vld [vmem:[%s1400_s0 + $0x180] sm:$0xf] }
   0x8   :  { %v90_v22 = vld [vmem:[%s1400_s0 + $0x144] sm:$0xf]  ;;  %v169_v24 = vmax.bf16 %v167_v14, %v165_v15  ;;  %v202_v25 = vsel %vm153_vm0, %v58_v12, 4286644096  ;;  %v175_v27 = vsel %vm153_vm0, %v89_v13, 4286644096 }
   0x9   :  { %v106_v26 = vld [vmem:[%s1400_s0 + $0x184] sm:$0xf]  ;;  %v200_v28 = vmax.bf16 %v198_v18, %v196_v21  ;;  %v121_v29 = vld [vmem:[%s1400_s0 + $0x1c0] sm:$0xf]  ;;  %v206_v32 = vsel %vm153_vm0, %v74_v19, 4286644096 }
   0xa   :  { %v137_v30 = vld [vmem:[%s1400_s0 + $0x200] sm:$0xf]  ;;  %v173_v31 = vmax.bf16 %v171_v20, %v169_v24  ;;  %v122_v33 = vld [vmem:[%s1400_s0 + $0x1c4] sm:$0xf]  ;;  %v179_v34 = vsel %vm153_vm0, %v105_v23, 4286644096 }
   0xb   :  { %v204_v35 = vmax.bf16 %v202_v25, %v200_v28  ;;  %v210_v36 = vsel %vm153_vm0, %v90_v22, 4286644096  ;;  %v138_v37 = vld [vmem:[%s1400_s0 + $0x204] sm:$0xf]  ;;  %v27_v40 = vld [vmem:[%s1400_s0 + $0x48] sm:$0xf] }
   0xc   :  { %v177_v38 = vmax.bf16 %v175_v27, %v173_v31  ;;  %v43_v41 = vld [vmem:[%s1400_s0 + $0x88] sm:$0xf]  ;;  %v183_v42 = vsel %vm153_vm0, %v121_v29, 4286644096  ;;  %v187_v43 = vsel %vm153_vm0, %v137_v30, 4286644096 }
   0xd   :  { %v208_v44 = vmax.bf16 %v206_v32, %v204_v35  ;;  %v214_v45 = vsel %vm153_vm0, %v106_v26, 4286644096  ;;  %v12_v47 = vld [vmem:[%s1400_s0 + $0xc] sm:$0xf]  ;;  %v59_v48 = vld [vmem:[%s1400_s0 + $0xc8] sm:$0xf] }
   0xe   :  { %v181_v46 = vmax.bf16 %v179_v34, %v177_v38  ;;  %v75_v49 = vld [vmem:[%s1400_s0 + $0x108] sm:$0xf]  ;;  %v226_v51 = vsel %vm153_vm0, %v11_v39, 4286644096  ;;  %v229_v52 = vsel %vm153_vm0, %v27_v40, 4286644096 }
   0xf   :  { %v212_v50 = vmax.bf16 %v210_v36, %v208_v44  ;;  %v233_v53 = vsel %vm153_vm0, %v43_v41, 4286644096  ;;  %v218_v55 = vsel %vm153_vm0, %v122_v33, 4286644096  ;;  %v28_v56 = vld [vmem:[%s1400_s0 + $0x4c] sm:$0xf]  ;;  %v231_v58 = vmax.bf16 %v229_v52, %v226_v51 }
  0x10   :  { %v185_v54 = vmax.bf16 %v183_v42, %v181_v46  ;;  %v44_v57 = vld [vmem:[%s1400_s0 + $0x8c] sm:$0xf]  ;;  %v222_v60 = vsel %vm153_vm0, %v138_v37, 4286644096  ;;  %v237_v62 = vsel %vm153_vm0, %v59_v48, 4286644096 }
  0x11   :  { %v216_v59 = vmax.bf16 %v214_v45, %v212_v50  ;;  %v60_v61 = vld [vmem:[%s1400_s0 + $0xcc] sm:$0xf]  ;;  %v91_v63 = vld [vmem:[%s1400_s0 + $0x148] sm:$0xf]  ;;  %v235_v0 = vmax.bf16 %v233_v53, %v231_v58  ;;  %v241_v1 = vsel %vm153_vm0, %v75_v49, 4286644096 }
  0x12   :  { %v261_v2 = vsel %vm153_vm0, %v12_v47, 4286644096  ;;  %v189_v3 = vmax.bf16 %v187_v43, %v185_v54  ;;  %v264_v5 = vsel %vm153_vm0, %v28_v56, 4286644096  ;;  %v268_v6 = vsel %vm153_vm0, %v44_v57, 4286644096 }
  0x13   :  { %v220_v4 = vmax.bf16 %v218_v55, %v216_v59  ;;  %v76_v7 = vld [vmem:[%s1400_s0 + $0x10c] sm:$0xf]  ;;  %v107_v8 = vld [vmem:[%s1400_s0 + $0x188] sm:$0xf]  ;;  %v239_v9 = vmax.bf16 %v237_v62, %v235_v0  ;;  %v266_v10 = vmax.bf16 %v264_v5, %v261_v2  ;;  %v245_v12 = vsel %vm153_vm0, %v91_v63, 4286644096 }
  0x14   :  { %v272_v13 = vsel %vm153_vm0, %v60_v61, 4286644096  ;;  %v92_v14 = vld [vmem:[%s1400_s0 + $0x14c] sm:$0xf]  ;;  %v123_v16 = vld [vmem:[%s1400_s0 + $0x1c8] sm:$0xf] }
  0x15   :  { %v224_v11 = vmax.bf16 %v222_v60, %v220_v4  ;;  %v108_v15 = vld [vmem:[%s1400_s0 + $0x18c] sm:$0xf]  ;;  %v243_v17 = vmax.bf16 %v241_v1, %v239_v9  ;;  %v270_v18 = vmax.bf16 %v268_v6, %v266_v10  ;;  %v139_v20 = vld [vmem:[%s1400_s0 + $0x208] sm:$0xf]  ;;  %v249_v21 = vsel %vm153_vm0, %v107_v8, 4286644096 }
  0x16   :  { %v276_v22 = vsel %vm153_vm0, %v76_v7, 4286644096  ;;  %v124_v23 = vld [vmem:[%s1400_s0 + $0x1cc] sm:$0xf]  ;;  %v13_v26 = vld [vmem:[%s1400_s0 + $0x10] sm:$0xf] }
  0x17   :  { %v775_v19 = vcombine.low %v189_v3, %v224_v11  ;;  %v247_v24 = vmax.bf16 %v245_v12, %v243_v17  ;;  %v274_v25 = vmax.bf16 %v272_v13, %v270_v18  ;;  %v29_v27 = vld [vmem:[%s1400_s0 + $0x50] sm:$0xf]  ;;  %v140_v29 = vld [vmem:[%s1400_s0 + $0x20c] sm:$0xf]  ;;  %v253_v30 = vsel %vm153_vm0, %v123_v16, 4286644096 }
  0x18   :  { %v45_v28 = vld [vmem:[%s1400_s0 + $0x90] sm:$0xf]  ;;  %v280_v31 = vsel %vm153_vm0, %v92_v14, 4286644096  ;;  %v257_v33 = vsel %vm153_vm0, %v139_v20, 4286644096 }
  0x19   :  { %739 = vst [vmem:[%s1401_s1] sm:$0xff] %v775_v19   ;;  %v251_v32 = vmax.bf16 %v249_v21, %v247_v24  ;;  %v278_v34 = vmax.bf16 %v276_v22, %v274_v25  ;;  %v284_v35 = vsel %vm153_vm0, %v108_v15, 4286644096  ;;  %v61_v36 = vld [vmem:[%s1400_s0 + $0xd0] sm:$0xf]  ;;  %v296_v37 = vsel %vm153_vm0, %v13_v26, 4286644096 }
  0x1a   :  { %v299_v38 = vsel %vm153_vm0, %v29_v27, 4286644096  ;;  %v303_v39 = vsel %vm153_vm0, %v45_v28, 4286644096  ;;  %v14_v42 = vld [vmem:[%s1400_s0 + $0x14] sm:$0xf] }
  0x1b   :  { %v255_v40 = vmax.bf16 %v253_v30, %v251_v32  ;;  %v282_v41 = vmax.bf16 %v280_v31, %v278_v34  ;;  %v30_v43 = vld [vmem:[%s1400_s0 + $0x54] sm:$0xf]  ;;  %v77_v44 = vld [vmem:[%s1400_s0 + $0x110] sm:$0xf]  ;;  %v301_v45 = vmax.bf16 %v299_v38, %v296_v37  ;;  %v288_v46 = vsel %vm153_vm0, %v124_v23, 4286644096 }
  0x1c   :  { %v46_v47 = vld [vmem:[%s1400_s0 + $0x94] sm:$0xf]  ;;  %v307_v48 = vsel %vm153_vm0, %v61_v36, 4286644096  ;;  %v292_v50 = vsel %vm153_vm0, %v140_v29, 4286644096 }
  0x1d   :  { %v286_v49 = vmax.bf16 %v284_v35, %v282_v41  ;;  %v62_v51 = vld [vmem:[%s1400_s0 + $0xd4] sm:$0xf]  ;;  %v93_v52 = vld [vmem:[%s1400_s0 + $0x150] sm:$0xf]  ;;  %v305_v53 = vmax.bf16 %v303_v39, %v301_v45  ;;  %v259_v54 = vmax.bf16 %v257_v33, %v255_v40  ;;  %v311_v55 = vsel %vm153_vm0, %v77_v44, 4286644096 }
  0x1e   :  { %v331_v56 = vsel %vm153_vm0, %v14_v42, 4286644096  ;;  %v334_v57 = vsel %vm153_vm0, %v30_v43, 4286644096  ;;  %v78_v59 = vld [vmem:[%s1400_s0 + $0x114] sm:$0xf] }
  0x1f   :  { %v290_v58 = vmax.bf16 %v288_v46, %v286_v49  ;;  %v109_v60 = vld [vmem:[%s1400_s0 + $0x190] sm:$0xf]  ;;  %v309_v61 = vmax.bf16 %v307_v48, %v305_v53  ;;  %v336_v62 = vmax.bf16 %v334_v57, %v331_v56  ;;  %v338_v63 = vsel %vm153_vm0, %v46_v47, 4286644096  ;;  %v94_v3 = vld [vmem:[%s1400_s0 + $0x154] sm:$0xf] }
  0x20   :  { %v315_v0 = vsel %vm153_vm0, %v93_v52, 4286644096  ;;  %v342_v1 = vsel %vm153_vm0, %v62_v51, 4286644096  ;;  %v110_v4 = vld [vmem:[%s1400_s0 + $0x194] sm:$0xf] }
  0x21   :  { %v294_v2 = vmax.bf16 %v292_v50, %v290_v58  ;;  %v125_v5 = vld [vmem:[%s1400_s0 + $0x1d0] sm:$0xf]  ;;  %v313_v6 = vmax.bf16 %v311_v55, %v309_v61  ;;  %v340_v7 = vmax.bf16 %v338_v63, %v336_v62  ;;  %v319_v9 = vsel %vm153_vm0, %v109_v60, 4286644096  ;;  %v126_v12 = vld [vmem:[%s1400_s0 + $0x1d4] sm:$0xf] }
  0x22   :  { %v141_v8 = vld [vmem:[%s1400_s0 + $0x210] sm:$0xf]  ;;  %v346_v10 = vsel %vm153_vm0, %v78_v59, 4286644096  ;;  %v15_v15 = vld [vmem:[%s1400_s0 + $0x18] sm:$0xf] }
  0x23   :  { %v776_v11 = vcombine.low %v259_v54, %v294_v2  ;;  %v317_v13 = vmax.bf16 %v315_v0, %v313_v6  ;;  %v344_v14 = vmax.bf16 %v342_v1, %v340_v7  ;;  %v31_v16 = vld [vmem:[%s1400_s0 + $0x58] sm:$0xf]  ;;  %v142_v18 = vld [vmem:[%s1400_s0 + $0x214] sm:$0xf]  ;;  %v323_v19 = vsel %vm153_vm0, %v125_v5, 4286644096 }
  0x24   :  { %v47_v17 = vld [vmem:[%s1400_s0 + $0x98] sm:$0xf]  ;;  %v350_v20 = vsel %vm153_vm0, %v94_v3, 4286644096  ;;  %v354_v23 = vsel %vm153_vm0, %v110_v4, 4286644096 }
  0x25   :  { %777 = vst [vmem:[%s1401_s1 + $0x8] sm:$0xff] %v776_v11   ;;  %v321_v21 = vmax.bf16 %v319_v9, %v317_v13  ;;  %v348_v22 = vmax.bf16 %v346_v10, %v344_v14  ;;  %v16_v24 = vld [vmem:[%s1400_s0 + $0x1c] sm:$0xf]  ;;  %v63_v25 = vld [vmem:[%s1400_s0 + $0xd8] sm:$0xf] }
  0x26   :  { %v366_v26 = vsel %vm153_vm0, %v15_v15, 4286644096  ;;  %v369_v27 = vsel %vm153_vm0, %v31_v16, 4286644096  ;;  %v373_v28 = vsel %vm153_vm0, %v47_v17, 4286644096 }
  0x27   :  { %v325_v29 = vmax.bf16 %v323_v19, %v321_v21  ;;  %v327_v30 = vsel %vm153_vm0, %v141_v8, 4286644096  ;;  %v352_v31 = vmax.bf16 %v350_v20, %v348_v22  ;;  %v32_v32 = vld [vmem:[%s1400_s0 + $0x5c] sm:$0xf]  ;;  %v79_v33 = vld [vmem:[%s1400_s0 + $0x118] sm:$0xf]  ;;  %v371_v34 = vmax.bf16 %v369_v27, %v366_v26 }
  0x28   :  { %v358_v35 = vsel %vm153_vm0, %v126_v12, 4286644096  ;;  %v48_v36 = vld [vmem:[%s1400_s0 + $0x9c] sm:$0xf]  ;;  %v377_v37 = vsel %vm153_vm0, %v63_v25, 4286644096 }
  0x29   :  { %v356_v38 = vmax.bf16 %v354_v23, %v352_v31  ;;  %v362_v39 = vsel %vm153_vm0, %v142_v18, 4286644096  ;;  %v64_v40 = vld [vmem:[%s1400_s0 + $0xdc] sm:$0xf]  ;;  %v95_v41 = vld [vmem:[%s1400_s0 + $0x158] sm:$0xf]  ;;  %v375_v42 = vmax.bf16 %v373_v28, %v371_v34  ;;  %v329_v43 = vmax.bf16 %v327_v30, %v325_v29 }
  0x2a   :  { %v381_v44 = vsel %vm153_vm0, %v79_v33, 4286644096  ;;  %v401_v45 = vsel %vm153_vm0, %v16_v24, 4286644096  ;;  %v404_v46 = vsel %vm153_vm0, %v32_v32, 4286644096 }
  0x2b   :  { %v360_v47 = vmax.bf16 %v358_v35, %v356_v38  ;;  %v80_v48 = vld [vmem:[%s1400_s0 + $0x11c] sm:$0xf]  ;;  %v111_v49 = vld [vmem:[%s1400_s0 + $0x198] sm:$0xf]  ;;  %v379_v50 = vmax.bf16 %v377_v37, %v375_v42  ;;  %v406_v51 = vmax.bf16 %v404_v46, %v401_v45  ;;  %v408_v52 = vsel %vm153_vm0, %v48_v36, 4286644096 }
  0x2c   :  { %v385_v53 = vsel %vm153_vm0, %v95_v41, 4286644096  ;;  %v412_v54 = vsel %vm153_vm0, %v64_v40, 4286644096  ;;  %v96_v56 = vld [vmem:[%s1400_s0 + $0x15c] sm:$0xf] }
  0x2d   :  { %v364_v55 = vmax.bf16 %v362_v39, %v360_v47  ;;  %v112_v57 = vld [vmem:[%s1400_s0 + $0x19c] sm:$0xf]  ;;  %v127_v58 = vld [vmem:[%s1400_s0 + $0x1d8] sm:$0xf]  ;;  %v383_v59 = vmax.bf16 %v381_v44, %v379_v50  ;;  %v410_v60 = vmax.bf16 %v408_v52, %v406_v51  ;;  %v389_v62 = vsel %vm153_vm0, %v111_v49, 4286644096 }
  0x2e   :  { %v143_v61 = vld [vmem:[%s1400_s0 + $0x218] sm:$0xf]  ;;  %v416_v63 = vsel %vm153_vm0, %v80_v48, 4286644096  ;;  %v128_v1 = vld [vmem:[%s1400_s0 + $0x1dc] sm:$0xf] }
  0x2f   :  { %v778_v0 = vcombine.low %v329_v43, %v364_v55  ;;  %v387_v2 = vmax.bf16 %v385_v53, %v383_v59  ;;  %v414_v3 = vmax.bf16 %v412_v54, %v410_v60  ;;  %v17_v4 = vld [vmem:[%s1400_s0 + $0x20] sm:$0xf]  ;;  %v144_v7 = vld [vmem:[%s1400_s0 + $0x21c] sm:$0xf]  ;;  %v393_v8 = vsel %vm153_vm0, %v127_v58, 4286644096 }
  0x30   :  { %v33_v5 = vld [vmem:[%s1400_s0 + $0x60] sm:$0xf]  ;;  %v420_v9 = vsel %vm153_vm0, %v96_v56, 4286644096  ;;  %v424_v12 = vsel %vm153_vm0, %v112_v57, 4286644096 }
  0x31   :  { %v49_v6 = vld [vmem:[%s1400_s0 + $0xa0] sm:$0xf]  ;;  %779 = vst [vmem:[%s1401_s1 + $0x10] sm:$0xff] %v778_v0   ;;  %v391_v10 = vmax.bf16 %v389_v62, %v387_v2  ;;  %v418_v11 = vmax.bf16 %v416_v63, %v414_v3  ;;  %v18_v13 = vld [vmem:[%s1400_s0 + $0x24] sm:$0xf] }
  0x32   :  { %v65_v14 = vld [vmem:[%s1400_s0 + $0xe0] sm:$0xf]  ;;  %v436_v15 = vsel %vm153_vm0, %v17_v4, 4286644096  ;;  %v439_v16 = vsel %vm153_vm0, %v33_v5, 4286644096 }
  0x33   :  { %v443_v17 = vsel %vm153_vm0, %v49_v6, 4286644096  ;;  %v395_v18 = vmax.bf16 %v393_v8, %v391_v10  ;;  %v397_v19 = vsel %vm153_vm0, %v143_v61, 4286644096  ;;  %v422_v20 = vmax.bf16 %v420_v9, %v418_v11  ;;  %v34_v21 = vld [vmem:[%s1400_s0 + $0x64] sm:$0xf] }
  0x34   :  { %v81_v22 = vld [vmem:[%s1400_s0 + $0x120] sm:$0xf]  ;;  %v441_v23 = vmax.bf16 %v439_v16, %v436_v15  ;;  %v428_v24 = vsel %vm153_vm0, %v128_v1, 4286644096  ;;  %v50_v25 = vld [vmem:[%s1400_s0 + $0xa4] sm:$0xf] }
  0x35   :  { %v447_v26 = vsel %vm153_vm0, %v65_v14, 4286644096  ;;  %v426_v27 = vmax.bf16 %v424_v12, %v422_v20  ;;  %v432_v28 = vsel %vm153_vm0, %v144_v7, 4286644096  ;;  %v66_v29 = vld [vmem:[%s1400_s0 + $0xe4] sm:$0xf]  ;;  %v399_v32 = vmax.bf16 %v397_v19, %v395_v18 }
  0x36   :  { %v97_v30 = vld [vmem:[%s1400_s0 + $0x160] sm:$0xf]  ;;  %v445_v31 = vmax.bf16 %v443_v17, %v441_v23  ;;  %v451_v33 = vsel %vm153_vm0, %v81_v22, 4286644096  ;;  %v471_v34 = vsel %vm153_vm0, %v18_v13, 4286644096 }
  0x37   :  { %v474_v35 = vsel %vm153_vm0, %v34_v21, 4286644096  ;;  %v430_v36 = vmax.bf16 %v428_v24, %v426_v27  ;;  %v82_v37 = vld [vmem:[%s1400_s0 + $0x124] sm:$0xf]  ;;  %v113_v38 = vld [vmem:[%s1400_s0 + $0x1a0] sm:$0xf] }
  0x38   :  { %v449_v39 = vmax.bf16 %v447_v26, %v445_v31  ;;  %v476_v40 = vmax.bf16 %v474_v35, %v471_v34  ;;  %v478_v41 = vsel %vm153_vm0, %v50_v25, 4286644096  ;;  %v455_v42 = vsel %vm153_vm0, %v97_v30, 4286644096  ;;  %v98_v45 = vld [vmem:[%s1400_s0 + $0x164] sm:$0xf] }
  0x39   :  { %v482_v43 = vsel %vm153_vm0, %v66_v29, 4286644096  ;;  %v434_v44 = vmax.bf16 %v432_v28, %v430_v36  ;;  %v114_v46 = vld [vmem:[%s1400_s0 + $0x1a4] sm:$0xf]  ;;  %v129_v47 = vld [vmem:[%s1400_s0 + $0x1e0] sm:$0xf] }
  0x3a   :  { %v453_v48 = vmax.bf16 %v451_v33, %v449_v39  ;;  %v480_v49 = vmax.bf16 %v478_v41, %v476_v40  ;;  %v145_v50 = vld [vmem:[%s1400_s0 + $0x220] sm:$0xf]  ;;  %v459_v51 = vsel %vm153_vm0, %v113_v38, 4286644096  ;;  %v486_v52 = vsel %vm153_vm0, %v82_v37, 4286644096 }
  0x3b   :  { %v780_v53 = vcombine.low %v399_v32, %v434_v44  ;;  %v130_v54 = vld [vmem:[%s1400_s0 + $0x1e4] sm:$0xf]  ;;  %v19_v57 = vld [vmem:[%s1400_s0 + $0x28] sm:$0xf]  ;;  %v463_v61 = vsel %vm153_vm0, %v129_v47, 4286644096 }
  0x3c   :  { %v457_v55 = vmax.bf16 %v455_v42, %v453_v48  ;;  %v484_v56 = vmax.bf16 %v482_v43, %v480_v49  ;;  %v35_v58 = vld [vmem:[%s1400_s0 + $0x68] sm:$0xf]  ;;  %v146_v60 = vld [vmem:[%s1400_s0 + $0x224] sm:$0xf]  ;;  %v490_v62 = vsel %vm153_vm0, %v98_v45, 4286644096 }
  0x3d   :  { %v51_v59 = vld [vmem:[%s1400_s0 + $0xa8] sm:$0xf]  ;;  %781 = vst [vmem:[%s1401_s1 + $0x18] sm:$0xff] %v780_v53   ;;  %v494_v1 = vsel %vm153_vm0, %v114_v46, 4286644096 }
  0x3e   :  { %v461_v63 = vmax.bf16 %v459_v51, %v457_v55  ;;  %v488_v0 = vmax.bf16 %v486_v52, %v484_v56  ;;  %v20_v2 = vld [vmem:[%s1400_s0 + $0x2c] sm:$0xf]  ;;  %v67_v3 = vld [vmem:[%s1400_s0 + $0xe8] sm:$0xf]  ;;  %v506_v4 = vsel %vm153_vm0, %v19_v57, 4286644096 }
  0x3f   :  { %v509_v5 = vsel %vm153_vm0, %v35_v58, 4286644096  ;;  %v513_v6 = vsel %vm153_vm0, %v51_v59, 4286644096  ;;  %v467_v8 = vsel %vm153_vm0, %v145_v50, 4286644096 }
  0x40   :  { %v465_v7 = vmax.bf16 %v463_v61, %v461_v63  ;;  %v492_v9 = vmax.bf16 %v490_v62, %v488_v0  ;;  %v36_v10 = vld [vmem:[%s1400_s0 + $0x6c] sm:$0xf]  ;;  %v83_v11 = vld [vmem:[%s1400_s0 + $0x128] sm:$0xf]  ;;  %v511_v12 = vmax.bf16 %v509_v5, %v506_v4  ;;  %v498_v13 = vsel %vm153_vm0, %v130_v54, 4286644096 }
  0x41   :  { %v52_v14 = vld [vmem:[%s1400_s0 + $0xac] sm:$0xf]  ;;  %v517_v15 = vsel %vm153_vm0, %v67_v3, 4286644096  ;;  %v502_v17 = vsel %vm153_vm0, %v146_v60, 4286644096 }
  0x42   :  { %v496_v16 = vmax.bf16 %v494_v1, %v492_v9  ;;  %v68_v18 = vld [vmem:[%s1400_s0 + $0xec] sm:$0xf]  ;;  %v99_v19 = vld [vmem:[%s1400_s0 + $0x168] sm:$0xf]  ;;  %v515_v20 = vmax.bf16 %v513_v6, %v511_v12  ;;  %v469_v21 = vmax.bf16 %v467_v8, %v465_v7  ;;  %v521_v22 = vsel %vm153_vm0, %v83_v11, 4286644096 }
  0x43   :  { %v541_v23 = vsel %vm153_vm0, %v20_v2, 4286644096  ;;  %v544_v24 = vsel %vm153_vm0, %v36_v10, 4286644096  ;;  %v84_v26 = vld [vmem:[%s1400_s0 + $0x12c] sm:$0xf] }
  0x44   :  { %v500_v25 = vmax.bf16 %v498_v13, %v496_v16  ;;  %v115_v27 = vld [vmem:[%s1400_s0 + $0x1a8] sm:$0xf]  ;;  %v519_v28 = vmax.bf16 %v517_v15, %v515_v20  ;;  %v546_v29 = vmax.bf16 %v544_v24, %v541_v23  ;;  %v548_v30 = vsel %vm153_vm0, %v52_v14, 4286644096  ;;  %v100_v34 = vld [vmem:[%s1400_s0 + $0x16c] sm:$0xf] }
  0x45   :  { %v525_v31 = vsel %vm153_vm0, %v99_v19, 4286644096  ;;  %v552_v32 = vsel %vm153_vm0, %v68_v18, 4286644096  ;;  %v116_v35 = vld [vmem:[%s1400_s0 + $0x1ac] sm:$0xf] }
  0x46   :  { %v504_v33 = vmax.bf16 %v502_v17, %v500_v25  ;;  %v131_v36 = vld [vmem:[%s1400_s0 + $0x1e8] sm:$0xf]  ;;  %v523_v37 = vmax.bf16 %v521_v22, %v519_v28  ;;  %v550_v38 = vmax.bf16 %v548_v30, %v546_v29  ;;  %v529_v40 = vsel %vm153_vm0, %v115_v27, 4286644096  ;;  %v132_v43 = vld [vmem:[%s1400_s0 + $0x1ec] sm:$0xf] }
  0x47   :  { %v147_v39 = vld [vmem:[%s1400_s0 + $0x228] sm:$0xf]  ;;  %v556_v41 = vsel %vm153_vm0, %v84_v26, 4286644096  ;;  %v21_v46 = vld [vmem:[%s1400_s0 + $0x30] sm:$0xf] }
  0x48   :  { %v782_v42 = vcombine.low %v469_v21, %v504_v33  ;;  %v527_v44 = vmax.bf16 %v525_v31, %v523_v37  ;;  %v554_v45 = vmax.bf16 %v552_v32, %v550_v38  ;;  %v37_v47 = vld [vmem:[%s1400_s0 + $0x70] sm:$0xf]  ;;  %v148_v49 = vld [vmem:[%s1400_s0 + $0x22c] sm:$0xf]  ;;  %v533_v50 = vsel %vm153_vm0, %v131_v36, 4286644096 }
  0x49   :  { %v53_v48 = vld [vmem:[%s1400_s0 + $0xb0] sm:$0xf]  ;;  %v560_v51 = vsel %vm153_vm0, %v100_v34, 4286644096  ;;  %v564_v54 = vsel %vm153_vm0, %v116_v35, 4286644096 }
  0x4a   :  { %783 = vst [vmem:[%s1401_s1 + $0x20] sm:$0xff] %v782_v42   ;;  %v531_v52 = vmax.bf16 %v529_v40, %v527_v44  ;;  %v558_v53 = vmax.bf16 %v556_v41, %v554_v45  ;;  %v22_v55 = vld [vmem:[%s1400_s0 + $0x34] sm:$0xf]  ;;  %v69_v56 = vld [vmem:[%s1400_s0 + $0xf0] sm:$0xf] }
  0x4b   :  { %v576_v57 = vsel %vm153_vm0, %v21_v46, 4286644096  ;;  %v579_v58 = vsel %vm153_vm0, %v37_v47, 4286644096  ;;  %v583_v59 = vsel %vm153_vm0, %v53_v48, 4286644096 }
  0x4c   :  { %v535_v60 = vmax.bf16 %v533_v50, %v531_v52  ;;  %v537_v61 = vsel %vm153_vm0, %v147_v39, 4286644096  ;;  %v562_v62 = vmax.bf16 %v560_v51, %v558_v53  ;;  %v38_v63 = vld [vmem:[%s1400_s0 + $0x74] sm:$0xf]  ;;  %v85_v0 = vld [vmem:[%s1400_s0 + $0x130] sm:$0xf]  ;;  %v581_v1 = vmax.bf16 %v579_v58, %v576_v57 }
  0x4d   :  { %v568_v2 = vsel %vm153_vm0, %v132_v43, 4286644096  ;;  %v54_v3 = vld [vmem:[%s1400_s0 + $0xb4] sm:$0xf]  ;;  %v587_v4 = vsel %vm153_vm0, %v69_v56, 4286644096 }
  0x4e   :  { %v566_v5 = vmax.bf16 %v564_v54, %v562_v62  ;;  %v572_v6 = vsel %vm153_vm0, %v148_v49, 4286644096  ;;  %v70_v7 = vld [vmem:[%s1400_s0 + $0xf4] sm:$0xf]  ;;  %v101_v8 = vld [vmem:[%s1400_s0 + $0x170] sm:$0xf]  ;;  %v585_v9 = vmax.bf16 %v583_v59, %v581_v1  ;;  %v539_v10 = vmax.bf16 %v537_v61, %v535_v60 }
  0x4f   :  { %v591_v11 = vsel %vm153_vm0, %v85_v0, 4286644096  ;;  %v611_v12 = vsel %vm153_vm0, %v22_v55, 4286644096  ;;  %v614_v13 = vsel %vm153_vm0, %v38_v63, 4286644096 }
  0x50   :  { %v570_v14 = vmax.bf16 %v568_v2, %v566_v5  ;;  %v86_v15 = vld [vmem:[%s1400_s0 + $0x134] sm:$0xf]  ;;  %v117_v16 = vld [vmem:[%s1400_s0 + $0x1b0] sm:$0xf]  ;;  %v589_v17 = vmax.bf16 %v587_v4, %v585_v9  ;;  %v616_v18 = vmax.bf16 %v614_v13, %v611_v12  ;;  %v618_v19 = vsel %vm153_vm0, %v54_v3, 4286644096 }
  0x51   :  { %v595_v20 = vsel %vm153_vm0, %v101_v8, 4286644096  ;;  %v622_v21 = vsel %vm153_vm0, %v70_v7, 4286644096  ;;  %v102_v23 = vld [vmem:[%s1400_s0 + $0x174] sm:$0xf] }
  0x52   :  { %v574_v22 = vmax.bf16 %v572_v6, %v570_v14  ;;  %v118_v24 = vld [vmem:[%s1400_s0 + $0x1b4] sm:$0xf]  ;;  %v133_v25 = vld [vmem:[%s1400_s0 + $0x1f0] sm:$0xf]  ;;  %v593_v26 = vmax.bf16 %v591_v11, %v589_v17  ;;  %v620_v27 = vmax.bf16 %v618_v19, %v616_v18  ;;  %v599_v29 = vsel %vm153_vm0, %v117_v16, 4286644096 }
  0x53   :  { %v149_v28 = vld [vmem:[%s1400_s0 + $0x230] sm:$0xf]  ;;  %v626_v30 = vsel %vm153_vm0, %v86_v15, 4286644096  ;;  %v134_v32 = vld [vmem:[%s1400_s0 + $0x1f4] sm:$0xf] }
  0x54   :  { %v784_v31 = vcombine.low %v539_v10, %v574_v22  ;;  %v597_v33 = vmax.bf16 %v595_v20, %v593_v26  ;;  %v624_v34 = vmax.bf16 %v622_v21, %v620_v27  ;;  %v23_v35 = vld [vmem:[%s1400_s0 + $0x38] sm:$0xf]  ;;  %v150_v38 = vld [vmem:[%s1400_s0 + $0x234] sm:$0xf]  ;;  %v603_v39 = vsel %vm153_vm0, %v133_v25, 4286644096 }
  0x55   :  { %v39_v36 = vld [vmem:[%s1400_s0 + $0x78] sm:$0xf]  ;;  %v630_v40 = vsel %vm153_vm0, %v102_v23, 4286644096  ;;  %v634_v43 = vsel %vm153_vm0, %v118_v24, 4286644096 }
  0x56   :  { %v55_v37 = vld [vmem:[%s1400_s0 + $0xb8] sm:$0xf]  ;;  %785 = vst [vmem:[%s1401_s1 + $0x28] sm:$0xff] %v784_v31   ;;  %v601_v41 = vmax.bf16 %v599_v29, %v597_v33  ;;  %v628_v42 = vmax.bf16 %v626_v30, %v624_v34  ;;  %v24_v44 = vld [vmem:[%s1400_s0 + $0x3c] sm:$0xf] }
  0x57   :  { %v71_v45 = vld [vmem:[%s1400_s0 + $0xf8] sm:$0xf]  ;;  %v646_v46 = vsel %vm153_vm0, %v23_v35, 4286644096  ;;  %v649_v47 = vsel %vm153_vm0, %v39_v36, 4286644096 }
  0x58   :  { %v653_v48 = vsel %vm153_vm0, %v55_v37, 4286644096  ;;  %v605_v49 = vmax.bf16 %v603_v39, %v601_v41  ;;  %v607_v50 = vsel %vm153_vm0, %v149_v28, 4286644096  ;;  %v632_v51 = vmax.bf16 %v630_v40, %v628_v42  ;;  %v40_v52 = vld [vmem:[%s1400_s0 + $0x7c] sm:$0xf] }
  0x59   :  { %v87_v53 = vld [vmem:[%s1400_s0 + $0x138] sm:$0xf]  ;;  %v651_v54 = vmax.bf16 %v649_v47, %v646_v46  ;;  %v638_v55 = vsel %vm153_vm0, %v134_v32, 4286644096  ;;  %v56_v56 = vld [vmem:[%s1400_s0 + $0xbc] sm:$0xf] }
  0x5a   :  { %v657_v57 = vsel %vm153_vm0, %v71_v45, 4286644096  ;;  %v636_v58 = vmax.bf16 %v634_v43, %v632_v51  ;;  %v642_v59 = vsel %vm153_vm0, %v150_v38, 4286644096  ;;  %v72_v60 = vld [vmem:[%s1400_s0 + $0xfc] sm:$0xf]  ;;  %v609_v63 = vmax.bf16 %v607_v50, %v605_v49 }
  0x5b   :  { %v103_v61 = vld [vmem:[%s1400_s0 + $0x178] sm:$0xf]  ;;  %v655_v62 = vmax.bf16 %v653_v48, %v651_v54  ;;  %v661_v0 = vsel %vm153_vm0, %v87_v53, 4286644096  ;;  %v681_v1 = vsel %vm153_vm0, %v24_v44, 4286644096 }
  0x5c   :  { %v684_v2 = vsel %vm153_vm0, %v40_v52, 4286644096  ;;  %v640_v3 = vmax.bf16 %v638_v55, %v636_v58  ;;  %v88_v4 = vld [vmem:[%s1400_s0 + $0x13c] sm:$0xf]  ;;  %v119_v5 = vld [vmem:[%s1400_s0 + $0x1b8] sm:$0xf] }
  0x5d   :  { %v659_v6 = vmax.bf16 %v657_v57, %v655_v62  ;;  %v686_v7 = vmax.bf16 %v684_v2, %v681_v1  ;;  %v688_v8 = vsel %vm153_vm0, %v56_v56, 4286644096  ;;  %v665_v9 = vsel %vm153_vm0, %v103_v61, 4286644096  ;;  %v104_v12 = vld [vmem:[%s1400_s0 + $0x17c] sm:$0xf] }
  0x5e   :  { %v692_v10 = vsel %vm153_vm0, %v72_v60, 4286644096  ;;  %v644_v11 = vmax.bf16 %v642_v59, %v640_v3  ;;  %v135_v13 = vld [vmem:[%s1400_s0 + $0x1f8] sm:$0xf]  ;;  %v669_v16 = vsel %vm153_vm0, %v119_v5, 4286644096 }
  0x5f   :  { %v663_v14 = vmax.bf16 %v661_v0, %v659_v6  ;;  %v690_v15 = vmax.bf16 %v688_v8, %v686_v7  ;;  %v696_v17 = vsel %vm153_vm0, %v88_v4, 4286644096  ;;  %v120_v19 = vld [vmem:[%s1400_s0 + $0x1bc] sm:$0xf]  ;;  %v673_v22 = vsel %vm153_vm0, %v135_v13, 4286644096 }
  0x60   :  { %v786_v18 = vcombine.low %v609_v63, %v644_v11  ;;  %v700_v23 = vsel %vm153_vm0, %v104_v12, 4286644096  ;;  %v136_v24 = vld [vmem:[%s1400_s0 + $0x1fc] sm:$0xf]  ;;  %v151_v25 = vld [vmem:[%s1400_s0 + $0x238] sm:$0xf] }
  0x61   :  { %v667_v20 = vmax.bf16 %v665_v9, %v663_v14  ;;  %v694_v21 = vmax.bf16 %v692_v10, %v690_v15  ;;  %v704_v28 = vsel %vm153_vm0, %v120_v19, 4286644096  ;;  %v152_v29 = vld [vmem:[%s1400_s0 + $0x23c] sm:$0xf]  ;;  %v677_v32 = vsel %vm153_vm0, %v151_v25, 4286644096 }
  0x62   :  { %787 = vst [vmem:[%s1401_s1 + $0x30] sm:$0xff] %v786_v18   ;;  %v708_v33 = vsel %vm153_vm0, %v136_v24, 4286644096  ;;  %v712_v35 = vsel %vm153_vm0, %v152_v29, 4286644096 }
  0x63   :  { %v671_v26 = vmax.bf16 %v669_v16, %v667_v20  ;;  %v698_v27 = vmax.bf16 %v696_v17, %v694_v21 }
  0x65   :  { %v675_v30 = vmax.bf16 %v673_v22, %v671_v26  ;;  %v702_v31 = vmax.bf16 %v700_v23, %v698_v27 }
  0x67   :  { %v706_v34 = vmax.bf16 %v704_v28, %v702_v31  ;;  %v679_v36 = vmax.bf16 %v677_v32, %v675_v30 }
  0x69   :  { %v710_v37 = vmax.bf16 %v708_v33, %v706_v34 }
  0x6b   :  { %v714_v38 = vmax.bf16 %v712_v35, %v710_v37 }
  0x6d   :  { %v788_v39 = vcombine.low %v679_v36, %v714_v38 }
  0x6f   :  { %789 = vst [vmem:[%s1401_s1 + $0x38] sm:$0xff] %v788_v39  }

// kernel: resnet_forward.48
= control target key start
LH: loop header
LB: loop body
LE: loop exit
PB: predicated region body
PF: predicated region fallthrough
CT: control target
= control target key end

     0   :  { %v600_v1 = vmov 0   ;;  %v293_v25 = vlaneseq  ;;  %s832_s1 = inlined_call_operand.vmem [shape: bf16[128,256], index: 1, kind: input, shape index: {}]   ;;  %s833_s0 = inlined_call_operand.vmem [shape: bf16[128,128], index: 0, kind: input, shape index: {}]   ;;  %s834_s2 = inlined_call_operand.vmem [shape: f32[1,256], index: 2, kind: input, shape index: {}]   ;;  %s835_s3 = inlined_call_operand.vmem [shape: f32[1,256], index: 3, kind: input, shape index: {}]   ;;  %s836_s4 = inlined_call_operand.vmem [shape: bf16[128,256], index: 4, kind: output, shape index: {}]  }
   0x1   :  { %v568_v0 = vld [vmem:[%s832_s1 + $0x74] ss:$8 sps:$4 sm:$0xff]   ;;  %210 = vmatprep.mubr.bf16.mxu0 %v600_v1  ;;  %250 = vmatprep.mubr.bf16.mxu1 %v600_v1  ;;  %v570_v2 = vld [vmem:[%s832_s1 + $0x70] ss:$8 sps:$4 sm:$0xff]   ;;  %v571_v3 = vld [vmem:[%s832_s1 + $0x64] ss:$8 sps:$4 sm:$0xff]  }
   0x2   :  { %178 = vmatprep.subr.bf16.mxu0 %v568_v0  ;;  %551 = vmatprep.subr.bf16.mxu1 %v568_v0  ;;  %v573_v4 = vld [vmem:[%s832_s1 + $0x60] ss:$8 sps:$4 sm:$0xff]   ;;  %v574_v5 = vld [vmem:[%s832_s1 + $0x54] ss:$8 sps:$4 sm:$0xff]   ;;  %v576_v6 = vld [vmem:[%s832_s1 + $0x50] ss:$8 sps:$4 sm:$0xff]  }
   0x3   :  { %179 = vmatpush1.bf16.msra.mxu0 %v570_v2  ;;  %559 = vmatpush1.bf16.msra.mxu1 %v570_v2  ;;  %v577_v7 = vld [vmem:[%s832_s1 + $0x44] ss:$8 sps:$4 sm:$0xff]   ;;  %v579_v8 = vld [vmem:[%s832_s1 + $0x40] ss:$8 sps:$4 sm:$0xff]   ;;  %v580_v9 = vld [vmem:[%s832_s1 + $0x34] ss:$8 sps:$4 sm:$0xff]  }
   0x4   :  { %180 = vmatprep.subr.bf16.mxu0 %v571_v3  ;;  %552 = vmatprep.subr.bf16.mxu1 %v571_v3  ;;  %v582_v10 = vld [vmem:[%s832_s1 + $0x30] ss:$8 sps:$4 sm:$0xff]   ;;  %v583_v11 = vld [vmem:[%s832_s1 + $0x24] ss:$8 sps:$4 sm:$0xff]   ;;  %v585_v12 = vld [vmem:[%s832_s1 + $0x20] ss:$8 sps:$4 sm:$0xff]  }
   0x5   :  { %v586_v13 = vld [vmem:[%s832_s1 + $0x14] ss:$8 sps:$4 sm:$0xff]   ;;  %v588_v14 = vld [vmem:[%s832_s1 + $0x10] ss:$8 sps:$4 sm:$0xff]   ;;  %v589_v15 = vld [vmem:[%s832_s1 + $0x4] ss:$8 sps:$4 sm:$0xff]  }
   0x6   :  { %v591_v16 = vld [vmem:[%s832_s1] ss:$8 sps:$4 sm:$0xff]   ;;  %v596_v21 = vld [vmem:[%s833_s0 + $0x10] sm:$0xff]   ;;  %v598_v23 = vld [vmem:[%s833_s0 + $0x18] sm:$0xff]   ;;  %v294_v26 = vshrl.u32 %v293_v25, 7 }
   0x7   :  { %181 = vmatpush1.bf16.msra.mxu0 %v573_v4  ;;  %560 = vmatpush1.bf16.msra.mxu1 %v573_v4  ;;  %v592_v17 = vld [vmem:[%s833_s0] sm:$0xff]   ;;  %v594_v19 = vld [vmem:[%s833_s0 + $0x8] sm:$0xff]   ;;  %v597_v22 = vld [vmem:[%s833_s0 + $0x30] sm:$0xff]  }
   0x8   :  { %182 = vmatprep.subr.bf16.mxu0 %v574_v5  ;;  %553 = vmatprep.subr.bf16.mxu1 %v574_v5  ;;  %v593_v18 = vld [vmem:[%s833_s0 + $0x20] sm:$0xff]   ;;  %v595_v20 = vld [vmem:[%s833_s0 + $0x28] sm:$0xff]   ;;  %v599_v24 = vld [vmem:[%s833_s0 + $0x38] sm:$0xff]   ;;  %v295_v27 = vsub.s32 0, %v294_v26  ;;  %v299_v29 = vsub.s32 1, %v294_v26 }
   0x9   :  { %v291_v28 = vld [vmem:[%s834_s2] sm:$0x3] }
   0xa   :  { %v709_v30 = vrot.slane %v291_v28, %v295_v27  ;;  %v335_v31 = vld [vmem:[%s835_s3] sm:$0x3]  ;;  %v714_v32 = vrot.slane %v291_v28, %v299_v29 }
   0xb   :  { %183 = vmatpush1.bf16.msra.mxu0 %v576_v6  ;;  %561 = vmatpush1.bf16.msra.mxu1 %v576_v6  ;;  %v717_v36 = vrot.slane %v335_v31, %v295_v27  ;;  %v720_v38 = vrot.slane %v335_v31, %v299_v29 }
   0xc   :  { %184 = vmatprep.subr.bf16.mxu0 %v577_v7  ;;  %554 = vmatprep.subr.bf16.mxu1 %v577_v7 }
   0xf   :  { %185 = vmatpush1.bf16.msra.mxu0 %v579_v8  ;;  %562 = vmatpush1.bf16.msra.mxu1 %v579_v8 }
  0x10   :  { %186 = vmatprep.subr.bf16.mxu0 %v580_v9  ;;  %555 = vmatprep.subr.bf16.mxu1 %v580_v9 }
  0x13   :  { %187 = vmatpush1.bf16.msra.mxu0 %v582_v10  ;;  %563 = vmatpush1.bf16.msra.mxu1 %v582_v10 }
  0x14   :  { %188 = vmatprep.subr.bf16.mxu0 %v583_v11  ;;  %556 = vmatprep.subr.bf16.mxu1 %v583_v11 }
  0x17   :  { %189 = vmatpush1.bf16.msra.mxu0 %v585_v12  ;;  %564 = vmatpush1.bf16.msra.mxu1 %v585_v12 }
  0x18   :  { %190 = vmatprep.subr.bf16.mxu0 %v586_v13  ;;  %557 = vmatprep.subr.bf16.mxu1 %v586_v13 }
  0x1b   :  { %191 = vmatpush1.bf16.msra.mxu0 %v588_v14  ;;  %565 = vmatpush1.bf16.msra.mxu1 %v588_v14 }
  0x1c   :  { %192 = vmatprep.subr.bf16.mxu0 %v589_v15  ;;  %558 = vmatprep.subr.bf16.mxu1 %v589_v15 }
  0x1f   :  { %193 = vmatpush1.bf16.msra.mxu0 %v591_v16  ;;  %566 = vmatpush1.bf16.msra.mxu1 %v591_v16 }
  0x22   :  { %211 = vmatmul.mubr.bf16.vlgmr.msra.gmra.mxu0 %v592_v17  ;;  %251 = vmatmul.mubr.bf16.vlgmr.msra.gmra.mxu1 %v593_v18 }
  0x23   :  { %220 = vmatprep.mubr.bf16.mxu0 %v600_v1  ;;  %260 = vmatprep.mubr.bf16.mxu1 %v600_v1 }
  0x2a   :  { %221 = vmatmul.mubr.bf16.gmra.mxu0 %v594_v19  ;;  %261 = vmatmul.mubr.bf16.gmra.mxu1 %v595_v20 }
  0x2b   :  { %230 = vmatprep.mubr.bf16.mxu0 %v600_v1  ;;  %270 = vmatprep.mubr.bf16.mxu1 %v600_v1 }
  0x32   :  { %231 = vmatmul.mubr.bf16.gmra.mxu0 %v596_v21  ;;  %271 = vmatmul.mubr.bf16.gmra.mxu1 %v597_v22 }
  0x33   :  { %240 = vmatprep.mubr.bf16.mxu0 %v600_v1  ;;  %280 = vmatprep.mubr.bf16.mxu1 %v600_v1 }
  0x3a   :  { %241 = vmatmul.mubr.bf16.gmra.mxu0 %v598_v23  ;;  %281 = vmatmul.mubr.bf16.gmra.mxu1 %v599_v24 }
  0xe2   :  { %v212_v33 = vpop.f32.mrf.mxu0  ;;  %v252_v34 = vpop.f32.mrf.mxu1 }
  0xe3   :  { %v303_v35 = vmul.f32 %v709_v30, %v212_v33  ;;  %v319_v37 = vmul.f32 %v709_v30, %v252_v34 }
  0xe4   :  { %v214_v39 = vpop.f32.mrf.mxu0  ;;  %v254_v40 = vpop.f32.mrf.mxu1 }
  0xe5   :  { %v304_v41 = vmul.f32 %v714_v32, %v214_v39  ;;  %v320_v42 = vmul.f32 %v714_v32, %v254_v40  ;;  %v347_v45 = vadd.f32 %v717_v36, %v303_v35  ;;  %v363_v46 = vadd.f32 %v717_v36, %v319_v37 }
  0xe6   :  { %v216_v43 = vpop.f32.mrf.mxu0  ;;  %v256_v44 = vpop.f32.mrf.mxu1 }
  0xe7   :  { %v348_v47 = vadd.f32 %v720_v38, %v304_v41  ;;  %v364_v48 = vadd.f32 %v720_v38, %v320_v42  ;;  %v305_v49 = vmul.f32 %v709_v30, %v216_v43  ;;  %v321_v50 = vmul.f32 %v709_v30, %v256_v44 }
  0xe8   :  { %v218_v51 = vpop.f32.mrf.mxu0  ;;  %v258_v52 = vpop.f32.mrf.mxu1 }
  0xe9   :  { %v535_v53 = vpack.c.bf16 %v348_v47, %v347_v45  ;;  %v543_v54 = vpack.c.bf16 %v364_v48, %v363_v46  ;;  %v306_v55 = vmul.f32 %v714_v32, %v218_v51  ;;  %v322_v56 = vmul.f32 %v714_v32, %v258_v52 }
  0xea   :  { %v222_v57 = vpop.f32.mrf.mxu0  ;;  %v262_v58 = vpop.f32.mrf.mxu1  ;;  %v349_v61 = vadd.f32 %v717_v36, %v305_v49  ;;  %v365_v62 = vadd.f32 %v717_v36, %v321_v50 }
  0xeb   :  { %475 = vst [vmem:[%s836_s4] sm:$0xff] %v535_v53  ;;  %483 = vst [vmem:[%s836_s4 + $0x40] sm:$0xff] %v543_v54  ;;  %v307_v59 = vmul.f32 %v709_v30, %v222_v57  ;;  %v323_v60 = vmul.f32 %v709_v30, %v262_v58  ;;  %v350_v63 = vadd.f32 %v720_v38, %v306_v55 }
  0xec   :  { %v366_v0 = vadd.f32 %v720_v38, %v322_v56  ;;  %v224_v1 = vpop.f32.mrf.mxu0  ;;  %v264_v2 = vpop.f32.mrf.mxu1 }
  0xed   :  { %v308_v3 = vmul.f32 %v714_v32, %v224_v1  ;;  %v324_v4 = vmul.f32 %v714_v32, %v264_v2  ;;  %v536_v5 = vpack.c.bf16 %v350_v63, %v349_v61  ;;  %v351_v9 = vadd.f32 %v717_v36, %v307_v59 }
  0xee   :  { %v544_v6 = vpack.c.bf16 %v366_v0, %v365_v62  ;;  %v226_v7 = vpop.f32.mrf.mxu0  ;;  %v266_v8 = vpop.f32.mrf.mxu1  ;;  %v367_v10 = vadd.f32 %v717_v36, %v323_v60 }
  0xef   :  { %v352_v11 = vadd.f32 %v720_v38, %v308_v3  ;;  %v368_v12 = vadd.f32 %v720_v38, %v324_v4  ;;  %476 = vst [vmem:[%s836_s4 + $0x8] sm:$0xff] %v536_v5  ;;  %v309_v13 = vmul.f32 %v709_v30, %v226_v7  ;;  %v325_v14 = vmul.f32 %v709_v30, %v266_v8 }
  0xf0   :  { %484 = vst [vmem:[%s836_s4 + $0x48] sm:$0xff] %v544_v6  ;;  %v228_v15 = vpop.f32.mrf.mxu0  ;;  %v268_v16 = vpop.f32.mrf.mxu1 }
  0xf1   :  { %v537_v17 = vpack.c.bf16 %v352_v11, %v351_v9  ;;  %v545_v18 = vpack.c.bf16 %v368_v12, %v367_v10  ;;  %v310_v19 = vmul.f32 %v714_v32, %v228_v15  ;;  %v326_v20 = vmul.f32 %v714_v32, %v268_v16 }
  0xf2   :  { %v232_v21 = vpop.f32.mrf.mxu0  ;;  %v272_v22 = vpop.f32.mrf.mxu1  ;;  %v353_v25 = vadd.f32 %v717_v36, %v309_v13  ;;  %v369_v26 = vadd.f32 %v717_v36, %v325_v14 }
  0xf3   :  { %477 = vst [vmem:[%s836_s4 + $0x10] sm:$0xff] %v537_v17  ;;  %485 = vst [vmem:[%s836_s4 + $0x50] sm:$0xff] %v545_v18  ;;  %v311_v23 = vmul.f32 %v709_v30, %v232_v21  ;;  %v327_v24 = vmul.f32 %v709_v30, %v272_v22  ;;  %v354_v27 = vadd.f32 %v720_v38, %v310_v19 }
  0xf4   :  { %v370_v28 = vadd.f32 %v720_v38, %v326_v20  ;;  %v234_v29 = vpop.f32.mrf.mxu0  ;;  %v274_v31 = vpop.f32.mrf.mxu1 }
  0xf5   :  { %v312_v33 = vmul.f32 %v714_v32, %v234_v29  ;;  %v328_v34 = vmul.f32 %v714_v32, %v274_v31  ;;  %v538_v35 = vpack.c.bf16 %v354_v27, %v353_v25  ;;  %v355_v41 = vadd.f32 %v717_v36, %v311_v23 }
  0xf6   :  { %v546_v37 = vpack.c.bf16 %v370_v28, %v369_v26  ;;  %v236_v39 = vpop.f32.mrf.mxu0  ;;  %v276_v40 = vpop.f32.mrf.mxu1  ;;  %v371_v42 = vadd.f32 %v717_v36, %v327_v24 }
  0xf7   :  { %v356_v43 = vadd.f32 %v720_v38, %v312_v33  ;;  %v372_v44 = vadd.f32 %v720_v38, %v328_v34  ;;  %478 = vst [vmem:[%s836_s4 + $0x18] sm:$0xff] %v538_v35  ;;  %v313_v45 = vmul.f32 %v709_v30, %v236_v39  ;;  %v329_v46 = vmul.f32 %v709_v30, %v276_v40 }
  0xf8   :  { %486 = vst [vmem:[%s836_s4 + $0x58] sm:$0xff] %v546_v37  ;;  %v238_v47 = vpop.f32.mrf.mxu0  ;;  %v278_v48 = vpop.f32.mrf.mxu1 }
  0xf9   :  { %v539_v49 = vpack.c.bf16 %v356_v43, %v355_v41  ;;  %v547_v50 = vpack.c.bf16 %v372_v44, %v371_v42  ;;  %v314_v51 = vmul.f32 %v714_v32, %v238_v47  ;;  %v330_v52 = vmul.f32 %v714_v32, %v278_v48 }
  0xfa   :  { %v242_v53 = vpop.f32.mrf.mxu0  ;;  %v282_v54 = vpop.f32.mrf.mxu1  ;;  %v357_v57 = vadd.f32 %v717_v36, %v313_v45  ;;  %v373_v58 = vadd.f32 %v717_v36, %v329_v46 }
  0xfb   :  { %479 = vst [vmem:[%s836_s4 + $0x20] sm:$0xff] %v539_v49  ;;  %487 = vst [vmem:[%s836_s4 + $0x60] sm:$0xff] %v547_v50  ;;  %v315_v55 = vmul.f32 %v709_v30, %v242_v53  ;;  %v331_v56 = vmul.f32 %v709_v30, %v282_v54  ;;  %v358_v59 = vadd.f32 %v720_v38, %v314_v51 }
  0xfc   :  { %v374_v60 = vadd.f32 %v720_v38, %v330_v52  ;;  %v244_v61 = vpop.f32.mrf.mxu0  ;;  %v284_v62 = vpop.f32.mrf.mxu1 }
  0xfd   :  { %v316_v63 = vmul.f32 %v714_v32, %v244_v61  ;;  %v332_v0 = vmul.f32 %v714_v32, %v284_v62  ;;  %v540_v1 = vpack.c.bf16 %v358_v59, %v357_v57  ;;  %v359_v5 = vadd.f32 %v717_v36, %v315_v55 }
  0xfe   :  { %v548_v2 = vpack.c.bf16 %v374_v60, %v373_v58  ;;  %v246_v3 = vpop.f32.mrf.mxu0  ;;  %v286_v4 = vpop.f32.mrf.mxu1  ;;  %v375_v6 = vadd.f32 %v717_v36, %v331_v56 }
  0xff   :  { %v360_v7 = vadd.f32 %v720_v38, %v316_v63  ;;  %v376_v8 = vadd.f32 %v720_v38, %v332_v0  ;;  %480 = vst [vmem:[%s836_s4 + $0x28] sm:$0xff] %v540_v1  ;;  %v317_v9 = vmul.f32 %v709_v30, %v246_v3  ;;  %v333_v10 = vmul.f32 %v709_v30, %v286_v4 }
 0x100   :  { %488 = vst [vmem:[%s836_s4 + $0x68] sm:$0xff] %v548_v2  ;;  %v248_v11 = vpop.f32.mrf.mxu0  ;;  %v288_v12 = vpop.f32.mrf.mxu1 }
 0x101   :  { %v541_v13 = vpack.c.bf16 %v360_v7, %v359_v5  ;;  %v549_v14 = vpack.c.bf16 %v376_v8, %v375_v6  ;;  %v318_v15 = vmul.f32 %v714_v32, %v248_v11  ;;  %v334_v16 = vmul.f32 %v714_v32, %v288_v12 }
 0x102   :  { %v361_v17 = vadd.f32 %v717_v36, %v317_v9  ;;  %v377_v30 = vadd.f32 %v717_v36, %v333_v10 }
 0x103   :  { %481 = vst [vmem:[%s836_s4 + $0x30] sm:$0xff] %v541_v13  ;;  %489 = vst [vmem:[%s836_s4 + $0x70] sm:$0xff] %v549_v14  ;;  %v362_v18 = vadd.f32 %v720_v38, %v318_v15  ;;  %v378_v19 = vadd.f32 %v720_v38, %v334_v16 }
 0x105   :  { %v542_v20 = vpack.c.bf16 %v362_v18, %v361_v17  ;;  %v550_v21 = vpack.c.bf16 %v378_v19, %v377_v30 }
 0x107   :  { %482 = vst [vmem:[%s836_s4 + $0x38] sm:$0xff] %v542_v20  ;;  %490 = vst [vmem:[%s836_s4 + $0x78] sm:$0xff] %v550_v21 }

// kernel: resnet_forward.47
= control target key start
LH: loop header
LB: loop body
LE: loop exit
PB: predicated region body
PF: predicated region fallthrough
CT: control target
= control target key end

     0   :  { %s1743_s15 = smov 0   ;;  %s1745_s16 = smov 0   ;;  %s1996_s0 = inlined_call_operand.vmem [shape: bf16[128,1152], index: 0, kind: input, shape index: {}]   ;;  %s1997_s1 = inlined_call_operand.vmem [shape: bf16[1152,128], index: 1, kind: input, shape index: {}]   ;;  %s1998_s2 = inlined_call_operand.vmem [shape: f32[1,128], index: 2, kind: input, shape index: {}]   ;;  %s1999_s3 = inlined_call_operand.vmem [shape: f32[1,128], index: 3, kind: input, shape index: {}]   ;;  %s2000_s4 = inlined_call_operand.vmem [shape: bf16[128,128], index: 4, kind: output, shape index: {}]  }
   0x1   :  { %s1747_s17 = smov 0   ;;  %s1749_s18 = smov 0  }
   0x2   :  { %s1751_s19 = smov 0  }
   0x3 LB: > { %s26_s20 = sadd.s32 1, %s1711_s18  ;;  %p49_p1 = scmp.ne.s32.totalorder %s1703_s16, %s1699_s15  ;;  %s1715_s19 = sphi %s1751_s19, %s14_s19   ;;  %s1711_s18 = sphi %s1749_s18, %s2004_s18   ;;  %s1707_s17 = sphi %s1747_s17, %s2003_s17   ;;  %s1703_s16 = sphi %s1745_s16, %s2002_s16   ;;  %s1699_s15 = sphi %s1743_s15, %s2001_s15  }
   0x4   : > { %p27_p0 = scmp.ge.s32.totalorder %s26_s20, 3  ;;  %p50_p2 = scmp.eq.s32.totalorder %s1715_s19, 0 }
   0x5   : > { %s42_s22 = sadd.s32 1, %s1703_s16  ;;  %p1294_p5 = scmp.ge.s32.totalorder %s1715_s19, 3 }
   0x6   : > { %s2006_s20 = smov (%p27_p0, %s26_s20), 0  ;;  %p51_p3 = por %p50_p2, %p49_p1 }
   0x7   : > { %s38_s21 = ssub.s32 %s1711_s18, %s2006_s20  ;;  %195 = sbr.rel (%p1294_p5) target bundleno = 35 (0x23), region = 24 }
   0x8   : > { %p40_p4 = scmp.eq.s32.totalorder %s38_s21, 0 }
   0xa   : > { %s1778_s23 = scalar_select %p40_p4, %s1703_s16, %s42_s22  }
   0xc   : > { %198 = sbr.rel (!%p51_p3) target bundleno = 35 (0x23), region = 28  ;;  %s200_s24 = sand.u32 (%p51_p3), 1, %s1703_s16  }
   0xd   : > { %s1402_s25 = smul.u32 (%p51_p3), 12, %s1711_s18 }
   0xe   : > { %s1578_s26 = smul.u32 (%p51_p3), 192, %s200_s24 }
   0xf   : > { %s1786_s29 = scalar_lea.vmem (%p51_p3), %s1996_s0, %s1402_s25 }
  0x10   : > { %v223_v0 = vld [vmem:[%s1786_s29] sm:$0xff] (%p51_p3)  ;;  %v227_v2 = vld [vmem:[%s1786_s29 + $0x48] sm:$0xff] (%p51_p3)  ;;  %s1791_s30 = scalar_lea.vmem (%p51_p3), [#allocation3], %s1578_s26  ;;  %v231_v4 = vld [vmem:[%s1786_s29 + $0x90] sm:$0xff] (%p51_p3) }
  0x11   : > { %v225_v1 = vld [vmem:[%s1786_s29 + $0x24] sm:$0xff]  ;;  %224 = vst [vmem:[%s1791_s30] sm:$0xff] %v223_v0  ;;  %228 = vst [vmem:[%s1791_s30 + $0x18] sm:$0xff] %v227_v2  ;;  %v229_v3 = vld [vmem:[%s1786_s29 + $0x6c] sm:$0xff] }
  0x12   : > { %226 = vst [vmem:[%s1791_s30 + $0xc] sm:$0xff] %v225_v1  ;;  %v233_v5 = vld [vmem:[%s1786_s29 + $0xb4] sm:$0xff]  ;;  %230 = vst [vmem:[%s1791_s30 + $0x24] sm:$0xff] %v229_v3  ;;  %v237_v7 = vld [vmem:[%s1786_s29 + $0xfc] sm:$0xff] }
  0x13   : > { %232 = vst [vmem:[%s1791_s30 + $0x30] sm:$0xff] %v231_v4  ;;  %234 = vst [vmem:[%s1791_s30 + $0x3c] sm:$0xff] %v233_v5  ;;  %v235_v6 = vld [vmem:[%s1786_s29 + $0xd8] sm:$0xff]  ;;  %v239_v8 = vld [vmem:[%s1786_s29 + $0x120] sm:$0xff] }
  0x14   : > { %236 = vst [vmem:[%s1791_s30 + $0x48] sm:$0xff] %v235_v6  ;;  %238 = vst [vmem:[%s1791_s30 + $0x54] sm:$0xff] %v237_v7  ;;  %v241_v9 = vld [vmem:[%s1786_s29 + $0x144] sm:$0xff]  ;;  %v245_v11 = vld [vmem:[%s1786_s29 + $0x18c] sm:$0xff] }
  0x15   : > { %240 = vst [vmem:[%s1791_s30 + $0x60] sm:$0xff] %v239_v8  ;;  %v243_v10 = vld [vmem:[%s1786_s29 + $0x168] sm:$0xff]  ;;  %242 = vst [vmem:[%s1791_s30 + $0x6c] sm:$0xff] %v241_v9  ;;  %v247_v12 = vld [vmem:[%s1786_s29 + $0x1b0] sm:$0xff] }
  0x16   : > { %244 = vst [vmem:[%s1791_s30 + $0x78] sm:$0xff] %v243_v10  ;;  %246 = vst [vmem:[%s1791_s30 + $0x84] sm:$0xff] %v245_v11  ;;  %v249_v13 = vld [vmem:[%s1786_s29 + $0x1d4] sm:$0xff]  ;;  %v253_v15 = vld [vmem:[%s1786_s29 + $0x21c] sm:$0xff] }
  0x17   : > { %v251_v14 = vld [vmem:[%s1786_s29 + $0x1f8] sm:$0xff]  ;;  %248 = vst [vmem:[%s1791_s30 + $0x90] sm:$0xff] %v247_v12  ;;  %250 = vst [vmem:[%s1791_s30 + $0x9c] sm:$0xff] %v249_v13  ;;  %v1296_v16 = vld [vmem:[%s1786_s29 + $0x8] sm:$0xf] }
  0x18   : > { %252 = vst [vmem:[%s1791_s30 + $0xa8] sm:$0xff] %v251_v14  ;;  %v1298_v17 = vld [vmem:[%s1786_s29 + $0x2c] sm:$0xf]  ;;  %254 = vst [vmem:[%s1791_s30 + $0xb4] sm:$0xff] %v253_v15  ;;  %v1300_v18 = vld [vmem:[%s1786_s29 + $0x50] sm:$0xf] }
  0x19   : > { %1297 = vst [vmem:[%s1791_s30 + $0x8] sm:$0xf] %v1296_v16  ;;  %1299 = vst [vmem:[%s1791_s30 + $0x14] sm:$0xf] %v1298_v17  ;;  %v1302_v19 = vld [vmem:[%s1786_s29 + $0x74] sm:$0xf] }
  0x1a   : > { %v1304_v20 = vld [vmem:[%s1786_s29 + $0x98] sm:$0xf]  ;;  %1301 = vst [vmem:[%s1791_s30 + $0x20] sm:$0xf] %v1300_v18  ;;  %1303 = vst [vmem:[%s1791_s30 + $0x2c] sm:$0xf] %v1302_v19 }
  0x1b   : > { %1305 = vst [vmem:[%s1791_s30 + $0x38] sm:$0xf] %v1304_v20  ;;  %v1306_v21 = vld [vmem:[%s1786_s29 + $0xbc] sm:$0xf]  ;;  %v1308_v22 = vld [vmem:[%s1786_s29 + $0xe0] sm:$0xf] }
  0x1c   : > { %v1310_v23 = vld [vmem:[%s1786_s29 + $0x104] sm:$0xf]  ;;  %1307 = vst [vmem:[%s1791_s30 + $0x44] sm:$0xf] %v1306_v21  ;;  %1309 = vst [vmem:[%s1791_s30 + $0x50] sm:$0xf] %v1308_v22 }
  0x1d   : > { %1311 = vst [vmem:[%s1791_s30 + $0x5c] sm:$0xf] %v1310_v23  ;;  %v1312_v24 = vld [vmem:[%s1786_s29 + $0x128] sm:$0xf]  ;;  %v1314_v25 = vld [vmem:[%s1786_s29 + $0x14c] sm:$0xf] }
  0x1e   : > { %v1316_v26 = vld [vmem:[%s1786_s29 + $0x170] sm:$0xf]  ;;  %1313 = vst [vmem:[%s1791_s30 + $0x68] sm:$0xf] %v1312_v24  ;;  %1315 = vst [vmem:[%s1791_s30 + $0x74] sm:$0xf] %v1314_v25 }
  0x1f   : > { %1317 = vst [vmem:[%s1791_s30 + $0x80] sm:$0xf] %v1316_v26  ;;  %v1318_v27 = vld [vmem:[%s1786_s29 + $0x194] sm:$0xf]  ;;  %v1320_v28 = vld [vmem:[%s1786_s29 + $0x1b8] sm:$0xf] }
  0x20   : > { %v1322_v29 = vld [vmem:[%s1786_s29 + $0x1dc] sm:$0xf]  ;;  %1319 = vst [vmem:[%s1791_s30 + $0x8c] sm:$0xf] %v1318_v27  ;;  %1321 = vst [vmem:[%s1791_s30 + $0x98] sm:$0xf] %v1320_v28 }
  0x21   : > { %1323 = vst [vmem:[%s1791_s30 + $0xa4] sm:$0xf] %v1322_v29  ;;  %v1324_v30 = vld [vmem:[%s1786_s29 + $0x200] sm:$0xf]  ;;  %v1326_v31 = vld [vmem:[%s1786_s29 + $0x224] sm:$0xf] }
  0x22   : > { %1325 = vst [vmem:[%s1791_s30 + $0xb0] sm:$0xf] %v1324_v30  ;;  %1327 = vst [vmem:[%s1791_s30 + $0xbc] sm:$0xf] %v1326_v31 }
  0x23 PF: > { %p1328_p6 = scmp.ge.s32.totalorder %s1715_s19, 1  ;;  %p311_p7 = scmp.lt.s32.totalorder %s1715_s19, 4 }
  0x25   : > { %p312_p8 = pnand %p1328_p6, %p311_p7 }
  0x26   : > { %s318_s5 = sand.u32 (!%p312_p8), 1, %s1699_s15   ;;  %s362_s6 = smul.u32 (!%p312_p8), 48, %s1707_s17 }
  0x27   : > { %315 = sbr.rel (%p312_p8) target bundleno = 375 (0x177), region = 58  ;;  %p1330_p10 = scmp.ne.s32.totalorder (!%p312_p8), %s1707_s17, 0 }
  0x28   : > { %s1579_s7 = smul.u32 (!%p312_p8), 192, %s318_s5  ;;  %p363_p9 = scmp.lt.s32.totalorder (!%p312_p8), %s362_s6, 143 }
  0x2a   : > { %s1863_s12 = scalar_lea.vmem (!%p312_p8), [#allocation3], %s1579_s7 }
  0x2c   : > { %s2008_s6 = smov (!%p363_p9, %s362_s6), 143  ;;  %390 = sbr.rel (%p1330_p10) target bundleno = 58 (0x3a), region = 66 }
  0x2d   : > { %s1329_s8 = sshll.u32 %s2008_s6, 2 }
  0x2e   : > { %s1861_s11 = scalar_lea.vmem %s1997_s1, %s1329_s8 }
  0x31   : > { %v1717_v32 = vmov 0.0  }
  0x32   : > { %391 = vst [vmem:[#allocation2 + $0x30] sm:$0xff] %v1717_v32  ;;  %392 = vst [vmem:[#allocation2] sm:$0xff] %v1717_v32 }
  0x33   : > { %393 = vst [vmem:[#allocation2 + $0x58] sm:$0xff] %v1717_v32  ;;  %394 = vst [vmem:[#allocation2 + $0x18] sm:$0xff] %v1717_v32 }
  0x34   : > { %395 = vst [vmem:[#allocation2 + $0x50] sm:$0xff] %v1717_v32  ;;  %396 = vst [vmem:[#allocation2 + $0x68] sm:$0xff] %v1717_v32 }
  0x35   : > { %397 = vst [vmem:[#allocation2 + $0x8] sm:$0xff] %v1717_v32  ;;  %398 = vst [vmem:[#allocation2 + $0x48] sm:$0xff] %v1717_v32 }
  0x36   : > { %399 = vst [vmem:[#allocation2 + $0x40] sm:$0xff] %v1717_v32  ;;  %400 = vst [vmem:[#allocation2 + $0x20] sm:$0xff] %v1717_v32 }
  0x37   : > { %401 = vst [vmem:[#allocation2 + $0x10] sm:$0xff] %v1717_v32  ;;  %402 = vst [vmem:[#allocation2 + $0x38] sm:$0xff] %v1717_v32 }
  0x38   : > { %403 = vst [vmem:[#allocation2 + $0x60] sm:$0xff] %v1717_v32  ;;  %404 = vst [vmem:[#allocation2 + $0x70] sm:$0xff] %v1717_v32 }
  0x39   : > { %405 = vst [vmem:[#allocation2 + $0x78] sm:$0xff] %v1717_v32  ;;  %406 = vst [vmem:[#allocation2 + $0x28] sm:$0xff] %v1717_v32 }
  0x3a PF: > { %v1621_v33 = vld [vmem:[%s1861_s11 + $0x78] sm:$0xff]   ;;  %v1624_v36 = vld [vmem:[%s1861_s11 + $0x70] sm:$0xff]   ;;  %v1627_v39 = vld [vmem:[%s1861_s11 + $0x68] sm:$0xff]   ;;  %p1379_p11 = scmp.ne.s32.totalorder %s1707_s17, 2 }
  0x3b   : > { %v1622_v34 = vld [vmem:[%s1861_s11 + $0x38] sm:$0xff]   ;;  %1466 = vmatprep.subr.bf16.mxu0 %v1621_v33  ;;  %v1625_v37 = vld [vmem:[%s1861_s11 + $0x30] sm:$0xff]   ;;  %v1628_v40 = vld [vmem:[%s1861_s11 + $0x28] sm:$0xff]  }
  0x3c   : > { %v1623_v35 = vld [vmem:[%s1861_s11 + $0xb8] sm:$0xff]   ;;  %1467 = vmatpush3.bf16.msra.mxu0 %v1622_v34  ;;  %v1626_v38 = vld [vmem:[%s1861_s11 + $0xb0] sm:$0xff]   ;;  %v1629_v41 = vld [vmem:[%s1861_s11 + $0xa8] sm:$0xff]  }
  0x3d   : > { %1546 = vmatprep.subr.bf16.mxu1 %v1623_v35  ;;  %1468 = vmatprep.subr.bf16.mxu0 %v1624_v36  ;;  %v1630_v42 = vld [vmem:[%s1861_s11 + $0x60] sm:$0xff]   ;;  %v1633_v45 = vld [vmem:[%s1861_s11 + $0x58] sm:$0xff]   ;;  %v1636_v48 = vld [vmem:[%s1861_s11 + $0x50] sm:$0xff]  }
  0x3e   : > { %1547 = vmatpush3.bf16.msra.mxu1 %v1623_v35  ;;  %v1631_v43 = vld [vmem:[%s1861_s11 + $0x20] sm:$0xff]   ;;  %v1635_v46 = vld [vmem:[%s1861_s11 + $0x98] sm:$0xff]   ;;  %v1638_v49 = vld [vmem:[%s1861_s11 + $0x90] sm:$0xff]  }
  0x3f   : > { %1548 = vmatprep.subr.bf16.mxu1 %v1626_v38  ;;  %v1632_v44 = vld [vmem:[%s1861_s11 + $0xa0] sm:$0xff]   ;;  %v1634_v47 = vld [vmem:[%s1861_s11 + $0x18] sm:$0xff]   ;;  %v1637_v50 = vld [vmem:[%s1861_s11 + $0x10] sm:$0xff]  }
  0x40   : > { %1469 = vmatpush3.bf16.msra.mxu0 %v1625_v37  ;;  %v1639_v51 = vld [vmem:[%s1861_s11 + $0x48] sm:$0xff]   ;;  %v1642_v54 = vld [vmem:[%s1861_s11 + $0x40] sm:$0xff]   ;;  %v1657_v1 = vld [vmem:[%s1863_s12 + $0x50] ss:$12 sps:$4 sm:$0xff]  }
  0x41   : > { %1470 = vmatprep.subr.bf16.mxu0 %v1627_v39  ;;  %v1640_v52 = vld [vmem:[%s1861_s11 + $0x8] sm:$0xff]   ;;  %v1644_v55 = vld [vmem:[%s1861_s11 + $0x80] sm:$0xff]   ;;  %v1655_v3 = vld [vmem:[%s1863_s12 + $0x30] ss:$12 sps:$4 sm:$0xff]  }
  0x42   : > { %1549 = vmatpush3.bf16.msra.mxu1 %v1626_v38  ;;  %v1641_v53 = vld [vmem:[%s1861_s11 + $0x88] sm:$0xff]   ;;  %v1647_v56 = vld [vmem:[%s1863_s12 + $0x4] ss:$12 sps:$4 sm:$0xff]   ;;  %v1653_v0 = vld [vmem:[%s1863_s12 + $0x34] ss:$12 sps:$4 sm:$0xff]  }
  0x43   : > { %1550 = vmatprep.subr.bf16.mxu1 %v1629_v41  ;;  %v1648_v57 = vld [vmem:[%s1863_s12 + $0x8] ss:$12 sps:$4 sm:$0xff]   ;;  %v1643_v58 = vld [vmem:[%s1861_s11] sm:$0xff]   ;;  %807 = vmatprep.mubr.bf16.mxu0 %v1647_v56  ;;  %v1658_v4 = vld [vmem:[%s1863_s12 + $0x4c] ss:$12 sps:$4 sm:$0xff]  }
  0x44   : > { %1471 = vmatpush3.bf16.msra.mxu0 %v1628_v40  ;;  %1562 = vmatprep.mubr.bf16.mxu1 %v1648_v57  ;;  %v1645_v59 = vld [vmem:[%s1863_s12] ss:$12 sps:$4 sm:$0xff]   ;;  %v1650_v60 = vld [vmem:[%s1863_s12 + $0x1c] ss:$12 sps:$4 sm:$0xff]   ;;  %v1656_v62 = vld [vmem:[%s1863_s12 + $0x38] ss:$12 sps:$4 sm:$0xff]  }
  0x45   : > { %1472 = vmatprep.subr.bf16.mxu0 %v1630_v42  ;;  %v1649_v61 = vld [vmem:[%s1863_s12 + $0x20] ss:$12 sps:$4 sm:$0xff]   ;;  %v1652_v63 = vld [vmem:[%s1863_s12 + $0x18] ss:$12 sps:$4 sm:$0xff]   ;;  %v1664_v2 = vld [vmem:[%s1863_s12 + $0x68] ss:$12 sps:$4 sm:$0xff]  }
  0x46   : > { %1551 = vmatpush3.bf16.msra.mxu1 %v1629_v41  ;;  %v1665_v5 = vld [vmem:[%s1863_s12 + $0x80] ss:$12 sps:$4 sm:$0xff]   ;;  %v1672_v6 = vld [vmem:[%s1863_s12 + $0x98] ss:$12 sps:$4 sm:$0xff]   ;;  %v1660_v7 = vld [vmem:[%s1863_s12 + $0x48] ss:$12 sps:$4 sm:$0xff]  }
  0x47   : > { %1552 = vmatprep.subr.bf16.mxu1 %v1632_v44  ;;  %v1661_v8 = vld [vmem:[%s1863_s12 + $0x64] ss:$12 sps:$4 sm:$0xff]   ;;  %v1663_v10 = vld [vmem:[%s1863_s12 + $0x60] ss:$12 sps:$4 sm:$0xff]   ;;  %v1666_v11 = vld [vmem:[%s1863_s12 + $0x7c] ss:$12 sps:$4 sm:$0xff]  }
  0x48   : > { %1473 = vmatpush3.bf16.msra.mxu0 %v1631_v43  ;;  %v1673_v9 = vld [vmem:[%s1863_s12 + $0xb0] ss:$12 sps:$4 sm:$0xff]   ;;  %v1668_v12 = vld [vmem:[%s1863_s12 + $0x78] ss:$12 sps:$4 sm:$0xff]   ;;  %v1669_v13 = vld [vmem:[%s1863_s12 + $0x94] ss:$12 sps:$4 sm:$0xff]  }
  0x49   : > { %1474 = vmatprep.subr.bf16.mxu0 %v1633_v45  ;;  %v1671_v14 = vld [vmem:[%s1863_s12 + $0x90] ss:$12 sps:$4 sm:$0xff]   ;;  %v1674_v15 = vld [vmem:[%s1863_s12 + $0xac] ss:$12 sps:$4 sm:$0xff]   ;;  %v1676_v16 = vld [vmem:[%s1863_s12 + $0xa8] ss:$12 sps:$4 sm:$0xff]  }
  0x4a   : > { %1553 = vmatpush3.bf16.msra.mxu1 %v1632_v44  ;;  %v407_v22 = vld [vmem:[#allocation2 + $0x30] sm:$0xff]  ;;  %v408_v30 = vld [vmem:[#allocation2] sm:$0xff]  ;;  %v409_v37 = vld [vmem:[#allocation2 + $0x58] sm:$0xff] }
  0x4b   : > { %1554 = vmatprep.subr.bf16.mxu1 %v1635_v46  ;;  %v410_v44 = vld [vmem:[#allocation2 + $0x18] sm:$0xff] }
  0x4c   : > { %1475 = vmatpush3.bf16.msra.mxu0 %v1634_v47 }
  0x4d   : > { %1476 = vmatprep.subr.bf16.mxu0 %v1636_v48 }
  0x4e   : > { %1555 = vmatpush3.bf16.msra.mxu1 %v1635_v46 }
  0x4f   : > { %1556 = vmatprep.subr.bf16.mxu1 %v1638_v49 }
  0x50   : > { %1477 = vmatpush3.bf16.msra.mxu0 %v1637_v50 }
  0x51   : > { %1478 = vmatprep.subr.bf16.mxu0 %v1639_v51 }
  0x52   : > { %1557 = vmatpush3.bf16.msra.mxu1 %v1638_v49 }
  0x53   : > { %1558 = vmatprep.subr.bf16.mxu1 %v1641_v53 }
  0x54   : > { %1479 = vmatpush3.bf16.msra.mxu0 %v1640_v52  ;;  %v411_v52 = vld [vmem:[#allocation2 + $0x50] sm:$0xff] }
  0x55   : > { %1480 = vmatprep.subr.bf16.mxu0 %v1642_v54 }
  0x56   : > { %1559 = vmatpush3.bf16.msra.mxu1 %v1641_v53 }
  0x57   : > { %1560 = vmatprep.subr.bf16.mxu1 %v1644_v55 }
  0x58   : > { %1481 = vmatpush3.bf16.msra.mxu0 %v1643_v58 }
  0x5a   : > { %1561 = vmatpush3.bf16.msra.mxu1 %v1644_v55 }
  0x5b   : > { %808 = vmatmul.mubr.bf16.vlgmr.msra.gmra.mxu0 %v1645_v59  ;;  %v412_v59 = vld [vmem:[#allocation2 + $0x68] sm:$0xff] }
  0x5c   : > { %815 = vmatprep.mubr.bf16.mxu0 %v1650_v60 }
  0x5d   : > { %1563 = vmatmul.mubr.bf16.vlgmr.msra.gmra.mxu1 %v1649_v61 }
  0x5e   : > { %1566 = vmatprep.mubr.bf16.mxu1 %v1656_v62 }
  0x63   : > { %816 = vmatmul.mubr.bf16.gmra.mxu0 %v1652_v63 }
  0x64   : > { %823 = vmatprep.mubr.bf16.mxu0 %v1653_v0 }
  0x65   : > { %1567 = vmatmul.mubr.bf16.gmra.mxu1 %v1657_v1  ;;  %v413_v1 = vld [vmem:[#allocation2 + $0x8] sm:$0xff] }
  0x66   : > { %1570 = vmatprep.mubr.bf16.mxu1 %v1664_v2 }
  0x6b   : > { %824 = vmatmul.mubr.bf16.gmra.mxu0 %v1655_v3 }
  0x6c   : > { %831 = vmatprep.mubr.bf16.mxu0 %v1658_v4 }
  0x6d   : > { %1571 = vmatmul.mubr.bf16.gmra.mxu1 %v1665_v5 }
  0x6e   : > { %1574 = vmatprep.mubr.bf16.mxu1 %v1672_v6 }
  0x73   : > { %832 = vmatmul.mubr.bf16.gmra.mxu0 %v1660_v7 }
  0x74   : > { %839 = vmatprep.mubr.bf16.mxu0 %v1661_v8  ;;  %v414_v8 = vld [vmem:[#allocation2 + $0x48] sm:$0xff] }
  0x75   : > { %1575 = vmatmul.mubr.bf16.gmra.mxu1 %v1673_v9 }
  0x7b   : > { %840 = vmatmul.mubr.bf16.gmra.mxu0 %v1663_v10 }
  0x7c   : > { %847 = vmatprep.mubr.bf16.mxu0 %v1666_v11 }
  0x83   : > { %848 = vmatmul.mubr.bf16.gmra.mxu0 %v1668_v12 }
  0x84   : > { %855 = vmatprep.mubr.bf16.mxu0 %v1669_v13 }
  0x8b   : > { %856 = vmatmul.mubr.bf16.gmra.mxu0 %v1671_v14 }
  0x8c   : > { %863 = vmatprep.mubr.bf16.mxu0 %v1674_v15 }
  0x93   : > { %864 = vmatmul.mubr.bf16.gmra.mxu0 %v1676_v16  ;;  %v415_v16 = vld [vmem:[#allocation2 + $0x40] sm:$0xff] }
 0x11b   : > { %v1482_v17 = vpop.f32.mrf.mxu0 }
 0x11d   : > { %v1483_v18 = vpop.f32.mrf.mxu0  ;;  %v1564_v19 = vpop.f32.mrf.mxu1 }
 0x11e   : > { %v1484_v20 = vadd.f32 %v1483_v18, %v1482_v17 }
 0x11f   : > { %v1485_v21 = vpop.f32.mrf.mxu0  ;;  %v906_v23 = vpop.f32.mrf.mxu1 }
 0x120   : > { %v907_v24 = vadd.f32 %v1484_v20, %v906_v23  ;;  %v416_v23 = vld [vmem:[#allocation2 + $0x20] sm:$0xff] }
 0x121   : > { %v1486_v25 = vpop.f32.mrf.mxu0  ;;  %v1565_v26 = vpop.f32.mrf.mxu1 }
 0x122   : > { %v969_v27 = vadd.f32 %v907_v24, %v407_v22  ;;  %v1487_v28 = vadd.f32 %v1486_v25, %v1485_v21 }
 0x123   : > { %v1488_v29 = vpop.f32.mrf.mxu0  ;;  %v909_v31 = vpop.f32.mrf.mxu1 }
 0x124   : > { %985 = vst [vmem:[#allocation2 + $0x30] sm:$0xff] %v969_v27  ;;  %v910_v32 = vadd.f32 %v1487_v28, %v909_v31 }
 0x125   : > { %v1489_v33 = vpop.f32.mrf.mxu0  ;;  %v1568_v34 = vpop.f32.mrf.mxu1 }
 0x126   : > { %v970_v35 = vadd.f32 %v910_v32, %v408_v30  ;;  %v1490_v36 = vadd.f32 %v1489_v33, %v1488_v29  ;;  %v417_v29 = vld [vmem:[#allocation2 + $0x10] sm:$0xff] }
 0x127   : > { %v1491_v38 = vpop.f32.mrf.mxu0  ;;  %v922_v41 = vpop.f32.mrf.mxu1 }
 0x128   : > { %986 = vst [vmem:[#allocation2] sm:$0xff] %v970_v35  ;;  %v915_v39 = vadd.f32 %v1564_v19, %v1490_v36  ;;  %v418_v36 = vld [vmem:[#allocation2 + $0x38] sm:$0xff] }
 0x129   : > { %v1492_v40 = vpop.f32.mrf.mxu0  ;;  %v1569_v48 = vpop.f32.mrf.mxu1 }
 0x12a   : > { %v971_v42 = vadd.f32 %v915_v39, %v409_v37  ;;  %v1493_v43 = vadd.f32 %v1492_v40, %v1491_v38 }
 0x12b   : > { %v1494_v45 = vpop.f32.mrf.mxu0  ;;  %v925_v55 = vpop.f32.mrf.mxu1 }
 0x12c   : > { %987 = vst [vmem:[#allocation2 + $0x58] sm:$0xff] %v971_v42  ;;  %v918_v46 = vadd.f32 %v1565_v26, %v1493_v43 }
 0x12d   : > { %v1495_v47 = vpop.f32.mrf.mxu0  ;;  %v1572_v62 = vpop.f32.mrf.mxu1 }
 0x12e   : > { %v972_v49 = vadd.f32 %v918_v46, %v410_v44  ;;  %v1496_v50 = vadd.f32 %v1495_v47, %v1494_v45  ;;  %v419_v44 = vld [vmem:[#allocation2 + $0x60] sm:$0xff] }
 0x12f   : > { %v1497_v51 = vpop.f32.mrf.mxu0  ;;  %v938_v5 = vpop.f32.mrf.mxu1 }
 0x130   : > { %988 = vst [vmem:[#allocation2 + $0x18] sm:$0xff] %v972_v49  ;;  %v923_v53 = vadd.f32 %v1496_v50, %v922_v41 }
 0x131   : > { %v1498_v54 = vpop.f32.mrf.mxu0  ;;  %v1573_v12 = vpop.f32.mrf.mxu1 }
 0x132   : > { %v973_v56 = vadd.f32 %v923_v53, %v411_v52  ;;  %v1499_v57 = vadd.f32 %v1498_v54, %v1497_v51  ;;  %v420_v51 = vld [vmem:[#allocation2 + $0x70] sm:$0xff] }
 0x133   : > { %v1500_v58 = vpop.f32.mrf.mxu0  ;;  %v941_v19 = vpop.f32.mrf.mxu1 }
 0x134   : > { %989 = vst [vmem:[#allocation2 + $0x50] sm:$0xff] %v973_v56  ;;  %v926_v60 = vadd.f32 %v1499_v57, %v925_v55  ;;  %v421_v56 = vld [vmem:[#allocation2 + $0x78] sm:$0xff] }
 0x135   : > { %v1501_v61 = vpop.f32.mrf.mxu0  ;;  %v1576_v26 = vpop.f32.mrf.mxu1 }
 0x136   : > { %v974_v63 = vadd.f32 %v926_v60, %v412_v59  ;;  %v1502_v0 = vadd.f32 %v1501_v61, %v1500_v58 }
 0x137   : > { %v1503_v2 = vpop.f32.mrf.mxu0  ;;  %v954_v33 = vpop.f32.mrf.mxu1 }
 0x138   : > { %990 = vst [vmem:[#allocation2 + $0x68] sm:$0xff] %v974_v63  ;;  %v931_v3 = vadd.f32 %v1568_v34, %v1502_v0 }
 0x139   : > { %v1504_v4 = vpop.f32.mrf.mxu0  ;;  %v1577_v40 = vpop.f32.mrf.mxu1 }
 0x13a   : > { %v975_v6 = vadd.f32 %v931_v3, %v413_v1  ;;  %v1505_v7 = vadd.f32 %v1504_v4, %v1503_v2 }
 0x13b   : > { %v1506_v9 = vpop.f32.mrf.mxu0  ;;  %v957_v47 = vpop.f32.mrf.mxu1 }
 0x13c   : > { %991 = vst [vmem:[#allocation2 + $0x8] sm:$0xff] %v975_v6  ;;  %v934_v10 = vadd.f32 %v1569_v48, %v1505_v7 }
 0x13d   : > { %v1507_v11 = vpop.f32.mrf.mxu0 }
 0x13e   : > { %v976_v13 = vadd.f32 %v934_v10, %v414_v8  ;;  %v1508_v14 = vadd.f32 %v1507_v11, %v1506_v9 }
 0x13f   : > { %v1509_v15 = vpop.f32.mrf.mxu0 }
 0x140   : > { %992 = vst [vmem:[#allocation2 + $0x48] sm:$0xff] %v976_v13  ;;  %v939_v17 = vadd.f32 %v1508_v14, %v938_v5 }
 0x141   : > { %v1510_v18 = vpop.f32.mrf.mxu0 }
 0x142   : > { %v977_v20 = vadd.f32 %v939_v17, %v415_v16  ;;  %v1511_v21 = vadd.f32 %v1510_v18, %v1509_v15 }
 0x143   : > { %v1512_v22 = vpop.f32.mrf.mxu0 }
 0x144   : > { %993 = vst [vmem:[#allocation2 + $0x40] sm:$0xff] %v977_v20  ;;  %v942_v24 = vadd.f32 %v1511_v21, %v941_v19 }
 0x145   : > { %v1513_v25 = vpop.f32.mrf.mxu0 }
 0x146   : > { %v978_v27 = vadd.f32 %v942_v24, %v416_v23  ;;  %v1514_v28 = vadd.f32 %v1513_v25, %v1512_v22 }
 0x147   : > { %v1515_v30 = vpop.f32.mrf.mxu0 }
 0x148   : > { %994 = vst [vmem:[#allocation2 + $0x20] sm:$0xff] %v978_v27  ;;  %v947_v31 = vadd.f32 %v1572_v62, %v1514_v28  ;;  %v422_v62 = vld [vmem:[#allocation2 + $0x28] sm:$0xff] }
 0x149   : > { %v1516_v32 = vpop.f32.mrf.mxu0 }
 0x14a   : > { %v979_v34 = vadd.f32 %v947_v31, %v417_v29  ;;  %v1517_v35 = vadd.f32 %v1516_v32, %v1515_v30 }
 0x14b   : > { %v1518_v37 = vpop.f32.mrf.mxu0 }
 0x14c   : > { %995 = vst [vmem:[#allocation2 + $0x10] sm:$0xff] %v979_v34  ;;  %v950_v38 = vadd.f32 %v1573_v12, %v1517_v35 }
 0x14d   : > { %v1519_v39 = vpop.f32.mrf.mxu0 }
 0x14e   : > { %v980_v41 = vadd.f32 %v950_v38, %v418_v36  ;;  %v1520_v42 = vadd.f32 %v1519_v39, %v1518_v37 }
 0x14f   : > { %v1521_v43 = vpop.f32.mrf.mxu0 }
 0x150   : > { %996 = vst [vmem:[#allocation2 + $0x38] sm:$0xff] %v980_v41  ;;  %v955_v45 = vadd.f32 %v1520_v42, %v954_v33 }
 0x151   : > { %v1522_v46 = vpop.f32.mrf.mxu0 }
 0x152   : > { %v981_v48 = vadd.f32 %v955_v45, %v419_v44  ;;  %v1523_v49 = vadd.f32 %v1522_v46, %v1521_v43 }
 0x153   : > { %v1524_v50 = vpop.f32.mrf.mxu0 }
 0x154   : > { %997 = vst [vmem:[#allocation2 + $0x60] sm:$0xff] %v981_v48  ;;  %v958_v52 = vadd.f32 %v1523_v49, %v957_v47 }
 0x155   : > { %v1525_v53 = vpop.f32.mrf.mxu0 }
 0x156   : > { %v982_v54 = vadd.f32 %v958_v52, %v420_v51  ;;  %v1526_v55 = vadd.f32 %v1525_v53, %v1524_v50 }
 0x157   : > { %v1527_v57 = vpop.f32.mrf.mxu0 }
 0x158   : > { %998 = vst [vmem:[#allocation2 + $0x70] sm:$0xff] %v982_v54  ;;  %v963_v58 = vadd.f32 %v1576_v26, %v1526_v55 }
 0x159   : > { %v1528_v59 = vpop.f32.mrf.mxu0 }
 0x15a   : > { %v983_v60 = vadd.f32 %v963_v58, %v421_v56  ;;  %v1529_v61 = vadd.f32 %v1528_v59, %v1527_v57 }
 0x15c   : > { %999 = vst [vmem:[#allocation2 + $0x78] sm:$0xff] %v983_v60  ;;  %v966_v63 = vadd.f32 %v1577_v40, %v1529_v61  ;;  %1004 = sbr.rel (%p1379_p11) target bundleno = 375 (0x177), region = 70 }
 0x15e   : > { %v984_v0 = vadd.f32 %v966_v63, %v422_v62 }
 0x160   : > { %1000 = vst [vmem:[#allocation2 + $0x28] sm:$0xff] %v984_v0 }
 0x161   : > { %v1005_v1 = vld [vmem:[#allocation2 + $0x30] sm:$0xff]  ;;  %v1006_v2 = vld [vmem:[#allocation2] sm:$0xff]  ;;  %v1007_v7 = vld [vmem:[#allocation2 + $0x58] sm:$0xff] }
 0x162   : > { %v1918_v3 = vld [vmem:[%s1998_s2] ss:$0 sm:$0xff]  ;;  %v1008_v8 = vld [vmem:[#allocation2 + $0x18] sm:$0xff]  ;;  %v1009_v11 = vld [vmem:[#allocation2 + $0x50] sm:$0xff] }
 0x163   : > { %v1028_v4 = vmul.f32 %v1918_v3, %v1005_v1  ;;  %v1029_v5 = vmul.f32 %v1918_v3, %v1006_v2  ;;  %v1925_v6 = vld [vmem:[%s1999_s3] ss:$0 sm:$0xff]  ;;  %v1030_v9 = vmul.f32 %v1918_v3, %v1007_v7  ;;  %v1031_v10 = vmul.f32 %v1918_v3, %v1008_v8  ;;  %v1010_v12 = vld [vmem:[#allocation2 + $0x68] sm:$0xff]  ;;  %v1015_v33 = vld [vmem:[#allocation2 + $0x10] sm:$0xff] }
 0x164   : > { %v1011_v13 = vld [vmem:[#allocation2 + $0x8] sm:$0xff]  ;;  %v1032_v16 = vmul.f32 %v1918_v3, %v1009_v11  ;;  %v1033_v17 = vmul.f32 %v1918_v3, %v1010_v12  ;;  %v1013_v23 = vld [vmem:[#allocation2 + $0x40] sm:$0xff]  ;;  %v1016_v34 = vld [vmem:[#allocation2 + $0x38] sm:$0xff]  ;;  %v1038_v48 = vmul.f32 %v1918_v3, %v1015_v33 }
 0x165   : > { %v1051_v14 = vadd.f32 %v1925_v6, %v1028_v4  ;;  %v1052_v15 = vadd.f32 %v1925_v6, %v1029_v5  ;;  %v1012_v18 = vld [vmem:[#allocation2 + $0x48] sm:$0xff]  ;;  %v1053_v19 = vadd.f32 %v1925_v6, %v1030_v9  ;;  %v1054_v20 = vadd.f32 %v1925_v6, %v1031_v10  ;;  %v1014_v28 = vld [vmem:[#allocation2 + $0x20] sm:$0xff]  ;;  %v1018_v40 = vld [vmem:[#allocation2 + $0x70] sm:$0xff] }
 0x166   : > { %v1034_v21 = vmul.f32 %v1918_v3, %v1011_v13  ;;  %v1035_v22 = vmul.f32 %v1918_v3, %v1012_v18  ;;  %v1055_v26 = vadd.f32 %v1925_v6, %v1032_v16  ;;  %v1056_v27 = vadd.f32 %v1925_v6, %v1033_v17  ;;  %v1017_v39 = vld [vmem:[#allocation2 + $0x60] sm:$0xff]  ;;  %v1019_v45 = vld [vmem:[#allocation2 + $0x78] sm:$0xff] }
 0x167   : > { %v1067_v24 = vmax.f32 %v1051_v14, 0.0  ;;  %v1068_v25 = vmax.f32 %v1052_v15, 0.0  ;;  %v1069_v29 = vmax.f32 %v1053_v19, 0.0  ;;  %v1070_v30 = vmax.f32 %v1054_v20, 0.0  ;;  %v1020_v50 = vld [vmem:[#allocation2 + $0x28] sm:$0xff] }
 0x168   : > { %v1057_v31 = vadd.f32 %v1925_v6, %v1034_v21  ;;  %v1058_v32 = vadd.f32 %v1925_v6, %v1035_v22  ;;  %v1071_v36 = vmax.f32 %v1055_v26, 0.0  ;;  %v1072_v37 = vmax.f32 %v1056_v27, 0.0 }
 0x169   : > { %v1422_v35 = vpack.c.bf16 %v1068_v25, %v1067_v24  ;;  %v1036_v38 = vmul.f32 %v1918_v3, %v1013_v23  ;;  %v1427_v41 = vpack.c.bf16 %v1070_v30, %v1069_v29  ;;  %v1037_v44 = vmul.f32 %v1918_v3, %v1014_v28 }
 0x16a   : > { %v1073_v42 = vmax.f32 %v1057_v31, 0.0  ;;  %v1074_v43 = vmax.f32 %v1058_v32, 0.0  ;;  %v1432_v46 = vpack.c.bf16 %v1072_v37, %v1071_v36  ;;  %v1039_v49 = vmul.f32 %v1918_v3, %v1016_v34 }
 0x16b   : > { %1423 = vst [vmem:[%s2000_s4] sm:$0xff] %v1422_v35   ;;  %v1059_v47 = vadd.f32 %v1925_v6, %v1036_v38  ;;  %1459 = vst [vmem:[%s2000_s4 + $0x8] sm:$0xff] %v1427_v41   ;;  %v1060_v52 = vadd.f32 %v1925_v6, %v1037_v44  ;;  %v1040_v53 = vmul.f32 %v1918_v3, %v1017_v39 }
 0x16c   : > { %v1437_v51 = vpack.c.bf16 %v1074_v43, %v1073_v42  ;;  %v1041_v54 = vmul.f32 %v1918_v3, %v1018_v40  ;;  %1460 = vst [vmem:[%s2000_s4 + $0x10] sm:$0xff] %v1432_v46   ;;  %v1061_v56 = vadd.f32 %v1925_v6, %v1038_v48  ;;  %v1062_v57 = vadd.f32 %v1925_v6, %v1039_v49 }
 0x16d   : > { %v1075_v55 = vmax.f32 %v1059_v47, 0.0  ;;  %v1042_v58 = vmul.f32 %v1918_v3, %v1019_v45  ;;  %v1076_v59 = vmax.f32 %v1060_v52, 0.0  ;;  %v1063_v60 = vadd.f32 %v1925_v6, %v1040_v53 }
 0x16e   : > { %1461 = vst [vmem:[%s2000_s4 + $0x18] sm:$0xff] %v1437_v51   ;;  %v1064_v61 = vadd.f32 %v1925_v6, %v1041_v54  ;;  %v1043_v62 = vmul.f32 %v1918_v3, %v1020_v50  ;;  %v1077_v63 = vmax.f32 %v1061_v56, 0.0  ;;  %v1078_v0 = vmax.f32 %v1062_v57, 0.0 }
 0x16f   : > { %v1065_v1 = vadd.f32 %v1925_v6, %v1042_v58  ;;  %v1442_v2 = vpack.c.bf16 %v1076_v59, %v1075_v55  ;;  %v1079_v4 = vmax.f32 %v1063_v60, 0.0 }
 0x170   : > { %v1080_v5 = vmax.f32 %v1064_v61, 0.0  ;;  %v1066_v7 = vadd.f32 %v1925_v6, %v1043_v62  ;;  %v1447_v8 = vpack.c.bf16 %v1078_v0, %v1077_v63 }
 0x171   : > { %v1081_v9 = vmax.f32 %v1065_v1, 0.0  ;;  %1462 = vst [vmem:[%s2000_s4 + $0x20] sm:$0xff] %v1442_v2  }
 0x172   : > { %v1452_v10 = vpack.c.bf16 %v1080_v5, %v1079_v4  ;;  %v1082_v11 = vmax.f32 %v1066_v7, 0.0  ;;  %1463 = vst [vmem:[%s2000_s4 + $0x28] sm:$0xff] %v1447_v8  }
 0x174   : > { %1464 = vst [vmem:[%s2000_s4 + $0x30] sm:$0xff] %v1452_v10   ;;  %v1457_v3 = vpack.c.bf16 %v1082_v11, %v1081_v9 }
 0x176   : > { %1465 = vst [vmem:[%s2000_s4 + $0x38] sm:$0xff] %v1457_v3  }
 0x177 PF: > { %s14_s19 = sadd.s32 1, %s1715_s19   ;;  %s2001_s15 = smov %s1703_s16 }
 0x178   : > { %p11_p12 = scmp.ge.s32.totalorder %s14_s19, 5   ;;  %s2002_s16 = smov %s1778_s23 }
 0x179   : > { %s2003_s17 = smov %s1711_s18  ;;  %s2004_s18 = smov %s2006_s20 }
 0x17a   :  { %13 = sbr.rel (!%p11_p12) target bundleno = 3 (0x3), region = 120 }

// kernel: resnet_forward.49
= control target key start
LH: loop header
LB: loop body
LE: loop exit
PB: predicated region body
PF: predicated region fallthrough
CT: control target
= control target key end

     0   :  { %v715_v1 = vmov 0   ;;  %v296_v25 = vlaneseq  ;;  %s1116_s1 = inlined_call_operand.vmem [shape: bf16[128,256], index: 1, kind: input, shape index: {}]   ;;  %s1117_s0 = inlined_call_operand.vmem [shape: bf16[128,128], index: 0, kind: input, shape index: {}]   ;;  %s1118_s2 = inlined_call_operand.vmem [shape: f32[1,256], index: 2, kind: input, shape index: {}]   ;;  %s1119_s3 = inlined_call_operand.vmem [shape: f32[1,256], index: 3, kind: input, shape index: {}]   ;;  %s1120_s4 = inlined_call_operand.vmem [shape: bf16[128,256], index: 4, kind: input, shape index: {}]   ;;  %s1121_s5 = inlined_call_operand.vmem [shape: bf16[128,256], index: 5, kind: output, shape index: {}]  }
   0x1   :  { %v683_v0 = vld [vmem:[%s1116_s1 + $0x74] ss:$8 sps:$4 sm:$0xff]   ;;  %213 = vmatprep.mubr.bf16.mxu0 %v715_v1  ;;  %253 = vmatprep.mubr.bf16.mxu1 %v715_v1  ;;  %v685_v2 = vld [vmem:[%s1116_s1 + $0x70] ss:$8 sps:$4 sm:$0xff]   ;;  %v686_v3 = vld [vmem:[%s1116_s1 + $0x64] ss:$8 sps:$4 sm:$0xff]  }
   0x2   :  { %181 = vmatprep.subr.bf16.mxu0 %v683_v0  ;;  %666 = vmatprep.subr.bf16.mxu1 %v683_v0  ;;  %v688_v4 = vld [vmem:[%s1116_s1 + $0x60] ss:$8 sps:$4 sm:$0xff]   ;;  %v689_v5 = vld [vmem:[%s1116_s1 + $0x54] ss:$8 sps:$4 sm:$0xff]   ;;  %v691_v6 = vld [vmem:[%s1116_s1 + $0x50] ss:$8 sps:$4 sm:$0xff]  }
   0x3   :  { %182 = vmatpush1.bf16.msra.mxu0 %v685_v2  ;;  %674 = vmatpush1.bf16.msra.mxu1 %v685_v2  ;;  %v692_v7 = vld [vmem:[%s1116_s1 + $0x44] ss:$8 sps:$4 sm:$0xff]   ;;  %v694_v8 = vld [vmem:[%s1116_s1 + $0x40] ss:$8 sps:$4 sm:$0xff]   ;;  %v695_v9 = vld [vmem:[%s1116_s1 + $0x34] ss:$8 sps:$4 sm:$0xff]  }
   0x4   :  { %183 = vmatprep.subr.bf16.mxu0 %v686_v3  ;;  %667 = vmatprep.subr.bf16.mxu1 %v686_v3  ;;  %v697_v10 = vld [vmem:[%s1116_s1 + $0x30] ss:$8 sps:$4 sm:$0xff]   ;;  %v698_v11 = vld [vmem:[%s1116_s1 + $0x24] ss:$8 sps:$4 sm:$0xff]   ;;  %v700_v12 = vld [vmem:[%s1116_s1 + $0x20] ss:$8 sps:$4 sm:$0xff]  }
   0x5   :  { %v701_v13 = vld [vmem:[%s1116_s1 + $0x14] ss:$8 sps:$4 sm:$0xff]   ;;  %v703_v14 = vld [vmem:[%s1116_s1 + $0x10] ss:$8 sps:$4 sm:$0xff]   ;;  %v704_v15 = vld [vmem:[%s1116_s1 + $0x4] ss:$8 sps:$4 sm:$0xff]  }
   0x6   :  { %v706_v16 = vld [vmem:[%s1116_s1] ss:$8 sps:$4 sm:$0xff]   ;;  %v711_v21 = vld [vmem:[%s1117_s0 + $0x10] sm:$0xff]   ;;  %v713_v23 = vld [vmem:[%s1117_s0 + $0x18] sm:$0xff]   ;;  %v297_v26 = vshrl.u32 %v296_v25, 7 }
   0x7   :  { %184 = vmatpush1.bf16.msra.mxu0 %v688_v4  ;;  %675 = vmatpush1.bf16.msra.mxu1 %v688_v4  ;;  %v707_v17 = vld [vmem:[%s1117_s0] sm:$0xff]   ;;  %v709_v19 = vld [vmem:[%s1117_s0 + $0x8] sm:$0xff]   ;;  %v712_v22 = vld [vmem:[%s1117_s0 + $0x30] sm:$0xff]  }
   0x8   :  { %185 = vmatprep.subr.bf16.mxu0 %v689_v5  ;;  %668 = vmatprep.subr.bf16.mxu1 %v689_v5  ;;  %v708_v18 = vld [vmem:[%s1117_s0 + $0x20] sm:$0xff]   ;;  %v710_v20 = vld [vmem:[%s1117_s0 + $0x28] sm:$0xff]   ;;  %v714_v24 = vld [vmem:[%s1117_s0 + $0x38] sm:$0xff]   ;;  %v298_v27 = vsub.s32 0, %v297_v26  ;;  %v302_v30 = vsub.s32 1, %v297_v26 }
   0x9   :  { %v294_v28 = vld [vmem:[%s1118_s2] sm:$0x3]  ;;  %v845_v33 = vld [vmem:[%s1120_s4 + $0x8] sm:$0xff]  ;;  %v859_v37 = vld [vmem:[%s1120_s4 + $0x10] sm:$0xff] }
   0xa   :  { %v338_v29 = vld [vmem:[%s1119_s3] sm:$0x3]  ;;  %v850_v34 = vld [vmem:[%s1120_s4 + $0x48] sm:$0xff]  ;;  %v852_v35 = vrot.slane %v294_v28, %v298_v27  ;;  %v864_v38 = vld [vmem:[%s1120_s4 + $0x50] sm:$0xff]  ;;  %v868_v41 = vrot.slane %v294_v28, %v302_v30  ;;  %v400_v47 = vunpack.c.l.bf16 %v845_v33  ;;  %v401_v51 = vunpack.c.h.bf16 %v845_v33 }
   0xb   :  { %186 = vmatpush1.bf16.msra.mxu0 %v691_v6  ;;  %676 = vmatpush1.bf16.msra.mxu1 %v691_v6  ;;  %v835_v31 = vld [vmem:[%s1120_s4] sm:$0xff]  ;;  %v854_v36 = vrot.slane %v338_v29, %v298_v27  ;;  %v870_v42 = vrot.slane %v338_v29, %v302_v30  ;;  %v875_v43 = vld [vmem:[%s1120_s4 + $0x18] sm:$0xff]  ;;  %v416_v48 = vunpack.c.l.bf16 %v850_v34  ;;  %v417_v52 = vunpack.c.h.bf16 %v850_v34  ;;  %v907_v59 = vld [vmem:[%s1120_s4 + $0x28] sm:$0xff] }
   0xc   :  { %187 = vmatprep.subr.bf16.mxu0 %v692_v7  ;;  %669 = vmatprep.subr.bf16.mxu1 %v692_v7  ;;  %v840_v32 = vld [vmem:[%s1120_s4 + $0x40] sm:$0xff]  ;;  %v398_v39 = vunpack.c.l.bf16 %v835_v31  ;;  %v880_v44 = vld [vmem:[%s1120_s4 + $0x58] sm:$0xff]  ;;  %v399_v45 = vunpack.c.h.bf16 %v835_v31  ;;  %v402_v53 = vunpack.c.l.bf16 %v859_v37  ;;  %v418_v54 = vunpack.c.l.bf16 %v864_v38  ;;  %v912_v60 = vld [vmem:[%s1120_s4 + $0x68] sm:$0xff] }
   0xd   :  { %v414_v40 = vunpack.c.l.bf16 %v840_v32  ;;  %v415_v46 = vunpack.c.h.bf16 %v840_v32  ;;  %v889_v49 = vld [vmem:[%s1120_s4 + $0x20] sm:$0xff]  ;;  %v403_v55 = vunpack.c.h.bf16 %v859_v37  ;;  %v419_v56 = vunpack.c.h.bf16 %v864_v38  ;;  %v925_v7 = vld [vmem:[%s1120_s4 + $0x30] sm:$0xff] }
   0xe   :  { %v894_v50 = vld [vmem:[%s1120_s4 + $0x60] sm:$0xff]  ;;  %v404_v57 = vunpack.c.l.bf16 %v875_v43  ;;  %v420_v58 = vunpack.c.l.bf16 %v880_v44  ;;  %v405_v63 = vunpack.c.h.bf16 %v875_v43  ;;  %v421_v0 = vunpack.c.h.bf16 %v880_v44 }
   0xf   :  { %188 = vmatpush1.bf16.msra.mxu0 %v694_v8  ;;  %677 = vmatpush1.bf16.msra.mxu1 %v694_v8  ;;  %v422_v2 = vunpack.c.l.bf16 %v894_v50  ;;  %v407_v5 = vunpack.c.h.bf16 %v889_v49  ;;  %v423_v6 = vunpack.c.h.bf16 %v894_v50  ;;  %v930_v8 = vld [vmem:[%s1120_s4 + $0x70] sm:$0xff] }
  0x10   :  { %189 = vmatprep.subr.bf16.mxu0 %v695_v9  ;;  %670 = vmatprep.subr.bf16.mxu1 %v695_v9 }
  0x13   :  { %190 = vmatpush1.bf16.msra.mxu0 %v697_v10  ;;  %678 = vmatpush1.bf16.msra.mxu1 %v697_v10 }
  0x14   :  { %191 = vmatprep.subr.bf16.mxu0 %v698_v11  ;;  %671 = vmatprep.subr.bf16.mxu1 %v698_v11  ;;  %v408_v11 = vunpack.c.l.bf16 %v907_v59 }
  0x17   :  { %192 = vmatpush1.bf16.msra.mxu0 %v700_v12  ;;  %679 = vmatpush1.bf16.msra.mxu1 %v700_v12  ;;  %v424_v12 = vunpack.c.l.bf16 %v912_v60 }
  0x18   :  { %193 = vmatprep.subr.bf16.mxu0 %v701_v13  ;;  %672 = vmatprep.subr.bf16.mxu1 %v701_v13  ;;  %v409_v13 = vunpack.c.h.bf16 %v907_v59 }
  0x1b   :  { %194 = vmatpush1.bf16.msra.mxu0 %v703_v14  ;;  %680 = vmatpush1.bf16.msra.mxu1 %v703_v14  ;;  %v425_v14 = vunpack.c.h.bf16 %v912_v60 }
  0x1c   :  { %195 = vmatprep.subr.bf16.mxu0 %v704_v15  ;;  %673 = vmatprep.subr.bf16.mxu1 %v704_v15 }
  0x1f   :  { %196 = vmatpush1.bf16.msra.mxu0 %v706_v16  ;;  %681 = vmatpush1.bf16.msra.mxu1 %v706_v16 }
  0x22   :  { %214 = vmatmul.mubr.bf16.vlgmr.msra.gmra.mxu0 %v707_v17  ;;  %254 = vmatmul.mubr.bf16.vlgmr.msra.gmra.mxu1 %v708_v18 }
  0x23   :  { %223 = vmatprep.mubr.bf16.mxu0 %v715_v1  ;;  %263 = vmatprep.mubr.bf16.mxu1 %v715_v1 }
  0x2a   :  { %224 = vmatmul.mubr.bf16.gmra.mxu0 %v709_v19  ;;  %264 = vmatmul.mubr.bf16.gmra.mxu1 %v710_v20  ;;  %v943_v19 = vld [vmem:[%s1120_s4 + $0x38] sm:$0xff] }
  0x2b   :  { %233 = vmatprep.mubr.bf16.mxu0 %v715_v1  ;;  %273 = vmatprep.mubr.bf16.mxu1 %v715_v1  ;;  %v948_v20 = vld [vmem:[%s1120_s4 + $0x78] sm:$0xff] }
  0x32   :  { %234 = vmatmul.mubr.bf16.gmra.mxu0 %v711_v21  ;;  %274 = vmatmul.mubr.bf16.gmra.mxu1 %v712_v22 }
  0x33   :  { %243 = vmatprep.mubr.bf16.mxu0 %v715_v1  ;;  %283 = vmatprep.mubr.bf16.mxu1 %v715_v1  ;;  %v406_v1 = vunpack.c.l.bf16 %v889_v49 }
  0x3a   :  { %244 = vmatmul.mubr.bf16.gmra.mxu0 %v713_v23  ;;  %284 = vmatmul.mubr.bf16.gmra.mxu1 %v714_v24  ;;  %v410_v23 = vunpack.c.l.bf16 %v925_v7  ;;  %v426_v24 = vunpack.c.l.bf16 %v930_v8 }
  0xe2   :  { %v215_v61 = vpop.f32.mrf.mxu0  ;;  %v255_v62 = vpop.f32.mrf.mxu1 }
  0xe3   :  { %v306_v3 = vmul.f32 %v852_v35, %v215_v61  ;;  %v322_v4 = vmul.f32 %v852_v35, %v255_v62 }
  0xe4   :  { %v217_v9 = vpop.f32.mrf.mxu0  ;;  %v257_v10 = vpop.f32.mrf.mxu1 }
  0xe5   :  { %v350_v15 = vadd.f32 %v854_v36, %v306_v3  ;;  %v366_v16 = vadd.f32 %v854_v36, %v322_v4  ;;  %v307_v17 = vmul.f32 %v868_v41, %v217_v9  ;;  %v323_v18 = vmul.f32 %v868_v41, %v257_v10 }
  0xe6   :  { %v219_v21 = vpop.f32.mrf.mxu0  ;;  %v259_v22 = vpop.f32.mrf.mxu1 }
  0xe7   :  { %v430_v27 = vadd.f32 %v398_v39, %v350_v15  ;;  %v446_v28 = vadd.f32 %v414_v40, %v366_v16  ;;  %v351_v29 = vadd.f32 %v870_v42, %v307_v17  ;;  %v367_v30 = vadd.f32 %v870_v42, %v323_v18 }
  0xe8   :  { %v308_v31 = vmul.f32 %v852_v35, %v219_v21  ;;  %v324_v32 = vmul.f32 %v852_v35, %v259_v22  ;;  %v221_v61 = vpop.f32.mrf.mxu0  ;;  %v261_v62 = vpop.f32.mrf.mxu1 }
  0xe9   :  { %v462_v9 = vmax.f32 %v430_v27, 0.0  ;;  %v478_v10 = vmax.f32 %v446_v28, 0.0  ;;  %v431_v25 = vadd.f32 %v399_v45, %v351_v29  ;;  %v447_v26 = vadd.f32 %v415_v46, %v367_v30 }
  0xea   :  { %v352_v39 = vadd.f32 %v854_v36, %v308_v31  ;;  %v368_v40 = vadd.f32 %v854_v36, %v324_v32  ;;  %v309_v15 = vmul.f32 %v868_v41, %v221_v61  ;;  %v325_v16 = vmul.f32 %v868_v41, %v261_v62  ;;  %v225_v17 = vpop.f32.mrf.mxu0  ;;  %v265_v18 = vpop.f32.mrf.mxu1 }
  0xeb   :  { %v463_v21 = vmax.f32 %v431_v25, 0.0  ;;  %v479_v22 = vmax.f32 %v447_v26, 0.0  ;;  %v310_v3 = vmul.f32 %v852_v35, %v225_v17  ;;  %v326_v4 = vmul.f32 %v852_v35, %v265_v18 }
  0xec   :  { %v432_v45 = vadd.f32 %v400_v47, %v352_v39  ;;  %v448_v46 = vadd.f32 %v416_v48, %v368_v40  ;;  %v353_v27 = vadd.f32 %v870_v42, %v309_v15  ;;  %v369_v28 = vadd.f32 %v870_v42, %v325_v16  ;;  %v227_v29 = vpop.f32.mrf.mxu0  ;;  %v267_v30 = vpop.f32.mrf.mxu1 }
  0xed   :  { %v650_v31 = vpack.c.bf16 %v463_v21, %v462_v9  ;;  %v658_v32 = vpack.c.bf16 %v479_v22, %v478_v10  ;;  %v354_v25 = vadd.f32 %v854_v36, %v310_v3  ;;  %v370_v26 = vadd.f32 %v854_v36, %v326_v4 }
  0xee   :  { %v464_v61 = vmax.f32 %v432_v45, 0.0  ;;  %v480_v62 = vmax.f32 %v448_v46, 0.0  ;;  %v433_v47 = vadd.f32 %v401_v51, %v353_v27  ;;  %v449_v48 = vadd.f32 %v417_v52, %v369_v28  ;;  %v229_v39 = vpop.f32.mrf.mxu0  ;;  %v269_v40 = vpop.f32.mrf.mxu1 }
  0xef   :  { %590 = vst [vmem:[%s1121_s5] sm:$0xff] %v650_v31  ;;  %598 = vst [vmem:[%s1121_s5 + $0x40] sm:$0xff] %v658_v32  ;;  %v434_v3 = vadd.f32 %v402_v53, %v354_v25  ;;  %v450_v33 = vadd.f32 %v418_v54, %v370_v26  ;;  %v311_v51 = vmul.f32 %v868_v41, %v227_v29 }
  0xf0   :  { %v327_v34 = vmul.f32 %v868_v41, %v267_v30  ;;  %v465_v52 = vmax.f32 %v433_v47, 0.0  ;;  %v481_v4 = vmax.f32 %v449_v48, 0.0  ;;  %v312_v9 = vmul.f32 %v852_v35, %v229_v39  ;;  %v231_v15 = vpop.f32.mrf.mxu0  ;;  %v271_v16 = vpop.f32.mrf.mxu1 }
  0xf1   :  { %v328_v10 = vmul.f32 %v852_v35, %v269_v40  ;;  %v466_v17 = vmax.f32 %v434_v3, 0.0  ;;  %v482_v18 = vmax.f32 %v450_v33, 0.0  ;;  %v355_v21 = vadd.f32 %v870_v42, %v311_v51 }
  0xf2   :  { %v371_v53 = vadd.f32 %v870_v42, %v327_v34  ;;  %v651_v22 = vpack.c.bf16 %v465_v52, %v464_v61  ;;  %v659_v54 = vpack.c.bf16 %v481_v4, %v480_v62  ;;  %v356_v45 = vadd.f32 %v854_v36, %v312_v9  ;;  %v235_v27 = vpop.f32.mrf.mxu0  ;;  %v275_v28 = vpop.f32.mrf.mxu1 }
  0xf3   :  { %v372_v46 = vadd.f32 %v854_v36, %v328_v10  ;;  %v435_v29 = vadd.f32 %v403_v55, %v355_v21  ;;  %v313_v31 = vmul.f32 %v868_v41, %v231_v15  ;;  %v329_v32 = vmul.f32 %v868_v41, %v271_v16 }
  0xf4   :  { %v451_v30 = vadd.f32 %v419_v56, %v371_v53  ;;  %591 = vst [vmem:[%s1121_s5 + $0x8] sm:$0xff] %v651_v22  ;;  %599 = vst [vmem:[%s1121_s5 + $0x48] sm:$0xff] %v659_v54  ;;  %v436_v25 = vadd.f32 %v404_v57, %v356_v45  ;;  %v314_v38 = vmul.f32 %v852_v35, %v235_v27  ;;  %v237_v56 = vpop.f32.mrf.mxu0  ;;  %v277_v26 = vpop.f32.mrf.mxu1 }
  0xf5   :  { %v452_v37 = vadd.f32 %v420_v58, %v372_v46  ;;  %v330_v55 = vmul.f32 %v852_v35, %v275_v28  ;;  %v467_v61 = vmax.f32 %v435_v29, 0.0  ;;  %v357_v47 = vadd.f32 %v870_v42, %v313_v31 }
  0xf6   :  { %v483_v62 = vmax.f32 %v451_v30, 0.0  ;;  %v373_v48 = vadd.f32 %v870_v42, %v329_v32  ;;  %v468_v39 = vmax.f32 %v436_v25, 0.0  ;;  %v358_v3 = vadd.f32 %v854_v36, %v314_v38  ;;  %v239_v33 = vpop.f32.mrf.mxu0  ;;  %v279_v58 = vpop.f32.mrf.mxu1 }
  0xf7   :  { %v484_v40 = vmax.f32 %v452_v37, 0.0  ;;  %v374_v57 = vadd.f32 %v854_v36, %v330_v55  ;;  %v652_v51 = vpack.c.bf16 %v467_v61, %v466_v17  ;;  %v437_v52 = vadd.f32 %v405_v63, %v357_v47 }
  0xf8   :  { %v660_v34 = vpack.c.bf16 %v483_v62, %v482_v18  ;;  %v453_v4 = vadd.f32 %v421_v0, %v373_v48  ;;  %v438_v9 = vadd.f32 %v406_v1, %v358_v3  ;;  %v315_v15 = vmul.f32 %v868_v41, %v237_v56  ;;  %v241_v21 = vpop.f32.mrf.mxu0  ;;  %v281_v53 = vpop.f32.mrf.mxu1 }
  0xf9   :  { %v454_v10 = vadd.f32 %v422_v2, %v374_v57  ;;  %v331_v16 = vmul.f32 %v868_v41, %v277_v26  ;;  %592 = vst [vmem:[%s1121_s5 + $0x10] sm:$0xff] %v652_v51  ;;  %v469_v43 = vmax.f32 %v437_v52, 0.0  ;;  %v316_v63 = vmul.f32 %v852_v35, %v239_v33 }
  0xfa   :  { %600 = vst [vmem:[%s1121_s5 + $0x50] sm:$0xff] %v660_v34  ;;  %v485_v44 = vmax.f32 %v453_v4, 0.0  ;;  %v332_v0 = vmul.f32 %v852_v35, %v279_v58  ;;  %v470_v1 = vmax.f32 %v438_v9, 0.0  ;;  %v359_v17 = vadd.f32 %v870_v42, %v315_v15  ;;  %v245_v22 = vpop.f32.mrf.mxu0  ;;  %v285_v54 = vpop.f32.mrf.mxu1 }
  0xfb   :  { %v486_v2 = vmax.f32 %v454_v10, 0.0  ;;  %v375_v18 = vadd.f32 %v870_v42, %v331_v16  ;;  %v653_v45 = vpack.c.bf16 %v469_v43, %v468_v39  ;;  %v360_v27 = vadd.f32 %v854_v36, %v316_v63 }
  0xfc   :  { %v661_v46 = vpack.c.bf16 %v485_v44, %v484_v40  ;;  %v376_v28 = vadd.f32 %v854_v36, %v332_v0  ;;  %v439_v29 = vadd.f32 %v407_v5, %v359_v17  ;;  %v317_v31 = vmul.f32 %v868_v41, %v241_v21  ;;  %v247_v25 = vpop.f32.mrf.mxu0  ;;  %v287_v37 = vpop.f32.mrf.mxu1 }
  0xfd   :  { %v455_v30 = vadd.f32 %v423_v6, %v375_v18  ;;  %v333_v32 = vmul.f32 %v868_v41, %v281_v53  ;;  %593 = vst [vmem:[%s1121_s5 + $0x18] sm:$0xff] %v653_v45  ;;  %v440_v49 = vadd.f32 %v408_v11, %v360_v27  ;;  %v318_v5 = vmul.f32 %v852_v35, %v245_v22 }
  0xfe   :  { %601 = vst [vmem:[%s1121_s5 + $0x58] sm:$0xff] %v661_v46  ;;  %v456_v50 = vadd.f32 %v424_v12, %v376_v28  ;;  %v334_v6 = vmul.f32 %v852_v35, %v285_v54  ;;  %v471_v38 = vmax.f32 %v439_v29, 0.0  ;;  %v361_v56 = vadd.f32 %v870_v42, %v317_v31  ;;  %v249_v61 = vpop.f32.mrf.mxu0  ;;  %v289_v62 = vpop.f32.mrf.mxu1 }
  0xff   :  { %v487_v55 = vmax.f32 %v455_v30, 0.0  ;;  %v377_v26 = vadd.f32 %v870_v42, %v333_v32  ;;  %v472_v47 = vmax.f32 %v440_v49, 0.0  ;;  %v362_v39 = vadd.f32 %v854_v36, %v318_v5 }
 0x100   :  { %v488_v48 = vmax.f32 %v456_v50, 0.0  ;;  %v378_v11 = vadd.f32 %v854_v36, %v334_v6  ;;  %v654_v40 = vpack.c.bf16 %v471_v38, %v470_v1  ;;  %v441_v3 = vadd.f32 %v409_v13, %v361_v56 }
 0x101   :  { %v662_v12 = vpack.c.bf16 %v487_v55, %v486_v2  ;;  %v457_v57 = vadd.f32 %v425_v14, %v377_v26  ;;  %v442_v33 = vadd.f32 %v410_v23, %v362_v39  ;;  %v319_v51 = vmul.f32 %v868_v41, %v247_v25  ;;  %v251_v23 = vpop.f32.mrf.mxu0 }
 0x102   :  { %v458_v58 = vadd.f32 %v426_v24, %v378_v11  ;;  %v335_v34 = vmul.f32 %v868_v41, %v287_v37  ;;  %594 = vst [vmem:[%s1121_s5 + $0x20] sm:$0xff] %v654_v40  ;;  %v473_v59 = vmax.f32 %v441_v3, 0.0  ;;  %v320_v13 = vmul.f32 %v852_v35, %v249_v61  ;;  %v291_v24 = vpop.f32.mrf.mxu1 }
 0x103   :  { %602 = vst [vmem:[%s1121_s5 + $0x60] sm:$0xff] %v662_v12  ;;  %v489_v60 = vmax.f32 %v457_v57, 0.0  ;;  %v336_v14 = vmul.f32 %v852_v35, %v289_v62  ;;  %v363_v52 = vadd.f32 %v870_v42, %v319_v51  ;;  %v413_v9 = vunpack.c.h.bf16 %v943_v19 }
 0x104   :  { %v379_v4 = vadd.f32 %v870_v42, %v335_v34  ;;  %v429_v10 = vunpack.c.h.bf16 %v948_v20  ;;  %v655_v15 = vpack.c.bf16 %v473_v59, %v472_v47  ;;  %v364_v21 = vadd.f32 %v854_v36, %v320_v13 }
 0x105   :  { %v663_v16 = vpack.c.bf16 %v489_v60, %v488_v48  ;;  %v380_v53 = vadd.f32 %v854_v36, %v336_v14  ;;  %v1122_v43 = vunpack.c.h.bf16 %v925_v7  ;;  %v1123_v35 = vunpack.c.h.bf16 %v930_v8 }
 0x106   :  { %v321_v0 = vmul.f32 %v868_v41, %v251_v23  ;;  %v337_v1 = vmul.f32 %v868_v41, %v291_v24  ;;  %595 = vst [vmem:[%s1121_s5 + $0x28] sm:$0xff] %v655_v15  ;;  %v474_v2 = vmax.f32 %v442_v33, 0.0  ;;  %v490_v36 = vmax.f32 %v458_v58, 0.0 }
 0x107   :  { %v443_v44 = vadd.f32 %v1122_v43, %v363_v52  ;;  %v459_v63 = vadd.f32 %v1123_v35, %v379_v4  ;;  %603 = vst [vmem:[%s1121_s5 + $0x68] sm:$0xff] %v663_v16  ;;  %v1124_v7 = vunpack.c.l.bf16 %v943_v19  ;;  %v1125_v8 = vunpack.c.l.bf16 %v948_v20 }
 0x108   :  { %v365_v41 = vadd.f32 %v870_v42, %v321_v0  ;;  %v381_v45 = vadd.f32 %v870_v42, %v337_v1 }
 0x109   :  { %v444_v17 = vadd.f32 %v1124_v7, %v364_v21  ;;  %v460_v18 = vadd.f32 %v1125_v8, %v380_v53  ;;  %v475_v22 = vmax.f32 %v443_v44, 0.0  ;;  %v491_v54 = vmax.f32 %v459_v63, 0.0 }
 0x10a   :  { %v445_v28 = vadd.f32 %v413_v9, %v365_v41  ;;  %v461_v29 = vadd.f32 %v429_v10, %v381_v45 }
 0x10b   :  { %v656_v46 = vpack.c.bf16 %v475_v22, %v474_v2  ;;  %v664_v27 = vpack.c.bf16 %v491_v54, %v490_v36  ;;  %v476_v19 = vmax.f32 %v444_v17, 0.0  ;;  %v492_v20 = vmax.f32 %v460_v18, 0.0 }
 0x10c   :  { %v477_v30 = vmax.f32 %v445_v28, 0.0  ;;  %v493_v31 = vmax.f32 %v461_v29, 0.0 }
 0x10d   :  { %596 = vst [vmem:[%s1121_s5 + $0x30] sm:$0xff] %v656_v46  ;;  %604 = vst [vmem:[%s1121_s5 + $0x70] sm:$0xff] %v664_v27 }
 0x10e   :  { %v657_v32 = vpack.c.bf16 %v477_v30, %v476_v19  ;;  %v665_v25 = vpack.c.bf16 %v493_v31, %v492_v20 }
 0x110   :  { %597 = vst [vmem:[%s1121_s5 + $0x38] sm:$0xff] %v657_v32  ;;  %605 = vst [vmem:[%s1121_s5 + $0x78] sm:$0xff] %v665_v25 }

// kernel: resnet_forward.50
= control target key start
LH: loop header
LB: loop body
LE: loop exit
PB: predicated region body
PF: predicated region fallthrough
CT: control target
= control target key end

     0   :  { %s905_s1 = inlined_call_operand.vmem [shape: bf16[256,128], index: 1, kind: input, shape index: {}]   ;;  %s906_s0 = inlined_call_operand.vmem [shape: bf16[128,256], index: 0, kind: input, shape index: {}]   ;;  %s907_s2 = inlined_call_operand.vmem [shape: f32[1,128], index: 2, kind: input, shape index: {}]   ;;  %s908_s3 = inlined_call_operand.vmem [shape: f32[1,128], index: 3, kind: input, shape index: {}]   ;;  %s909_s4 = inlined_call_operand.vmem [shape: bf16[128,128], index: 4, kind: output, shape index: {}]  }
   0x1   :  { %v678_v0 = vld [vmem:[%s905_s1 + $0x78] sm:$0xff]   ;;  %v680_v2 = vld [vmem:[%s905_s1 + $0x70] sm:$0xff]   ;;  %v682_v4 = vld [vmem:[%s905_s1 + $0x68] sm:$0xff]  }
   0x2   :  { %v679_v1 = vld [vmem:[%s905_s1 + $0x38] sm:$0xff]   ;;  %598 = vmatprep.subr.bf16.mxu0 %v678_v0  ;;  %662 = vmatprep.subr.bf16.mxu1 %v678_v0  ;;  %v681_v3 = vld [vmem:[%s905_s1 + $0x30] sm:$0xff]   ;;  %v683_v5 = vld [vmem:[%s905_s1 + $0x28] sm:$0xff]  }
   0x3   :  { %599 = vmatpush3.bf16.msra.mxu0 %v679_v1  ;;  %670 = vmatpush3.bf16.msra.mxu1 %v679_v1  ;;  %v684_v6 = vld [vmem:[%s905_s1 + $0x60] sm:$0xff]   ;;  %v686_v8 = vld [vmem:[%s905_s1 + $0x58] sm:$0xff]   ;;  %v688_v10 = vld [vmem:[%s905_s1 + $0x50] sm:$0xff]  }
   0x4   :  { %600 = vmatprep.subr.bf16.mxu0 %v680_v2  ;;  %663 = vmatprep.subr.bf16.mxu1 %v680_v2  ;;  %v685_v7 = vld [vmem:[%s905_s1 + $0x20] sm:$0xff]   ;;  %v687_v9 = vld [vmem:[%s905_s1 + $0x18] sm:$0xff]   ;;  %v689_v13 = vld [vmem:[%s905_s1 + $0x10] sm:$0xff]  }
   0x5   :  { %v696_v11 = vld [vmem:[%s906_s0 + $0x4] ss:$8 sps:$4 sm:$0xff]   ;;  %v694_v18 = vld [vmem:[%s906_s0] ss:$8 sps:$4 sm:$0xff]   ;;  %v700_v20 = vld [vmem:[%s906_s0 + $0x14] ss:$8 sps:$4 sm:$0xff]  }
   0x6   :  { %v699_v12 = vld [vmem:[%s906_s0 + $0x44] ss:$8 sps:$4 sm:$0xff]   ;;  %274 = vmatprep.mubr.bf16.mxu0 %v696_v11  ;;  %v697_v19 = vld [vmem:[%s906_s0 + $0x40] ss:$8 sps:$4 sm:$0xff]   ;;  %v702_v21 = vld [vmem:[%s906_s0 + $0x54] ss:$8 sps:$4 sm:$0xff]  }
   0x7   :  { %601 = vmatpush3.bf16.msra.mxu0 %v681_v3  ;;  %671 = vmatpush3.bf16.msra.mxu1 %v681_v3  ;;  %v690_v14 = vld [vmem:[%s905_s1 + $0x48] sm:$0xff]   ;;  %v692_v16 = vld [vmem:[%s905_s1 + $0x40] sm:$0xff]   ;;  %v704_v22 = vld [vmem:[%s906_s0 + $0x10] ss:$8 sps:$4 sm:$0xff]  }
   0x8   :  { %602 = vmatprep.subr.bf16.mxu0 %v682_v4  ;;  %664 = vmatprep.subr.bf16.mxu1 %v682_v4  ;;  %v691_v15 = vld [vmem:[%s905_s1 + $0x8] sm:$0xff]   ;;  %v693_v17 = vld [vmem:[%s905_s1] sm:$0xff]   ;;  %v705_v23 = vld [vmem:[%s906_s0 + $0x50] ss:$8 sps:$4 sm:$0xff]  }
   0x9   :  { %306 = vmatprep.mubr.bf16.mxu1 %v699_v12  ;;  %v706_v24 = vld [vmem:[%s906_s0 + $0x24] ss:$8 sps:$4 sm:$0xff]   ;;  %v710_v26 = vld [vmem:[%s906_s0 + $0x20] ss:$8 sps:$4 sm:$0xff]   ;;  %v712_v28 = vld [vmem:[%s906_s0 + $0x34] ss:$8 sps:$4 sm:$0xff]  }
   0xa   :  { %v708_v25 = vld [vmem:[%s906_s0 + $0x64] ss:$8 sps:$4 sm:$0xff]   ;;  %v711_v27 = vld [vmem:[%s906_s0 + $0x60] ss:$8 sps:$4 sm:$0xff]   ;;  %v714_v29 = vld [vmem:[%s906_s0 + $0x74] ss:$8 sps:$4 sm:$0xff]  }
   0xb   :  { %603 = vmatpush3.bf16.msra.mxu0 %v683_v5  ;;  %672 = vmatpush3.bf16.msra.mxu1 %v683_v5  ;;  %v716_v30 = vld [vmem:[%s906_s0 + $0x30] ss:$8 sps:$4 sm:$0xff]   ;;  %v842_v35 = vld [vmem:[%s907_s2] ss:$0 sm:$0xff] }
   0xc   :  { %604 = vmatprep.subr.bf16.mxu0 %v684_v6  ;;  %665 = vmatprep.subr.bf16.mxu1 %v684_v6  ;;  %v717_v31 = vld [vmem:[%s906_s0 + $0x70] ss:$8 sps:$4 sm:$0xff]   ;;  %v849_v43 = vld [vmem:[%s908_s3] ss:$0 sm:$0xff] }
   0xf   :  { %605 = vmatpush3.bf16.msra.mxu0 %v685_v7  ;;  %673 = vmatpush3.bf16.msra.mxu1 %v685_v7 }
  0x10   :  { %606 = vmatprep.subr.bf16.mxu0 %v686_v8  ;;  %666 = vmatprep.subr.bf16.mxu1 %v686_v8 }
  0x13   :  { %607 = vmatpush3.bf16.msra.mxu0 %v687_v9  ;;  %674 = vmatpush3.bf16.msra.mxu1 %v687_v9 }
  0x14   :  { %608 = vmatprep.subr.bf16.mxu0 %v688_v10  ;;  %667 = vmatprep.subr.bf16.mxu1 %v688_v10 }
  0x17   :  { %609 = vmatpush3.bf16.msra.mxu0 %v689_v13  ;;  %675 = vmatpush3.bf16.msra.mxu1 %v689_v13 }
  0x18   :  { %610 = vmatprep.subr.bf16.mxu0 %v690_v14  ;;  %668 = vmatprep.subr.bf16.mxu1 %v690_v14 }
  0x1b   :  { %611 = vmatpush3.bf16.msra.mxu0 %v691_v15  ;;  %676 = vmatpush3.bf16.msra.mxu1 %v691_v15 }
  0x1c   :  { %612 = vmatprep.subr.bf16.mxu0 %v692_v16  ;;  %669 = vmatprep.subr.bf16.mxu1 %v692_v16 }
  0x1f   :  { %613 = vmatpush3.bf16.msra.mxu0 %v693_v17  ;;  %677 = vmatpush3.bf16.msra.mxu1 %v693_v17 }
  0x22   :  { %275 = vmatmul.mubr.bf16.vlgmr.msra.gmra.mxu0 %v694_v18  ;;  %307 = vmatmul.mubr.bf16.vlgmr.msra.gmra.mxu1 %v697_v19 }
  0x23   :  { %282 = vmatprep.mubr.bf16.mxu0 %v700_v20  ;;  %314 = vmatprep.mubr.bf16.mxu1 %v702_v21 }
  0x2a   :  { %283 = vmatmul.mubr.bf16.gmra.mxu0 %v704_v22  ;;  %315 = vmatmul.mubr.bf16.gmra.mxu1 %v705_v23 }
  0x2b   :  { %290 = vmatprep.mubr.bf16.mxu0 %v706_v24  ;;  %322 = vmatprep.mubr.bf16.mxu1 %v708_v25 }
  0x32   :  { %291 = vmatmul.mubr.bf16.gmra.mxu0 %v710_v26  ;;  %323 = vmatmul.mubr.bf16.gmra.mxu1 %v711_v27 }
  0x33   :  { %298 = vmatprep.mubr.bf16.mxu0 %v712_v28  ;;  %330 = vmatprep.mubr.bf16.mxu1 %v714_v29 }
  0x3a   :  { %299 = vmatmul.mubr.bf16.gmra.mxu0 %v716_v30  ;;  %331 = vmatmul.mubr.bf16.gmra.mxu1 %v717_v31 }
  0xe2   :  { %v614_v32 = vpop.f32.mrf.mxu0  ;;  %v638_v33 = vpop.f32.mrf.mxu1 }
  0xe4   :  { %v615_v34 = vpop.f32.mrf.mxu0  ;;  %v639_v36 = vpop.f32.mrf.mxu1 }
  0xe5   :  { %v616_v37 = vadd.f32 %v615_v34, %v614_v32  ;;  %v640_v38 = vadd.f32 %v639_v36, %v638_v33 }
  0xe6   :  { %v617_v39 = vpop.f32.mrf.mxu0  ;;  %v641_v40 = vpop.f32.mrf.mxu1 }
  0xe7   :  { %v346_v41 = vmul.f32 %v616_v37, %v842_v35  ;;  %v354_v42 = vmul.f32 %v640_v38, %v842_v35 }
  0xe8   :  { %v618_v44 = vpop.f32.mrf.mxu0  ;;  %v642_v45 = vpop.f32.mrf.mxu1 }
  0xe9   :  { %v619_v46 = vadd.f32 %v618_v44, %v617_v39  ;;  %v643_v47 = vadd.f32 %v642_v45, %v641_v40  ;;  %v369_v50 = vadd.f32 %v849_v43, %v346_v41  ;;  %v377_v51 = vadd.f32 %v849_v43, %v354_v42 }
  0xea   :  { %v620_v48 = vpop.f32.mrf.mxu0  ;;  %v644_v49 = vpop.f32.mrf.mxu1 }
  0xeb   :  { %v347_v52 = vmul.f32 %v619_v46, %v842_v35  ;;  %v355_v53 = vmul.f32 %v643_v47, %v842_v35  ;;  %v385_v62 = vmax.f32 %v369_v50, 0.0  ;;  %v393_v63 = vmax.f32 %v377_v51, 0.0 }
  0xec   :  { %v621_v54 = vpop.f32.mrf.mxu0  ;;  %v645_v55 = vpop.f32.mrf.mxu1 }
  0xed   :  { %v370_v56 = vadd.f32 %v849_v43, %v347_v52  ;;  %v378_v57 = vadd.f32 %v849_v43, %v355_v53  ;;  %v622_v58 = vadd.f32 %v621_v54, %v620_v48  ;;  %v646_v59 = vadd.f32 %v645_v55, %v644_v49 }
  0xee   :  { %v623_v60 = vpop.f32.mrf.mxu0  ;;  %v647_v61 = vpop.f32.mrf.mxu1 }
  0xef   :  { %v386_v0 = vmax.f32 %v370_v56, 0.0  ;;  %v394_v1 = vmax.f32 %v378_v57, 0.0  ;;  %v348_v2 = vmul.f32 %v622_v58, %v842_v35  ;;  %v356_v3 = vmul.f32 %v646_v59, %v842_v35 }
  0xf0   :  { %v624_v4 = vpop.f32.mrf.mxu0  ;;  %v648_v5 = vpop.f32.mrf.mxu1 }
  0xf1   :  { %v554_v6 = vpack.c.bf16 %v386_v0, %v385_v62  ;;  %v574_v7 = vpack.c.bf16 %v394_v1, %v393_v63  ;;  %v625_v8 = vadd.f32 %v624_v4, %v623_v60  ;;  %v649_v9 = vadd.f32 %v648_v5, %v647_v61 }
  0xf2   :  { %v626_v10 = vpop.f32.mrf.mxu0  ;;  %v650_v11 = vpop.f32.mrf.mxu1  ;;  %v371_v12 = vadd.f32 %v849_v43, %v348_v2  ;;  %v379_v13 = vadd.f32 %v849_v43, %v356_v3 }
  0xf3   :  { %555 = vst [vmem:[%s909_s4] sm:$0xff] %v554_v6   ;;  %594 = vst [vmem:[%s909_s4 + $0x20] sm:$0xff] %v574_v7   ;;  %v349_v14 = vmul.f32 %v625_v8, %v842_v35  ;;  %v357_v15 = vmul.f32 %v649_v9, %v842_v35 }
  0xf4   :  { %v627_v16 = vpop.f32.mrf.mxu0  ;;  %v651_v17 = vpop.f32.mrf.mxu1  ;;  %v387_v26 = vmax.f32 %v371_v12, 0.0  ;;  %v395_v27 = vmax.f32 %v379_v13, 0.0 }
  0xf5   :  { %v628_v18 = vadd.f32 %v627_v16, %v626_v10  ;;  %v652_v19 = vadd.f32 %v651_v17, %v650_v11  ;;  %v372_v20 = vadd.f32 %v849_v43, %v349_v14  ;;  %v380_v21 = vadd.f32 %v849_v43, %v357_v15 }
  0xf6   :  { %v629_v22 = vpop.f32.mrf.mxu0  ;;  %v653_v23 = vpop.f32.mrf.mxu1 }
  0xf7   :  { %v350_v24 = vmul.f32 %v628_v18, %v842_v35  ;;  %v358_v25 = vmul.f32 %v652_v19, %v842_v35  ;;  %v388_v28 = vmax.f32 %v372_v20, 0.0  ;;  %v396_v29 = vmax.f32 %v380_v21, 0.0 }
  0xf8   :  { %v630_v30 = vpop.f32.mrf.mxu0  ;;  %v654_v31 = vpop.f32.mrf.mxu1 }
  0xf9   :  { %v631_v32 = vadd.f32 %v630_v30, %v629_v22  ;;  %v655_v33 = vadd.f32 %v654_v31, %v653_v23  ;;  %v559_v34 = vpack.c.bf16 %v388_v28, %v387_v26  ;;  %v579_v36 = vpack.c.bf16 %v396_v29, %v395_v27 }
  0xfa   :  { %v632_v37 = vpop.f32.mrf.mxu0  ;;  %v656_v38 = vpop.f32.mrf.mxu1  ;;  %v373_v39 = vadd.f32 %v849_v43, %v350_v24  ;;  %v381_v40 = vadd.f32 %v849_v43, %v358_v25 }
  0xfb   :  { %v351_v41 = vmul.f32 %v631_v32, %v842_v35  ;;  %v359_v42 = vmul.f32 %v655_v33, %v842_v35  ;;  %591 = vst [vmem:[%s909_s4 + $0x8] sm:$0xff] %v559_v34   ;;  %595 = vst [vmem:[%s909_s4 + $0x28] sm:$0xff] %v579_v36  }
  0xfc   :  { %v633_v44 = vpop.f32.mrf.mxu0  ;;  %v657_v45 = vpop.f32.mrf.mxu1  ;;  %v389_v52 = vmax.f32 %v373_v39, 0.0  ;;  %v397_v53 = vmax.f32 %v381_v40, 0.0 }
  0xfd   :  { %v374_v46 = vadd.f32 %v849_v43, %v351_v41  ;;  %v382_v47 = vadd.f32 %v849_v43, %v359_v42  ;;  %v634_v48 = vadd.f32 %v633_v44, %v632_v37  ;;  %v658_v49 = vadd.f32 %v657_v45, %v656_v38 }
  0xfe   :  { %v635_v50 = vpop.f32.mrf.mxu0  ;;  %v659_v51 = vpop.f32.mrf.mxu1 }
  0xff   :  { %v390_v54 = vmax.f32 %v374_v46, 0.0  ;;  %v398_v55 = vmax.f32 %v382_v47, 0.0  ;;  %v352_v56 = vmul.f32 %v634_v48, %v842_v35  ;;  %v360_v57 = vmul.f32 %v658_v49, %v842_v35 }
 0x100   :  { %v636_v58 = vpop.f32.mrf.mxu0  ;;  %v660_v59 = vpop.f32.mrf.mxu1 }
 0x101   :  { %v564_v60 = vpack.c.bf16 %v390_v54, %v389_v52  ;;  %v584_v61 = vpack.c.bf16 %v398_v55, %v397_v53  ;;  %v637_v62 = vadd.f32 %v636_v58, %v635_v50  ;;  %v661_v63 = vadd.f32 %v660_v59, %v659_v51 }
 0x102   :  { %v375_v0 = vadd.f32 %v849_v43, %v352_v56  ;;  %v383_v1 = vadd.f32 %v849_v43, %v360_v57 }
 0x103   :  { %592 = vst [vmem:[%s909_s4 + $0x10] sm:$0xff] %v564_v60   ;;  %596 = vst [vmem:[%s909_s4 + $0x30] sm:$0xff] %v584_v61   ;;  %v353_v2 = vmul.f32 %v637_v62, %v842_v35  ;;  %v361_v3 = vmul.f32 %v661_v63, %v842_v35 }
 0x104   :  { %v391_v6 = vmax.f32 %v375_v0, 0.0  ;;  %v399_v7 = vmax.f32 %v383_v1, 0.0 }
 0x105   :  { %v376_v4 = vadd.f32 %v849_v43, %v353_v2  ;;  %v384_v5 = vadd.f32 %v849_v43, %v361_v3 }
 0x107   :  { %v392_v8 = vmax.f32 %v376_v4, 0.0  ;;  %v400_v9 = vmax.f32 %v384_v5, 0.0 }
 0x109   :  { %v569_v10 = vpack.c.bf16 %v392_v8, %v391_v6  ;;  %v589_v11 = vpack.c.bf16 %v400_v9, %v399_v7 }
 0x10b   :  { %593 = vst [vmem:[%s909_s4 + $0x18] sm:$0xff] %v569_v10   ;;  %597 = vst [vmem:[%s909_s4 + $0x38] sm:$0xff] %v589_v11  }

// kernel: resnet_forward.57
= control target key start
LH: loop header
LB: loop body
LE: loop exit
PB: predicated region body
PF: predicated region fallthrough
CT: control target
= control target key end

     0   :  { %s1143_s15 = smov 0   ;;  %s1145_s16 = smov 0   ;;  %s1256_s0 = inlined_call_operand.vmem [shape: bf16[32,1152], index: 0, kind: input, shape index: {}]   ;;  %s1257_s1 = inlined_call_operand.vmem [shape: bf16[1152,128], index: 1, kind: input, shape index: {}]   ;;  %s1258_s2 = inlined_call_operand.vmem [shape: f32[1,128], index: 2, kind: input, shape index: {}]   ;;  %s1259_s3 = inlined_call_operand.vmem [shape: f32[1,128], index: 3, kind: input, shape index: {}]   ;;  %s1260_s4 = inlined_call_operand.vmem [shape: bf16[32,128], index: 4, kind: output, shape index: {}]  }
   0x1   :  { %s1147_s17 = smov 0   ;;  %s1149_s18 = smov 0  }
   0x2   :  { %s1151_s19 = smov 0  }
   0x3 LB: > { %s26_s20 = sadd.s32 1, %s1111_s18  ;;  %p49_p1 = scmp.ne.s32.totalorder %s1103_s16, %s1099_s15  ;;  %s1115_s19 = sphi %s1151_s19, %s14_s19   ;;  %s1111_s18 = sphi %s1149_s18, %s1264_s18   ;;  %s1107_s17 = sphi %s1147_s17, %s1263_s17   ;;  %s1103_s16 = sphi %s1145_s16, %s1262_s16   ;;  %s1099_s15 = sphi %s1143_s15, %s1261_s15  }
   0x4   : > { %p27_p0 = scmp.ge.s32.totalorder %s26_s20, 3  ;;  %p50_p2 = scmp.eq.s32.totalorder %s1115_s19, 0 }
   0x5   : > { %s42_s22 = sadd.s32 1, %s1103_s16  ;;  %p874_p5 = scmp.ge.s32.totalorder %s1115_s19, 3 }
   0x6   : > { %s1266_s20 = smov (%p27_p0, %s26_s20), 0  ;;  %p51_p3 = por %p50_p2, %p49_p1 }
   0x7   : > { %s38_s21 = ssub.s32 %s1111_s18, %s1266_s20  ;;  %195 = sbr.rel (%p874_p5) target bundleno = 21 (0x15), region = 24 }
   0x8   : > { %p40_p4 = scmp.eq.s32.totalorder %s38_s21, 0 }
   0xa   : > { %s1178_s23 = scalar_select %p40_p4, %s1103_s16, %s42_s22  }
   0xc   : > { %198 = sbr.rel (!%p51_p3) target bundleno = 21 (0x15), region = 28  ;;  %s200_s24 = sand.u32 (%p51_p3), 1, %s1103_s16  }
   0xd   : > { %s928_s25 = smul.u32 (%p51_p3), 12, %s1111_s18 }
   0xe   : > { %s1002_s26 = smul.u32 (%p51_p3), 48, %s200_s24 }
   0xf   : > { %s208_s29 = scalar_lea.vmem (%p51_p3), %s1256_s0, %s928_s25 }
  0x10   : > { %v223_v0 = vld [vmem:[%s208_s29] sm:$0xff] (%p51_p3)  ;;  %v227_v2 = vld [vmem:[%s208_s29 + $0x48] sm:$0xff] (%p51_p3)  ;;  %s202_s30 = scalar_lea.vmem (%p51_p3), [#allocation3], %s1002_s26  ;;  %v880_v6 = vld [vmem:[%s208_s29 + $0x50] sm:$0xf] (%p51_p3) }
  0x11   : > { %v225_v1 = vld [vmem:[%s208_s29 + $0x24] sm:$0xff]  ;;  %224 = vst [vmem:[%s202_s30] sm:$0xff] %v223_v0  ;;  %228 = vst [vmem:[%s202_s30 + $0x18] sm:$0xff] %v227_v2  ;;  %v229_v3 = vld [vmem:[%s208_s29 + $0x6c] sm:$0xff] }
  0x12   : > { %226 = vst [vmem:[%s202_s30 + $0xc] sm:$0xff] %v225_v1  ;;  %v876_v4 = vld [vmem:[%s208_s29 + $0x8] sm:$0xf]  ;;  %v878_v5 = vld [vmem:[%s208_s29 + $0x2c] sm:$0xf]  ;;  %230 = vst [vmem:[%s202_s30 + $0x24] sm:$0xff] %v229_v3 }
  0x13   : > { %877 = vst [vmem:[%s202_s30 + $0x8] sm:$0xf] %v876_v4  ;;  %879 = vst [vmem:[%s202_s30 + $0x14] sm:$0xf] %v878_v5  ;;  %v882_v7 = vld [vmem:[%s208_s29 + $0x74] sm:$0xf] }
  0x14   : > { %881 = vst [vmem:[%s202_s30 + $0x20] sm:$0xf] %v880_v6  ;;  %883 = vst [vmem:[%s202_s30 + $0x2c] sm:$0xf] %v882_v7 }
  0x15 PF: > { %p884_p6 = scmp.ge.s32.totalorder %s1115_s19, 1  ;;  %p263_p7 = scmp.lt.s32.totalorder %s1115_s19, 4 }
  0x17   : > { %p264_p8 = pnand %p884_p6, %p263_p7 }
  0x18   : > { %s270_s5 = sand.u32 (!%p264_p8), 1, %s1099_s15   ;;  %s314_s6 = smul.u32 (!%p264_p8), 48, %s1107_s17 }
  0x19   : > { %267 = sbr.rel (%p264_p8) target bundleno = 301 (0x12d), region = 58  ;;  %p886_p10 = scmp.ne.s32.totalorder (!%p264_p8), %s1107_s17, 0 }
  0x1a   : > { %s1003_s7 = smul.u32 (!%p264_p8), 48, %s270_s5  ;;  %p315_p9 = scmp.lt.s32.totalorder (!%p264_p8), %s314_s6, 143 }
  0x1c   : > { %s1195_s12 = scalar_lea.vmem (!%p264_p8), [#allocation3], %s1003_s7 }
  0x1e   : > { %s1268_s6 = smov (!%p315_p9, %s314_s6), 143  ;;  %342 = sbr.rel (%p886_p10) target bundleno = 38 (0x26), region = 66 }
  0x1f   : > { %s885_s8 = sshll.u32 %s1268_s6, 2 }
  0x20   : > { %s1193_s11 = scalar_lea.vmem %s1257_s1, %s885_s8 }
  0x23   : > { %v1117_v8 = vmov 0.0  }
  0x24   : > { %343 = vst [vmem:[#allocation2 + $0x10] sm:$0xff] %v1117_v8  ;;  %344 = vst [vmem:[#allocation2] sm:$0xff] %v1117_v8 }
  0x25   : > { %345 = vst [vmem:[#allocation2 + $0x18] sm:$0xff] %v1117_v8  ;;  %346 = vst [vmem:[#allocation2 + $0x8] sm:$0xff] %v1117_v8 }
  0x26 PF: > { %v1045_v9 = vld [vmem:[%s1193_s11 + $0x78] sm:$0xff]   ;;  %v1048_v12 = vld [vmem:[%s1193_s11 + $0x70] sm:$0xff]   ;;  %v1051_v15 = vld [vmem:[%s1193_s11 + $0x68] sm:$0xff]   ;;  %p917_p11 = scmp.ne.s32.totalorder %s1107_s17, 2 }
  0x27   : > { %v1046_v10 = vld [vmem:[%s1193_s11 + $0x38] sm:$0xff]   ;;  %944 = vmatprep.subr.bf16.mxu0 %v1045_v9  ;;  %v1049_v13 = vld [vmem:[%s1193_s11 + $0x30] sm:$0xff]   ;;  %v1052_v16 = vld [vmem:[%s1193_s11 + $0x28] sm:$0xff]  }
  0x28   : > { %v1047_v11 = vld [vmem:[%s1193_s11 + $0xb8] sm:$0xff]   ;;  %945 = vmatpush3.bf16.msra.mxu0 %v1046_v10  ;;  %v1050_v14 = vld [vmem:[%s1193_s11 + $0xb0] sm:$0xff]   ;;  %v1053_v17 = vld [vmem:[%s1193_s11 + $0xa8] sm:$0xff]  }
  0x29   : > { %982 = vmatprep.subr.bf16.mxu1 %v1047_v11  ;;  %946 = vmatprep.subr.bf16.mxu0 %v1048_v12  ;;  %v1054_v18 = vld [vmem:[%s1193_s11 + $0x60] sm:$0xff]   ;;  %v1057_v21 = vld [vmem:[%s1193_s11 + $0x58] sm:$0xff]   ;;  %v1060_v24 = vld [vmem:[%s1193_s11 + $0x50] sm:$0xff]  }
  0x2a   : > { %983 = vmatpush3.bf16.msra.mxu1 %v1047_v11  ;;  %v1055_v19 = vld [vmem:[%s1193_s11 + $0x20] sm:$0xff]   ;;  %v1059_v22 = vld [vmem:[%s1193_s11 + $0x98] sm:$0xff]   ;;  %v1062_v25 = vld [vmem:[%s1193_s11 + $0x90] sm:$0xff]  }
  0x2b   : > { %984 = vmatprep.subr.bf16.mxu1 %v1050_v14  ;;  %v1056_v20 = vld [vmem:[%s1193_s11 + $0xa0] sm:$0xff]   ;;  %v1058_v23 = vld [vmem:[%s1193_s11 + $0x18] sm:$0xff]   ;;  %v1061_v26 = vld [vmem:[%s1193_s11 + $0x10] sm:$0xff]  }
  0x2c   : > { %947 = vmatpush3.bf16.msra.mxu0 %v1049_v13  ;;  %v1063_v27 = vld [vmem:[%s1193_s11 + $0x48] sm:$0xff]   ;;  %v1066_v30 = vld [vmem:[%s1193_s11 + $0x40] sm:$0xff]   ;;  %v347_v44 = vld [vmem:[#allocation2 + $0x10] sm:$0xff] }
  0x2d   : > { %948 = vmatprep.subr.bf16.mxu0 %v1051_v15  ;;  %v1064_v28 = vld [vmem:[%s1193_s11 + $0x8] sm:$0xff]   ;;  %v1068_v31 = vld [vmem:[%s1193_s11 + $0x80] sm:$0xff]   ;;  %v349_v58 = vld [vmem:[#allocation2 + $0x18] sm:$0xff] }
  0x2e   : > { %985 = vmatpush3.bf16.msra.mxu1 %v1050_v14  ;;  %v1065_v29 = vld [vmem:[%s1193_s11 + $0x88] sm:$0xff]   ;;  %v1071_v32 = vld [vmem:[%s1195_s12 + $0x4] ss:$12 sps:$4 sm:$0xff]  }
  0x2f   : > { %986 = vmatprep.subr.bf16.mxu1 %v1053_v17  ;;  %v1072_v33 = vld [vmem:[%s1195_s12 + $0x8] ss:$12 sps:$4 sm:$0xff]   ;;  %615 = vmatprep.mubr.bf16.mxu0 %v1071_v32  ;;  %v1069_v35 = vld [vmem:[%s1195_s12] ss:$12 sps:$4 sm:$0xff]   ;;  %v1076_v38 = vld [vmem:[%s1195_s12 + $0x18] ss:$12 sps:$4 sm:$0xff]  }
  0x30   : > { %949 = vmatpush3.bf16.msra.mxu0 %v1052_v16  ;;  %v1067_v34 = vld [vmem:[%s1193_s11] sm:$0xff]   ;;  %998 = vmatprep.mubr.bf16.mxu1 %v1072_v33  ;;  %v1074_v36 = vld [vmem:[%s1195_s12 + $0x1c] ss:$12 sps:$4 sm:$0xff]  }
  0x31   : > { %950 = vmatprep.subr.bf16.mxu0 %v1054_v18  ;;  %v1073_v37 = vld [vmem:[%s1195_s12 + $0x20] ss:$12 sps:$4 sm:$0xff]  }
  0x32   : > { %987 = vmatpush3.bf16.msra.mxu1 %v1053_v17  ;;  %v348_v52 = vld [vmem:[#allocation2] sm:$0xff]  ;;  %v350_v0 = vld [vmem:[#allocation2 + $0x8] sm:$0xff] }
  0x33   : > { %988 = vmatprep.subr.bf16.mxu1 %v1056_v20 }
  0x34   : > { %951 = vmatpush3.bf16.msra.mxu0 %v1055_v19 }
  0x35   : > { %952 = vmatprep.subr.bf16.mxu0 %v1057_v21 }
  0x36   : > { %989 = vmatpush3.bf16.msra.mxu1 %v1056_v20 }
  0x37   : > { %990 = vmatprep.subr.bf16.mxu1 %v1059_v22 }
  0x38   : > { %953 = vmatpush3.bf16.msra.mxu0 %v1058_v23 }
  0x39   : > { %954 = vmatprep.subr.bf16.mxu0 %v1060_v24 }
  0x3a   : > { %991 = vmatpush3.bf16.msra.mxu1 %v1059_v22 }
  0x3b   : > { %992 = vmatprep.subr.bf16.mxu1 %v1062_v25 }
  0x3c   : > { %955 = vmatpush3.bf16.msra.mxu0 %v1061_v26 }
  0x3d   : > { %956 = vmatprep.subr.bf16.mxu0 %v1063_v27 }
  0x3e   : > { %993 = vmatpush3.bf16.msra.mxu1 %v1062_v25 }
  0x3f   : > { %994 = vmatprep.subr.bf16.mxu1 %v1065_v29 }
  0x40   : > { %957 = vmatpush3.bf16.msra.mxu0 %v1064_v28 }
  0x41   : > { %958 = vmatprep.subr.bf16.mxu0 %v1066_v30 }
  0x42   : > { %995 = vmatpush3.bf16.msra.mxu1 %v1065_v29 }
  0x43   : > { %996 = vmatprep.subr.bf16.mxu1 %v1068_v31 }
  0x44   : > { %959 = vmatpush3.bf16.msra.mxu0 %v1067_v34 }
  0x46   : > { %997 = vmatpush3.bf16.msra.mxu1 %v1068_v31 }
  0x47   : > { %616 = vmatmul.mubr.bf16.vlgmr.msra.gmra.mxu0 %v1069_v35 }
  0x48   : > { %623 = vmatprep.mubr.bf16.mxu0 %v1074_v36 }
  0x49   : > { %999 = vmatmul.mubr.bf16.vlgmr.msra.gmra.mxu1 %v1073_v37 }
  0x4f   : > { %624 = vmatmul.mubr.bf16.gmra.mxu0 %v1076_v38 }
 0x107   : > { %v960_v39 = vpop.f32.mrf.mxu0 }
 0x109   : > { %v961_v40 = vpop.f32.mrf.mxu0  ;;  %v1000_v41 = vpop.f32.mrf.mxu1 }
 0x10a   : > { %v962_v42 = vadd.f32 %v961_v40, %v960_v39 }
 0x10b   : > { %v963_v43 = vpop.f32.mrf.mxu0  ;;  %v666_v45 = vpop.f32.mrf.mxu1 }
 0x10c   : > { %v667_v46 = vadd.f32 %v962_v42, %v666_v45 }
 0x10d   : > { %v964_v47 = vpop.f32.mrf.mxu0  ;;  %v1001_v48 = vpop.f32.mrf.mxu1 }
 0x10e   : > { %v681_v49 = vadd.f32 %v667_v46, %v347_v44  ;;  %v965_v50 = vadd.f32 %v964_v47, %v963_v43 }
 0x10f   : > { %v966_v51 = vpop.f32.mrf.mxu0  ;;  %v669_v53 = vpop.f32.mrf.mxu1 }
 0x110   : > { %685 = vst [vmem:[#allocation2 + $0x10] sm:$0xff] %v681_v49  ;;  %v670_v54 = vadd.f32 %v965_v50, %v669_v53 }
 0x111   : > { %v967_v55 = vpop.f32.mrf.mxu0 }
 0x112   : > { %v682_v56 = vadd.f32 %v670_v54, %v348_v52  ;;  %v968_v57 = vadd.f32 %v967_v55, %v966_v51 }
 0x113   : > { %v969_v59 = vpop.f32.mrf.mxu0 }
 0x114   : > { %686 = vst [vmem:[#allocation2] sm:$0xff] %v682_v56  ;;  %v675_v60 = vadd.f32 %v1000_v41, %v968_v57 }
 0x115   : > { %v970_v61 = vpop.f32.mrf.mxu0 }
 0x116   : > { %v683_v62 = vadd.f32 %v675_v60, %v349_v58  ;;  %v971_v63 = vadd.f32 %v970_v61, %v969_v59 }
 0x118   : > { %687 = vst [vmem:[#allocation2 + $0x18] sm:$0xff] %v683_v62  ;;  %v678_v1 = vadd.f32 %v1001_v48, %v971_v63  ;;  %692 = sbr.rel (%p917_p11) target bundleno = 301 (0x12d), region = 70 }
 0x11a   : > { %v684_v2 = vadd.f32 %v678_v1, %v350_v0 }
 0x11c   : > { %688 = vst [vmem:[#allocation2 + $0x8] sm:$0xff] %v684_v2 }
 0x11d   : > { %v693_v3 = vld [vmem:[#allocation2 + $0x10] sm:$0xff]  ;;  %v694_v4 = vld [vmem:[#allocation2] sm:$0xff] }
 0x11e   : > { %v918_v5 = vld [vmem:[%s1258_s2] ss:$0 sm:$0xff] }
 0x11f   : > { %v704_v6 = vmul.f32 %v918_v5, %v693_v3  ;;  %v705_v7 = vmul.f32 %v918_v5, %v694_v4  ;;  %v919_v8 = vld [vmem:[%s1259_s3] ss:$0 sm:$0xff]  ;;  %v695_v9 = vld [vmem:[#allocation2 + $0x18] sm:$0xff] }
 0x120   : > { %v706_v11 = vmul.f32 %v918_v5, %v695_v9 }
 0x121   : > { %v715_v13 = vadd.f32 %v919_v8, %v704_v6  ;;  %v716_v14 = vadd.f32 %v919_v8, %v705_v7 }
 0x122   : > { %v717_v15 = vadd.f32 %v919_v8, %v706_v11 }
 0x123   : > { %v696_v10 = vld [vmem:[#allocation2 + $0x8] sm:$0xff]  ;;  %v719_v17 = vmax.f32 %v715_v13, 0.0  ;;  %v720_v18 = vmax.f32 %v716_v14, 0.0 }
 0x124   : > { %v707_v12 = vmul.f32 %v918_v5, %v696_v10  ;;  %v721_v19 = vmax.f32 %v717_v15, 0.0 }
 0x125   : > { %v936_v21 = vpack.c.bf16 %v720_v18, %v719_v17 }
 0x126   : > { %v718_v16 = vadd.f32 %v919_v8, %v707_v12 }
 0x127   : > { %937 = vst [vmem:[%s1260_s4] sm:$0xff] %v936_v21  }
 0x128   : > { %v722_v20 = vmax.f32 %v718_v16, 0.0 }
 0x12a   : > { %v941_v22 = vpack.c.bf16 %v722_v20, %v721_v19 }
 0x12c   : > { %943 = vst [vmem:[%s1260_s4 + $0x8] sm:$0xff] %v941_v22  }
 0x12d PF: > { %s14_s19 = sadd.s32 1, %s1115_s19   ;;  %s1261_s15 = smov %s1103_s16 }
 0x12e   : > { %p11_p12 = scmp.ge.s32.totalorder %s14_s19, 5   ;;  %s1262_s16 = smov %s1178_s23 }
 0x12f   : > { %s1263_s17 = smov %s1111_s18  ;;  %s1264_s18 = smov %s1266_s20 }
 0x130   :  { %13 = sbr.rel (!%p11_p12) target bundleno = 3 (0x3), region = 120 }

// kernel: resnet_forward.58
= control target key start
LH: loop header
LB: loop body
LE: loop exit
PB: predicated region body
PF: predicated region fallthrough
CT: control target
= control target key end

     0   :  { %s1183_s15 = smov 0   ;;  %s1185_s16 = smov 0   ;;  %s1380_s0 = inlined_call_operand.vmem [shape: bf16[32,256], index: 0, kind: input, shape index: {}]   ;;  %s1381_s1 = inlined_call_operand.vmem [shape: bf16[256,512], index: 1, kind: input, shape index: {}]   ;;  %s1382_s2 = inlined_call_operand.vmem [shape: f32[1,512], index: 2, kind: input, shape index: {}]   ;;  %s1383_s3 = inlined_call_operand.vmem [shape: f32[1,512], index: 3, kind: input, shape index: {}]   ;;  %s1384_s4 = inlined_call_operand.vmem [shape: bf16[32,512], index: 4, kind: output, shape index: {}]  }
   0x1   :  { %s1187_s17 = smov 0   ;;  %s1189_s18 = smov 0  }
   0x2   :  { %s1191_s19 = smov 0  }
   0x3 LB: > { %s23_s20 = sadd.s32 1, %s1152_s18  ;;  %s928_s21 = sadd.s32 4294967295, %s1156_s19   ;;  %s1156_s19 = sphi %s1191_s19, %s14_s19   ;;  %s1152_s18 = sphi %s1189_s18, %s1389_s18   ;;  %s1148_s17 = sphi %s1187_s17, %s1388_s17   ;;  %s1144_s16 = sphi %s1185_s16, %s1387_s16   ;;  %s1140_s15 = sphi %s1183_s15, %s1386_s15  }
   0x4   : > { %p24_p0 = scmp.ge.s32.totalorder %s23_s20, 2  ;;  %p66_p1 = scmp.ne.s32.totalorder %s1144_s16, %s1140_s15 }
   0x5   : > { %p67_p2 = scmp.eq.s32.totalorder %s1156_s19, 0  ;;  %p150_p4 = scmp.eq.s32.totalorder %s928_s21, 1 }
   0x6   : > { %s1391_s20 = smov (%p24_p0, %s23_s20), 0  ;;  %s59_s23 = sadd.s32 1, %s1144_s16 }
   0x7   : > { %p68_p3 = por %p67_p2, %p66_p1  ;;  %s56_s22 = ssub.s32 %s1152_s18, %s1391_s20 }
   0x8   : > { %p57_p5 = scmp.eq.s32.totalorder %s56_s22, 0  ;;  %p1218_p6 = por %p150_p4, %p66_p1 }
   0x9   : > { %p932_p7 = scmp.ge.s32.totalorder %s1156_s19, 2 }
   0xa   : > { %s1223_s25 = scalar_select %p57_p5, %s1144_s16, %s59_s23  }
   0xb   : > { %182 = sbr.rel (%p932_p7) target bundleno = 36 (0x24), region = 20 }
  0x10   : > { %185 = sbr.rel (!%p68_p3) target bundleno = 36 (0x24), region = 24  ;;  %s187_s26 = sand.u32 (%p68_p3), 1, %s1144_s16  }
  0x11   : > { %s986_s27 = sshll.u32 (%p68_p3), %s1152_s18, 3  ;;  %s933_s28 = sshll.u32 (%p68_p3), %s187_s26, 8 }
  0x12   : > { %s1231_s5 = scalar_lea.vmem (%p68_p3), %s1381_s1, %s986_s27  ;;  %s1236_s6 = scalar_lea.vmem (%p68_p3), [#allocation2], %s933_s28 }
  0x13   : > { %v283_v0 = vld [vmem:[%s1231_s5] sm:$0xff] (%p68_p3)  ;;  %v285_v1 = vld [vmem:[%s1231_s5 + $0x10] sm:$0xff] (%p68_p3) }
  0x14   : > { %v287_v2 = vld [vmem:[%s1231_s5 + $0x20] sm:$0xff] (%p68_p3)  ;;  %284 = vst [vmem:[%s1236_s6] sm:$0xff] (%p68_p3), %v283_v0  ;;  %286 = vst [vmem:[%s1236_s6 + $0x8] sm:$0xff] (%p68_p3), %v285_v1  ;;  %v289_v3 = vld [vmem:[%s1231_s5 + $0x30] sm:$0xff] (%p68_p3) }
  0x15   : > { %288 = vst [vmem:[%s1236_s6 + $0x10] sm:$0xff] %v287_v2  ;;  %v291_v4 = vld [vmem:[%s1231_s5 + $0x40] sm:$0xff]  ;;  %v293_v5 = vld [vmem:[%s1231_s5 + $0x50] sm:$0xff]  ;;  %290 = vst [vmem:[%s1236_s6 + $0x18] sm:$0xff] %v289_v3 }
  0x16   : > { %292 = vst [vmem:[%s1236_s6 + $0x20] sm:$0xff] %v291_v4  ;;  %294 = vst [vmem:[%s1236_s6 + $0x28] sm:$0xff] %v293_v5  ;;  %v295_v6 = vld [vmem:[%s1231_s5 + $0x60] sm:$0xff]  ;;  %v297_v7 = vld [vmem:[%s1231_s5 + $0x70] sm:$0xff] }
  0x17   : > { %v299_v8 = vld [vmem:[%s1231_s5 + $0x80] sm:$0xff]  ;;  %296 = vst [vmem:[%s1236_s6 + $0x30] sm:$0xff] %v295_v6  ;;  %298 = vst [vmem:[%s1236_s6 + $0x38] sm:$0xff] %v297_v7  ;;  %v301_v9 = vld [vmem:[%s1231_s5 + $0x90] sm:$0xff] }
  0x18   : > { %300 = vst [vmem:[%s1236_s6 + $0x40] sm:$0xff] %v299_v8  ;;  %v303_v10 = vld [vmem:[%s1231_s5 + $0xa0] sm:$0xff]  ;;  %v305_v11 = vld [vmem:[%s1231_s5 + $0xb0] sm:$0xff]  ;;  %302 = vst [vmem:[%s1236_s6 + $0x48] sm:$0xff] %v301_v9 }
  0x19   : > { %304 = vst [vmem:[%s1236_s6 + $0x50] sm:$0xff] %v303_v10  ;;  %306 = vst [vmem:[%s1236_s6 + $0x58] sm:$0xff] %v305_v11  ;;  %v307_v12 = vld [vmem:[%s1231_s5 + $0xc0] sm:$0xff]  ;;  %v309_v13 = vld [vmem:[%s1231_s5 + $0xd0] sm:$0xff] }
  0x1a   : > { %v311_v14 = vld [vmem:[%s1231_s5 + $0xe0] sm:$0xff]  ;;  %308 = vst [vmem:[%s1236_s6 + $0x60] sm:$0xff] %v307_v12  ;;  %310 = vst [vmem:[%s1236_s6 + $0x68] sm:$0xff] %v309_v13  ;;  %v313_v15 = vld [vmem:[%s1231_s5 + $0xf0] sm:$0xff] }
  0x1b   : > { %312 = vst [vmem:[%s1236_s6 + $0x70] sm:$0xff] %v311_v14  ;;  %v315_v16 = vld [vmem:[%s1231_s5 + $0x100] sm:$0xff]  ;;  %v317_v17 = vld [vmem:[%s1231_s5 + $0x110] sm:$0xff]  ;;  %314 = vst [vmem:[%s1236_s6 + $0x78] sm:$0xff] %v313_v15 }
  0x1c   : > { %316 = vst [vmem:[%s1236_s6 + $0x80] sm:$0xff] %v315_v16  ;;  %318 = vst [vmem:[%s1236_s6 + $0x88] sm:$0xff] %v317_v17  ;;  %v319_v18 = vld [vmem:[%s1231_s5 + $0x120] sm:$0xff]  ;;  %v321_v19 = vld [vmem:[%s1231_s5 + $0x130] sm:$0xff] }
  0x1d   : > { %v323_v20 = vld [vmem:[%s1231_s5 + $0x140] sm:$0xff]  ;;  %320 = vst [vmem:[%s1236_s6 + $0x90] sm:$0xff] %v319_v18  ;;  %322 = vst [vmem:[%s1236_s6 + $0x98] sm:$0xff] %v321_v19  ;;  %v325_v21 = vld [vmem:[%s1231_s5 + $0x150] sm:$0xff] }
  0x1e   : > { %324 = vst [vmem:[%s1236_s6 + $0xa0] sm:$0xff] %v323_v20  ;;  %v327_v22 = vld [vmem:[%s1231_s5 + $0x160] sm:$0xff]  ;;  %v329_v23 = vld [vmem:[%s1231_s5 + $0x170] sm:$0xff]  ;;  %326 = vst [vmem:[%s1236_s6 + $0xa8] sm:$0xff] %v325_v21 }
  0x1f   : > { %328 = vst [vmem:[%s1236_s6 + $0xb0] sm:$0xff] %v327_v22  ;;  %330 = vst [vmem:[%s1236_s6 + $0xb8] sm:$0xff] %v329_v23  ;;  %v331_v24 = vld [vmem:[%s1231_s5 + $0x180] sm:$0xff]  ;;  %v333_v25 = vld [vmem:[%s1231_s5 + $0x190] sm:$0xff] }
  0x20   : > { %v335_v26 = vld [vmem:[%s1231_s5 + $0x1a0] sm:$0xff]  ;;  %332 = vst [vmem:[%s1236_s6 + $0xc0] sm:$0xff] %v331_v24  ;;  %334 = vst [vmem:[%s1236_s6 + $0xc8] sm:$0xff] %v333_v25  ;;  %v337_v27 = vld [vmem:[%s1231_s5 + $0x1b0] sm:$0xff] }
  0x21   : > { %336 = vst [vmem:[%s1236_s6 + $0xd0] sm:$0xff] %v335_v26  ;;  %v339_v28 = vld [vmem:[%s1231_s5 + $0x1c0] sm:$0xff]  ;;  %v341_v29 = vld [vmem:[%s1231_s5 + $0x1d0] sm:$0xff]  ;;  %338 = vst [vmem:[%s1236_s6 + $0xd8] sm:$0xff] %v337_v27 }
  0x22   : > { %340 = vst [vmem:[%s1236_s6 + $0xe0] sm:$0xff] %v339_v28  ;;  %342 = vst [vmem:[%s1236_s6 + $0xe8] sm:$0xff] %v341_v29  ;;  %v343_v30 = vld [vmem:[%s1231_s5 + $0x1e0] sm:$0xff]  ;;  %v345_v31 = vld [vmem:[%s1231_s5 + $0x1f0] sm:$0xff] }
  0x23   : > { %344 = vst [vmem:[%s1236_s6 + $0xf0] sm:$0xff] %v343_v30  ;;  %346 = vst [vmem:[%s1236_s6 + $0xf8] sm:$0xff] %v345_v31 }
  0x24 PF: > { %p936_p8 = scmp.ge.s32.totalorder %s1156_s19, 1  ;;  %p367_p9 = scmp.lt.s32.totalorder %s1156_s19, 3 }
  0x26   : > { %p368_p10 = pnand %p936_p8, %p367_p9 }
  0x27   : > { %s374_s7 = sand.u32 (!%p368_p10), 1, %s1140_s15   ;;  %s939_s26 = sshll.u32 (!%p368_p10), %s1148_s17, 1 }
  0x28   : > { %371 = sbr.rel (%p368_p10) target bundleno = 325 (0x145), region = 70  ;;  %s937_s8 = sshll.u32 (!%p368_p10), %s374_s7, 8 }
  0x29   : > { %s1310_s13 = scalar_lea.vmem (!%p368_p10), [#allocation2], %s937_s8  ;;  %p421_p11 = scmp.lt.s32.totalorder (!%p368_p10), %s939_s26, 3 }
  0x2a   : > { %s938_s8 = sshll.u32 (!%p368_p10), %s374_s7, 5 }
  0x2b   : > { %s411_s9 = scalar_lea.vmem (!%p368_p10), [#allocation3], %s938_s8 }
  0x2d   : > { %v1114_v32 = vld [vmem:[%s1380_s0 + $0x4] ss:$8 sps:$4 sm:$0xff]   ;;  %v1117_v33 = vld [vmem:[%s1380_s0 + $0x14] ss:$8 sps:$4 sm:$0xff]   ;;  %v1066_v35 = vld [vmem:[%s1310_s13 + $0x70] ss:$8 sps:$4 sm:$0xff]   ;;  %v703_v4 = vlaneseq }
  0x2e   : > { %v1064_v34 = vld [vmem:[%s1310_s13 + $0x74] ss:$8 sps:$4 sm:$0xff]   ;;  %680 = vmatprep.mubr.bf16.mxu0 %v1114_v32  ;;  %690 = vmatprep.mubr.bf16.mxu1 %v1117_v33  ;;  %v1067_v36 = vld [vmem:[%s1310_s13 + $0x64] ss:$8 sps:$4 sm:$0xff]   ;;  %v1069_v37 = vld [vmem:[%s1310_s13 + $0x60] ss:$8 sps:$4 sm:$0xff]  }
  0x2f   : > { %648 = vmatprep.subr.bf16.mxu0 %v1064_v34  ;;  %992 = vmatprep.subr.bf16.mxu1 %v1064_v34  ;;  %v1070_v38 = vld [vmem:[%s1310_s13 + $0x54] ss:$8 sps:$4 sm:$0xff]   ;;  %v1072_v39 = vld [vmem:[%s1310_s13 + $0x50] ss:$8 sps:$4 sm:$0xff]   ;;  %v1073_v40 = vld [vmem:[%s1310_s13 + $0x44] ss:$8 sps:$4 sm:$0xff]  }
  0x30   : > { %649 = vmatpush1.bf16.msra.mxu0 %v1066_v35  ;;  %1008 = vmatpush1.bf16.msra.mxu1 %v1066_v35  ;;  %v1075_v41 = vld [vmem:[%s1310_s13 + $0x40] ss:$8 sps:$4 sm:$0xff]   ;;  %v1076_v42 = vld [vmem:[%s1310_s13 + $0x34] ss:$8 sps:$4 sm:$0xff]   ;;  %v1078_v43 = vld [vmem:[%s1310_s13 + $0x30] ss:$8 sps:$4 sm:$0xff]  }
  0x31   : > { %650 = vmatprep.subr.bf16.mxu0 %v1067_v36  ;;  %993 = vmatprep.subr.bf16.mxu1 %v1067_v36  ;;  %v1079_v44 = vld [vmem:[%s1310_s13 + $0x24] ss:$8 sps:$4 sm:$0xff]   ;;  %v1081_v45 = vld [vmem:[%s1310_s13 + $0x20] ss:$8 sps:$4 sm:$0xff]   ;;  %v1082_v46 = vld [vmem:[%s1310_s13 + $0x14] ss:$8 sps:$4 sm:$0xff]  }
  0x32   : > { %v1084_v47 = vld [vmem:[%s1310_s13 + $0x10] ss:$8 sps:$4 sm:$0xff]   ;;  %v1085_v48 = vld [vmem:[%s1310_s13 + $0x4] ss:$8 sps:$4 sm:$0xff]   ;;  %v1087_v49 = vld [vmem:[%s1310_s13] ss:$8 sps:$4 sm:$0xff]  }
  0x33   : > { %v1088_v50 = vld [vmem:[%s1310_s13 + $0xf4] ss:$8 sps:$4 sm:$0xff]   ;;  %v1090_v51 = vld [vmem:[%s1310_s13 + $0xf0] ss:$8 sps:$4 sm:$0xff]   ;;  %v1091_v52 = vld [vmem:[%s1310_s13 + $0xe4] ss:$8 sps:$4 sm:$0xff]  }
  0x34   : > { %651 = vmatpush1.bf16.msra.mxu0 %v1069_v37  ;;  %1009 = vmatpush1.bf16.msra.mxu1 %v1069_v37  ;;  %v1093_v53 = vld [vmem:[%s1310_s13 + $0xe0] ss:$8 sps:$4 sm:$0xff]   ;;  %v1094_v54 = vld [vmem:[%s1310_s13 + $0xd4] ss:$8 sps:$4 sm:$0xff]   ;;  %v1096_v55 = vld [vmem:[%s1310_s13 + $0xd0] ss:$8 sps:$4 sm:$0xff]  }
  0x35   : > { %652 = vmatprep.subr.bf16.mxu0 %v1070_v38  ;;  %994 = vmatprep.subr.bf16.mxu1 %v1070_v38  ;;  %v1097_v56 = vld [vmem:[%s1310_s13 + $0xc4] ss:$8 sps:$4 sm:$0xff]   ;;  %v1099_v57 = vld [vmem:[%s1310_s13 + $0xc0] ss:$8 sps:$4 sm:$0xff]   ;;  %v1100_v58 = vld [vmem:[%s1310_s13 + $0xb4] ss:$8 sps:$4 sm:$0xff]  }
  0x36   : > { %v1102_v59 = vld [vmem:[%s1310_s13 + $0xb0] ss:$8 sps:$4 sm:$0xff]   ;;  %v1103_v60 = vld [vmem:[%s1310_s13 + $0xa4] ss:$8 sps:$4 sm:$0xff]   ;;  %v1105_v61 = vld [vmem:[%s1310_s13 + $0xa0] ss:$8 sps:$4 sm:$0xff]  }
  0x37   : > { %v1106_v62 = vld [vmem:[%s1310_s13 + $0x94] ss:$8 sps:$4 sm:$0xff]   ;;  %v1108_v63 = vld [vmem:[%s1310_s13 + $0x90] ss:$8 sps:$4 sm:$0xff]   ;;  %v1109_v0 = vld [vmem:[%s1310_s13 + $0x84] ss:$8 sps:$4 sm:$0xff]  }
  0x38   : > { %653 = vmatpush1.bf16.msra.mxu0 %v1072_v39  ;;  %1010 = vmatpush1.bf16.msra.mxu1 %v1072_v39  ;;  %v1111_v1 = vld [vmem:[%s1310_s13 + $0x80] ss:$8 sps:$4 sm:$0xff]   ;;  %v1115_v3 = vld [vmem:[%s1380_s0 + $0x10] ss:$8 sps:$4 sm:$0xff]   ;;  %s1393_s26 = smov (!%p421_p11, %s939_s26), 3  ;;  %v704_v5 = vshrl.u32 %v703_v4, 7 }
  0x39   : > { %654 = vmatprep.subr.bf16.mxu0 %v1073_v40  ;;  %995 = vmatprep.subr.bf16.mxu1 %v1073_v40  ;;  %v1112_v2 = vld [vmem:[%s1380_s0] ss:$8 sps:$4 sm:$0xff]   ;;  %s423_s29 = scalar_lea.vmem %s1382_s2, %s1393_s26  ;;  %s428_s6 = scalar_lea.vmem %s1383_s3, %s1393_s26 }
  0x3a   : > { %v705_v6 = vsub.s32 0, %v704_v5  ;;  %v701_v7 = vld [vmem:[%s423_s29] sm:$0x3]  ;;  %v709_v8 = vsub.s32 1, %v704_v5  ;;  %s991_s15 = sshll.u32 (%p1218_p6), %s1148_s17, 3 }
  0x3b   : > { %v721_v10 = vld [vmem:[%s428_s6] sm:$0x3]  ;;  %s781_s11 = scalar_lea.vmem (%p1218_p6), %s1384_s4, %s991_s15 }
  0x3c   : > { %655 = vmatpush1.bf16.msra.mxu0 %v1075_v41  ;;  %1011 = vmatpush1.bf16.msra.mxu1 %v1075_v41  ;;  %v706_v9 = vrot.slane %v701_v7, %v705_v6  ;;  %v710_v11 = vrot.slane %v701_v7, %v709_v8  ;;  %v726_v15 = vrot.slane %v721_v10, %v705_v6 }
  0x3d   : > { %656 = vmatprep.subr.bf16.mxu0 %v1076_v42  ;;  %996 = vmatprep.subr.bf16.mxu1 %v1076_v42  ;;  %v730_v17 = vrot.slane %v721_v10, %v709_v8 }
  0x40   : > { %657 = vmatpush1.bf16.msra.mxu0 %v1078_v43  ;;  %1012 = vmatpush1.bf16.msra.mxu1 %v1078_v43 }
  0x41   : > { %658 = vmatprep.subr.bf16.mxu0 %v1079_v44  ;;  %997 = vmatprep.subr.bf16.mxu1 %v1079_v44 }
  0x44   : > { %659 = vmatpush1.bf16.msra.mxu0 %v1081_v45  ;;  %1013 = vmatpush1.bf16.msra.mxu1 %v1081_v45 }
  0x45   : > { %660 = vmatprep.subr.bf16.mxu0 %v1082_v46  ;;  %998 = vmatprep.subr.bf16.mxu1 %v1082_v46 }
  0x48   : > { %661 = vmatpush1.bf16.msra.mxu0 %v1084_v47  ;;  %1014 = vmatpush1.bf16.msra.mxu1 %v1084_v47 }
  0x49   : > { %662 = vmatprep.subr.bf16.mxu0 %v1085_v48  ;;  %999 = vmatprep.subr.bf16.mxu1 %v1085_v48 }
  0x4c   : > { %663 = vmatpush1.bf16.msra.mxu0 %v1087_v49  ;;  %1015 = vmatpush1.bf16.msra.mxu1 %v1087_v49 }
  0x4d   : > { %664 = vmatprep.subr.bf16.mxu0 %v1088_v50  ;;  %1000 = vmatprep.subr.bf16.mxu1 %v1088_v50 }
  0x50   : > { %665 = vmatpush2.bf16.msra.mxu0 %v1090_v51  ;;  %1016 = vmatpush2.bf16.msra.mxu1 %v1090_v51 }
  0x51   : > { %666 = vmatprep.subr.bf16.mxu0 %v1091_v52  ;;  %1001 = vmatprep.subr.bf16.mxu1 %v1091_v52 }
  0x54   : > { %667 = vmatpush2.bf16.msra.mxu0 %v1093_v53  ;;  %1017 = vmatpush2.bf16.msra.mxu1 %v1093_v53 }
  0x55   : > { %668 = vmatprep.subr.bf16.mxu0 %v1094_v54  ;;  %1002 = vmatprep.subr.bf16.mxu1 %v1094_v54 }
  0x58   : > { %669 = vmatpush2.bf16.msra.mxu0 %v1096_v55  ;;  %1018 = vmatpush2.bf16.msra.mxu1 %v1096_v55 }
  0x59   : > { %670 = vmatprep.subr.bf16.mxu0 %v1097_v56  ;;  %1003 = vmatprep.subr.bf16.mxu1 %v1097_v56 }
  0x5c   : > { %671 = vmatpush2.bf16.msra.mxu0 %v1099_v57  ;;  %1019 = vmatpush2.bf16.msra.mxu1 %v1099_v57 }
  0x5d   : > { %672 = vmatprep.subr.bf16.mxu0 %v1100_v58  ;;  %1004 = vmatprep.subr.bf16.mxu1 %v1100_v58 }
  0x60   : > { %673 = vmatpush2.bf16.msra.mxu0 %v1102_v59  ;;  %1020 = vmatpush2.bf16.msra.mxu1 %v1102_v59 }
  0x61   : > { %674 = vmatprep.subr.bf16.mxu0 %v1103_v60  ;;  %1005 = vmatprep.subr.bf16.mxu1 %v1103_v60 }
  0x64   : > { %675 = vmatpush2.bf16.msra.mxu0 %v1105_v61  ;;  %1021 = vmatpush2.bf16.msra.mxu1 %v1105_v61 }
  0x65   : > { %676 = vmatprep.subr.bf16.mxu0 %v1106_v62  ;;  %1006 = vmatprep.subr.bf16.mxu1 %v1106_v62 }
  0x68   : > { %677 = vmatpush2.bf16.msra.mxu0 %v1108_v63  ;;  %1022 = vmatpush2.bf16.msra.mxu1 %v1108_v63 }
  0x69   : > { %678 = vmatprep.subr.bf16.mxu0 %v1109_v0  ;;  %1007 = vmatprep.subr.bf16.mxu1 %v1109_v0 }
  0x6c   : > { %679 = vmatpush2.bf16.msra.mxu0 %v1111_v1  ;;  %1023 = vmatpush2.bf16.msra.mxu1 %v1111_v1 }
  0x6f   : > { %681 = vmatmul.mubr.bf16.vlgmr.msra.gmra.mxu0 %v1112_v2  ;;  %691 = vmatmul.mubr.bf16.vlgmr.msra.gmra.mxu1 %v1115_v3 }
 0x12f   : > { %v682_v12 = vpop.f32.mrf.mxu0  ;;  %v692_v13 = vpop.f32.mrf.mxu1 }
 0x130   : > { %v713_v14 = vmul.f32 %v706_v9, %v682_v12  ;;  %v717_v16 = vmul.f32 %v706_v9, %v692_v13 }
 0x131   : > { %v684_v18 = vpop.f32.mrf.mxu0  ;;  %v694_v19 = vpop.f32.mrf.mxu1 }
 0x132   : > { %v714_v20 = vmul.f32 %v710_v11, %v684_v18  ;;  %v718_v21 = vmul.f32 %v710_v11, %v694_v19  ;;  %v733_v24 = vadd.f32 %v726_v15, %v713_v14  ;;  %v737_v25 = vadd.f32 %v726_v15, %v717_v16 }
 0x133   : > { %v686_v22 = vpop.f32.mrf.mxu0  ;;  %v696_v23 = vpop.f32.mrf.mxu1 }
 0x134   : > { %v734_v26 = vadd.f32 %v730_v17, %v714_v20  ;;  %v738_v27 = vadd.f32 %v730_v17, %v718_v21  ;;  %v715_v28 = vmul.f32 %v706_v9, %v686_v22  ;;  %v719_v29 = vmul.f32 %v706_v9, %v696_v23 }
 0x135   : > { %v688_v30 = vpop.f32.mrf.mxu0  ;;  %v698_v31 = vpop.f32.mrf.mxu1 }
 0x136   : > { %v987_v32 = vpack.c.bf16 %v734_v26, %v733_v24  ;;  %v989_v33 = vpack.c.bf16 %v738_v27, %v737_v25  ;;  %v716_v34 = vmul.f32 %v710_v11, %v688_v30  ;;  %v720_v35 = vmul.f32 %v710_v11, %v698_v31 }
 0x137   : > { %v735_v36 = vadd.f32 %v726_v15, %v715_v28  ;;  %v739_v37 = vadd.f32 %v726_v15, %v719_v29 }
 0x138   : > { %765 = vst [vmem:[%s411_s9] sm:$0xff] %v987_v32  ;;  %767 = vst [vmem:[%s411_s9 + $0x10] sm:$0xff] %v989_v33  ;;  %v736_v38 = vadd.f32 %v730_v17, %v716_v34  ;;  %v740_v39 = vadd.f32 %v730_v17, %v720_v35  ;;  %775 = sbr.rel (!%p1218_p6) target bundleno = 325 (0x145), region = 78 }
 0x13a   : > { %v988_v40 = vpack.c.bf16 %v736_v38, %v735_v36  ;;  %v990_v41 = vpack.c.bf16 %v740_v39, %v739_v37 }
 0x13c   : > { %766 = vst [vmem:[%s411_s9 + $0x8] sm:$0xff] %v988_v40  ;;  %768 = vst [vmem:[%s411_s9 + $0x18] sm:$0xff] %v990_v41 }
 0x13f   : > { %v816_v42 = vld [vmem:[%s411_s9] sm:$0xff]  ;;  %v820_v44 = vld [vmem:[%s411_s9 + $0x10] sm:$0xff] }
 0x140   : > { %817 = vst [vmem:[%s781_s11] sm:$0xff] %v816_v42  ;;  %821 = vst [vmem:[%s781_s11 + $0x20] sm:$0xff] %v820_v44 }
 0x143   : > { %v818_v43 = vld [vmem:[%s411_s9 + $0x8] sm:$0xff]  ;;  %v822_v45 = vld [vmem:[%s411_s9 + $0x18] sm:$0xff] }
 0x144   : > { %819 = vst [vmem:[%s781_s11 + $0x10] sm:$0xff] %v818_v43  ;;  %823 = vst [vmem:[%s781_s11 + $0x30] sm:$0xff] %v822_v45 }
 0x145 PF: > { %s14_s19 = sadd.s32 1, %s1156_s19   ;;  %s1386_s15 = smov %s1144_s16 }
 0x146   : > { %p11_p12 = scmp.ge.s32.totalorder %s14_s19, 4   ;;  %s1387_s16 = smov %s1223_s25 }
 0x147   : > { %s1388_s17 = smov %s1152_s18  ;;  %s1389_s18 = smov %s1391_s20 }
 0x148   :  { %13 = sbr.rel (!%p11_p12) target bundleno = 3 (0x3), region = 156 }

// kernel: resnet_forward.59
= control target key start
LH: loop header
LB: loop body
LE: loop exit
PB: predicated region body
PF: predicated region fallthrough
CT: control target
= control target key end

     0   :  { %s1114_s18 = smov 0   ;;  %s1116_s19 = smov 0   ;;  %s1256_s0 = inlined_call_operand.vmem [shape: bf16[32,128], index: 0, kind: input, shape index: {}]   ;;  %s1257_s1 = inlined_call_operand.vmem [shape: bf16[128,512], index: 1, kind: input, shape index: {}]   ;;  %s1258_s2 = inlined_call_operand.vmem [shape: f32[1,512], index: 2, kind: input, shape index: {}]   ;;  %s1259_s3 = inlined_call_operand.vmem [shape: f32[1,512], index: 3, kind: input, shape index: {}]   ;;  %s1260_s4 = inlined_call_operand.vmem [shape: bf16[32,512], index: 4, kind: input, shape index: {}]   ;;  %s1261_s5 = inlined_call_operand.vmem [shape: bf16[32,512], index: 5, kind: output, shape index: {}]  }
   0x1   :  { %s1118_s20 = smov 0   ;;  %s1120_s21 = smov 0  }
   0x2   :  { %s1122_s22 = smov 0  }
   0x3 LB: > { %s24_s23 = sadd.s32 1, %s1077_s21  ;;  %s909_s24 = sadd.s32 4294967295, %s1081_s22   ;;  %s1081_s22 = sphi %s1122_s22, %s15_s22   ;;  %s1077_s21 = sphi %s1120_s21, %s1267_s21   ;;  %s1073_s20 = sphi %s1118_s20, %s1266_s20   ;;  %s1069_s19 = sphi %s1116_s19, %s1265_s19   ;;  %s1065_s18 = sphi %s1114_s18, %s1264_s18  }
   0x4   : > { %p25_p0 = scmp.ge.s32.totalorder %s24_s23, 2  ;;  %p67_p1 = scmp.ne.s32.totalorder %s1069_s19, %s1065_s18 }
   0x5   : > { %p68_p2 = scmp.eq.s32.totalorder %s1081_s22, 0  ;;  %p179_p4 = scmp.eq.s32.totalorder %s909_s24, 1 }
   0x6   : > { %s1269_s23 = smov (%p25_p0, %s24_s23), 0  ;;  %s60_s27 = sadd.s32 1, %s1069_s19 }
   0x7   : > { %p1146_p3 = por %p68_p2, %p67_p1  ;;  %s57_s26 = ssub.s32 %s1077_s21, %s1269_s23 }
   0x8   : > { %p58_p5 = scmp.eq.s32.totalorder %s57_s26, 0  ;;  %p1153_p6 = por %p179_p4, %p67_p1 }
   0x9   : > { %p913_p7 = scmp.ge.s32.totalorder %s1081_s22, 2 }
   0xa   : > { %s1158_s29 = scalar_select %p58_p5, %s1069_s19, %s60_s27  }
   0xb   : > { %210 = sbr.rel (%p913_p7) target bundleno = 34 (0x22), region = 20 }
  0x10   : > { %213 = sbr.rel (!%p1146_p3) target bundleno = 28 (0x1c), region = 24  ;;  %s215_s30 = sand.u32 (%p1146_p3), 1, %s1069_s19  }
  0x11   : > { %s953_s6 = sshll.u32 (%p1146_p3), %s1077_s21, 3  ;;  %s914_s7 = sshll.u32 (%p1146_p3), %s215_s30, 7 }
  0x12   : > { %s1168_s10 = scalar_lea.vmem (%p1146_p3), %s1257_s1, %s953_s6  ;;  %s217_s11 = scalar_lea.vmem (%p1146_p3), [#allocation2], %s914_s7 }
  0x13   : > { %v279_v0 = vld [vmem:[%s1168_s10] sm:$0xff] (%p1146_p3)  ;;  %v281_v1 = vld [vmem:[%s1168_s10 + $0x10] sm:$0xff] (%p1146_p3) }
  0x14   : > { %v283_v2 = vld [vmem:[%s1168_s10 + $0x20] sm:$0xff] (%p1146_p3)  ;;  %280 = vst [vmem:[%s217_s11] sm:$0xff] (%p1146_p3), %v279_v0  ;;  %282 = vst [vmem:[%s217_s11 + $0x8] sm:$0xff] (%p1146_p3), %v281_v1  ;;  %v285_v3 = vld [vmem:[%s1168_s10 + $0x30] sm:$0xff] (%p1146_p3) }
  0x15   : > { %284 = vst [vmem:[%s217_s11 + $0x10] sm:$0xff] %v283_v2  ;;  %v287_v4 = vld [vmem:[%s1168_s10 + $0x40] sm:$0xff]  ;;  %v289_v5 = vld [vmem:[%s1168_s10 + $0x50] sm:$0xff]  ;;  %286 = vst [vmem:[%s217_s11 + $0x18] sm:$0xff] %v285_v3 }
  0x16   : > { %288 = vst [vmem:[%s217_s11 + $0x20] sm:$0xff] %v287_v4  ;;  %290 = vst [vmem:[%s217_s11 + $0x28] sm:$0xff] %v289_v5  ;;  %v291_v6 = vld [vmem:[%s1168_s10 + $0x60] sm:$0xff]  ;;  %v293_v7 = vld [vmem:[%s1168_s10 + $0x70] sm:$0xff] }
  0x17   : > { %v295_v8 = vld [vmem:[%s1168_s10 + $0x80] sm:$0xff]  ;;  %292 = vst [vmem:[%s217_s11 + $0x30] sm:$0xff] %v291_v6  ;;  %294 = vst [vmem:[%s217_s11 + $0x38] sm:$0xff] %v293_v7  ;;  %v297_v9 = vld [vmem:[%s1168_s10 + $0x90] sm:$0xff] }
  0x18   : > { %296 = vst [vmem:[%s217_s11 + $0x40] sm:$0xff] %v295_v8  ;;  %v299_v10 = vld [vmem:[%s1168_s10 + $0xa0] sm:$0xff]  ;;  %v301_v11 = vld [vmem:[%s1168_s10 + $0xb0] sm:$0xff]  ;;  %298 = vst [vmem:[%s217_s11 + $0x48] sm:$0xff] %v297_v9 }
  0x19   : > { %300 = vst [vmem:[%s217_s11 + $0x50] sm:$0xff] %v299_v10  ;;  %302 = vst [vmem:[%s217_s11 + $0x58] sm:$0xff] %v301_v11  ;;  %v303_v12 = vld [vmem:[%s1168_s10 + $0xc0] sm:$0xff]  ;;  %v305_v13 = vld [vmem:[%s1168_s10 + $0xd0] sm:$0xff] }
  0x1a   : > { %v307_v14 = vld [vmem:[%s1168_s10 + $0xe0] sm:$0xff]  ;;  %304 = vst [vmem:[%s217_s11 + $0x60] sm:$0xff] %v303_v12  ;;  %306 = vst [vmem:[%s217_s11 + $0x68] sm:$0xff] %v305_v13  ;;  %v309_v15 = vld [vmem:[%s1168_s10 + $0xf0] sm:$0xff] }
  0x1b   : > { %308 = vst [vmem:[%s217_s11 + $0x70] sm:$0xff] %v307_v14  ;;  %310 = vst [vmem:[%s217_s11 + $0x78] sm:$0xff] %v309_v15 }
  0x1c PF: > { %332 = sbr.rel (!%p1146_p3) target bundleno = 34 (0x22), region = 70  ;;  %s334_s12 = sand.u32 (%p1146_p3), 1, %s1069_s19  }
  0x1d   : > { %s954_s13 = sshll.u32 (%p1146_p3), %s1077_s21, 3  ;;  %s917_s14 = sshll.u32 (%p1146_p3), %s334_s12, 5 }
  0x1e   : > { %s342_s17 = scalar_lea.vmem (%p1146_p3), %s1260_s4, %s954_s13  ;;  %s336_s24 = scalar_lea.vmem (%p1146_p3), [#allocation3], %s917_s14 }
  0x1f   : > { %v377_v16 = vld [vmem:[%s342_s17] sm:$0xff] (%p1146_p3)  ;;  %v379_v17 = vld [vmem:[%s342_s17 + $0x10] sm:$0xff] (%p1146_p3) }
  0x20   : > { %v381_v18 = vld [vmem:[%s342_s17 + $0x20] sm:$0xff] (%p1146_p3)  ;;  %378 = vst [vmem:[%s336_s24] sm:$0xff] (%p1146_p3), %v377_v16  ;;  %380 = vst [vmem:[%s336_s24 + $0x8] sm:$0xff] (%p1146_p3), %v379_v17  ;;  %v383_v19 = vld [vmem:[%s342_s17 + $0x30] sm:$0xff] (%p1146_p3) }
  0x21   : > { %382 = vst [vmem:[%s336_s24 + $0x10] sm:$0xff] %v381_v18  ;;  %384 = vst [vmem:[%s336_s24 + $0x18] sm:$0xff] %v383_v19 }
  0x22 PF: > { %p920_p8 = scmp.ge.s32.totalorder %s1081_s22, 1  ;;  %p389_p9 = scmp.lt.s32.totalorder %s1081_s22, 3 }
  0x24   : > { %p390_p10 = pnand %p920_p8, %p389_p9 }
  0x25   : > { %s396_s25 = sand.u32 (!%p390_p10), 1, %s1065_s18   ;;  %s924_s9 = sshll.u32 (!%p390_p10), %s1073_s20, 1 }
  0x26   : > { %393 = sbr.rel (%p390_p10) target bundleno = 295 (0x127), region = 108  ;;  %s921_s26 = sshll.u32 (!%p390_p10), %s396_s25, 7 }
  0x27   : > { %s1198_s27 = scalar_lea.vmem (!%p390_p10), [#allocation2], %s921_s26  ;;  %p454_p11 = scmp.lt.s32.totalorder (!%p390_p10), %s924_s9, 3 }
  0x28   : > { %s1225_s10 = sshll.u32 (!%p390_p10), %s396_s25, 5 }
  0x29   : > { %s405_s17 = scalar_lea.vmem (!%p390_p10), [#allocation3], %s1225_s10  ;;  %s445_s18 = scalar_lea.vmem (!%p390_p10), [#allocation4], %s1225_s10 }
  0x2b   : > { %v1083_v20 = vmov 0   ;;  %v1017_v21 = vld [vmem:[%s1198_s27 + $0x74] ss:$8 sps:$4 sm:$0xff]   ;;  %v1019_v22 = vld [vmem:[%s1198_s27 + $0x70] ss:$8 sps:$4 sm:$0xff]   ;;  %v1041_v37 = vld [vmem:[%s1256_s0] sm:$0xff]   ;;  %v635_v39 = vlaneseq }
  0x2c   : > { %612 = vmatprep.mubr.bf16.mxu0 %v1083_v20  ;;  %622 = vmatprep.mubr.bf16.mxu1 %v1083_v20  ;;  %v1020_v23 = vld [vmem:[%s1198_s27 + $0x64] ss:$8 sps:$4 sm:$0xff]   ;;  %v1022_v24 = vld [vmem:[%s1198_s27 + $0x60] ss:$8 sps:$4 sm:$0xff]   ;;  %v1023_v25 = vld [vmem:[%s1198_s27 + $0x54] ss:$8 sps:$4 sm:$0xff]  }
  0x2d   : > { %580 = vmatprep.subr.bf16.mxu0 %v1017_v21  ;;  %960 = vmatprep.subr.bf16.mxu1 %v1017_v21  ;;  %v1025_v26 = vld [vmem:[%s1198_s27 + $0x50] ss:$8 sps:$4 sm:$0xff]   ;;  %v1026_v27 = vld [vmem:[%s1198_s27 + $0x44] ss:$8 sps:$4 sm:$0xff]   ;;  %v1028_v28 = vld [vmem:[%s1198_s27 + $0x40] ss:$8 sps:$4 sm:$0xff]  }
  0x2e   : > { %581 = vmatpush1.bf16.msra.mxu0 %v1019_v22  ;;  %968 = vmatpush1.bf16.msra.mxu1 %v1019_v22  ;;  %v1029_v29 = vld [vmem:[%s1198_s27 + $0x34] ss:$8 sps:$4 sm:$0xff]   ;;  %v1031_v30 = vld [vmem:[%s1198_s27 + $0x30] ss:$8 sps:$4 sm:$0xff]   ;;  %v1032_v31 = vld [vmem:[%s1198_s27 + $0x24] ss:$8 sps:$4 sm:$0xff]  }
  0x2f   : > { %582 = vmatprep.subr.bf16.mxu0 %v1020_v23  ;;  %961 = vmatprep.subr.bf16.mxu1 %v1020_v23  ;;  %v1034_v32 = vld [vmem:[%s1198_s27 + $0x20] ss:$8 sps:$4 sm:$0xff]   ;;  %v1035_v33 = vld [vmem:[%s1198_s27 + $0x14] ss:$8 sps:$4 sm:$0xff]   ;;  %v1037_v34 = vld [vmem:[%s1198_s27 + $0x10] ss:$8 sps:$4 sm:$0xff]  }
  0x30   : > { %v1038_v35 = vld [vmem:[%s1198_s27 + $0x4] ss:$8 sps:$4 sm:$0xff]   ;;  %v1040_v36 = vld [vmem:[%s1198_s27] ss:$8 sps:$4 sm:$0xff]   ;;  %s1271_s9 = smov (!%p454_p11, %s924_s9), 3  ;;  %v636_v40 = vshrl.u32 %v635_v39, 7 }
  0x31   : > { %v1042_v38 = vld [vmem:[%s1256_s0 + $0x8] sm:$0xff]   ;;  %s456_s13 = scalar_lea.vmem %s1258_s2, %s1271_s9  ;;  %s461_s16 = scalar_lea.vmem %s1259_s3, %s1271_s9  ;;  %v673_v46 = vld [vmem:[%s405_s17] sm:$0xff]  ;;  %v675_v47 = vld [vmem:[%s405_s17 + $0x10] sm:$0xff] }
  0x32   : > { %583 = vmatpush1.bf16.msra.mxu0 %v1022_v24  ;;  %969 = vmatpush1.bf16.msra.mxu1 %v1022_v24  ;;  %v637_v41 = vsub.s32 0, %v636_v40  ;;  %v633_v42 = vld [vmem:[%s456_s13] sm:$0x3]  ;;  %v641_v43 = vsub.s32 1, %v636_v40  ;;  %v677_v51 = vunpack.c.l.bf16 %v673_v46  ;;  %v681_v55 = vunpack.c.l.bf16 %v675_v47  ;;  %v674_v1 = vld [vmem:[%s405_s17 + $0x8] sm:$0xff]  ;;  %v676_v2 = vld [vmem:[%s405_s17 + $0x18] sm:$0xff] }
  0x33   : > { %584 = vmatprep.subr.bf16.mxu0 %v1023_v25  ;;  %962 = vmatprep.subr.bf16.mxu1 %v1023_v25  ;;  %v653_v44 = vld [vmem:[%s461_s16] sm:$0x3]  ;;  %v678_v58 = vunpack.c.h.bf16 %v673_v46  ;;  %v682_v60 = vunpack.c.h.bf16 %v675_v47  ;;  %v679_v10 = vunpack.c.l.bf16 %v674_v1  ;;  %v683_v12 = vunpack.c.l.bf16 %v676_v2  ;;  %s959_s24 = sshll.u32 (%p1153_p6), %s1073_s20, 3 }
  0x34   : > { %v638_v45 = vrot.slane %v633_v42, %v637_v41  ;;  %v658_v48 = vrot.slane %v653_v44, %v637_v41  ;;  %v642_v49 = vrot.slane %v633_v42, %v641_v43  ;;  %v662_v56 = vrot.slane %v653_v44, %v641_v43  ;;  %s741_s27 = scalar_lea.vmem (%p1153_p6), %s1261_s5, %s959_s24 }
  0x35   : > { %v680_v17 = vunpack.c.h.bf16 %v674_v1  ;;  %v684_v18 = vunpack.c.h.bf16 %v676_v2 }
  0x36   : > { %585 = vmatpush1.bf16.msra.mxu0 %v1025_v26  ;;  %970 = vmatpush1.bf16.msra.mxu1 %v1025_v26 }
  0x37   : > { %586 = vmatprep.subr.bf16.mxu0 %v1026_v27  ;;  %963 = vmatprep.subr.bf16.mxu1 %v1026_v27 }
  0x3a   : > { %587 = vmatpush1.bf16.msra.mxu0 %v1028_v28  ;;  %971 = vmatpush1.bf16.msra.mxu1 %v1028_v28 }
  0x3b   : > { %588 = vmatprep.subr.bf16.mxu0 %v1029_v29  ;;  %964 = vmatprep.subr.bf16.mxu1 %v1029_v29 }
  0x3e   : > { %589 = vmatpush1.bf16.msra.mxu0 %v1031_v30  ;;  %972 = vmatpush1.bf16.msra.mxu1 %v1031_v30 }
  0x3f   : > { %590 = vmatprep.subr.bf16.mxu0 %v1032_v31  ;;  %965 = vmatprep.subr.bf16.mxu1 %v1032_v31 }
  0x42   : > { %591 = vmatpush1.bf16.msra.mxu0 %v1034_v32  ;;  %973 = vmatpush1.bf16.msra.mxu1 %v1034_v32 }
  0x43   : > { %592 = vmatprep.subr.bf16.mxu0 %v1035_v33  ;;  %966 = vmatprep.subr.bf16.mxu1 %v1035_v33 }
  0x46   : > { %593 = vmatpush1.bf16.msra.mxu0 %v1037_v34  ;;  %974 = vmatpush1.bf16.msra.mxu1 %v1037_v34 }
  0x47   : > { %594 = vmatprep.subr.bf16.mxu0 %v1038_v35  ;;  %967 = vmatprep.subr.bf16.mxu1 %v1038_v35 }
  0x4a   : > { %595 = vmatpush1.bf16.msra.mxu0 %v1040_v36  ;;  %975 = vmatpush1.bf16.msra.mxu1 %v1040_v36 }
  0x4d   : > { %613 = vmatmul.mubr.bf16.vlgmr.msra.gmra.mxu0 %v1041_v37  ;;  %623 = vmatmul.mubr.bf16.vlgmr.msra.gmra.mxu1 %v1042_v38 }
 0x10d   : > { %v614_v50 = vpop.f32.mrf.mxu0  ;;  %v624_v52 = vpop.f32.mrf.mxu1 }
 0x10e   : > { %v645_v53 = vmul.f32 %v638_v45, %v614_v50  ;;  %v649_v54 = vmul.f32 %v638_v45, %v624_v52 }
 0x10f   : > { %v616_v57 = vpop.f32.mrf.mxu0  ;;  %v626_v59 = vpop.f32.mrf.mxu1 }
 0x110   : > { %v665_v61 = vadd.f32 %v658_v48, %v645_v53  ;;  %v669_v62 = vadd.f32 %v658_v48, %v649_v54  ;;  %v646_v63 = vmul.f32 %v642_v49, %v616_v57  ;;  %v650_v0 = vmul.f32 %v642_v49, %v626_v59 }
 0x111   : > { %v618_v3 = vpop.f32.mrf.mxu0  ;;  %v628_v4 = vpop.f32.mrf.mxu1 }
 0x112   : > { %v685_v5 = vadd.f32 %v677_v51, %v665_v61  ;;  %v689_v6 = vadd.f32 %v681_v55, %v669_v62  ;;  %v666_v7 = vadd.f32 %v662_v56, %v646_v63  ;;  %v670_v8 = vadd.f32 %v662_v56, %v650_v0 }
 0x113   : > { %v647_v9 = vmul.f32 %v638_v45, %v618_v3  ;;  %v651_v11 = vmul.f32 %v638_v45, %v628_v4  ;;  %v620_v13 = vpop.f32.mrf.mxu0  ;;  %v630_v14 = vpop.f32.mrf.mxu1 }
 0x114   : > { %v686_v15 = vadd.f32 %v678_v58, %v666_v7  ;;  %v690_v16 = vadd.f32 %v682_v60, %v670_v8  ;;  %v648_v21 = vmul.f32 %v642_v49, %v620_v13  ;;  %v652_v22 = vmul.f32 %v642_v49, %v630_v14 }
 0x115   : > { %v667_v19 = vadd.f32 %v658_v48, %v647_v9  ;;  %v671_v20 = vadd.f32 %v658_v48, %v651_v11  ;;  %v693_v23 = vmax.f32 %v685_v5, 0.0  ;;  %v697_v24 = vmax.f32 %v689_v6, 0.0 }
 0x116   : > { %v694_v25 = vmax.f32 %v686_v15, 0.0  ;;  %v698_v26 = vmax.f32 %v690_v16, 0.0  ;;  %v668_v29 = vadd.f32 %v662_v56, %v648_v21  ;;  %v672_v30 = vadd.f32 %v662_v56, %v652_v22 }
 0x117   : > { %v687_v27 = vadd.f32 %v679_v10, %v667_v19  ;;  %v691_v28 = vadd.f32 %v683_v12, %v671_v20 }
 0x118   : > { %v955_v31 = vpack.c.bf16 %v694_v25, %v693_v23  ;;  %v957_v32 = vpack.c.bf16 %v698_v26, %v697_v24  ;;  %v688_v33 = vadd.f32 %v680_v17, %v668_v29  ;;  %v692_v34 = vadd.f32 %v684_v18, %v672_v30 }
 0x119   : > { %v695_v35 = vmax.f32 %v687_v27, 0.0  ;;  %v699_v36 = vmax.f32 %v691_v28, 0.0 }
 0x11a   : > { %725 = vst [vmem:[%s445_s18] sm:$0xff] %v955_v31  ;;  %727 = vst [vmem:[%s445_s18 + $0x10] sm:$0xff] %v957_v32  ;;  %v696_v37 = vmax.f32 %v688_v33, 0.0  ;;  %v700_v38 = vmax.f32 %v692_v34, 0.0  ;;  %735 = sbr.rel (!%p1153_p6) target bundleno = 295 (0x127), region = 120 }
 0x11c   : > { %v956_v39 = vpack.c.bf16 %v696_v37, %v695_v35  ;;  %v958_v40 = vpack.c.bf16 %v700_v38, %v699_v36 }
 0x11e   : > { %726 = vst [vmem:[%s445_s18 + $0x8] sm:$0xff] %v956_v39  ;;  %728 = vst [vmem:[%s445_s18 + $0x18] sm:$0xff] %v958_v40 }
 0x121   : > { %v776_v41 = vld [vmem:[%s445_s18] sm:$0xff]  ;;  %v780_v43 = vld [vmem:[%s445_s18 + $0x10] sm:$0xff] }
 0x122   : > { %777 = vst [vmem:[%s741_s27] sm:$0xff] %v776_v41  ;;  %781 = vst [vmem:[%s741_s27 + $0x20] sm:$0xff] %v780_v43 }
 0x125   : > { %v778_v42 = vld [vmem:[%s445_s18 + $0x8] sm:$0xff]  ;;  %v782_v44 = vld [vmem:[%s445_s18 + $0x18] sm:$0xff] }
 0x126   : > { %779 = vst [vmem:[%s741_s27 + $0x10] sm:$0xff] %v778_v42  ;;  %783 = vst [vmem:[%s741_s27 + $0x30] sm:$0xff] %v782_v44 }
 0x127 PF: > { %s15_s22 = sadd.s32 1, %s1081_s22   ;;  %s1264_s18 = smov %s1069_s19 }
 0x128   : > { %p12_p12 = scmp.ge.s32.totalorder %s15_s22, 4   ;;  %s1265_s19 = smov %s1158_s29 }
 0x129   : > { %s1266_s20 = smov %s1077_s21  ;;  %s1267_s21 = smov %s1269_s23 }
 0x12a   :  { %14 = sbr.rel (!%p12_p12) target bundleno = 3 (0x3), region = 206 }

// kernel: resnet_forward.60
= control target key start
LH: loop header
LB: loop body
LE: loop exit
PB: predicated region body
PF: predicated region fallthrough
CT: control target
= control target key end

     0   :  { %s788_s1 = inlined_call_operand.vmem [shape: bf16[512,128], index: 1, kind: input, shape index: {}]   ;;  %s789_s0 = inlined_call_operand.vmem [shape: bf16[32,512], index: 0, kind: input, shape index: {}]   ;;  %s790_s2 = inlined_call_operand.vmem [shape: f32[1,128], index: 2, kind: input, shape index: {}]   ;;  %s791_s3 = inlined_call_operand.vmem [shape: f32[1,128], index: 3, kind: input, shape index: {}]   ;;  %s792_s4 = inlined_call_operand.vmem [shape: bf16[32,128], index: 4, kind: output, shape index: {}]  }
   0x1   :  { %v587_v0 = vld [vmem:[%s788_s1 + $0x78] sm:$0xff]   ;;  %v591_v4 = vld [vmem:[%s788_s1 + $0x70] sm:$0xff]   ;;  %v595_v8 = vld [vmem:[%s788_s1 + $0x68] sm:$0xff]  }
   0x2   :  { %v588_v1 = vld [vmem:[%s788_s1 + $0xf8] sm:$0xff]   ;;  %531 = vmatprep.subr.bf16.mxu0 %v587_v0  ;;  %v592_v5 = vld [vmem:[%s788_s1 + $0xf0] sm:$0xff]   ;;  %v596_v9 = vld [vmem:[%s788_s1 + $0xe8] sm:$0xff]  }
   0x3   :  { %v589_v2 = vld [vmem:[%s788_s1 + $0x38] sm:$0xff]   ;;  %559 = vmatprep.subr.bf16.mxu1 %v588_v1  ;;  %v593_v6 = vld [vmem:[%s788_s1 + $0x30] sm:$0xff]   ;;  %v597_v10 = vld [vmem:[%s788_s1 + $0x28] sm:$0xff]  }
   0x4   :  { %v590_v3 = vld [vmem:[%s788_s1 + $0xb8] sm:$0xff]   ;;  %532 = vmatpush3.bf16.msra.mxu0 %v589_v2  ;;  %v594_v7 = vld [vmem:[%s788_s1 + $0xb0] sm:$0xff]   ;;  %v598_v11 = vld [vmem:[%s788_s1 + $0xa8] sm:$0xff]  }
   0x5   :  { %560 = vmatpush3.bf16.msra.mxu1 %v590_v3  ;;  %533 = vmatprep.subr.bf16.mxu0 %v591_v4  ;;  %v599_v12 = vld [vmem:[%s788_s1 + $0x60] sm:$0xff]   ;;  %v603_v16 = vld [vmem:[%s788_s1 + $0x58] sm:$0xff]   ;;  %v607_v20 = vld [vmem:[%s788_s1 + $0x50] sm:$0xff]  }
   0x6   :  { %561 = vmatprep.subr.bf16.mxu1 %v592_v5  ;;  %v600_v13 = vld [vmem:[%s788_s1 + $0xe0] sm:$0xff]   ;;  %v604_v17 = vld [vmem:[%s788_s1 + $0xd8] sm:$0xff]   ;;  %v608_v21 = vld [vmem:[%s788_s1 + $0xd0] sm:$0xff]  }
   0x7   :  { %v601_v14 = vld [vmem:[%s788_s1 + $0x20] sm:$0xff]   ;;  %v605_v18 = vld [vmem:[%s788_s1 + $0x18] sm:$0xff]   ;;  %v609_v22 = vld [vmem:[%s788_s1 + $0x10] sm:$0xff]  }
   0x8   :  { %534 = vmatpush3.bf16.msra.mxu0 %v593_v6  ;;  %v602_v15 = vld [vmem:[%s788_s1 + $0xa0] sm:$0xff]   ;;  %v606_v19 = vld [vmem:[%s788_s1 + $0x98] sm:$0xff]   ;;  %v610_v23 = vld [vmem:[%s788_s1 + $0x90] sm:$0xff]  }
   0x9   :  { %562 = vmatpush3.bf16.msra.mxu1 %v594_v7  ;;  %535 = vmatprep.subr.bf16.mxu0 %v595_v8  ;;  %v611_v24 = vld [vmem:[%s788_s1 + $0x48] sm:$0xff]   ;;  %v615_v28 = vld [vmem:[%s788_s1 + $0x40] sm:$0xff]  }
   0xa   :  { %563 = vmatprep.subr.bf16.mxu1 %v596_v9  ;;  %v612_v25 = vld [vmem:[%s788_s1 + $0xc8] sm:$0xff]   ;;  %v616_v29 = vld [vmem:[%s788_s1 + $0xc0] sm:$0xff]  }
   0xb   :  { %v613_v26 = vld [vmem:[%s788_s1 + $0x8] sm:$0xff]   ;;  %v617_v30 = vld [vmem:[%s788_s1] sm:$0xff]  }
   0xc   :  { %536 = vmatpush3.bf16.msra.mxu0 %v597_v10  ;;  %v614_v27 = vld [vmem:[%s788_s1 + $0x88] sm:$0xff]   ;;  %v618_v31 = vld [vmem:[%s788_s1 + $0x80] sm:$0xff]  }
   0xd   :  { %564 = vmatpush3.bf16.msra.mxu1 %v598_v11  ;;  %537 = vmatprep.subr.bf16.mxu0 %v599_v12  ;;  %v619_v32 = vld [vmem:[%s789_s0] ss:$16 sps:$4 sm:$0xff]   ;;  %v621_v33 = vld [vmem:[%s789_s0 + $0x4] ss:$16 sps:$4 sm:$0xff]   ;;  %v622_v34 = vld [vmem:[%s789_s0 + $0x8] ss:$16 sps:$4 sm:$0xff]  }
   0xe   :  { %565 = vmatprep.subr.bf16.mxu1 %v600_v13  ;;  %v624_v35 = vld [vmem:[%s789_s0 + $0xc] ss:$16 sps:$4 sm:$0xff]   ;;  %354 = vmatprep.mubr.bf16.mxu0 %v621_v33  ;;  %v625_v36 = vld [vmem:[%s789_s0 + $0x24] ss:$16 sps:$4 sm:$0xff]   ;;  %v629_v38 = vld [vmem:[%s789_s0 + $0x20] ss:$16 sps:$4 sm:$0xff]  }
   0xf   :  { %403 = vmatprep.mubr.bf16.mxu1 %v624_v35  ;;  %v627_v37 = vld [vmem:[%s789_s0 + $0x2c] ss:$16 sps:$4 sm:$0xff]   ;;  %v630_v39 = vld [vmem:[%s789_s0 + $0x28] ss:$16 sps:$4 sm:$0xff]   ;;  %v510_v47 = vld [vmem:[%s790_s2] ss:$0 sm:$0xff] }
  0x10   :  { %538 = vmatpush3.bf16.msra.mxu0 %v601_v14  ;;  %v511_v56 = vld [vmem:[%s791_s3] ss:$0 sm:$0xff] }
  0x11   :  { %566 = vmatpush3.bf16.msra.mxu1 %v602_v15  ;;  %539 = vmatprep.subr.bf16.mxu0 %v603_v16 }
  0x12   :  { %567 = vmatprep.subr.bf16.mxu1 %v604_v17 }
  0x14   :  { %540 = vmatpush3.bf16.msra.mxu0 %v605_v18 }
  0x15   :  { %568 = vmatpush3.bf16.msra.mxu1 %v606_v19  ;;  %541 = vmatprep.subr.bf16.mxu0 %v607_v20 }
  0x16   :  { %569 = vmatprep.subr.bf16.mxu1 %v608_v21 }
  0x18   :  { %542 = vmatpush3.bf16.msra.mxu0 %v609_v22 }
  0x19   :  { %570 = vmatpush3.bf16.msra.mxu1 %v610_v23  ;;  %543 = vmatprep.subr.bf16.mxu0 %v611_v24 }
  0x1a   :  { %571 = vmatprep.subr.bf16.mxu1 %v612_v25 }
  0x1c   :  { %544 = vmatpush3.bf16.msra.mxu0 %v613_v26 }
  0x1d   :  { %572 = vmatpush3.bf16.msra.mxu1 %v614_v27  ;;  %545 = vmatprep.subr.bf16.mxu0 %v615_v28 }
  0x1e   :  { %573 = vmatprep.subr.bf16.mxu1 %v616_v29 }
  0x20   :  { %546 = vmatpush3.bf16.msra.mxu0 %v617_v30 }
  0x21   :  { %574 = vmatpush3.bf16.msra.mxu1 %v618_v31 }
  0x23   :  { %355 = vmatmul.mubr.bf16.vlgmr.msra.gmra.mxu0 %v619_v32 }
  0x24   :  { %404 = vmatmul.mubr.bf16.vlgmr.msra.gmra.mxu1 %v622_v34  ;;  %362 = vmatprep.mubr.bf16.mxu0 %v625_v36 }
  0x25   :  { %411 = vmatprep.mubr.bf16.mxu1 %v627_v37 }
  0x2b   :  { %363 = vmatmul.mubr.bf16.gmra.mxu0 %v629_v38 }
  0x2c   :  { %412 = vmatmul.mubr.bf16.gmra.mxu1 %v630_v39 }
  0xe3   :  { %v547_v40 = vpop.f32.mrf.mxu0 }
  0xe4   :  { %v575_v41 = vpop.f32.mrf.mxu1 }
  0xe5   :  { %v548_v42 = vpop.f32.mrf.mxu0 }
  0xe6   :  { %v549_v43 = vadd.f32 %v548_v42, %v547_v40  ;;  %v576_v44 = vpop.f32.mrf.mxu1 }
  0xe7   :  { %v577_v45 = vadd.f32 %v576_v44, %v575_v41  ;;  %v550_v46 = vpop.f32.mrf.mxu0 }
  0xe8   :  { %v578_v48 = vpop.f32.mrf.mxu1 }
  0xe9   :  { %v406_v49 = vadd.f32 %v577_v45, %v549_v43  ;;  %v551_v50 = vpop.f32.mrf.mxu0 }
  0xea   :  { %v552_v51 = vadd.f32 %v551_v50, %v550_v46  ;;  %v579_v52 = vpop.f32.mrf.mxu1 }
  0xeb   :  { %v427_v53 = vmul.f32 %v510_v47, %v406_v49  ;;  %v580_v54 = vadd.f32 %v579_v52, %v578_v48  ;;  %v553_v55 = vpop.f32.mrf.mxu0 }
  0xec   :  { %v581_v57 = vpop.f32.mrf.mxu1 }
  0xed   :  { %v409_v58 = vadd.f32 %v580_v54, %v552_v51  ;;  %v554_v59 = vpop.f32.mrf.mxu0  ;;  %v438_v62 = vadd.f32 %v511_v56, %v427_v53 }
  0xee   :  { %v555_v60 = vadd.f32 %v554_v59, %v553_v55  ;;  %v582_v61 = vpop.f32.mrf.mxu1 }
  0xef   :  { %v428_v63 = vmul.f32 %v510_v47, %v409_v58  ;;  %v583_v0 = vadd.f32 %v582_v61, %v581_v57  ;;  %v556_v1 = vpop.f32.mrf.mxu0  ;;  %v442_v8 = vmax.f32 %v438_v62, 0.0 }
  0xf0   :  { %v584_v2 = vpop.f32.mrf.mxu1 }
  0xf1   :  { %v439_v3 = vadd.f32 %v511_v56, %v428_v63  ;;  %v414_v4 = vadd.f32 %v583_v0, %v555_v60  ;;  %v557_v5 = vpop.f32.mrf.mxu0 }
  0xf2   :  { %v558_v6 = vadd.f32 %v557_v5, %v556_v1  ;;  %v585_v7 = vpop.f32.mrf.mxu1 }
  0xf3   :  { %v443_v9 = vmax.f32 %v439_v3, 0.0  ;;  %v429_v10 = vmul.f32 %v510_v47, %v414_v4  ;;  %v586_v11 = vadd.f32 %v585_v7, %v584_v2 }
  0xf5   :  { %v523_v12 = vpack.c.bf16 %v443_v9, %v442_v8  ;;  %v417_v13 = vadd.f32 %v586_v11, %v558_v6  ;;  %v440_v14 = vadd.f32 %v511_v56, %v429_v10 }
  0xf7   :  { %524 = vst [vmem:[%s792_s4] sm:$0xff] %v523_v12   ;;  %v430_v15 = vmul.f32 %v510_v47, %v417_v13  ;;  %v444_v17 = vmax.f32 %v440_v14, 0.0 }
  0xf9   :  { %v441_v16 = vadd.f32 %v511_v56, %v430_v15 }
  0xfb   :  { %v445_v18 = vmax.f32 %v441_v16, 0.0 }
  0xfd   :  { %v528_v19 = vpack.c.bf16 %v445_v18, %v444_v17 }
  0xff   :  { %530 = vst [vmem:[%s792_s4 + $0x8] sm:$0xff] %v528_v19  }

// kernel: resnet_forward.69
= control target key start
LH: loop header
LB: loop body
LE: loop exit
PB: predicated region body
PF: predicated region fallthrough
CT: control target
= control target key end

     0   :  { %s1082_s1 = inlined_call_operand.vmem [shape: bf16[512,256], index: 1, kind: input, shape index: {}]   ;;  %s1083_s0 = inlined_call_operand.vmem [shape: bf16[32,512], index: 0, kind: input, shape index: {}]   ;;  %s1084_s2 = inlined_call_operand.vmem [shape: f32[1,256], index: 2, kind: input, shape index: {}]   ;;  %s1085_s3 = inlined_call_operand.vmem [shape: f32[1,256], index: 3, kind: input, shape index: {}]   ;;  %s1086_s4 = inlined_call_operand.vmem [shape: bf16[32,256], index: 4, kind: output, shape index: {}]  }
   0x1   :  { %v715_v0 = vld [vmem:[%s1082_s1 + $0x74] ss:$8 sps:$4 sm:$0xff]   ;;  %v719_v2 = vld [vmem:[%s1082_s1 + $0x70] ss:$8 sps:$4 sm:$0xff]   ;;  %v721_v4 = vld [vmem:[%s1082_s1 + $0x64] ss:$8 sps:$4 sm:$0xff]  }
   0x2   :  { %v717_v1 = vld [vmem:[%s1082_s1 + $0x174] ss:$8 sps:$4 sm:$0xff]   ;;  %449 = vmatprep.subr.bf16.mxu0 %v715_v0  ;;  %v720_v3 = vld [vmem:[%s1082_s1 + $0x170] ss:$8 sps:$4 sm:$0xff]   ;;  %v723_v5 = vld [vmem:[%s1082_s1 + $0x164] ss:$8 sps:$4 sm:$0xff]  }
   0x3   :  { %502 = vmatprep.subr.bf16.mxu1 %v717_v1  ;;  %450 = vmatpush1.bf16.msra.mxu0 %v719_v2  ;;  %v725_v6 = vld [vmem:[%s1082_s1 + $0x60] ss:$8 sps:$4 sm:$0xff]   ;;  %v727_v8 = vld [vmem:[%s1082_s1 + $0x54] ss:$8 sps:$4 sm:$0xff]   ;;  %v731_v10 = vld [vmem:[%s1082_s1 + $0x50] ss:$8 sps:$4 sm:$0xff]  }
   0x4   :  { %503 = vmatpush1.bf16.msra.mxu1 %v720_v3  ;;  %451 = vmatprep.subr.bf16.mxu0 %v721_v4  ;;  %v726_v7 = vld [vmem:[%s1082_s1 + $0x160] ss:$8 sps:$4 sm:$0xff]   ;;  %v729_v9 = vld [vmem:[%s1082_s1 + $0x154] ss:$8 sps:$4 sm:$0xff]   ;;  %v732_v11 = vld [vmem:[%s1082_s1 + $0x150] ss:$8 sps:$4 sm:$0xff]  }
   0x5   :  { %504 = vmatprep.subr.bf16.mxu1 %v723_v5  ;;  %v733_v12 = vld [vmem:[%s1082_s1 + $0x44] ss:$8 sps:$4 sm:$0xff]   ;;  %v737_v14 = vld [vmem:[%s1082_s1 + $0x40] ss:$8 sps:$4 sm:$0xff]   ;;  %v739_v16 = vld [vmem:[%s1082_s1 + $0x34] ss:$8 sps:$4 sm:$0xff]  }
   0x6   :  { %v735_v13 = vld [vmem:[%s1082_s1 + $0x144] ss:$8 sps:$4 sm:$0xff]   ;;  %v738_v15 = vld [vmem:[%s1082_s1 + $0x140] ss:$8 sps:$4 sm:$0xff]   ;;  %v741_v17 = vld [vmem:[%s1082_s1 + $0x134] ss:$8 sps:$4 sm:$0xff]  }
   0x7   :  { %452 = vmatpush1.bf16.msra.mxu0 %v725_v6  ;;  %v743_v18 = vld [vmem:[%s1082_s1 + $0x30] ss:$8 sps:$4 sm:$0xff]   ;;  %v745_v20 = vld [vmem:[%s1082_s1 + $0x24] ss:$8 sps:$4 sm:$0xff]   ;;  %v749_v22 = vld [vmem:[%s1082_s1 + $0x20] ss:$8 sps:$4 sm:$0xff]  }
   0x8   :  { %505 = vmatpush1.bf16.msra.mxu1 %v726_v7  ;;  %453 = vmatprep.subr.bf16.mxu0 %v727_v8  ;;  %v744_v19 = vld [vmem:[%s1082_s1 + $0x130] ss:$8 sps:$4 sm:$0xff]   ;;  %v747_v21 = vld [vmem:[%s1082_s1 + $0x124] ss:$8 sps:$4 sm:$0xff]   ;;  %v750_v23 = vld [vmem:[%s1082_s1 + $0x120] ss:$8 sps:$4 sm:$0xff]   ;;  %v557_v8 = vlaneseq }
   0x9   :  { %506 = vmatprep.subr.bf16.mxu1 %v729_v9  ;;  %v751_v24 = vld [vmem:[%s1082_s1 + $0x14] ss:$8 sps:$4 sm:$0xff]   ;;  %v755_v26 = vld [vmem:[%s1082_s1 + $0x10] ss:$8 sps:$4 sm:$0xff]   ;;  %v757_v28 = vld [vmem:[%s1082_s1 + $0x4] ss:$8 sps:$4 sm:$0xff]  }
   0xa   :  { %v753_v25 = vld [vmem:[%s1082_s1 + $0x114] ss:$8 sps:$4 sm:$0xff]   ;;  %v756_v27 = vld [vmem:[%s1082_s1 + $0x110] ss:$8 sps:$4 sm:$0xff]   ;;  %v759_v29 = vld [vmem:[%s1082_s1 + $0x104] ss:$8 sps:$4 sm:$0xff]  }
   0xb   :  { %454 = vmatpush1.bf16.msra.mxu0 %v731_v10  ;;  %v761_v30 = vld [vmem:[%s1082_s1] ss:$8 sps:$4 sm:$0xff]   ;;  %v763_v32 = vld [vmem:[%s1082_s1 + $0xf4] ss:$8 sps:$4 sm:$0xff]   ;;  %v767_v34 = vld [vmem:[%s1082_s1 + $0xf0] ss:$8 sps:$4 sm:$0xff]  }
   0xc   :  { %507 = vmatpush1.bf16.msra.mxu1 %v732_v11  ;;  %455 = vmatprep.subr.bf16.mxu0 %v733_v12  ;;  %v762_v31 = vld [vmem:[%s1082_s1 + $0x100] ss:$8 sps:$4 sm:$0xff]   ;;  %v765_v33 = vld [vmem:[%s1082_s1 + $0x1f4] ss:$8 sps:$4 sm:$0xff]   ;;  %v768_v35 = vld [vmem:[%s1082_s1 + $0x1f0] ss:$8 sps:$4 sm:$0xff]  }
   0xd   :  { %508 = vmatprep.subr.bf16.mxu1 %v735_v13  ;;  %v769_v36 = vld [vmem:[%s1082_s1 + $0xe4] ss:$8 sps:$4 sm:$0xff]   ;;  %v773_v38 = vld [vmem:[%s1082_s1 + $0xe0] ss:$8 sps:$4 sm:$0xff]   ;;  %v775_v40 = vld [vmem:[%s1082_s1 + $0xd4] ss:$8 sps:$4 sm:$0xff]  }
   0xe   :  { %v771_v37 = vld [vmem:[%s1082_s1 + $0x1e4] ss:$8 sps:$4 sm:$0xff]   ;;  %v774_v39 = vld [vmem:[%s1082_s1 + $0x1e0] ss:$8 sps:$4 sm:$0xff]   ;;  %v777_v41 = vld [vmem:[%s1082_s1 + $0x1d4] ss:$8 sps:$4 sm:$0xff]  }
   0xf   :  { %456 = vmatpush1.bf16.msra.mxu0 %v737_v14  ;;  %v779_v42 = vld [vmem:[%s1082_s1 + $0xd0] ss:$8 sps:$4 sm:$0xff]   ;;  %v781_v44 = vld [vmem:[%s1082_s1 + $0xc4] ss:$8 sps:$4 sm:$0xff]   ;;  %v785_v46 = vld [vmem:[%s1082_s1 + $0xc0] ss:$8 sps:$4 sm:$0xff]  }
  0x10   :  { %509 = vmatpush1.bf16.msra.mxu1 %v738_v15  ;;  %457 = vmatprep.subr.bf16.mxu0 %v739_v16  ;;  %v780_v43 = vld [vmem:[%s1082_s1 + $0x1d0] ss:$8 sps:$4 sm:$0xff]   ;;  %v783_v45 = vld [vmem:[%s1082_s1 + $0x1c4] ss:$8 sps:$4 sm:$0xff]   ;;  %v786_v47 = vld [vmem:[%s1082_s1 + $0x1c0] ss:$8 sps:$4 sm:$0xff]  }
  0x11   :  { %510 = vmatprep.subr.bf16.mxu1 %v741_v17  ;;  %v787_v48 = vld [vmem:[%s1082_s1 + $0xb4] ss:$8 sps:$4 sm:$0xff]   ;;  %v791_v52 = vld [vmem:[%s1082_s1 + $0xb0] ss:$8 sps:$4 sm:$0xff]   ;;  %v793_v54 = vld [vmem:[%s1082_s1 + $0xa4] ss:$8 sps:$4 sm:$0xff]  }
  0x12   :  { %v813_v49 = vld [vmem:[%s1083_s0 + $0x4] ss:$16 sps:$4 sm:$0xff]   ;;  %v816_v51 = vld [vmem:[%s1083_s0 + $0xc] ss:$16 sps:$4 sm:$0xff]   ;;  %v792_v53 = vld [vmem:[%s1082_s1 + $0x1b0] ss:$8 sps:$4 sm:$0xff]  }
  0x13   :  { %458 = vmatpush1.bf16.msra.mxu0 %v743_v18  ;;  %v789_v50 = vld [vmem:[%s1082_s1 + $0x1b4] ss:$8 sps:$4 sm:$0xff]   ;;  %481 = vmatprep.mubr.bf16.mxu0 %v813_v49  ;;  %v795_v55 = vld [vmem:[%s1082_s1 + $0x1a4] ss:$8 sps:$4 sm:$0xff]   ;;  %v797_v56 = vld [vmem:[%s1082_s1 + $0xa0] ss:$8 sps:$4 sm:$0xff]  }
  0x14   :  { %511 = vmatpush1.bf16.msra.mxu1 %v744_v19  ;;  %459 = vmatprep.subr.bf16.mxu0 %v745_v20  ;;  %v798_v57 = vld [vmem:[%s1082_s1 + $0x1a0] ss:$8 sps:$4 sm:$0xff]   ;;  %v799_v58 = vld [vmem:[%s1082_s1 + $0x94] ss:$8 sps:$4 sm:$0xff]   ;;  %v803_v60 = vld [vmem:[%s1082_s1 + $0x90] ss:$8 sps:$4 sm:$0xff]  }
  0x15   :  { %512 = vmatprep.subr.bf16.mxu1 %v747_v21  ;;  %534 = vmatprep.mubr.bf16.mxu1 %v816_v51  ;;  %v801_v59 = vld [vmem:[%s1082_s1 + $0x194] ss:$8 sps:$4 sm:$0xff]   ;;  %v804_v61 = vld [vmem:[%s1082_s1 + $0x190] ss:$8 sps:$4 sm:$0xff]   ;;  %v805_v62 = vld [vmem:[%s1082_s1 + $0x84] ss:$8 sps:$4 sm:$0xff]  }
  0x16   :  { %v807_v63 = vld [vmem:[%s1082_s1 + $0x184] ss:$8 sps:$4 sm:$0xff]   ;;  %v809_v0 = vld [vmem:[%s1082_s1 + $0x80] ss:$8 sps:$4 sm:$0xff]   ;;  %v558_v9 = vshrl.u32 %v557_v8, 7 }
  0x17   :  { %460 = vmatpush1.bf16.msra.mxu0 %v749_v22  ;;  %v810_v1 = vld [vmem:[%s1082_s1 + $0x180] ss:$8 sps:$4 sm:$0xff]   ;;  %v817_v4 = vld [vmem:[%s1083_s0 + $0x24] ss:$16 sps:$4 sm:$0xff]   ;;  %v819_v5 = vld [vmem:[%s1083_s0 + $0x2c] ss:$16 sps:$4 sm:$0xff]  }
  0x18   :  { %513 = vmatpush1.bf16.msra.mxu1 %v750_v23  ;;  %461 = vmatprep.subr.bf16.mxu0 %v751_v24  ;;  %v811_v2 = vld [vmem:[%s1083_s0] ss:$16 sps:$4 sm:$0xff]   ;;  %v814_v3 = vld [vmem:[%s1083_s0 + $0x8] ss:$16 sps:$4 sm:$0xff]   ;;  %v559_v10 = vsub.s32 0, %v558_v9  ;;  %v563_v12 = vsub.s32 1, %v558_v9 }
  0x19   :  { %514 = vmatprep.subr.bf16.mxu1 %v753_v25  ;;  %v821_v6 = vld [vmem:[%s1083_s0 + $0x20] ss:$16 sps:$4 sm:$0xff]   ;;  %v822_v7 = vld [vmem:[%s1083_s0 + $0x28] ss:$16 sps:$4 sm:$0xff]  }
  0x1a   :  { %v555_v11 = vld [vmem:[%s1084_s2] sm:$0x3] }
  0x1b   :  { %462 = vmatpush1.bf16.msra.mxu0 %v755_v26  ;;  %v575_v13 = vld [vmem:[%s1085_s3] sm:$0x3]  ;;  %v560_v14 = vrot.slane %v555_v11, %v559_v10  ;;  %v564_v19 = vrot.slane %v555_v11, %v563_v12 }
  0x1c   :  { %515 = vmatpush1.bf16.msra.mxu1 %v756_v27  ;;  %463 = vmatprep.subr.bf16.mxu0 %v757_v28  ;;  %v580_v18 = vrot.slane %v575_v13, %v559_v10  ;;  %v584_v24 = vrot.slane %v575_v13, %v563_v12 }
  0x1d   :  { %516 = vmatprep.subr.bf16.mxu1 %v759_v29 }
  0x1f   :  { %464 = vmatpush1.bf16.msra.mxu0 %v761_v30 }
  0x20   :  { %517 = vmatpush1.bf16.msra.mxu1 %v762_v31  ;;  %465 = vmatprep.subr.bf16.mxu0 %v763_v32 }
  0x21   :  { %518 = vmatprep.subr.bf16.mxu1 %v765_v33 }
  0x23   :  { %466 = vmatpush2.bf16.msra.mxu0 %v767_v34 }
  0x24   :  { %519 = vmatpush2.bf16.msra.mxu1 %v768_v35  ;;  %467 = vmatprep.subr.bf16.mxu0 %v769_v36 }
  0x25   :  { %520 = vmatprep.subr.bf16.mxu1 %v771_v37 }
  0x27   :  { %468 = vmatpush2.bf16.msra.mxu0 %v773_v38 }
  0x28   :  { %521 = vmatpush2.bf16.msra.mxu1 %v774_v39  ;;  %469 = vmatprep.subr.bf16.mxu0 %v775_v40 }
  0x29   :  { %522 = vmatprep.subr.bf16.mxu1 %v777_v41 }
  0x2b   :  { %470 = vmatpush2.bf16.msra.mxu0 %v779_v42 }
  0x2c   :  { %523 = vmatpush2.bf16.msra.mxu1 %v780_v43  ;;  %471 = vmatprep.subr.bf16.mxu0 %v781_v44 }
  0x2d   :  { %524 = vmatprep.subr.bf16.mxu1 %v783_v45 }
  0x2f   :  { %472 = vmatpush2.bf16.msra.mxu0 %v785_v46 }
  0x30   :  { %525 = vmatpush2.bf16.msra.mxu1 %v786_v47  ;;  %473 = vmatprep.subr.bf16.mxu0 %v787_v48 }
  0x31   :  { %526 = vmatprep.subr.bf16.mxu1 %v789_v50 }
  0x33   :  { %474 = vmatpush2.bf16.msra.mxu0 %v791_v52 }
  0x34   :  { %527 = vmatpush2.bf16.msra.mxu1 %v792_v53  ;;  %475 = vmatprep.subr.bf16.mxu0 %v793_v54 }
  0x35   :  { %528 = vmatprep.subr.bf16.mxu1 %v795_v55 }
  0x37   :  { %476 = vmatpush2.bf16.msra.mxu0 %v797_v56 }
  0x38   :  { %529 = vmatpush2.bf16.msra.mxu1 %v798_v57  ;;  %477 = vmatprep.subr.bf16.mxu0 %v799_v58 }
  0x39   :  { %530 = vmatprep.subr.bf16.mxu1 %v801_v59 }
  0x3b   :  { %478 = vmatpush2.bf16.msra.mxu0 %v803_v60 }
  0x3c   :  { %531 = vmatpush2.bf16.msra.mxu1 %v804_v61  ;;  %479 = vmatprep.subr.bf16.mxu0 %v805_v62 }
  0x3d   :  { %532 = vmatprep.subr.bf16.mxu1 %v807_v63 }
  0x3f   :  { %480 = vmatpush2.bf16.msra.mxu0 %v809_v0 }
  0x40   :  { %533 = vmatpush2.bf16.msra.mxu1 %v810_v1 }
  0x42   :  { %482 = vmatmul.mubr.bf16.vlgmr.msra.gmra.mxu0 %v811_v2 }
  0x43   :  { %535 = vmatmul.mubr.bf16.vlgmr.msra.gmra.mxu1 %v814_v3  ;;  %491 = vmatprep.mubr.bf16.mxu0 %v817_v4 }
  0x44   :  { %544 = vmatprep.mubr.bf16.mxu1 %v819_v5 }
  0x4a   :  { %492 = vmatmul.mubr.bf16.gmra.mxu0 %v821_v6 }
  0x4b   :  { %545 = vmatmul.mubr.bf16.gmra.mxu1 %v822_v7 }
 0x102   :  { %v483_v15 = vpop.f32.mrf.mxu0 }
 0x103   :  { %v536_v16 = vpop.f32.mrf.mxu1 }
 0x104   :  { %v537_v17 = vadd.f32 %v536_v16, %v483_v15  ;;  %v485_v20 = vpop.f32.mrf.mxu0 }
 0x105   :  { %v538_v21 = vpop.f32.mrf.mxu1 }
 0x106   :  { %v567_v22 = vmul.f32 %v560_v14, %v537_v17  ;;  %v539_v23 = vadd.f32 %v538_v21, %v485_v20  ;;  %v487_v25 = vpop.f32.mrf.mxu0 }
 0x107   :  { %v540_v26 = vpop.f32.mrf.mxu1 }
 0x108   :  { %v587_v27 = vadd.f32 %v580_v18, %v567_v22  ;;  %v568_v28 = vmul.f32 %v564_v19, %v539_v23  ;;  %v541_v29 = vadd.f32 %v540_v26, %v487_v25  ;;  %v489_v30 = vpop.f32.mrf.mxu0 }
 0x109   :  { %v542_v31 = vpop.f32.mrf.mxu1 }
 0x10a   :  { %v588_v32 = vadd.f32 %v584_v24, %v568_v28  ;;  %v569_v33 = vmul.f32 %v560_v14, %v541_v29  ;;  %v543_v34 = vadd.f32 %v542_v31, %v489_v30  ;;  %v595_v35 = vmax.f32 %v587_v27, 0.0  ;;  %v493_v36 = vpop.f32.mrf.mxu0 }
 0x10b   :  { %v546_v37 = vpop.f32.mrf.mxu1 }
 0x10c   :  { %v596_v38 = vmax.f32 %v588_v32, 0.0  ;;  %v589_v39 = vadd.f32 %v580_v18, %v569_v33  ;;  %v570_v40 = vmul.f32 %v564_v19, %v543_v34  ;;  %v547_v41 = vadd.f32 %v546_v37, %v493_v36  ;;  %v495_v42 = vpop.f32.mrf.mxu0 }
 0x10d   :  { %v548_v43 = vpop.f32.mrf.mxu1 }
 0x10e   :  { %v711_v44 = vpack.c.bf16 %v596_v38, %v595_v35  ;;  %v590_v45 = vadd.f32 %v584_v24, %v570_v40  ;;  %v571_v46 = vmul.f32 %v560_v14, %v547_v41  ;;  %v549_v47 = vadd.f32 %v548_v43, %v495_v42  ;;  %v497_v48 = vpop.f32.mrf.mxu0 }
 0x10f   :  { %v550_v49 = vpop.f32.mrf.mxu1  ;;  %v597_v50 = vmax.f32 %v589_v39, 0.0 }
 0x110   :  { %627 = vst [vmem:[%s1086_s4] sm:$0xff] %v711_v44  ;;  %v598_v51 = vmax.f32 %v590_v45, 0.0  ;;  %v551_v52 = vadd.f32 %v550_v49, %v497_v48  ;;  %v591_v53 = vadd.f32 %v580_v18, %v571_v46  ;;  %v572_v54 = vmul.f32 %v564_v19, %v549_v47  ;;  %v499_v55 = vpop.f32.mrf.mxu0 }
 0x111   :  { %v552_v56 = vpop.f32.mrf.mxu1 }
 0x112   :  { %v712_v57 = vpack.c.bf16 %v598_v51, %v597_v50  ;;  %v573_v58 = vmul.f32 %v560_v14, %v551_v52  ;;  %v553_v59 = vadd.f32 %v552_v56, %v499_v55  ;;  %v592_v60 = vadd.f32 %v584_v24, %v572_v54 }
 0x113   :  { %v599_v63 = vmax.f32 %v591_v53, 0.0 }
 0x114   :  { %628 = vst [vmem:[%s1086_s4 + $0x8] sm:$0xff] %v712_v57  ;;  %v593_v61 = vadd.f32 %v580_v18, %v573_v58  ;;  %v574_v62 = vmul.f32 %v564_v19, %v553_v59  ;;  %v600_v0 = vmax.f32 %v592_v60, 0.0 }
 0x116   :  { %v594_v1 = vadd.f32 %v584_v24, %v574_v62  ;;  %v713_v2 = vpack.c.bf16 %v600_v0, %v599_v63  ;;  %v601_v3 = vmax.f32 %v593_v61, 0.0 }
 0x118   :  { %v602_v4 = vmax.f32 %v594_v1, 0.0  ;;  %629 = vst [vmem:[%s1086_s4 + $0x10] sm:$0xff] %v713_v2 }
 0x11a   :  { %v714_v5 = vpack.c.bf16 %v602_v4, %v601_v3 }
 0x11c   :  { %630 = vst [vmem:[%s1086_s4 + $0x18] sm:$0xff] %v714_v5 }

// kernel: resnet_forward.70
= control target key start
LH: loop header
LB: loop body
LE: loop exit
PB: predicated region body
PF: predicated region fallthrough
CT: control target
= control target key end

     0   :  { %s1577_s15 = smov 0   ;;  %s1579_s16 = smov 0   ;;  %s1734_s0 = inlined_call_operand.vmem [shape: bf16[8,2304], index: 0, kind: input, shape index: {}]   ;;  %s1735_s1 = inlined_call_operand.vmem [shape: bf16[2304,256], index: 1, kind: input, shape index: {}]   ;;  %s1736_s2 = inlined_call_operand.vmem [shape: f32[1,256], index: 2, kind: input, shape index: {}]   ;;  %s1737_s3 = inlined_call_operand.vmem [shape: f32[1,256], index: 3, kind: input, shape index: {}]   ;;  %s1738_s4 = inlined_call_operand.vmem [shape: bf16[8,256], index: 4, kind: output, shape index: {}]  }
   0x1   :  { %s1581_s17 = smov 0  }
   0x2 LB: > { %s26_s18 = sadd.s32 1, %s1545_s16  ;;  %p1237_p0 = scmp.ge.s32.totalorder %s1549_s17, 1  ;;  %s1549_s17 = sphi %s1581_s17, %s14_s17   ;;  %s1545_s16 = sphi %s1579_s16, %s1740_s16   ;;  %s1541_s15 = sphi %s1577_s15, %s1739_s15  }
   0x3   : > { %p27_p1 = scmp.ge.s32.totalorder %s26_s18, 3  ;;  %p229_p2 = scmp.lt.s32.totalorder %s1549_s17, 4 }
   0x5   : > { %s1742_s18 = smov (%p27_p1, %s26_s18), 0  ;;  %p230_p3 = pnand %p1237_p0, %p229_p2 }
   0x6   : > { %s281_s19 = smul.u32 (!%p230_p3), 6, %s1541_s15  ;;  %p1241_p6 = scmp.ne.s32.totalorder (!%p230_p3), %s1541_s15, 0 }
   0x7   : > { %233 = sbr.rel (%p230_p3) target bundleno = 368 (0x170), region = 36 }
   0x8   : > { %s291_s20 = smul.u32 (!%p230_p3), 96, %s1541_s15  ;;  %p284_p4 = scmp.lt.s32.totalorder (!%p230_p3), %s281_s19, 17 }
   0xa   : > { %p293_p5 = scmp.lt.s32.totalorder (!%p230_p3), %s291_s20, 287 }
   0xc   : > { %s1744_s19 = smov (!%p284_p4, %s281_s19), 17  ;;  %s1746_s20 = smov (!%p293_p5, %s291_s20), 287 }
   0xd   : > { %s1238_s21 = sshll.u32 %s1744_s19, 2  ;;  %s1350_s25 = sshll.u32 %s1746_s20, 3 }
   0xe   : > { %s1602_s24 = scalar_lea.vmem %s1734_s0, %s1238_s21  ;;  %s1607_s28 = scalar_lea.vmem %s1735_s1, %s1350_s25 }
   0xf   : > { %326 = sbr.rel (%p1241_p6) target bundleno = 22 (0x16), region = 40 }
  0x14   : > { %v1551_v0 = vmov 0.0  }
  0x15   : > { %327 = vst [vmem:[#allocation2] sm:$0xff] %v1551_v0  ;;  %328 = vst [vmem:[#allocation2 + $0x8] sm:$0xff] %v1551_v0 }
  0x16 PF: > { %v1377_v1 = vld [vmem:[%s1607_s28 + $0x74] ss:$8 sps:$4 sm:$0xff]   ;;  %v1381_v3 = vld [vmem:[%s1607_s28 + $0x70] ss:$8 sps:$4 sm:$0xff]   ;;  %v1383_v5 = vld [vmem:[%s1607_s28 + $0x64] ss:$8 sps:$4 sm:$0xff]  }
  0x17   : > { %v1379_v2 = vld [vmem:[%s1607_s28 + $0x174] ss:$8 sps:$4 sm:$0xff]   ;;  %931 = vmatprep.subr.bf16.mxu0 %v1377_v1  ;;  %v1382_v4 = vld [vmem:[%s1607_s28 + $0x170] ss:$8 sps:$4 sm:$0xff]   ;;  %v1385_v6 = vld [vmem:[%s1607_s28 + $0x164] ss:$8 sps:$4 sm:$0xff]  }
  0x18   : > { %972 = vmatprep.subr.bf16.mxu1 %v1379_v2  ;;  %932 = vmatpush1.bf16.msra.mxu0 %v1381_v3  ;;  %v1387_v7 = vld [vmem:[%s1607_s28 + $0x60] ss:$8 sps:$4 sm:$0xff]   ;;  %v1389_v9 = vld [vmem:[%s1607_s28 + $0x54] ss:$8 sps:$4 sm:$0xff]   ;;  %v1393_v11 = vld [vmem:[%s1607_s28 + $0x50] ss:$8 sps:$4 sm:$0xff]  }
  0x19   : > { %973 = vmatpush1.bf16.msra.mxu1 %v1382_v4  ;;  %933 = vmatprep.subr.bf16.mxu0 %v1383_v5  ;;  %v1388_v8 = vld [vmem:[%s1607_s28 + $0x160] ss:$8 sps:$4 sm:$0xff]   ;;  %v1391_v10 = vld [vmem:[%s1607_s28 + $0x154] ss:$8 sps:$4 sm:$0xff]   ;;  %v1394_v12 = vld [vmem:[%s1607_s28 + $0x150] ss:$8 sps:$4 sm:$0xff]  }
  0x1a   : > { %974 = vmatprep.subr.bf16.mxu1 %v1385_v6  ;;  %v1395_v13 = vld [vmem:[%s1607_s28 + $0x44] ss:$8 sps:$4 sm:$0xff]   ;;  %v1399_v15 = vld [vmem:[%s1607_s28 + $0x40] ss:$8 sps:$4 sm:$0xff]   ;;  %v1401_v17 = vld [vmem:[%s1607_s28 + $0x34] ss:$8 sps:$4 sm:$0xff]  }
  0x1b   : > { %v1397_v14 = vld [vmem:[%s1607_s28 + $0x144] ss:$8 sps:$4 sm:$0xff]   ;;  %v1400_v16 = vld [vmem:[%s1607_s28 + $0x140] ss:$8 sps:$4 sm:$0xff]   ;;  %v1403_v18 = vld [vmem:[%s1607_s28 + $0x134] ss:$8 sps:$4 sm:$0xff]  }
  0x1c   : > { %934 = vmatpush1.bf16.msra.mxu0 %v1387_v7  ;;  %v1405_v19 = vld [vmem:[%s1607_s28 + $0x30] ss:$8 sps:$4 sm:$0xff]   ;;  %v1407_v21 = vld [vmem:[%s1607_s28 + $0x24] ss:$8 sps:$4 sm:$0xff]   ;;  %v1411_v23 = vld [vmem:[%s1607_s28 + $0x20] ss:$8 sps:$4 sm:$0xff]  }
  0x1d   : > { %975 = vmatpush1.bf16.msra.mxu1 %v1388_v8  ;;  %935 = vmatprep.subr.bf16.mxu0 %v1389_v9  ;;  %v1406_v20 = vld [vmem:[%s1607_s28 + $0x130] ss:$8 sps:$4 sm:$0xff]   ;;  %v1409_v22 = vld [vmem:[%s1607_s28 + $0x124] ss:$8 sps:$4 sm:$0xff]   ;;  %v1412_v24 = vld [vmem:[%s1607_s28 + $0x120] ss:$8 sps:$4 sm:$0xff]  }
  0x1e   : > { %976 = vmatprep.subr.bf16.mxu1 %v1391_v10  ;;  %v1413_v25 = vld [vmem:[%s1607_s28 + $0x14] ss:$8 sps:$4 sm:$0xff]   ;;  %v1417_v27 = vld [vmem:[%s1607_s28 + $0x10] ss:$8 sps:$4 sm:$0xff]   ;;  %v1419_v29 = vld [vmem:[%s1607_s28 + $0x4] ss:$8 sps:$4 sm:$0xff]  }
  0x1f   : > { %v1415_v26 = vld [vmem:[%s1607_s28 + $0x114] ss:$8 sps:$4 sm:$0xff]   ;;  %v1418_v28 = vld [vmem:[%s1607_s28 + $0x110] ss:$8 sps:$4 sm:$0xff]   ;;  %v1421_v30 = vld [vmem:[%s1607_s28 + $0x104] ss:$8 sps:$4 sm:$0xff]  }
  0x20   : > { %936 = vmatpush1.bf16.msra.mxu0 %v1393_v11  ;;  %v1423_v31 = vld [vmem:[%s1607_s28] ss:$8 sps:$4 sm:$0xff]   ;;  %v1425_v33 = vld [vmem:[%s1607_s28 + $0xf4] ss:$8 sps:$4 sm:$0xff]   ;;  %v1429_v35 = vld [vmem:[%s1607_s28 + $0xf0] ss:$8 sps:$4 sm:$0xff]  }
  0x21   : > { %977 = vmatpush1.bf16.msra.mxu1 %v1394_v12  ;;  %937 = vmatprep.subr.bf16.mxu0 %v1395_v13  ;;  %v1424_v32 = vld [vmem:[%s1607_s28 + $0x100] ss:$8 sps:$4 sm:$0xff]   ;;  %v1427_v34 = vld [vmem:[%s1607_s28 + $0x1f4] ss:$8 sps:$4 sm:$0xff]   ;;  %v1430_v36 = vld [vmem:[%s1607_s28 + $0x1f0] ss:$8 sps:$4 sm:$0xff]  }
  0x22   : > { %978 = vmatprep.subr.bf16.mxu1 %v1397_v14  ;;  %v1431_v37 = vld [vmem:[%s1607_s28 + $0xe4] ss:$8 sps:$4 sm:$0xff]   ;;  %v1435_v39 = vld [vmem:[%s1607_s28 + $0xe0] ss:$8 sps:$4 sm:$0xff]   ;;  %v1437_v41 = vld [vmem:[%s1607_s28 + $0xd4] ss:$8 sps:$4 sm:$0xff]  }
  0x23   : > { %v1433_v38 = vld [vmem:[%s1607_s28 + $0x1e4] ss:$8 sps:$4 sm:$0xff]   ;;  %v1436_v40 = vld [vmem:[%s1607_s28 + $0x1e0] ss:$8 sps:$4 sm:$0xff]   ;;  %v1439_v42 = vld [vmem:[%s1607_s28 + $0x1d4] ss:$8 sps:$4 sm:$0xff]  }
  0x24   : > { %938 = vmatpush1.bf16.msra.mxu0 %v1399_v15  ;;  %v1441_v43 = vld [vmem:[%s1607_s28 + $0xd0] ss:$8 sps:$4 sm:$0xff]   ;;  %v1443_v45 = vld [vmem:[%s1607_s28 + $0xc4] ss:$8 sps:$4 sm:$0xff]   ;;  %v1447_v50 = vld [vmem:[%s1607_s28 + $0xc0] ss:$8 sps:$4 sm:$0xff]  }
  0x25   : > { %979 = vmatpush1.bf16.msra.mxu1 %v1400_v16  ;;  %939 = vmatprep.subr.bf16.mxu0 %v1401_v17  ;;  %v1442_v44 = vld [vmem:[%s1607_s28 + $0x1d0] ss:$8 sps:$4 sm:$0xff]   ;;  %v1445_v46 = vld [vmem:[%s1607_s28 + $0x1c4] ss:$8 sps:$4 sm:$0xff]   ;;  %v1448_v51 = vld [vmem:[%s1607_s28 + $0x1c0] ss:$8 sps:$4 sm:$0xff]  }
  0x26   : > { %980 = vmatprep.subr.bf16.mxu1 %v1403_v18  ;;  %v331_v47 = vld [vmem:[%s1602_s24] sm:$0xff]  ;;  %v332_v49 = vld [vmem:[%s1602_s24 + $0x8] sm:$0xff]  ;;  %v1449_v53 = vld [vmem:[%s1607_s28 + $0xb4] ss:$8 sps:$4 sm:$0xff]   ;;  %p1344_p7 = scmp.ne.s32.totalorder %s1541_s15, 2 }
  0x27   : > { %v1243_v48 = vcombine.high %v331_v47, %v331_v47  ;;  %v1245_v52 = vcombine.high %v332_v49, %v332_v49  ;;  %v1451_v54 = vld [vmem:[%s1607_s28 + $0x1b4] ss:$8 sps:$4 sm:$0xff]   ;;  %v1453_v55 = vld [vmem:[%s1607_s28 + $0xb0] ss:$8 sps:$4 sm:$0xff]   ;;  %v1455_v57 = vld [vmem:[%s1607_s28 + $0xa4] ss:$8 sps:$4 sm:$0xff]   ;;  %v1242_v6 = vcombine.low %v331_v47, %v331_v47  ;;  %v1244_v7 = vcombine.low %v332_v49, %v332_v49 }
  0x28   : > { %940 = vmatpush1.bf16.msra.mxu0 %v1405_v19  ;;  %v1454_v56 = vld [vmem:[%s1607_s28 + $0x1b0] ss:$8 sps:$4 sm:$0xff]   ;;  %v1457_v58 = vld [vmem:[%s1607_s28 + $0x1a4] ss:$8 sps:$4 sm:$0xff]   ;;  %v1459_v59 = vld [vmem:[%s1607_s28 + $0xa0] ss:$8 sps:$4 sm:$0xff]  }
  0x29   : > { %981 = vmatpush1.bf16.msra.mxu1 %v1406_v20  ;;  %941 = vmatprep.subr.bf16.mxu0 %v1407_v21  ;;  %v1460_v60 = vld [vmem:[%s1607_s28 + $0x1a0] ss:$8 sps:$4 sm:$0xff]   ;;  %v1461_v61 = vld [vmem:[%s1607_s28 + $0x94] ss:$8 sps:$4 sm:$0xff]   ;;  %v1465_v63 = vld [vmem:[%s1607_s28 + $0x90] ss:$8 sps:$4 sm:$0xff]  }
  0x2a   : > { %982 = vmatprep.subr.bf16.mxu1 %v1409_v22  ;;  %963 = vmatprep.mubr.bf16.mxu0 %v1243_v48  ;;  %v1463_v62 = vld [vmem:[%s1607_s28 + $0x194] ss:$8 sps:$4 sm:$0xff]   ;;  %v1466_v0 = vld [vmem:[%s1607_s28 + $0x190] ss:$8 sps:$4 sm:$0xff]   ;;  %v1467_v1 = vld [vmem:[%s1607_s28 + $0x84] ss:$8 sps:$4 sm:$0xff]  }
  0x2b   : > { %1004 = vmatprep.mubr.bf16.mxu1 %v1245_v52  ;;  %v1469_v2 = vld [vmem:[%s1607_s28 + $0x184] ss:$8 sps:$4 sm:$0xff]   ;;  %v1471_v3 = vld [vmem:[%s1607_s28 + $0x80] ss:$8 sps:$4 sm:$0xff]   ;;  %v1479_v5 = vld [vmem:[%s1607_s28 + $0x274] ss:$8 sps:$4 sm:$0xff]  }
  0x2c   : > { %942 = vmatpush1.bf16.msra.mxu0 %v1411_v23  ;;  %v1472_v4 = vld [vmem:[%s1607_s28 + $0x180] ss:$8 sps:$4 sm:$0xff]   ;;  %v1477_v8 = vld [vmem:[%s1607_s28 + $0x270] ss:$8 sps:$4 sm:$0xff]   ;;  %v1482_v10 = vld [vmem:[%s1607_s28 + $0x264] ss:$8 sps:$4 sm:$0xff]  }
  0x2d   : > { %983 = vmatpush1.bf16.msra.mxu1 %v1412_v24  ;;  %943 = vmatprep.subr.bf16.mxu0 %v1413_v25  ;;  %v1679_v9 = vld [vmem:[%s1602_s24 + $0x10] sm:$0xff]  ;;  %v1480_v12 = vld [vmem:[%s1607_s28 + $0x260] ss:$8 sps:$4 sm:$0xff]   ;;  %v1488_v15 = vld [vmem:[%s1607_s28 + $0x244] ss:$8 sps:$4 sm:$0xff]  }
  0x2e   : > { %984 = vmatprep.subr.bf16.mxu1 %v1415_v26  ;;  %v1247_v11 = vcombine.high %v1679_v9, %v1679_v9  ;;  %v1485_v13 = vld [vmem:[%s1607_s28 + $0x254] ss:$8 sps:$4 sm:$0xff]   ;;  %v1483_v14 = vld [vmem:[%s1607_s28 + $0x250] ss:$8 sps:$4 sm:$0xff]   ;;  %v1486_v16 = vld [vmem:[%s1607_s28 + $0x240] ss:$8 sps:$4 sm:$0xff]  }
  0x2f   : > { %v1491_v17 = vld [vmem:[%s1607_s28 + $0x234] ss:$8 sps:$4 sm:$0xff]   ;;  %v1489_v18 = vld [vmem:[%s1607_s28 + $0x230] ss:$8 sps:$4 sm:$0xff]   ;;  %v1494_v19 = vld [vmem:[%s1607_s28 + $0x224] ss:$8 sps:$4 sm:$0xff]  }
  0x30   : > { %944 = vmatpush1.bf16.msra.mxu0 %v1417_v27  ;;  %v1492_v20 = vld [vmem:[%s1607_s28 + $0x220] ss:$8 sps:$4 sm:$0xff]   ;;  %v1497_v21 = vld [vmem:[%s1607_s28 + $0x214] ss:$8 sps:$4 sm:$0xff]   ;;  %v1495_v22 = vld [vmem:[%s1607_s28 + $0x210] ss:$8 sps:$4 sm:$0xff]  }
  0x31   : > { %985 = vmatpush1.bf16.msra.mxu1 %v1418_v28  ;;  %945 = vmatprep.subr.bf16.mxu0 %v1419_v29  ;;  %v1500_v23 = vld [vmem:[%s1607_s28 + $0x204] ss:$8 sps:$4 sm:$0xff]   ;;  %v1498_v24 = vld [vmem:[%s1607_s28 + $0x200] ss:$8 sps:$4 sm:$0xff]   ;;  %v1503_v25 = vld [vmem:[%s1607_s28 + $0x2f4] ss:$8 sps:$4 sm:$0xff]  }
  0x32   : > { %986 = vmatprep.subr.bf16.mxu1 %v1421_v30  ;;  %v1501_v26 = vld [vmem:[%s1607_s28 + $0x2f0] ss:$8 sps:$4 sm:$0xff]   ;;  %v1506_v27 = vld [vmem:[%s1607_s28 + $0x2e4] ss:$8 sps:$4 sm:$0xff]   ;;  %v1504_v28 = vld [vmem:[%s1607_s28 + $0x2e0] ss:$8 sps:$4 sm:$0xff]  }
  0x33   : > { %v1509_v29 = vld [vmem:[%s1607_s28 + $0x2d4] ss:$8 sps:$4 sm:$0xff]   ;;  %v1507_v30 = vld [vmem:[%s1607_s28 + $0x2d0] ss:$8 sps:$4 sm:$0xff]  }
  0x34   : > { %946 = vmatpush1.bf16.msra.mxu0 %v1423_v31  ;;  %v1512_v31 = vld [vmem:[%s1607_s28 + $0x2c4] ss:$8 sps:$4 sm:$0xff]  }
  0x35   : > { %987 = vmatpush1.bf16.msra.mxu1 %v1424_v32  ;;  %947 = vmatprep.subr.bf16.mxu0 %v1425_v33  ;;  %v1510_v32 = vld [vmem:[%s1607_s28 + $0x2c0] ss:$8 sps:$4 sm:$0xff]   ;;  %v1515_v33 = vld [vmem:[%s1607_s28 + $0x2b4] ss:$8 sps:$4 sm:$0xff]  }
  0x36   : > { %988 = vmatprep.subr.bf16.mxu1 %v1427_v34  ;;  %v1513_v34 = vld [vmem:[%s1607_s28 + $0x2b0] ss:$8 sps:$4 sm:$0xff]  }
  0x38   : > { %948 = vmatpush2.bf16.msra.mxu0 %v1429_v35  ;;  %v1518_v35 = vld [vmem:[%s1607_s28 + $0x2a4] ss:$8 sps:$4 sm:$0xff]  }
  0x39   : > { %989 = vmatpush2.bf16.msra.mxu1 %v1430_v36  ;;  %949 = vmatprep.subr.bf16.mxu0 %v1431_v37  ;;  %v1516_v36 = vld [vmem:[%s1607_s28 + $0x2a0] ss:$8 sps:$4 sm:$0xff]   ;;  %v1521_v37 = vld [vmem:[%s1607_s28 + $0x294] ss:$8 sps:$4 sm:$0xff]  }
  0x3a   : > { %990 = vmatprep.subr.bf16.mxu1 %v1433_v38  ;;  %v1519_v38 = vld [vmem:[%s1607_s28 + $0x290] ss:$8 sps:$4 sm:$0xff]  }
  0x3c   : > { %950 = vmatpush2.bf16.msra.mxu0 %v1435_v39  ;;  %v1524_v39 = vld [vmem:[%s1607_s28 + $0x284] ss:$8 sps:$4 sm:$0xff]  }
  0x3d   : > { %991 = vmatpush2.bf16.msra.mxu1 %v1436_v40  ;;  %951 = vmatprep.subr.bf16.mxu0 %v1437_v41  ;;  %v1522_v40 = vld [vmem:[%s1607_s28 + $0x280] ss:$8 sps:$4 sm:$0xff]   ;;  %v1246_v41 = vcombine.low %v1679_v9, %v1679_v9 }
  0x3e   : > { %992 = vmatprep.subr.bf16.mxu1 %v1439_v42 }
  0x40   : > { %952 = vmatpush2.bf16.msra.mxu0 %v1441_v43 }
  0x41   : > { %993 = vmatpush2.bf16.msra.mxu1 %v1442_v44  ;;  %953 = vmatprep.subr.bf16.mxu0 %v1443_v45 }
  0x42   : > { %994 = vmatprep.subr.bf16.mxu1 %v1445_v46 }
  0x44   : > { %954 = vmatpush2.bf16.msra.mxu0 %v1447_v50 }
  0x45   : > { %995 = vmatpush2.bf16.msra.mxu1 %v1448_v51  ;;  %955 = vmatprep.subr.bf16.mxu0 %v1449_v53  ;;  %v329_v51 = vld [vmem:[#allocation2] sm:$0xff] }
  0x46   : > { %996 = vmatprep.subr.bf16.mxu1 %v1451_v54 }
  0x48   : > { %956 = vmatpush2.bf16.msra.mxu0 %v1453_v55  ;;  %v330_v55 = vld [vmem:[#allocation2 + $0x8] sm:$0xff] }
  0x49   : > { %997 = vmatpush2.bf16.msra.mxu1 %v1454_v56  ;;  %957 = vmatprep.subr.bf16.mxu0 %v1455_v57 }
  0x4a   : > { %998 = vmatprep.subr.bf16.mxu1 %v1457_v58 }
  0x4c   : > { %958 = vmatpush2.bf16.msra.mxu0 %v1459_v59 }
  0x4d   : > { %999 = vmatpush2.bf16.msra.mxu1 %v1460_v60  ;;  %959 = vmatprep.subr.bf16.mxu0 %v1461_v61 }
  0x4e   : > { %1000 = vmatprep.subr.bf16.mxu1 %v1463_v62 }
  0x50   : > { %960 = vmatpush2.bf16.msra.mxu0 %v1465_v63 }
  0x51   : > { %1001 = vmatpush2.bf16.msra.mxu1 %v1466_v0  ;;  %961 = vmatprep.subr.bf16.mxu0 %v1467_v1 }
  0x52   : > { %1002 = vmatprep.subr.bf16.mxu1 %v1469_v2 }
  0x54   : > { %962 = vmatpush2.bf16.msra.mxu0 %v1471_v3 }
  0x55   : > { %1003 = vmatpush2.bf16.msra.mxu1 %v1472_v4  ;;  %1013 = vmatprep.subr.bf16.mxu0 %v1479_v5 }
  0x57   : > { %964 = vmatmul.mubr.bf16.vlgmr.msra.gmra.mxu0 %v1242_v6 }
  0x58   : > { %1005 = vmatmul.mubr.bf16.vlgmr.msra.gmra.mxu1 %v1244_v7  ;;  %1014 = vmatpush1.bf16.msra.mxu0 %v1477_v8 }
  0x59   : > { %1045 = vmatprep.mubr.bf16.mxu0 %v1247_v11  ;;  %1015 = vmatprep.subr.bf16.mxu0 %v1482_v10 }
  0x5c   : > { %1016 = vmatpush1.bf16.msra.mxu0 %v1480_v12 }
  0x5d   : > { %1017 = vmatprep.subr.bf16.mxu0 %v1485_v13 }
  0x60   : > { %1018 = vmatpush1.bf16.msra.mxu0 %v1483_v14 }
  0x61   : > { %1019 = vmatprep.subr.bf16.mxu0 %v1488_v15 }
  0x64   : > { %1020 = vmatpush1.bf16.msra.mxu0 %v1486_v16 }
  0x65   : > { %1021 = vmatprep.subr.bf16.mxu0 %v1491_v17 }
  0x68   : > { %1022 = vmatpush1.bf16.msra.mxu0 %v1489_v18 }
  0x69   : > { %1023 = vmatprep.subr.bf16.mxu0 %v1494_v19 }
  0x6c   : > { %1024 = vmatpush1.bf16.msra.mxu0 %v1492_v20 }
  0x6d   : > { %1025 = vmatprep.subr.bf16.mxu0 %v1497_v21 }
  0x70   : > { %1026 = vmatpush1.bf16.msra.mxu0 %v1495_v22 }
  0x71   : > { %1027 = vmatprep.subr.bf16.mxu0 %v1500_v23 }
  0x74   : > { %1028 = vmatpush1.bf16.msra.mxu0 %v1498_v24 }
  0x75   : > { %1029 = vmatprep.subr.bf16.mxu0 %v1503_v25 }
  0x78   : > { %1030 = vmatpush2.bf16.msra.mxu0 %v1501_v26 }
  0x79   : > { %1031 = vmatprep.subr.bf16.mxu0 %v1506_v27 }
  0x7c   : > { %1032 = vmatpush2.bf16.msra.mxu0 %v1504_v28 }
  0x7d   : > { %1033 = vmatprep.subr.bf16.mxu0 %v1509_v29 }
  0x80   : > { %1034 = vmatpush2.bf16.msra.mxu0 %v1507_v30 }
  0x81   : > { %1035 = vmatprep.subr.bf16.mxu0 %v1512_v31 }
  0x84   : > { %1036 = vmatpush2.bf16.msra.mxu0 %v1510_v32 }
  0x85   : > { %1037 = vmatprep.subr.bf16.mxu0 %v1515_v33 }
  0x88   : > { %1038 = vmatpush2.bf16.msra.mxu0 %v1513_v34 }
  0x89   : > { %1039 = vmatprep.subr.bf16.mxu0 %v1518_v35 }
  0x8c   : > { %1040 = vmatpush2.bf16.msra.mxu0 %v1516_v36 }
  0x8d   : > { %1041 = vmatprep.subr.bf16.mxu0 %v1521_v37 }
  0x90   : > { %1042 = vmatpush2.bf16.msra.mxu0 %v1519_v38 }
  0x91   : > { %1043 = vmatprep.subr.bf16.mxu0 %v1524_v39 }
  0x94   : > { %1044 = vmatpush2.bf16.msra.mxu0 %v1522_v40 }
  0x97   : > { %1046 = vmatmul.mubr.bf16.vlgmr.msra.gmra.mxu0 %v1246_v41 }
 0x117   : > { %v965_v42 = vpop.f32.mrf.mxu0 }
 0x118   : > { %v1006_v43 = vpop.f32.mrf.mxu1 }
 0x119   : > { %v967_v44 = vpop.f32.mrf.mxu0  ;;  %v1007_v50 = vadd.f32 %v1006_v43, %v965_v42 }
 0x11a   : > { %v1008_v45 = vpop.f32.mrf.mxu1 }
 0x11b   : > { %v969_v46 = vpop.f32.mrf.mxu0  ;;  %v1009_v53 = vadd.f32 %v1008_v45, %v967_v44 }
 0x11c   : > { %v1010_v47 = vpop.f32.mrf.mxu1 }
 0x11d   : > { %v970_v48 = vpop.f32.mrf.mxu0 }
 0x11e   : > { %v1011_v49 = vpop.f32.mrf.mxu1 }
 0x157   : > { %v1047_v52 = vpop.f32.mrf.mxu0 }
 0x158   : > { %v1048_v54 = vadd.f32 %v1047_v52, %v1007_v50 }
 0x159   : > { %v1049_v56 = vpop.f32.mrf.mxu0 }
 0x15a   : > { %v1054_v57 = vadd.f32 %v1048_v54, %v329_v51  ;;  %v1050_v58 = vadd.f32 %v1049_v56, %v1009_v53  ;;  %1061 = sbr.rel (%p1344_p7) target bundleno = 368 (0x170), region = 44 }
 0x15b   : > { %v1051_v59 = vpop.f32.mrf.mxu0 }
 0x15c   : > { %1056 = vst [vmem:[#allocation2] sm:$0xff] %v1054_v57  ;;  %v1055_v60 = vadd.f32 %v1050_v58, %v330_v55 }
 0x15d   : > { %v1052_v61 = vpop.f32.mrf.mxu0 }
 0x15e   : > { %1057 = vst [vmem:[#allocation2 + $0x8] sm:$0xff] %v1055_v60 }
 0x15f   : > { %v1066_v62 = vlaneseq  ;;  %v1064_v0 = vld [vmem:[%s1736_s2] sm:$0x3] }
 0x160   : > { %v1078_v1 = vld [vmem:[%s1737_s3] sm:$0x3] }
 0x161   : > { %v1067_v63 = vshrl.u32 %v1066_v62, 7 }
 0x163   : > { %v1068_v2 = vsub.s32 0, %v1067_v63  ;;  %v1072_v3 = vsub.s32 1, %v1067_v63  ;;  %v1062_v4 = vld [vmem:[#allocation2] sm:$0xff] }
 0x165   : > { %v1063_v5 = vld [vmem:[#allocation2 + $0x8] sm:$0xff]  ;;  %v1069_v6 = vrot.slane %v1064_v0, %v1068_v2  ;;  %v1073_v7 = vrot.slane %v1064_v0, %v1072_v3  ;;  %v1083_v8 = vrot.slane %v1078_v1, %v1068_v2  ;;  %v1087_v9 = vrot.slane %v1078_v1, %v1072_v3 }
 0x167   : > { %v1076_v10 = vmul.f32 %v1069_v6, %v1062_v4  ;;  %v1077_v11 = vmul.f32 %v1073_v7, %v1063_v5 }
 0x169   : > { %v1090_v12 = vadd.f32 %v1083_v8, %v1076_v10  ;;  %v1091_v13 = vadd.f32 %v1087_v9, %v1077_v11 }
 0x16b   : > { %v1092_v14 = vmax.f32 %v1090_v12, 0.0  ;;  %v1093_v15 = vmax.f32 %v1091_v13, 0.0 }
 0x16d   : > { %v1351_v16 = vpack.c.bf16 %v1093_v15, %v1092_v14 }
 0x16f   : > { %1102 = vst [vmem:[%s1738_s4] sm:$0xff] %v1351_v16 }
 0x170 PF: > { %s14_s17 = sadd.s32 1, %s1549_s17   ;;  %s1739_s15 = smov %s1545_s16 }
 0x171   : > { %p11_p8 = scmp.ge.s32.totalorder %s14_s17, 5   ;;  %s1740_s16 = smov %s1742_s18 }
 0x173   :  { %13 = sbr.rel (!%p11_p8) target bundleno = 2 (0x2), region = 83 }

// kernel: resnet_forward.71
= control target key start
LH: loop header
LB: loop body
LE: loop exit
PB: predicated region body
PF: predicated region fallthrough
CT: control target
= control target key end

     0   :  { %s1499_s15 = smov 0   ;;  %s1501_s16 = smov 0   ;;  %s1786_s0 = inlined_call_operand.vmem [shape: bf16[8,512], index: 0, kind: input, shape index: {}]   ;;  %s1787_s1 = inlined_call_operand.vmem [shape: bf16[512,1024], index: 1, kind: input, shape index: {}]   ;;  %s1788_s2 = inlined_call_operand.vmem [shape: f32[1,1024], index: 2, kind: input, shape index: {}]   ;;  %s1789_s3 = inlined_call_operand.vmem [shape: f32[1,1024], index: 3, kind: input, shape index: {}]   ;;  %s1790_s4 = inlined_call_operand.vmem [shape: bf16[8,1024], index: 4, kind: output, shape index: {}]  }
   0x1   :  { %s1503_s17 = smov 0   ;;  %s1505_s18 = smov 0  }
   0x2   :  { %s1507_s19 = smov 0  }
   0x3 LB: > { %s23_s20 = sadd.s32 1, %s1468_s18  ;;  %p66_p1 = scmp.ne.s32.totalorder %s1460_s16, %s1456_s15  ;;  %s1472_s19 = sphi %s1507_s19, %s14_s19   ;;  %s1468_s18 = sphi %s1505_s18, %s1794_s18   ;;  %s1464_s17 = sphi %s1503_s17, %s1793_s17   ;;  %s1460_s16 = sphi %s1501_s16, %s1792_s16   ;;  %s1456_s15 = sphi %s1499_s15, %s1791_s15  }
   0x4   : > { %p24_p0 = scmp.ge.s32.totalorder %s23_s20, 4  ;;  %p67_p2 = scmp.eq.s32.totalorder %s1472_s19, 0 }
   0x5   : > { %s59_s22 = sadd.s32 1, %s1460_s16  ;;  %p1211_p5 = scmp.ge.s32.totalorder %s1472_s19, 4 }
   0x6   : > { %s1796_s20 = smov (%p24_p0, %s23_s20), 0  ;;  %p68_p3 = por %p67_p2, %p66_p1 }
   0x7   : > { %s56_s21 = ssub.s32 %s1468_s18, %s1796_s20  ;;  %180 = sbr.rel (%p1211_p5) target bundleno = 80 (0x50), region = 20 }
   0x8   : > { %p57_p4 = scmp.eq.s32.totalorder %s56_s21, 0 }
   0xa   : > { %s1534_s23 = scalar_select %p57_p4, %s1460_s16, %s59_s22  }
   0xc   : > { %183 = sbr.rel (!%p68_p3) target bundleno = 80 (0x50), region = 24  ;;  %s185_s24 = sand.u32 (%p68_p3), 1, %s1460_s16  }
   0xd   : > { %s1292_s25 = sshll.u32 (%p68_p3), %s1468_s18, 3  ;;  %s1212_s26 = sshll.u32 (%p68_p3), %s185_s24, 9 }
   0xe   : > { %s1542_s29 = scalar_lea.vmem (%p68_p3), %s1787_s1, %s1292_s25  ;;  %s1547_s30 = scalar_lea.vmem (%p68_p3), [#allocation2], %s1212_s26 }
   0xf   : > { %v345_v0 = vld [vmem:[%s1542_s29] sm:$0xff] (%p68_p3) }
  0x10   : > { %v347_v1 = vld [vmem:[%s1542_s29 + $0x20] sm:$0xff] (%p68_p3)  ;;  %346 = vst [vmem:[%s1547_s30] sm:$0xff] (%p68_p3), %v345_v0 }
  0x11   : > { %v349_v2 = vld [vmem:[%s1542_s29 + $0x40] sm:$0xff]  ;;  %348 = vst [vmem:[%s1547_s30 + $0x8] sm:$0xff] %v347_v1 }
  0x12   : > { %350 = vst [vmem:[%s1547_s30 + $0x10] sm:$0xff] %v349_v2  ;;  %v351_v3 = vld [vmem:[%s1542_s29 + $0x60] sm:$0xff] }
  0x13   : > { %v353_v4 = vld [vmem:[%s1542_s29 + $0x80] sm:$0xff]  ;;  %352 = vst [vmem:[%s1547_s30 + $0x18] sm:$0xff] %v351_v3 }
  0x14   : > { %v355_v5 = vld [vmem:[%s1542_s29 + $0xa0] sm:$0xff]  ;;  %354 = vst [vmem:[%s1547_s30 + $0x20] sm:$0xff] %v353_v4 }
  0x15   : > { %356 = vst [vmem:[%s1547_s30 + $0x28] sm:$0xff] %v355_v5  ;;  %v357_v6 = vld [vmem:[%s1542_s29 + $0xc0] sm:$0xff] }
  0x16   : > { %v359_v7 = vld [vmem:[%s1542_s29 + $0xe0] sm:$0xff]  ;;  %358 = vst [vmem:[%s1547_s30 + $0x30] sm:$0xff] %v357_v6 }
  0x17   : > { %v361_v8 = vld [vmem:[%s1542_s29 + $0x100] sm:$0xff]  ;;  %360 = vst [vmem:[%s1547_s30 + $0x38] sm:$0xff] %v359_v7 }
  0x18   : > { %362 = vst [vmem:[%s1547_s30 + $0x40] sm:$0xff] %v361_v8  ;;  %v363_v9 = vld [vmem:[%s1542_s29 + $0x120] sm:$0xff] }
  0x19   : > { %v365_v10 = vld [vmem:[%s1542_s29 + $0x140] sm:$0xff]  ;;  %364 = vst [vmem:[%s1547_s30 + $0x48] sm:$0xff] %v363_v9 }
  0x1a   : > { %v367_v11 = vld [vmem:[%s1542_s29 + $0x160] sm:$0xff]  ;;  %366 = vst [vmem:[%s1547_s30 + $0x50] sm:$0xff] %v365_v10 }
  0x1b   : > { %368 = vst [vmem:[%s1547_s30 + $0x58] sm:$0xff] %v367_v11  ;;  %v369_v12 = vld [vmem:[%s1542_s29 + $0x180] sm:$0xff] }
  0x1c   : > { %v371_v13 = vld [vmem:[%s1542_s29 + $0x1a0] sm:$0xff]  ;;  %370 = vst [vmem:[%s1547_s30 + $0x60] sm:$0xff] %v369_v12 }
  0x1d   : > { %v373_v14 = vld [vmem:[%s1542_s29 + $0x1c0] sm:$0xff]  ;;  %372 = vst [vmem:[%s1547_s30 + $0x68] sm:$0xff] %v371_v13 }
  0x1e   : > { %374 = vst [vmem:[%s1547_s30 + $0x70] sm:$0xff] %v373_v14  ;;  %v375_v15 = vld [vmem:[%s1542_s29 + $0x1e0] sm:$0xff] }
  0x1f   : > { %v377_v16 = vld [vmem:[%s1542_s29 + $0x200] sm:$0xff]  ;;  %376 = vst [vmem:[%s1547_s30 + $0x78] sm:$0xff] %v375_v15 }
  0x20   : > { %v379_v17 = vld [vmem:[%s1542_s29 + $0x220] sm:$0xff]  ;;  %378 = vst [vmem:[%s1547_s30 + $0x80] sm:$0xff] %v377_v16 }
  0x21   : > { %380 = vst [vmem:[%s1547_s30 + $0x88] sm:$0xff] %v379_v17  ;;  %v381_v18 = vld [vmem:[%s1542_s29 + $0x240] sm:$0xff] }
  0x22   : > { %v383_v19 = vld [vmem:[%s1542_s29 + $0x260] sm:$0xff]  ;;  %382 = vst [vmem:[%s1547_s30 + $0x90] sm:$0xff] %v381_v18 }
  0x23   : > { %v385_v20 = vld [vmem:[%s1542_s29 + $0x280] sm:$0xff]  ;;  %384 = vst [vmem:[%s1547_s30 + $0x98] sm:$0xff] %v383_v19 }
  0x24   : > { %386 = vst [vmem:[%s1547_s30 + $0xa0] sm:$0xff] %v385_v20  ;;  %v387_v21 = vld [vmem:[%s1542_s29 + $0x2a0] sm:$0xff] }
  0x25   : > { %v389_v22 = vld [vmem:[%s1542_s29 + $0x2c0] sm:$0xff]  ;;  %388 = vst [vmem:[%s1547_s30 + $0xa8] sm:$0xff] %v387_v21 }
  0x26   : > { %v391_v23 = vld [vmem:[%s1542_s29 + $0x2e0] sm:$0xff]  ;;  %390 = vst [vmem:[%s1547_s30 + $0xb0] sm:$0xff] %v389_v22 }
  0x27   : > { %392 = vst [vmem:[%s1547_s30 + $0xb8] sm:$0xff] %v391_v23  ;;  %v393_v24 = vld [vmem:[%s1542_s29 + $0x300] sm:$0xff] }
  0x28   : > { %v395_v25 = vld [vmem:[%s1542_s29 + $0x320] sm:$0xff]  ;;  %394 = vst [vmem:[%s1547_s30 + $0xc0] sm:$0xff] %v393_v24 }
  0x29   : > { %v397_v26 = vld [vmem:[%s1542_s29 + $0x340] sm:$0xff]  ;;  %396 = vst [vmem:[%s1547_s30 + $0xc8] sm:$0xff] %v395_v25 }
  0x2a   : > { %398 = vst [vmem:[%s1547_s30 + $0xd0] sm:$0xff] %v397_v26  ;;  %v399_v27 = vld [vmem:[%s1542_s29 + $0x360] sm:$0xff] }
  0x2b   : > { %v401_v28 = vld [vmem:[%s1542_s29 + $0x380] sm:$0xff]  ;;  %400 = vst [vmem:[%s1547_s30 + $0xd8] sm:$0xff] %v399_v27 }
  0x2c   : > { %v403_v29 = vld [vmem:[%s1542_s29 + $0x3a0] sm:$0xff]  ;;  %402 = vst [vmem:[%s1547_s30 + $0xe0] sm:$0xff] %v401_v28 }
  0x2d   : > { %404 = vst [vmem:[%s1547_s30 + $0xe8] sm:$0xff] %v403_v29  ;;  %v405_v30 = vld [vmem:[%s1542_s29 + $0x3c0] sm:$0xff] }
  0x2e   : > { %v407_v31 = vld [vmem:[%s1542_s29 + $0x3e0] sm:$0xff]  ;;  %406 = vst [vmem:[%s1547_s30 + $0xf0] sm:$0xff] %v405_v30 }
  0x2f   : > { %v409_v32 = vld [vmem:[%s1542_s29 + $0x400] sm:$0xff]  ;;  %408 = vst [vmem:[%s1547_s30 + $0xf8] sm:$0xff] %v407_v31 }
  0x30   : > { %410 = vst [vmem:[%s1547_s30 + $0x100] sm:$0xff] %v409_v32  ;;  %v411_v33 = vld [vmem:[%s1542_s29 + $0x420] sm:$0xff] }
  0x31   : > { %v413_v34 = vld [vmem:[%s1542_s29 + $0x440] sm:$0xff]  ;;  %412 = vst [vmem:[%s1547_s30 + $0x108] sm:$0xff] %v411_v33 }
  0x32   : > { %v415_v35 = vld [vmem:[%s1542_s29 + $0x460] sm:$0xff]  ;;  %414 = vst [vmem:[%s1547_s30 + $0x110] sm:$0xff] %v413_v34 }
  0x33   : > { %416 = vst [vmem:[%s1547_s30 + $0x118] sm:$0xff] %v415_v35  ;;  %v417_v36 = vld [vmem:[%s1542_s29 + $0x480] sm:$0xff] }
  0x34   : > { %v419_v37 = vld [vmem:[%s1542_s29 + $0x4a0] sm:$0xff]  ;;  %418 = vst [vmem:[%s1547_s30 + $0x120] sm:$0xff] %v417_v36 }
  0x35   : > { %v421_v38 = vld [vmem:[%s1542_s29 + $0x4c0] sm:$0xff]  ;;  %420 = vst [vmem:[%s1547_s30 + $0x128] sm:$0xff] %v419_v37 }
  0x36   : > { %422 = vst [vmem:[%s1547_s30 + $0x130] sm:$0xff] %v421_v38  ;;  %v423_v39 = vld [vmem:[%s1542_s29 + $0x4e0] sm:$0xff] }
  0x37   : > { %v425_v40 = vld [vmem:[%s1542_s29 + $0x500] sm:$0xff]  ;;  %424 = vst [vmem:[%s1547_s30 + $0x138] sm:$0xff] %v423_v39 }
  0x38   : > { %v427_v41 = vld [vmem:[%s1542_s29 + $0x520] sm:$0xff]  ;;  %426 = vst [vmem:[%s1547_s30 + $0x140] sm:$0xff] %v425_v40 }
  0x39   : > { %428 = vst [vmem:[%s1547_s30 + $0x148] sm:$0xff] %v427_v41  ;;  %v429_v42 = vld [vmem:[%s1542_s29 + $0x540] sm:$0xff] }
  0x3a   : > { %v431_v43 = vld [vmem:[%s1542_s29 + $0x560] sm:$0xff]  ;;  %430 = vst [vmem:[%s1547_s30 + $0x150] sm:$0xff] %v429_v42 }
  0x3b   : > { %v433_v44 = vld [vmem:[%s1542_s29 + $0x580] sm:$0xff]  ;;  %432 = vst [vmem:[%s1547_s30 + $0x158] sm:$0xff] %v431_v43 }
  0x3c   : > { %434 = vst [vmem:[%s1547_s30 + $0x160] sm:$0xff] %v433_v44  ;;  %v435_v45 = vld [vmem:[%s1542_s29 + $0x5a0] sm:$0xff] }
  0x3d   : > { %v437_v46 = vld [vmem:[%s1542_s29 + $0x5c0] sm:$0xff]  ;;  %436 = vst [vmem:[%s1547_s30 + $0x168] sm:$0xff] %v435_v45 }
  0x3e   : > { %v439_v47 = vld [vmem:[%s1542_s29 + $0x5e0] sm:$0xff]  ;;  %438 = vst [vmem:[%s1547_s30 + $0x170] sm:$0xff] %v437_v46 }
  0x3f   : > { %440 = vst [vmem:[%s1547_s30 + $0x178] sm:$0xff] %v439_v47  ;;  %v441_v48 = vld [vmem:[%s1542_s29 + $0x600] sm:$0xff] }
  0x40   : > { %v443_v49 = vld [vmem:[%s1542_s29 + $0x620] sm:$0xff]  ;;  %442 = vst [vmem:[%s1547_s30 + $0x180] sm:$0xff] %v441_v48 }
  0x41   : > { %v445_v50 = vld [vmem:[%s1542_s29 + $0x640] sm:$0xff]  ;;  %444 = vst [vmem:[%s1547_s30 + $0x188] sm:$0xff] %v443_v49 }
  0x42   : > { %446 = vst [vmem:[%s1547_s30 + $0x190] sm:$0xff] %v445_v50  ;;  %v447_v51 = vld [vmem:[%s1542_s29 + $0x660] sm:$0xff] }
  0x43   : > { %v449_v52 = vld [vmem:[%s1542_s29 + $0x680] sm:$0xff]  ;;  %448 = vst [vmem:[%s1547_s30 + $0x198] sm:$0xff] %v447_v51 }
  0x44   : > { %v451_v53 = vld [vmem:[%s1542_s29 + $0x6a0] sm:$0xff]  ;;  %450 = vst [vmem:[%s1547_s30 + $0x1a0] sm:$0xff] %v449_v52 }
  0x45   : > { %452 = vst [vmem:[%s1547_s30 + $0x1a8] sm:$0xff] %v451_v53  ;;  %v453_v54 = vld [vmem:[%s1542_s29 + $0x6c0] sm:$0xff] }
  0x46   : > { %v455_v55 = vld [vmem:[%s1542_s29 + $0x6e0] sm:$0xff]  ;;  %454 = vst [vmem:[%s1547_s30 + $0x1b0] sm:$0xff] %v453_v54 }
  0x47   : > { %v457_v56 = vld [vmem:[%s1542_s29 + $0x700] sm:$0xff]  ;;  %456 = vst [vmem:[%s1547_s30 + $0x1b8] sm:$0xff] %v455_v55 }
  0x48   : > { %458 = vst [vmem:[%s1547_s30 + $0x1c0] sm:$0xff] %v457_v56  ;;  %v459_v57 = vld [vmem:[%s1542_s29 + $0x720] sm:$0xff] }
  0x49   : > { %v461_v58 = vld [vmem:[%s1542_s29 + $0x740] sm:$0xff]  ;;  %460 = vst [vmem:[%s1547_s30 + $0x1c8] sm:$0xff] %v459_v57 }
  0x4a   : > { %v463_v59 = vld [vmem:[%s1542_s29 + $0x760] sm:$0xff]  ;;  %462 = vst [vmem:[%s1547_s30 + $0x1d0] sm:$0xff] %v461_v58 }
  0x4b   : > { %464 = vst [vmem:[%s1547_s30 + $0x1d8] sm:$0xff] %v463_v59  ;;  %v465_v60 = vld [vmem:[%s1542_s29 + $0x780] sm:$0xff] }
  0x4c   : > { %v467_v61 = vld [vmem:[%s1542_s29 + $0x7a0] sm:$0xff]  ;;  %466 = vst [vmem:[%s1547_s30 + $0x1e0] sm:$0xff] %v465_v60 }
  0x4d   : > { %v469_v62 = vld [vmem:[%s1542_s29 + $0x7c0] sm:$0xff]  ;;  %468 = vst [vmem:[%s1547_s30 + $0x1e8] sm:$0xff] %v467_v61 }
  0x4e   : > { %470 = vst [vmem:[%s1547_s30 + $0x1f0] sm:$0xff] %v469_v62  ;;  %v471_v63 = vld [vmem:[%s1542_s29 + $0x7e0] sm:$0xff] }
  0x4f   : > { %472 = vst [vmem:[%s1547_s30 + $0x1f8] sm:$0xff] %v471_v63 }
  0x50 PF: > { %p1215_p6 = scmp.ge.s32.totalorder %s1472_s19, 1  ;;  %p493_p7 = scmp.lt.s32.totalorder %s1472_s19, 5 }
  0x52   : > { %p494_p8 = pnand %p1215_p6, %p493_p7 }
  0x53   : > { %s500_s5 = sand.u32 (!%p494_p8), 1, %s1456_s15   ;;  %s1217_s12 = sshll.u32 (!%p494_p8), %s1464_s17, 1 }
  0x54   : > { %497 = sbr.rel (%p494_p8) target bundleno = 360 (0x168), region = 70  ;;  %s1216_s10 = sshll.u32 (!%p494_p8), %s500_s5, 9 }
  0x55   : > { %s1691_s11 = scalar_lea.vmem (!%p494_p8), [#allocation2], %s1216_s10  ;;  %p549_p9 = scmp.lt.s32.totalorder (!%p494_p8), %s1217_s12, 7 }
  0x59   : > { %v1680_v0 = vld [vmem:[%s1786_s0] sm:$0xff]  ;;  %v1685_v1 = vld [vmem:[%s1786_s0 + $0x8] sm:$0xff]  ;;  %v1334_v4 = vld [vmem:[%s1691_s11 + $0x74] ss:$8 sps:$4 sm:$0xff]   ;;  %s1798_s12 = smov (!%p549_p9, %s1217_s12), 7 }
  0x5a   : > { %v1222_v2 = vcombine.high %v1680_v0, %v1680_v0  ;;  %v1224_v3 = vcombine.high %v1685_v1, %v1685_v1  ;;  %v1336_v5 = vld [vmem:[%s1691_s11 + $0x174] ss:$8 sps:$4 sm:$0xff]   ;;  %968 = vmatprep.subr.bf16.mxu0 %v1334_v4  ;;  %v1338_v6 = vld [vmem:[%s1691_s11 + $0x70] ss:$8 sps:$4 sm:$0xff]   ;;  %v1340_v8 = vld [vmem:[%s1691_s11 + $0x64] ss:$8 sps:$4 sm:$0xff]   ;;  %s551_s15 = scalar_lea.vmem %s1788_s2, %s1798_s12  ;;  %s556_s24 = scalar_lea.vmem %s1789_s3, %s1798_s12 }
  0x5b   : > { %v1339_v7 = vld [vmem:[%s1691_s11 + $0x170] ss:$8 sps:$4 sm:$0xff]   ;;  %1009 = vmatprep.subr.bf16.mxu1 %v1336_v5  ;;  %969 = vmatpush1.bf16.msra.mxu0 %v1338_v6  ;;  %v1342_v9 = vld [vmem:[%s1691_s11 + $0x164] ss:$8 sps:$4 sm:$0xff]   ;;  %v1344_v10 = vld [vmem:[%s1691_s11 + $0x60] ss:$8 sps:$4 sm:$0xff]   ;;  %v1221_v6 = vcombine.low %v1680_v0, %v1680_v0 }
  0x5c   : > { %1000 = vmatprep.mubr.bf16.mxu0 %v1222_v2  ;;  %1041 = vmatprep.mubr.bf16.mxu1 %v1224_v3  ;;  %v1345_v11 = vld [vmem:[%s1691_s11 + $0x160] ss:$8 sps:$4 sm:$0xff]   ;;  %v1346_v12 = vld [vmem:[%s1691_s11 + $0x54] ss:$8 sps:$4 sm:$0xff]   ;;  %v1350_v14 = vld [vmem:[%s1691_s11 + $0x50] ss:$8 sps:$4 sm:$0xff]  }
  0x5d   : > { %1010 = vmatpush1.bf16.msra.mxu1 %v1339_v7  ;;  %970 = vmatprep.subr.bf16.mxu0 %v1340_v8  ;;  %v1348_v13 = vld [vmem:[%s1691_s11 + $0x154] ss:$8 sps:$4 sm:$0xff]   ;;  %v1351_v15 = vld [vmem:[%s1691_s11 + $0x150] ss:$8 sps:$4 sm:$0xff]   ;;  %v1352_v16 = vld [vmem:[%s1691_s11 + $0x44] ss:$8 sps:$4 sm:$0xff]   ;;  %v1223_v7 = vcombine.low %v1685_v1, %v1685_v1  ;;  %v1052_v8 = vlaneseq }
  0x5e   : > { %1011 = vmatprep.subr.bf16.mxu1 %v1342_v9  ;;  %v1354_v17 = vld [vmem:[%s1691_s11 + $0x144] ss:$8 sps:$4 sm:$0xff]   ;;  %v1356_v18 = vld [vmem:[%s1691_s11 + $0x40] ss:$8 sps:$4 sm:$0xff]   ;;  %v1358_v20 = vld [vmem:[%s1691_s11 + $0x34] ss:$8 sps:$4 sm:$0xff]  }
  0x5f   : > { %971 = vmatpush1.bf16.msra.mxu0 %v1344_v10  ;;  %v1357_v19 = vld [vmem:[%s1691_s11 + $0x140] ss:$8 sps:$4 sm:$0xff]   ;;  %v1360_v21 = vld [vmem:[%s1691_s11 + $0x134] ss:$8 sps:$4 sm:$0xff]   ;;  %v1362_v22 = vld [vmem:[%s1691_s11 + $0x30] ss:$8 sps:$4 sm:$0xff]  }
  0x60   : > { %972 = vmatprep.subr.bf16.mxu0 %v1346_v12  ;;  %v1363_v23 = vld [vmem:[%s1691_s11 + $0x130] ss:$8 sps:$4 sm:$0xff]   ;;  %v1364_v24 = vld [vmem:[%s1691_s11 + $0x24] ss:$8 sps:$4 sm:$0xff]   ;;  %v1368_v26 = vld [vmem:[%s1691_s11 + $0x20] ss:$8 sps:$4 sm:$0xff]  }
  0x61   : > { %1012 = vmatpush1.bf16.msra.mxu1 %v1345_v11  ;;  %v1366_v25 = vld [vmem:[%s1691_s11 + $0x124] ss:$8 sps:$4 sm:$0xff]   ;;  %v1369_v27 = vld [vmem:[%s1691_s11 + $0x120] ss:$8 sps:$4 sm:$0xff]   ;;  %v1370_v28 = vld [vmem:[%s1691_s11 + $0x14] ss:$8 sps:$4 sm:$0xff]  }
  0x62   : > { %1013 = vmatprep.subr.bf16.mxu1 %v1348_v13  ;;  %v1372_v29 = vld [vmem:[%s1691_s11 + $0x114] ss:$8 sps:$4 sm:$0xff]   ;;  %v1374_v30 = vld [vmem:[%s1691_s11 + $0x10] ss:$8 sps:$4 sm:$0xff]   ;;  %v1376_v32 = vld [vmem:[%s1691_s11 + $0x4] ss:$8 sps:$4 sm:$0xff]  }
  0x63   : > { %973 = vmatpush1.bf16.msra.mxu0 %v1350_v14  ;;  %v1375_v31 = vld [vmem:[%s1691_s11 + $0x110] ss:$8 sps:$4 sm:$0xff]   ;;  %v1378_v33 = vld [vmem:[%s1691_s11 + $0x104] ss:$8 sps:$4 sm:$0xff]   ;;  %v1380_v34 = vld [vmem:[%s1691_s11] ss:$8 sps:$4 sm:$0xff]  }
  0x64   : > { %974 = vmatprep.subr.bf16.mxu0 %v1352_v16  ;;  %v1381_v35 = vld [vmem:[%s1691_s11 + $0x100] ss:$8 sps:$4 sm:$0xff]   ;;  %v1382_v36 = vld [vmem:[%s1691_s11 + $0xf4] ss:$8 sps:$4 sm:$0xff]   ;;  %v1386_v38 = vld [vmem:[%s1691_s11 + $0xf0] ss:$8 sps:$4 sm:$0xff]  }
  0x65   : > { %1014 = vmatpush1.bf16.msra.mxu1 %v1351_v15  ;;  %v1384_v37 = vld [vmem:[%s1691_s11 + $0x1f4] ss:$8 sps:$4 sm:$0xff]   ;;  %v1387_v39 = vld [vmem:[%s1691_s11 + $0x1f0] ss:$8 sps:$4 sm:$0xff]   ;;  %v1388_v40 = vld [vmem:[%s1691_s11 + $0xe4] ss:$8 sps:$4 sm:$0xff]  }
  0x66   : > { %1015 = vmatprep.subr.bf16.mxu1 %v1354_v17  ;;  %v1390_v41 = vld [vmem:[%s1691_s11 + $0x1e4] ss:$8 sps:$4 sm:$0xff]   ;;  %v1392_v42 = vld [vmem:[%s1691_s11 + $0xe0] ss:$8 sps:$4 sm:$0xff]   ;;  %v1394_v44 = vld [vmem:[%s1691_s11 + $0xd4] ss:$8 sps:$4 sm:$0xff]  }
  0x67   : > { %975 = vmatpush1.bf16.msra.mxu0 %v1356_v18  ;;  %v1393_v43 = vld [vmem:[%s1691_s11 + $0x1e0] ss:$8 sps:$4 sm:$0xff]   ;;  %v1396_v45 = vld [vmem:[%s1691_s11 + $0x1d4] ss:$8 sps:$4 sm:$0xff]   ;;  %v1398_v46 = vld [vmem:[%s1691_s11 + $0xd0] ss:$8 sps:$4 sm:$0xff]  }
  0x68   : > { %976 = vmatprep.subr.bf16.mxu0 %v1358_v20  ;;  %v1399_v47 = vld [vmem:[%s1691_s11 + $0x1d0] ss:$8 sps:$4 sm:$0xff]   ;;  %v1400_v48 = vld [vmem:[%s1691_s11 + $0xc4] ss:$8 sps:$4 sm:$0xff]   ;;  %v1404_v50 = vld [vmem:[%s1691_s11 + $0xc0] ss:$8 sps:$4 sm:$0xff]  }
  0x69   : > { %1016 = vmatpush1.bf16.msra.mxu1 %v1357_v19  ;;  %v1402_v49 = vld [vmem:[%s1691_s11 + $0x1c4] ss:$8 sps:$4 sm:$0xff]   ;;  %v1405_v51 = vld [vmem:[%s1691_s11 + $0x1c0] ss:$8 sps:$4 sm:$0xff]   ;;  %v1406_v52 = vld [vmem:[%s1691_s11 + $0xb4] ss:$8 sps:$4 sm:$0xff]  }
  0x6a   : > { %1017 = vmatprep.subr.bf16.mxu1 %v1360_v21  ;;  %v1408_v53 = vld [vmem:[%s1691_s11 + $0x1b4] ss:$8 sps:$4 sm:$0xff]   ;;  %v1410_v54 = vld [vmem:[%s1691_s11 + $0xb0] ss:$8 sps:$4 sm:$0xff]   ;;  %v1412_v56 = vld [vmem:[%s1691_s11 + $0xa4] ss:$8 sps:$4 sm:$0xff]  }
  0x6b   : > { %977 = vmatpush1.bf16.msra.mxu0 %v1362_v22  ;;  %v1411_v55 = vld [vmem:[%s1691_s11 + $0x1b0] ss:$8 sps:$4 sm:$0xff]   ;;  %v1414_v57 = vld [vmem:[%s1691_s11 + $0x1a4] ss:$8 sps:$4 sm:$0xff]   ;;  %v1416_v58 = vld [vmem:[%s1691_s11 + $0xa0] ss:$8 sps:$4 sm:$0xff]  }
  0x6c   : > { %978 = vmatprep.subr.bf16.mxu0 %v1364_v24  ;;  %v1417_v59 = vld [vmem:[%s1691_s11 + $0x1a0] ss:$8 sps:$4 sm:$0xff]   ;;  %v1418_v60 = vld [vmem:[%s1691_s11 + $0x94] ss:$8 sps:$4 sm:$0xff]   ;;  %v1422_v62 = vld [vmem:[%s1691_s11 + $0x90] ss:$8 sps:$4 sm:$0xff]  }
  0x6d   : > { %1018 = vmatpush1.bf16.msra.mxu1 %v1363_v23  ;;  %v1420_v61 = vld [vmem:[%s1691_s11 + $0x194] ss:$8 sps:$4 sm:$0xff]   ;;  %v1423_v63 = vld [vmem:[%s1691_s11 + $0x190] ss:$8 sps:$4 sm:$0xff]   ;;  %v1424_v2 = vld [vmem:[%s1691_s11 + $0x84] ss:$8 sps:$4 sm:$0xff]  }
  0x6e   : > { %1019 = vmatprep.subr.bf16.mxu1 %v1366_v25  ;;  %v1426_v3 = vld [vmem:[%s1691_s11 + $0x184] ss:$8 sps:$4 sm:$0xff]   ;;  %v1428_v4 = vld [vmem:[%s1691_s11 + $0x80] ss:$8 sps:$4 sm:$0xff]   ;;  %v1053_v9 = vshrl.u32 %v1052_v8, 7  ;;  %s1220_s17 = sshll.u32 %s1798_s12, 2 }
  0x6f   : > { %979 = vmatpush1.bf16.msra.mxu0 %v1368_v26  ;;  %v1429_v5 = vld [vmem:[%s1691_s11 + $0x180] ss:$8 sps:$4 sm:$0xff]   ;;  %s566_s27 = scalar_lea.vmem %s1790_s4, %s1220_s17 }
  0x70   : > { %980 = vmatprep.subr.bf16.mxu0 %v1370_v28  ;;  %v1054_v10 = vsub.s32 0, %v1053_v9  ;;  %v1050_v11 = vld [vmem:[%s551_s15] sm:$0x3]  ;;  %v1058_v0 = vsub.s32 1, %v1053_v9 }
  0x71   : > { %1020 = vmatpush1.bf16.msra.mxu1 %v1369_v27  ;;  %v1064_v14 = vld [vmem:[%s556_s24] sm:$0x3] }
  0x72   : > { %1021 = vmatprep.subr.bf16.mxu1 %v1372_v29  ;;  %v1055_v1 = vrot.slane %v1050_v11, %v1054_v10  ;;  %v1059_v16 = vrot.slane %v1050_v11, %v1058_v0  ;;  %v1069_v20 = vrot.slane %v1064_v14, %v1054_v10  ;;  %v1073_v22 = vrot.slane %v1064_v14, %v1058_v0 }
  0x73   : > { %981 = vmatpush1.bf16.msra.mxu0 %v1374_v30 }
  0x74   : > { %982 = vmatprep.subr.bf16.mxu0 %v1376_v32 }
  0x75   : > { %1022 = vmatpush1.bf16.msra.mxu1 %v1375_v31 }
  0x76   : > { %1023 = vmatprep.subr.bf16.mxu1 %v1378_v33 }
  0x77   : > { %983 = vmatpush1.bf16.msra.mxu0 %v1380_v34 }
  0x78   : > { %984 = vmatprep.subr.bf16.mxu0 %v1382_v36 }
  0x79   : > { %1024 = vmatpush1.bf16.msra.mxu1 %v1381_v35 }
  0x7a   : > { %1025 = vmatprep.subr.bf16.mxu1 %v1384_v37 }
  0x7b   : > { %985 = vmatpush2.bf16.msra.mxu0 %v1386_v38 }
  0x7c   : > { %986 = vmatprep.subr.bf16.mxu0 %v1388_v40 }
  0x7d   : > { %1026 = vmatpush2.bf16.msra.mxu1 %v1387_v39 }
  0x7e   : > { %1027 = vmatprep.subr.bf16.mxu1 %v1390_v41 }
  0x7f   : > { %987 = vmatpush2.bf16.msra.mxu0 %v1392_v42 }
  0x80   : > { %988 = vmatprep.subr.bf16.mxu0 %v1394_v44 }
  0x81   : > { %1028 = vmatpush2.bf16.msra.mxu1 %v1393_v43 }
  0x82   : > { %1029 = vmatprep.subr.bf16.mxu1 %v1396_v45 }
  0x83   : > { %989 = vmatpush2.bf16.msra.mxu0 %v1398_v46 }
  0x84   : > { %990 = vmatprep.subr.bf16.mxu0 %v1400_v48 }
  0x85   : > { %1030 = vmatpush2.bf16.msra.mxu1 %v1399_v47 }
  0x86   : > { %1031 = vmatprep.subr.bf16.mxu1 %v1402_v49 }
  0x87   : > { %991 = vmatpush2.bf16.msra.mxu0 %v1404_v50 }
  0x88   : > { %992 = vmatprep.subr.bf16.mxu0 %v1406_v52 }
  0x89   : > { %1032 = vmatpush2.bf16.msra.mxu1 %v1405_v51 }
  0x8a   : > { %1033 = vmatprep.subr.bf16.mxu1 %v1408_v53 }
  0x8b   : > { %993 = vmatpush2.bf16.msra.mxu0 %v1410_v54 }
  0x8c   : > { %994 = vmatprep.subr.bf16.mxu0 %v1412_v56 }
  0x8d   : > { %1034 = vmatpush2.bf16.msra.mxu1 %v1411_v55 }
  0x8e   : > { %1035 = vmatprep.subr.bf16.mxu1 %v1414_v57 }
  0x8f   : > { %995 = vmatpush2.bf16.msra.mxu0 %v1416_v58 }
  0x90   : > { %996 = vmatprep.subr.bf16.mxu0 %v1418_v60 }
  0x91   : > { %1036 = vmatpush2.bf16.msra.mxu1 %v1417_v59 }
  0x92   : > { %1037 = vmatprep.subr.bf16.mxu1 %v1420_v61 }
  0x93   : > { %997 = vmatpush2.bf16.msra.mxu0 %v1422_v62 }
  0x94   : > { %998 = vmatprep.subr.bf16.mxu0 %v1424_v2 }
  0x95   : > { %1038 = vmatpush2.bf16.msra.mxu1 %v1423_v63 }
  0x96   : > { %1039 = vmatprep.subr.bf16.mxu1 %v1426_v3 }
  0x97   : > { %999 = vmatpush2.bf16.msra.mxu0 %v1428_v4 }
  0x99   : > { %1040 = vmatpush2.bf16.msra.mxu1 %v1429_v5 }
  0x9a   : > { %1001 = vmatmul.mubr.bf16.vlgmr.msra.gmra.mxu0 %v1221_v6 }
  0x9c   : > { %1042 = vmatmul.mubr.bf16.vlgmr.msra.gmra.mxu1 %v1223_v7 }
 0x15a   : > { %v1002_v12 = vpop.f32.mrf.mxu0 }
 0x15c   : > { %v1043_v13 = vpop.f32.mrf.mxu1  ;;  %v1004_v17 = vpop.f32.mrf.mxu0 }
 0x15d   : > { %v1044_v15 = vadd.f32 %v1043_v13, %v1002_v12 }
 0x15e   : > { %v1045_v18 = vpop.f32.mrf.mxu1  ;;  %v1006_v23 = vpop.f32.mrf.mxu0 }
 0x15f   : > { %v1062_v19 = vmul.f32 %v1055_v1, %v1044_v15  ;;  %v1046_v21 = vadd.f32 %v1045_v18, %v1004_v17 }
 0x160   : > { %v1047_v24 = vpop.f32.mrf.mxu1  ;;  %v1007_v26 = vpop.f32.mrf.mxu0 }
 0x161   : > { %v1063_v25 = vmul.f32 %v1059_v16, %v1046_v21  ;;  %v1076_v28 = vadd.f32 %v1069_v20, %v1062_v19 }
 0x162   : > { %v1048_v27 = vpop.f32.mrf.mxu1 }
 0x163   : > { %v1077_v29 = vadd.f32 %v1073_v22, %v1063_v25 }
 0x165   : > { %v1293_v30 = vpack.c.bf16 %v1077_v29, %v1076_v28 }
 0x167   : > { %1086 = vst [vmem:[%s566_s27] sm:$0xff] %v1293_v30 }
 0x168 PF: > { %s14_s19 = sadd.s32 1, %s1472_s19   ;;  %s1791_s15 = smov %s1460_s16 }
 0x169   : > { %p11_p10 = scmp.ge.s32.totalorder %s14_s19, 6   ;;  %s1792_s16 = smov %s1534_s23 }
 0x16a   : > { %s1793_s17 = smov %s1468_s18  ;;  %s1794_s18 = smov %s1796_s20 }
 0x16b   :  { %13 = sbr.rel (!%p11_p10) target bundleno = 3 (0x3), region = 118 }

// kernel: resnet_forward.72
= control target key start
LH: loop header
LB: loop body
LE: loop exit
PB: predicated region body
PF: predicated region fallthrough
CT: control target
= control target key end

     0   :  { %s1141_s18 = smov 0   ;;  %s1143_s19 = smov 0   ;;  %s1331_s0 = inlined_call_operand.vmem [shape: bf16[8,256], index: 0, kind: input, shape index: {}]   ;;  %s1332_s1 = inlined_call_operand.vmem [shape: bf16[256,1024], index: 1, kind: input, shape index: {}]   ;;  %s1333_s2 = inlined_call_operand.vmem [shape: f32[1,1024], index: 2, kind: input, shape index: {}]   ;;  %s1334_s3 = inlined_call_operand.vmem [shape: f32[1,1024], index: 3, kind: input, shape index: {}]   ;;  %s1335_s4 = inlined_call_operand.vmem [shape: bf16[8,1024], index: 4, kind: input, shape index: {}]   ;;  %s1336_s5 = inlined_call_operand.vmem [shape: bf16[8,1024], index: 5, kind: output, shape index: {}]  }
   0x1   :  { %s1145_s20 = smov 0   ;;  %s1147_s21 = smov 0  }
   0x2   :  { %s1149_s22 = smov 0  }
   0x3 LB: > { %s24_s23 = sadd.s32 1, %s1105_s21  ;;  %p67_p1 = scmp.ne.s32.totalorder %s1097_s19, %s1093_s18  ;;  %s1109_s22 = sphi %s1149_s22, %s15_s22   ;;  %s1105_s21 = sphi %s1147_s21, %s1340_s21   ;;  %s1101_s20 = sphi %s1145_s20, %s1339_s20   ;;  %s1097_s19 = sphi %s1143_s19, %s1338_s19   ;;  %s1093_s18 = sphi %s1141_s18, %s1337_s18  }
   0x4   : > { %p25_p0 = scmp.ge.s32.totalorder %s24_s23, 4  ;;  %p68_p2 = scmp.eq.s32.totalorder %s1109_s22, 0 }
   0x5   : > { %s60_s25 = sadd.s32 1, %s1097_s19  ;;  %p930_p5 = scmp.ge.s32.totalorder %s1109_s22, 4 }
   0x6   : > { %s1342_s23 = smov (%p25_p0, %s24_s23), 0  ;;  %p69_p3 = por %p68_p2, %p67_p1 }
   0x7   : > { %s57_s24 = ssub.s32 %s1105_s21, %s1342_s23  ;;  %209 = sbr.rel (%p930_p5) target bundleno = 48 (0x30), region = 20 }
   0x8   : > { %p58_p4 = scmp.eq.s32.totalorder %s57_s24, 0 }
   0xa   : > { %s1176_s26 = scalar_select %p58_p4, %s1097_s19, %s60_s25  }
   0xc   : > { %212 = sbr.rel (!%p69_p3) target bundleno = 48 (0x30), region = 24  ;;  %s214_s27 = sand.u32 (%p69_p3), 1, %s1097_s19  }
   0xd   : > { %s979_s28 = sshll.u32 (%p69_p3), %s1105_s21, 3  ;;  %s931_s29 = sshll.u32 (%p69_p3), %s214_s27, 8 }
   0xe   : > { %s1184_s7 = scalar_lea.vmem (%p69_p3), %s1332_s1, %s979_s28  ;;  %s1189_s8 = scalar_lea.vmem (%p69_p3), [#allocation2], %s931_s29 }
   0xf   : > { %v310_v0 = vld [vmem:[%s1184_s7] sm:$0xff] (%p69_p3) }
  0x10   : > { %v312_v1 = vld [vmem:[%s1184_s7 + $0x20] sm:$0xff] (%p69_p3)  ;;  %311 = vst [vmem:[%s1189_s8] sm:$0xff] (%p69_p3), %v310_v0 }
  0x11   : > { %v314_v2 = vld [vmem:[%s1184_s7 + $0x40] sm:$0xff]  ;;  %313 = vst [vmem:[%s1189_s8 + $0x8] sm:$0xff] %v312_v1 }
  0x12   : > { %315 = vst [vmem:[%s1189_s8 + $0x10] sm:$0xff] %v314_v2  ;;  %v316_v3 = vld [vmem:[%s1184_s7 + $0x60] sm:$0xff] }
  0x13   : > { %v318_v4 = vld [vmem:[%s1184_s7 + $0x80] sm:$0xff]  ;;  %317 = vst [vmem:[%s1189_s8 + $0x18] sm:$0xff] %v316_v3 }
  0x14   : > { %v320_v5 = vld [vmem:[%s1184_s7 + $0xa0] sm:$0xff]  ;;  %319 = vst [vmem:[%s1189_s8 + $0x20] sm:$0xff] %v318_v4 }
  0x15   : > { %321 = vst [vmem:[%s1189_s8 + $0x28] sm:$0xff] %v320_v5  ;;  %v322_v6 = vld [vmem:[%s1184_s7 + $0xc0] sm:$0xff] }
  0x16   : > { %v324_v7 = vld [vmem:[%s1184_s7 + $0xe0] sm:$0xff]  ;;  %323 = vst [vmem:[%s1189_s8 + $0x30] sm:$0xff] %v322_v6 }
  0x17   : > { %v326_v8 = vld [vmem:[%s1184_s7 + $0x100] sm:$0xff]  ;;  %325 = vst [vmem:[%s1189_s8 + $0x38] sm:$0xff] %v324_v7 }
  0x18   : > { %327 = vst [vmem:[%s1189_s8 + $0x40] sm:$0xff] %v326_v8  ;;  %v328_v9 = vld [vmem:[%s1184_s7 + $0x120] sm:$0xff] }
  0x19   : > { %v330_v10 = vld [vmem:[%s1184_s7 + $0x140] sm:$0xff]  ;;  %329 = vst [vmem:[%s1189_s8 + $0x48] sm:$0xff] %v328_v9 }
  0x1a   : > { %v332_v11 = vld [vmem:[%s1184_s7 + $0x160] sm:$0xff]  ;;  %331 = vst [vmem:[%s1189_s8 + $0x50] sm:$0xff] %v330_v10 }
  0x1b   : > { %333 = vst [vmem:[%s1189_s8 + $0x58] sm:$0xff] %v332_v11  ;;  %v334_v12 = vld [vmem:[%s1184_s7 + $0x180] sm:$0xff] }
  0x1c   : > { %v336_v13 = vld [vmem:[%s1184_s7 + $0x1a0] sm:$0xff]  ;;  %335 = vst [vmem:[%s1189_s8 + $0x60] sm:$0xff] %v334_v12 }
  0x1d   : > { %v338_v14 = vld [vmem:[%s1184_s7 + $0x1c0] sm:$0xff]  ;;  %337 = vst [vmem:[%s1189_s8 + $0x68] sm:$0xff] %v336_v13 }
  0x1e   : > { %339 = vst [vmem:[%s1189_s8 + $0x70] sm:$0xff] %v338_v14  ;;  %v340_v15 = vld [vmem:[%s1184_s7 + $0x1e0] sm:$0xff] }
  0x1f   : > { %v342_v16 = vld [vmem:[%s1184_s7 + $0x200] sm:$0xff]  ;;  %341 = vst [vmem:[%s1189_s8 + $0x78] sm:$0xff] %v340_v15 }
  0x20   : > { %v344_v17 = vld [vmem:[%s1184_s7 + $0x220] sm:$0xff]  ;;  %343 = vst [vmem:[%s1189_s8 + $0x80] sm:$0xff] %v342_v16 }
  0x21   : > { %345 = vst [vmem:[%s1189_s8 + $0x88] sm:$0xff] %v344_v17  ;;  %v346_v18 = vld [vmem:[%s1184_s7 + $0x240] sm:$0xff] }
  0x22   : > { %v348_v19 = vld [vmem:[%s1184_s7 + $0x260] sm:$0xff]  ;;  %347 = vst [vmem:[%s1189_s8 + $0x90] sm:$0xff] %v346_v18 }
  0x23   : > { %v350_v20 = vld [vmem:[%s1184_s7 + $0x280] sm:$0xff]  ;;  %349 = vst [vmem:[%s1189_s8 + $0x98] sm:$0xff] %v348_v19 }
  0x24   : > { %351 = vst [vmem:[%s1189_s8 + $0xa0] sm:$0xff] %v350_v20  ;;  %v352_v21 = vld [vmem:[%s1184_s7 + $0x2a0] sm:$0xff] }
  0x25   : > { %v354_v22 = vld [vmem:[%s1184_s7 + $0x2c0] sm:$0xff]  ;;  %353 = vst [vmem:[%s1189_s8 + $0xa8] sm:$0xff] %v352_v21 }
  0x26   : > { %v356_v23 = vld [vmem:[%s1184_s7 + $0x2e0] sm:$0xff]  ;;  %355 = vst [vmem:[%s1189_s8 + $0xb0] sm:$0xff] %v354_v22 }
  0x27   : > { %357 = vst [vmem:[%s1189_s8 + $0xb8] sm:$0xff] %v356_v23  ;;  %v358_v24 = vld [vmem:[%s1184_s7 + $0x300] sm:$0xff] }
  0x28   : > { %v360_v25 = vld [vmem:[%s1184_s7 + $0x320] sm:$0xff]  ;;  %359 = vst [vmem:[%s1189_s8 + $0xc0] sm:$0xff] %v358_v24 }
  0x29   : > { %v362_v26 = vld [vmem:[%s1184_s7 + $0x340] sm:$0xff]  ;;  %361 = vst [vmem:[%s1189_s8 + $0xc8] sm:$0xff] %v360_v25 }
  0x2a   : > { %363 = vst [vmem:[%s1189_s8 + $0xd0] sm:$0xff] %v362_v26  ;;  %v364_v27 = vld [vmem:[%s1184_s7 + $0x360] sm:$0xff] }
  0x2b   : > { %v366_v28 = vld [vmem:[%s1184_s7 + $0x380] sm:$0xff]  ;;  %365 = vst [vmem:[%s1189_s8 + $0xd8] sm:$0xff] %v364_v27 }
  0x2c   : > { %v368_v29 = vld [vmem:[%s1184_s7 + $0x3a0] sm:$0xff]  ;;  %367 = vst [vmem:[%s1189_s8 + $0xe0] sm:$0xff] %v366_v28 }
  0x2d   : > { %369 = vst [vmem:[%s1189_s8 + $0xe8] sm:$0xff] %v368_v29  ;;  %v370_v30 = vld [vmem:[%s1184_s7 + $0x3c0] sm:$0xff] }
  0x2e   : > { %v372_v31 = vld [vmem:[%s1184_s7 + $0x3e0] sm:$0xff]  ;;  %371 = vst [vmem:[%s1189_s8 + $0xf0] sm:$0xff] %v370_v30 }
  0x2f   : > { %373 = vst [vmem:[%s1189_s8 + $0xf8] sm:$0xff] %v372_v31 }
  0x30 PF: > { %p934_p6 = scmp.ge.s32.totalorder %s1109_s22, 1  ;;  %p407_p7 = scmp.lt.s32.totalorder %s1109_s22, 5 }
  0x32   : > { %p408_p8 = pnand %p934_p6, %p407_p7 }
  0x33   : > { %s414_s9 = sand.u32 (!%p408_p8), 1, %s1093_s18   ;;  %s936_s14 = sshll.u32 (!%p408_p8), %s1101_s20, 1 }
  0x34   : > { %411 = sbr.rel (%p408_p8) target bundleno = 328 (0x148), region = 74  ;;  %s935_s12 = sshll.u32 (!%p408_p8), %s414_s9, 8 }
  0x35   : > { %s1262_s13 = scalar_lea.vmem (!%p408_p8), [#allocation2], %s935_s12  ;;  %p474_p9 = scmp.lt.s32.totalorder (!%p408_p8), %s936_s14, 7 }
  0x39   : > { %v1258_v32 = vld [vmem:[%s1331_s0] sm:$0xff]  ;;  %v1021_v34 = vld [vmem:[%s1262_s13 + $0x74] ss:$8 sps:$4 sm:$0xff]   ;;  %v1023_v35 = vld [vmem:[%s1262_s13 + $0x70] ss:$8 sps:$4 sm:$0xff]   ;;  %v746_v3 = vlaneseq  ;;  %s1344_s14 = smov (!%p474_p9, %s936_s14), 7 }
  0x3a   : > { %v943_v33 = vcombine.high %v1258_v32, %v1258_v32  ;;  %703 = vmatprep.subr.bf16.mxu0 %v1021_v34  ;;  %v1024_v36 = vld [vmem:[%s1262_s13 + $0x64] ss:$8 sps:$4 sm:$0xff]   ;;  %v1026_v37 = vld [vmem:[%s1262_s13 + $0x60] ss:$8 sps:$4 sm:$0xff]   ;;  %v1027_v38 = vld [vmem:[%s1262_s13 + $0x54] ss:$8 sps:$4 sm:$0xff]   ;;  %v942_v2 = vcombine.low %v1258_v32, %v1258_v32  ;;  %s476_s17 = scalar_lea.vmem %s1333_s2, %s1344_s14  ;;  %s481_s27 = scalar_lea.vmem %s1334_s3, %s1344_s14 }
  0x3b   : > { %704 = vmatpush1.bf16.msra.mxu0 %v1023_v35  ;;  %v1029_v39 = vld [vmem:[%s1262_s13 + $0x50] ss:$8 sps:$4 sm:$0xff]   ;;  %v1030_v40 = vld [vmem:[%s1262_s13 + $0x44] ss:$8 sps:$4 sm:$0xff]   ;;  %v1032_v41 = vld [vmem:[%s1262_s13 + $0x40] ss:$8 sps:$4 sm:$0xff]  }
  0x3c   : > { %735 = vmatprep.mubr.bf16.mxu0 %v943_v33  ;;  %705 = vmatprep.subr.bf16.mxu0 %v1024_v36  ;;  %v1033_v42 = vld [vmem:[%s1262_s13 + $0x34] ss:$8 sps:$4 sm:$0xff]   ;;  %v1035_v43 = vld [vmem:[%s1262_s13 + $0x30] ss:$8 sps:$4 sm:$0xff]   ;;  %v1036_v44 = vld [vmem:[%s1262_s13 + $0x24] ss:$8 sps:$4 sm:$0xff]  }
  0x3d   : > { %v1038_v45 = vld [vmem:[%s1262_s13 + $0x20] ss:$8 sps:$4 sm:$0xff]   ;;  %v1039_v46 = vld [vmem:[%s1262_s13 + $0x14] ss:$8 sps:$4 sm:$0xff]   ;;  %v1041_v47 = vld [vmem:[%s1262_s13 + $0x10] ss:$8 sps:$4 sm:$0xff]  }
  0x3e   : > { %v1042_v48 = vld [vmem:[%s1262_s13 + $0x4] ss:$8 sps:$4 sm:$0xff]   ;;  %v1044_v49 = vld [vmem:[%s1262_s13] ss:$8 sps:$4 sm:$0xff]   ;;  %v1045_v50 = vld [vmem:[%s1262_s13 + $0xf4] ss:$8 sps:$4 sm:$0xff]  }
  0x3f   : > { %706 = vmatpush1.bf16.msra.mxu0 %v1026_v37  ;;  %v1047_v51 = vld [vmem:[%s1262_s13 + $0xf0] ss:$8 sps:$4 sm:$0xff]   ;;  %v1048_v52 = vld [vmem:[%s1262_s13 + $0xe4] ss:$8 sps:$4 sm:$0xff]   ;;  %v1050_v53 = vld [vmem:[%s1262_s13 + $0xe0] ss:$8 sps:$4 sm:$0xff]  }
  0x40   : > { %707 = vmatprep.subr.bf16.mxu0 %v1027_v38  ;;  %v1051_v54 = vld [vmem:[%s1262_s13 + $0xd4] ss:$8 sps:$4 sm:$0xff]   ;;  %v1053_v55 = vld [vmem:[%s1262_s13 + $0xd0] ss:$8 sps:$4 sm:$0xff]   ;;  %v1054_v56 = vld [vmem:[%s1262_s13 + $0xc4] ss:$8 sps:$4 sm:$0xff]  }
  0x41   : > { %v1056_v57 = vld [vmem:[%s1262_s13 + $0xc0] ss:$8 sps:$4 sm:$0xff]   ;;  %v1057_v58 = vld [vmem:[%s1262_s13 + $0xb4] ss:$8 sps:$4 sm:$0xff]   ;;  %v1059_v59 = vld [vmem:[%s1262_s13 + $0xb0] ss:$8 sps:$4 sm:$0xff]  }
  0x42   : > { %v1060_v60 = vld [vmem:[%s1262_s13 + $0xa4] ss:$8 sps:$4 sm:$0xff]   ;;  %v1062_v61 = vld [vmem:[%s1262_s13 + $0xa0] ss:$8 sps:$4 sm:$0xff]   ;;  %v1063_v62 = vld [vmem:[%s1262_s13 + $0x94] ss:$8 sps:$4 sm:$0xff]  }
  0x43   : > { %708 = vmatpush1.bf16.msra.mxu0 %v1029_v39  ;;  %v1065_v63 = vld [vmem:[%s1262_s13 + $0x90] ss:$8 sps:$4 sm:$0xff]   ;;  %v1066_v0 = vld [vmem:[%s1262_s13 + $0x84] ss:$8 sps:$4 sm:$0xff]   ;;  %v1068_v1 = vld [vmem:[%s1262_s13 + $0x80] ss:$8 sps:$4 sm:$0xff]  }
  0x44   : > { %709 = vmatprep.subr.bf16.mxu0 %v1030_v40  ;;  %v747_v4 = vshrl.u32 %v746_v3, 7  ;;  %s939_s18 = sshll.u32 %s1344_s14, 2  ;;  %v744_v6 = vld [vmem:[%s476_s17] sm:$0x3] }
  0x45   : > { %s491_s29 = scalar_lea.vmem %s1335_s4, %s939_s18  ;;  %v758_v8 = vld [vmem:[%s481_s27] sm:$0x3]  ;;  %s501_s7 = scalar_lea.vmem %s1336_s5, %s939_s18 }
  0x46   : > { %v748_v5 = vsub.s32 0, %v747_v4  ;;  %v752_v7 = vsub.s32 1, %v747_v4  ;;  %v772_v10 = vld [vmem:[%s491_s29] sm:$0xff] }
  0x47   : > { %710 = vmatpush1.bf16.msra.mxu0 %v1032_v41  ;;  %v773_v15 = vunpack.c.l.bf16 %v772_v10  ;;  %v774_v20 = vunpack.c.h.bf16 %v772_v10 }
  0x48   : > { %711 = vmatprep.subr.bf16.mxu0 %v1033_v42  ;;  %v749_v9 = vrot.slane %v744_v6, %v748_v5  ;;  %v763_v11 = vrot.slane %v758_v8, %v748_v5  ;;  %v753_v12 = vrot.slane %v744_v6, %v752_v7  ;;  %v767_v16 = vrot.slane %v758_v8, %v752_v7 }
  0x4b   : > { %712 = vmatpush1.bf16.msra.mxu0 %v1035_v43 }
  0x4c   : > { %713 = vmatprep.subr.bf16.mxu0 %v1036_v44 }
  0x4f   : > { %714 = vmatpush1.bf16.msra.mxu0 %v1038_v45 }
  0x50   : > { %715 = vmatprep.subr.bf16.mxu0 %v1039_v46 }
  0x53   : > { %716 = vmatpush1.bf16.msra.mxu0 %v1041_v47 }
  0x54   : > { %717 = vmatprep.subr.bf16.mxu0 %v1042_v48 }
  0x57   : > { %718 = vmatpush1.bf16.msra.mxu0 %v1044_v49 }
  0x58   : > { %719 = vmatprep.subr.bf16.mxu0 %v1045_v50 }
  0x5b   : > { %720 = vmatpush2.bf16.msra.mxu0 %v1047_v51 }
  0x5c   : > { %721 = vmatprep.subr.bf16.mxu0 %v1048_v52 }
  0x5f   : > { %722 = vmatpush2.bf16.msra.mxu0 %v1050_v53 }
  0x60   : > { %723 = vmatprep.subr.bf16.mxu0 %v1051_v54 }
  0x63   : > { %724 = vmatpush2.bf16.msra.mxu0 %v1053_v55 }
  0x64   : > { %725 = vmatprep.subr.bf16.mxu0 %v1054_v56 }
  0x67   : > { %726 = vmatpush2.bf16.msra.mxu0 %v1056_v57 }
  0x68   : > { %727 = vmatprep.subr.bf16.mxu0 %v1057_v58 }
  0x6b   : > { %728 = vmatpush2.bf16.msra.mxu0 %v1059_v59 }
  0x6c   : > { %729 = vmatprep.subr.bf16.mxu0 %v1060_v60 }
  0x6f   : > { %730 = vmatpush2.bf16.msra.mxu0 %v1062_v61 }
  0x70   : > { %731 = vmatprep.subr.bf16.mxu0 %v1063_v62 }
  0x73   : > { %732 = vmatpush2.bf16.msra.mxu0 %v1065_v63 }
  0x74   : > { %733 = vmatprep.subr.bf16.mxu0 %v1066_v0 }
  0x77   : > { %734 = vmatpush2.bf16.msra.mxu0 %v1068_v1 }
  0x7a   : > { %736 = vmatmul.mubr.bf16.vlgmr.msra.gmra.mxu0 %v942_v2 }
 0x13a   : > { %v737_v13 = vpop.f32.mrf.mxu0 }
 0x13b   : > { %v756_v14 = vmul.f32 %v749_v9, %v737_v13 }
 0x13c   : > { %v739_v17 = vpop.f32.mrf.mxu0 }
 0x13d   : > { %v770_v18 = vadd.f32 %v763_v11, %v756_v14  ;;  %v757_v19 = vmul.f32 %v753_v12, %v739_v17 }
 0x13e   : > { %v741_v21 = vpop.f32.mrf.mxu0 }
 0x13f   : > { %v775_v22 = vadd.f32 %v773_v15, %v770_v18  ;;  %v771_v23 = vadd.f32 %v767_v16, %v757_v19 }
 0x140   : > { %v742_v24 = vpop.f32.mrf.mxu0 }
 0x141   : > { %v776_v25 = vadd.f32 %v774_v20, %v771_v23  ;;  %v777_v26 = vmax.f32 %v775_v22, 0.0 }
 0x143   : > { %v778_v27 = vmax.f32 %v776_v25, 0.0 }
 0x145   : > { %v980_v28 = vpack.c.bf16 %v778_v27, %v777_v26 }
 0x147   : > { %787 = vst [vmem:[%s501_s7] sm:$0xff] %v980_v28 }
 0x148 PF: > { %s15_s22 = sadd.s32 1, %s1109_s22   ;;  %s1337_s18 = smov %s1097_s19 }
 0x149   : > { %p12_p10 = scmp.ge.s32.totalorder %s15_s22, 6   ;;  %s1338_s19 = smov %s1176_s26 }
 0x14a   : > { %s1339_s20 = smov %s1105_s21  ;;  %s1340_s21 = smov %s1342_s23 }
 0x14b   :  { %14 = sbr.rel (!%p12_p10) target bundleno = 3 (0x3), region = 125 }

// kernel: resnet_forward.73
= control target key start
LH: loop header
LB: loop body
LE: loop exit
PB: predicated region body
PF: predicated region fallthrough
CT: control target
= control target key end

     0   :  { %s1804_s1 = inlined_call_operand.vmem [shape: bf16[1024,256], index: 1, kind: input, shape index: {}]   ;;  %s1805_s0 = inlined_call_operand.vmem [shape: bf16[8,1024], index: 0, kind: input, shape index: {}]   ;;  %s1806_s2 = inlined_call_operand.vmem [shape: f32[1,256], index: 2, kind: input, shape index: {}]   ;;  %s1807_s3 = inlined_call_operand.vmem [shape: f32[1,256], index: 3, kind: input, shape index: {}]   ;;  %s1808_s4 = inlined_call_operand.vmem [shape: bf16[8,256], index: 4, kind: output, shape index: {}]  }
   0x1   :  { %v1162_v0 = vld [vmem:[%s1804_s1 + $0x74] ss:$8 sps:$4 sm:$0xff]   ;;  %v1166_v2 = vld [vmem:[%s1804_s1 + $0x70] ss:$8 sps:$4 sm:$0xff]   ;;  %v1168_v4 = vld [vmem:[%s1804_s1 + $0x64] ss:$8 sps:$4 sm:$0xff]  }
   0x2   :  { %v1164_v1 = vld [vmem:[%s1804_s1 + $0x174] ss:$8 sps:$4 sm:$0xff]   ;;  %817 = vmatprep.subr.bf16.mxu0 %v1162_v0  ;;  %v1167_v3 = vld [vmem:[%s1804_s1 + $0x170] ss:$8 sps:$4 sm:$0xff]   ;;  %v1170_v5 = vld [vmem:[%s1804_s1 + $0x164] ss:$8 sps:$4 sm:$0xff]  }
   0x3   :  { %858 = vmatprep.subr.bf16.mxu1 %v1164_v1  ;;  %818 = vmatpush1.bf16.msra.mxu0 %v1166_v2  ;;  %v1172_v6 = vld [vmem:[%s1804_s1 + $0x60] ss:$8 sps:$4 sm:$0xff]   ;;  %v1174_v8 = vld [vmem:[%s1804_s1 + $0x54] ss:$8 sps:$4 sm:$0xff]   ;;  %v1178_v10 = vld [vmem:[%s1804_s1 + $0x50] ss:$8 sps:$4 sm:$0xff]  }
   0x4   :  { %859 = vmatpush1.bf16.msra.mxu1 %v1167_v3  ;;  %819 = vmatprep.subr.bf16.mxu0 %v1168_v4  ;;  %v1173_v7 = vld [vmem:[%s1804_s1 + $0x160] ss:$8 sps:$4 sm:$0xff]   ;;  %v1176_v9 = vld [vmem:[%s1804_s1 + $0x154] ss:$8 sps:$4 sm:$0xff]   ;;  %v1179_v11 = vld [vmem:[%s1804_s1 + $0x150] ss:$8 sps:$4 sm:$0xff]  }
   0x5   :  { %860 = vmatprep.subr.bf16.mxu1 %v1170_v5  ;;  %v1180_v12 = vld [vmem:[%s1804_s1 + $0x44] ss:$8 sps:$4 sm:$0xff]   ;;  %v1184_v14 = vld [vmem:[%s1804_s1 + $0x40] ss:$8 sps:$4 sm:$0xff]   ;;  %v1186_v16 = vld [vmem:[%s1804_s1 + $0x34] ss:$8 sps:$4 sm:$0xff]  }
   0x6   :  { %v1182_v13 = vld [vmem:[%s1804_s1 + $0x144] ss:$8 sps:$4 sm:$0xff]   ;;  %v1185_v15 = vld [vmem:[%s1804_s1 + $0x140] ss:$8 sps:$4 sm:$0xff]   ;;  %v1188_v17 = vld [vmem:[%s1804_s1 + $0x134] ss:$8 sps:$4 sm:$0xff]  }
   0x7   :  { %820 = vmatpush1.bf16.msra.mxu0 %v1172_v6  ;;  %v1190_v18 = vld [vmem:[%s1804_s1 + $0x30] ss:$8 sps:$4 sm:$0xff]   ;;  %v1192_v20 = vld [vmem:[%s1804_s1 + $0x24] ss:$8 sps:$4 sm:$0xff]   ;;  %v1196_v22 = vld [vmem:[%s1804_s1 + $0x20] ss:$8 sps:$4 sm:$0xff]  }
   0x8   :  { %861 = vmatpush1.bf16.msra.mxu1 %v1173_v7  ;;  %821 = vmatprep.subr.bf16.mxu0 %v1174_v8  ;;  %v1191_v19 = vld [vmem:[%s1804_s1 + $0x130] ss:$8 sps:$4 sm:$0xff]   ;;  %v1194_v21 = vld [vmem:[%s1804_s1 + $0x124] ss:$8 sps:$4 sm:$0xff]   ;;  %v1197_v23 = vld [vmem:[%s1804_s1 + $0x120] ss:$8 sps:$4 sm:$0xff]  }
   0x9   :  { %862 = vmatprep.subr.bf16.mxu1 %v1176_v9  ;;  %v1198_v24 = vld [vmem:[%s1804_s1 + $0x14] ss:$8 sps:$4 sm:$0xff]   ;;  %v1202_v26 = vld [vmem:[%s1804_s1 + $0x10] ss:$8 sps:$4 sm:$0xff]   ;;  %v1204_v28 = vld [vmem:[%s1804_s1 + $0x4] ss:$8 sps:$4 sm:$0xff]  }
   0xa   :  { %v1200_v25 = vld [vmem:[%s1804_s1 + $0x114] ss:$8 sps:$4 sm:$0xff]   ;;  %v1203_v27 = vld [vmem:[%s1804_s1 + $0x110] ss:$8 sps:$4 sm:$0xff]   ;;  %v1206_v29 = vld [vmem:[%s1804_s1 + $0x104] ss:$8 sps:$4 sm:$0xff]  }
   0xb   :  { %822 = vmatpush1.bf16.msra.mxu0 %v1178_v10  ;;  %v1208_v30 = vld [vmem:[%s1804_s1] ss:$8 sps:$4 sm:$0xff]   ;;  %v1210_v32 = vld [vmem:[%s1804_s1 + $0xf4] ss:$8 sps:$4 sm:$0xff]   ;;  %v1214_v34 = vld [vmem:[%s1804_s1 + $0xf0] ss:$8 sps:$4 sm:$0xff]  }
   0xc   :  { %863 = vmatpush1.bf16.msra.mxu1 %v1179_v11  ;;  %823 = vmatprep.subr.bf16.mxu0 %v1180_v12  ;;  %v1209_v31 = vld [vmem:[%s1804_s1 + $0x100] ss:$8 sps:$4 sm:$0xff]   ;;  %v1212_v33 = vld [vmem:[%s1804_s1 + $0x1f4] ss:$8 sps:$4 sm:$0xff]   ;;  %v1215_v35 = vld [vmem:[%s1804_s1 + $0x1f0] ss:$8 sps:$4 sm:$0xff]  }
   0xd   :  { %864 = vmatprep.subr.bf16.mxu1 %v1182_v13  ;;  %v1216_v36 = vld [vmem:[%s1804_s1 + $0xe4] ss:$8 sps:$4 sm:$0xff]   ;;  %v1220_v38 = vld [vmem:[%s1804_s1 + $0xe0] ss:$8 sps:$4 sm:$0xff]   ;;  %v1222_v40 = vld [vmem:[%s1804_s1 + $0xd4] ss:$8 sps:$4 sm:$0xff]  }
   0xe   :  { %v1218_v37 = vld [vmem:[%s1804_s1 + $0x1e4] ss:$8 sps:$4 sm:$0xff]   ;;  %v1221_v39 = vld [vmem:[%s1804_s1 + $0x1e0] ss:$8 sps:$4 sm:$0xff]   ;;  %v1224_v41 = vld [vmem:[%s1804_s1 + $0x1d4] ss:$8 sps:$4 sm:$0xff]  }
   0xf   :  { %824 = vmatpush1.bf16.msra.mxu0 %v1184_v14  ;;  %v1226_v42 = vld [vmem:[%s1804_s1 + $0xd0] ss:$8 sps:$4 sm:$0xff]   ;;  %v1228_v44 = vld [vmem:[%s1804_s1 + $0xc4] ss:$8 sps:$4 sm:$0xff]   ;;  %v1232_v49 = vld [vmem:[%s1804_s1 + $0xc0] ss:$8 sps:$4 sm:$0xff]  }
  0x10   :  { %865 = vmatpush1.bf16.msra.mxu1 %v1185_v15  ;;  %825 = vmatprep.subr.bf16.mxu0 %v1186_v16  ;;  %v1227_v43 = vld [vmem:[%s1804_s1 + $0x1d0] ss:$8 sps:$4 sm:$0xff]   ;;  %v1230_v45 = vld [vmem:[%s1804_s1 + $0x1c4] ss:$8 sps:$4 sm:$0xff]   ;;  %v1233_v50 = vld [vmem:[%s1804_s1 + $0x1c0] ss:$8 sps:$4 sm:$0xff]  }
  0x11   :  { %866 = vmatprep.subr.bf16.mxu1 %v1188_v17  ;;  %v17_v46 = vld [vmem:[%s1805_s0] sm:$0xff]  ;;  %v18_v48 = vld [vmem:[%s1805_s0 + $0x8] sm:$0xff]  ;;  %v1234_v52 = vld [vmem:[%s1804_s1 + $0xb4] ss:$8 sps:$4 sm:$0xff]  }
  0x12   :  { %v1025_v47 = vcombine.high %v17_v46, %v17_v46  ;;  %v1027_v51 = vcombine.high %v18_v48, %v18_v48  ;;  %v1236_v53 = vld [vmem:[%s1804_s1 + $0x1b4] ss:$8 sps:$4 sm:$0xff]   ;;  %v1238_v54 = vld [vmem:[%s1804_s1 + $0xb0] ss:$8 sps:$4 sm:$0xff]   ;;  %v1240_v56 = vld [vmem:[%s1804_s1 + $0xa4] ss:$8 sps:$4 sm:$0xff]   ;;  %v1024_v6 = vcombine.low %v17_v46, %v17_v46  ;;  %v1026_v7 = vcombine.low %v18_v48, %v18_v48 }
  0x13   :  { %826 = vmatpush1.bf16.msra.mxu0 %v1190_v18  ;;  %v1239_v55 = vld [vmem:[%s1804_s1 + $0x1b0] ss:$8 sps:$4 sm:$0xff]   ;;  %v1242_v57 = vld [vmem:[%s1804_s1 + $0x1a4] ss:$8 sps:$4 sm:$0xff]   ;;  %v1244_v58 = vld [vmem:[%s1804_s1 + $0xa0] ss:$8 sps:$4 sm:$0xff]  }
  0x14   :  { %867 = vmatpush1.bf16.msra.mxu1 %v1191_v19  ;;  %827 = vmatprep.subr.bf16.mxu0 %v1192_v20  ;;  %v1245_v59 = vld [vmem:[%s1804_s1 + $0x1a0] ss:$8 sps:$4 sm:$0xff]   ;;  %v1246_v60 = vld [vmem:[%s1804_s1 + $0x94] ss:$8 sps:$4 sm:$0xff]   ;;  %v1250_v62 = vld [vmem:[%s1804_s1 + $0x90] ss:$8 sps:$4 sm:$0xff]  }
  0x15   :  { %868 = vmatprep.subr.bf16.mxu1 %v1194_v21  ;;  %849 = vmatprep.mubr.bf16.mxu0 %v1025_v47  ;;  %v1248_v61 = vld [vmem:[%s1804_s1 + $0x194] ss:$8 sps:$4 sm:$0xff]   ;;  %v1251_v63 = vld [vmem:[%s1804_s1 + $0x190] ss:$8 sps:$4 sm:$0xff]   ;;  %v1252_v0 = vld [vmem:[%s1804_s1 + $0x84] ss:$8 sps:$4 sm:$0xff]  }
  0x16   :  { %890 = vmatprep.mubr.bf16.mxu1 %v1027_v51  ;;  %v1254_v1 = vld [vmem:[%s1804_s1 + $0x184] ss:$8 sps:$4 sm:$0xff]   ;;  %v1256_v2 = vld [vmem:[%s1804_s1 + $0x80] ss:$8 sps:$4 sm:$0xff]   ;;  %v1264_v4 = vld [vmem:[%s1804_s1 + $0x274] ss:$8 sps:$4 sm:$0xff]  }
  0x17   :  { %828 = vmatpush1.bf16.msra.mxu0 %v1196_v22  ;;  %v1257_v3 = vld [vmem:[%s1804_s1 + $0x180] ss:$8 sps:$4 sm:$0xff]   ;;  %v1267_v5 = vld [vmem:[%s1804_s1 + $0x374] ss:$8 sps:$4 sm:$0xff]   ;;  %v1262_v8 = vld [vmem:[%s1804_s1 + $0x270] ss:$8 sps:$4 sm:$0xff]  }
  0x18   :  { %869 = vmatpush1.bf16.msra.mxu1 %v1197_v23  ;;  %829 = vmatprep.subr.bf16.mxu0 %v1198_v24  ;;  %v1265_v9 = vld [vmem:[%s1804_s1 + $0x370] ss:$8 sps:$4 sm:$0xff]   ;;  %v1270_v10 = vld [vmem:[%s1804_s1 + $0x264] ss:$8 sps:$4 sm:$0xff]   ;;  %v1268_v12 = vld [vmem:[%s1804_s1 + $0x260] ss:$8 sps:$4 sm:$0xff]  }
  0x19   :  { %870 = vmatprep.subr.bf16.mxu1 %v1200_v25  ;;  %v1273_v11 = vld [vmem:[%s1804_s1 + $0x364] ss:$8 sps:$4 sm:$0xff]   ;;  %v1271_v13 = vld [vmem:[%s1804_s1 + $0x360] ss:$8 sps:$4 sm:$0xff]   ;;  %v1276_v14 = vld [vmem:[%s1804_s1 + $0x254] ss:$8 sps:$4 sm:$0xff]  }
  0x1a   :  { %v1279_v15 = vld [vmem:[%s1804_s1 + $0x354] ss:$8 sps:$4 sm:$0xff]   ;;  %v1274_v16 = vld [vmem:[%s1804_s1 + $0x250] ss:$8 sps:$4 sm:$0xff]   ;;  %v1282_v18 = vld [vmem:[%s1804_s1 + $0x244] ss:$8 sps:$4 sm:$0xff]  }
  0x1b   :  { %830 = vmatpush1.bf16.msra.mxu0 %v1202_v26  ;;  %v1277_v17 = vld [vmem:[%s1804_s1 + $0x350] ss:$8 sps:$4 sm:$0xff]   ;;  %v1285_v19 = vld [vmem:[%s1804_s1 + $0x344] ss:$8 sps:$4 sm:$0xff]   ;;  %v1280_v20 = vld [vmem:[%s1804_s1 + $0x240] ss:$8 sps:$4 sm:$0xff]  }
  0x1c   :  { %871 = vmatpush1.bf16.msra.mxu1 %v1203_v27  ;;  %831 = vmatprep.subr.bf16.mxu0 %v1204_v28  ;;  %v1283_v21 = vld [vmem:[%s1804_s1 + $0x340] ss:$8 sps:$4 sm:$0xff]   ;;  %v1288_v22 = vld [vmem:[%s1804_s1 + $0x234] ss:$8 sps:$4 sm:$0xff]   ;;  %v1286_v24 = vld [vmem:[%s1804_s1 + $0x230] ss:$8 sps:$4 sm:$0xff]  }
  0x1d   :  { %872 = vmatprep.subr.bf16.mxu1 %v1206_v29  ;;  %v1291_v23 = vld [vmem:[%s1804_s1 + $0x334] ss:$8 sps:$4 sm:$0xff]   ;;  %v1289_v25 = vld [vmem:[%s1804_s1 + $0x330] ss:$8 sps:$4 sm:$0xff]   ;;  %v1294_v26 = vld [vmem:[%s1804_s1 + $0x224] ss:$8 sps:$4 sm:$0xff]  }
  0x1e   :  { %v1297_v27 = vld [vmem:[%s1804_s1 + $0x324] ss:$8 sps:$4 sm:$0xff]   ;;  %v1292_v28 = vld [vmem:[%s1804_s1 + $0x220] ss:$8 sps:$4 sm:$0xff]   ;;  %v1327_v51 = vld [vmem:[%s1804_s1 + $0x3d4] ss:$8 sps:$4 sm:$0xff]  }
  0x1f   :  { %832 = vmatpush1.bf16.msra.mxu0 %v1208_v30  ;;  %v1295_v29 = vld [vmem:[%s1804_s1 + $0x320] ss:$8 sps:$4 sm:$0xff]   ;;  %v1300_v30 = vld [vmem:[%s1804_s1 + $0x214] ss:$8 sps:$4 sm:$0xff]   ;;  %v1318_v46 = vld [vmem:[%s1804_s1 + $0x2e4] ss:$8 sps:$4 sm:$0xff]  }
  0x20   :  { %873 = vmatpush1.bf16.msra.mxu1 %v1209_v31  ;;  %833 = vmatprep.subr.bf16.mxu0 %v1210_v32  ;;  %v1303_v31 = vld [vmem:[%s1804_s1 + $0x314] ss:$8 sps:$4 sm:$0xff]   ;;  %v1321_v47 = vld [vmem:[%s1804_s1 + $0x3e4] ss:$8 sps:$4 sm:$0xff]   ;;  %v1316_v48 = vld [vmem:[%s1804_s1 + $0x2e0] ss:$8 sps:$4 sm:$0xff]  }
  0x21   :  { %874 = vmatprep.subr.bf16.mxu1 %v1212_v33  ;;  %v1666_v32 = vld [vmem:[%s1805_s0 + $0x10] sm:$0xff]  ;;  %v1671_v33 = vld [vmem:[%s1805_s0 + $0x18] sm:$0xff] }
  0x23   :  { %834 = vmatpush2.bf16.msra.mxu0 %v1214_v34  ;;  %v1029_v34 = vcombine.high %v1666_v32, %v1666_v32 }
  0x24   :  { %875 = vmatpush2.bf16.msra.mxu1 %v1215_v35  ;;  %835 = vmatprep.subr.bf16.mxu0 %v1216_v36  ;;  %v1031_v35 = vcombine.high %v1671_v33, %v1671_v33  ;;  %v1298_v36 = vld [vmem:[%s1804_s1 + $0x210] ss:$8 sps:$4 sm:$0xff]  }
  0x25   :  { %876 = vmatprep.subr.bf16.mxu1 %v1218_v37  ;;  %v1301_v37 = vld [vmem:[%s1804_s1 + $0x310] ss:$8 sps:$4 sm:$0xff]  }
  0x27   :  { %836 = vmatpush2.bf16.msra.mxu0 %v1220_v38  ;;  %v1306_v38 = vld [vmem:[%s1804_s1 + $0x204] ss:$8 sps:$4 sm:$0xff]  }
  0x28   :  { %877 = vmatpush2.bf16.msra.mxu1 %v1221_v39  ;;  %837 = vmatprep.subr.bf16.mxu0 %v1222_v40  ;;  %v1309_v39 = vld [vmem:[%s1804_s1 + $0x304] ss:$8 sps:$4 sm:$0xff]   ;;  %v1304_v40 = vld [vmem:[%s1804_s1 + $0x200] ss:$8 sps:$4 sm:$0xff]  }
  0x29   :  { %878 = vmatprep.subr.bf16.mxu1 %v1224_v41  ;;  %v1307_v41 = vld [vmem:[%s1804_s1 + $0x300] ss:$8 sps:$4 sm:$0xff]  }
  0x2b   :  { %838 = vmatpush2.bf16.msra.mxu0 %v1226_v42  ;;  %v1312_v42 = vld [vmem:[%s1804_s1 + $0x2f4] ss:$8 sps:$4 sm:$0xff]  }
  0x2c   :  { %879 = vmatpush2.bf16.msra.mxu1 %v1227_v43  ;;  %839 = vmatprep.subr.bf16.mxu0 %v1228_v44  ;;  %v1315_v43 = vld [vmem:[%s1804_s1 + $0x3f4] ss:$8 sps:$4 sm:$0xff]   ;;  %v1310_v44 = vld [vmem:[%s1804_s1 + $0x2f0] ss:$8 sps:$4 sm:$0xff]  }
  0x2d   :  { %880 = vmatprep.subr.bf16.mxu1 %v1230_v45  ;;  %v1313_v45 = vld [vmem:[%s1804_s1 + $0x3f0] ss:$8 sps:$4 sm:$0xff]  }
  0x2f   :  { %840 = vmatpush2.bf16.msra.mxu0 %v1232_v49  ;;  %v1319_v49 = vld [vmem:[%s1804_s1 + $0x3e0] ss:$8 sps:$4 sm:$0xff]  }
  0x30   :  { %881 = vmatpush2.bf16.msra.mxu1 %v1233_v50  ;;  %841 = vmatprep.subr.bf16.mxu0 %v1234_v52  ;;  %v1324_v50 = vld [vmem:[%s1804_s1 + $0x2d4] ss:$8 sps:$4 sm:$0xff]   ;;  %v1322_v52 = vld [vmem:[%s1804_s1 + $0x2d0] ss:$8 sps:$4 sm:$0xff]  }
  0x31   :  { %882 = vmatprep.subr.bf16.mxu1 %v1236_v53  ;;  %v1325_v53 = vld [vmem:[%s1804_s1 + $0x3d0] ss:$8 sps:$4 sm:$0xff]  }
  0x33   :  { %842 = vmatpush2.bf16.msra.mxu0 %v1238_v54  ;;  %v1330_v54 = vld [vmem:[%s1804_s1 + $0x2c4] ss:$8 sps:$4 sm:$0xff]  }
  0x34   :  { %883 = vmatpush2.bf16.msra.mxu1 %v1239_v55  ;;  %843 = vmatprep.subr.bf16.mxu0 %v1240_v56  ;;  %v1333_v55 = vld [vmem:[%s1804_s1 + $0x3c4] ss:$8 sps:$4 sm:$0xff]   ;;  %v1328_v56 = vld [vmem:[%s1804_s1 + $0x2c0] ss:$8 sps:$4 sm:$0xff]  }
  0x35   :  { %884 = vmatprep.subr.bf16.mxu1 %v1242_v57  ;;  %v1331_v57 = vld [vmem:[%s1804_s1 + $0x3c0] ss:$8 sps:$4 sm:$0xff]  }
  0x37   :  { %844 = vmatpush2.bf16.msra.mxu0 %v1244_v58  ;;  %v1336_v58 = vld [vmem:[%s1804_s1 + $0x2b4] ss:$8 sps:$4 sm:$0xff]  }
  0x38   :  { %885 = vmatpush2.bf16.msra.mxu1 %v1245_v59  ;;  %845 = vmatprep.subr.bf16.mxu0 %v1246_v60  ;;  %v1339_v59 = vld [vmem:[%s1804_s1 + $0x3b4] ss:$8 sps:$4 sm:$0xff]   ;;  %v1334_v60 = vld [vmem:[%s1804_s1 + $0x2b0] ss:$8 sps:$4 sm:$0xff]  }
  0x39   :  { %886 = vmatprep.subr.bf16.mxu1 %v1248_v61  ;;  %v1337_v61 = vld [vmem:[%s1804_s1 + $0x3b0] ss:$8 sps:$4 sm:$0xff]  }
  0x3b   :  { %846 = vmatpush2.bf16.msra.mxu0 %v1250_v62  ;;  %v1342_v62 = vld [vmem:[%s1804_s1 + $0x2a4] ss:$8 sps:$4 sm:$0xff]  }
  0x3c   :  { %887 = vmatpush2.bf16.msra.mxu1 %v1251_v63  ;;  %847 = vmatprep.subr.bf16.mxu0 %v1252_v0  ;;  %v1345_v63 = vld [vmem:[%s1804_s1 + $0x3a4] ss:$8 sps:$4 sm:$0xff]   ;;  %v1340_v0 = vld [vmem:[%s1804_s1 + $0x2a0] ss:$8 sps:$4 sm:$0xff]  }
  0x3d   :  { %888 = vmatprep.subr.bf16.mxu1 %v1254_v1  ;;  %v1343_v1 = vld [vmem:[%s1804_s1 + $0x3a0] ss:$8 sps:$4 sm:$0xff]  }
  0x3f   :  { %848 = vmatpush2.bf16.msra.mxu0 %v1256_v2  ;;  %v1348_v2 = vld [vmem:[%s1804_s1 + $0x294] ss:$8 sps:$4 sm:$0xff]  }
  0x40   :  { %889 = vmatpush2.bf16.msra.mxu1 %v1257_v3  ;;  %899 = vmatprep.subr.bf16.mxu0 %v1264_v4  ;;  %v1351_v3 = vld [vmem:[%s1804_s1 + $0x394] ss:$8 sps:$4 sm:$0xff]   ;;  %v1346_v4 = vld [vmem:[%s1804_s1 + $0x290] ss:$8 sps:$4 sm:$0xff]  }
  0x41   :  { %940 = vmatprep.subr.bf16.mxu1 %v1267_v5  ;;  %v1349_v5 = vld [vmem:[%s1804_s1 + $0x390] ss:$8 sps:$4 sm:$0xff]  }
  0x42   :  { %850 = vmatmul.mubr.bf16.vlgmr.msra.gmra.mxu0 %v1024_v6  ;;  %v1354_v6 = vld [vmem:[%s1804_s1 + $0x284] ss:$8 sps:$4 sm:$0xff]  }
  0x43   :  { %891 = vmatmul.mubr.bf16.vlgmr.msra.gmra.mxu1 %v1026_v7  ;;  %900 = vmatpush1.bf16.msra.mxu0 %v1262_v8  ;;  %v1357_v7 = vld [vmem:[%s1804_s1 + $0x384] ss:$8 sps:$4 sm:$0xff]   ;;  %v1352_v8 = vld [vmem:[%s1804_s1 + $0x280] ss:$8 sps:$4 sm:$0xff]  }
  0x44   :  { %941 = vmatpush1.bf16.msra.mxu1 %v1265_v9  ;;  %901 = vmatprep.subr.bf16.mxu0 %v1270_v10  ;;  %v1355_v9 = vld [vmem:[%s1804_s1 + $0x380] ss:$8 sps:$4 sm:$0xff]   ;;  %v1028_v10 = vcombine.low %v1666_v32, %v1666_v32 }
  0x45   :  { %942 = vmatprep.subr.bf16.mxu1 %v1273_v11  ;;  %931 = vmatprep.mubr.bf16.mxu0 %v1029_v34  ;;  %v1030_v11 = vcombine.low %v1671_v33, %v1671_v33 }
  0x46   :  { %972 = vmatprep.mubr.bf16.mxu1 %v1031_v35 }
  0x47   :  { %902 = vmatpush1.bf16.msra.mxu0 %v1268_v12 }
  0x48   :  { %943 = vmatpush1.bf16.msra.mxu1 %v1271_v13  ;;  %903 = vmatprep.subr.bf16.mxu0 %v1276_v14 }
  0x49   :  { %944 = vmatprep.subr.bf16.mxu1 %v1279_v15 }
  0x4b   :  { %904 = vmatpush1.bf16.msra.mxu0 %v1274_v16 }
  0x4c   :  { %945 = vmatpush1.bf16.msra.mxu1 %v1277_v17  ;;  %905 = vmatprep.subr.bf16.mxu0 %v1282_v18 }
  0x4d   :  { %946 = vmatprep.subr.bf16.mxu1 %v1285_v19 }
  0x4f   :  { %906 = vmatpush1.bf16.msra.mxu0 %v1280_v20 }
  0x50   :  { %947 = vmatpush1.bf16.msra.mxu1 %v1283_v21  ;;  %907 = vmatprep.subr.bf16.mxu0 %v1288_v22  ;;  %v983_v21 = vlaneseq }
  0x51   :  { %948 = vmatprep.subr.bf16.mxu1 %v1291_v23 }
  0x52   :  { %v984_v22 = vshrl.u32 %v983_v21, 7 }
  0x53   :  { %908 = vmatpush1.bf16.msra.mxu0 %v1286_v24  ;;  %v981_v24 = vld [vmem:[%s1806_s2] sm:$0x3] }
  0x54   :  { %949 = vmatpush1.bf16.msra.mxu1 %v1289_v25  ;;  %909 = vmatprep.subr.bf16.mxu0 %v1294_v26  ;;  %v985_v23 = vsub.s32 0, %v984_v22  ;;  %v989_v25 = vsub.s32 1, %v984_v22 }
  0x55   :  { %950 = vmatprep.subr.bf16.mxu1 %v1297_v27 }
  0x57   :  { %910 = vmatpush1.bf16.msra.mxu0 %v1292_v28  ;;  %v995_v28 = vld [vmem:[%s1807_s3] sm:$0x3] }
  0x58   :  { %951 = vmatpush1.bf16.msra.mxu1 %v1295_v29  ;;  %911 = vmatprep.subr.bf16.mxu0 %v1300_v30  ;;  %v1000_v35 = vrot.slane %v995_v28, %v985_v23 }
  0x59   :  { %952 = vmatprep.subr.bf16.mxu1 %v1303_v31  ;;  %v986_v31 = vrot.slane %v981_v24, %v985_v23 }
  0x5b   :  { %912 = vmatpush1.bf16.msra.mxu0 %v1298_v36 }
  0x5c   :  { %953 = vmatpush1.bf16.msra.mxu1 %v1301_v37  ;;  %913 = vmatprep.subr.bf16.mxu0 %v1306_v38  ;;  %v990_v37 = vrot.slane %v981_v24, %v989_v25 }
  0x5d   :  { %954 = vmatprep.subr.bf16.mxu1 %v1309_v39 }
  0x5f   :  { %914 = vmatpush1.bf16.msra.mxu0 %v1304_v40 }
  0x60   :  { %955 = vmatpush1.bf16.msra.mxu1 %v1307_v41  ;;  %915 = vmatprep.subr.bf16.mxu0 %v1312_v42  ;;  %v1004_v42 = vrot.slane %v995_v28, %v989_v25 }
  0x61   :  { %956 = vmatprep.subr.bf16.mxu1 %v1315_v43 }
  0x63   :  { %916 = vmatpush2.bf16.msra.mxu0 %v1310_v44 }
  0x64   :  { %957 = vmatpush2.bf16.msra.mxu1 %v1313_v45  ;;  %917 = vmatprep.subr.bf16.mxu0 %v1318_v46 }
  0x65   :  { %958 = vmatprep.subr.bf16.mxu1 %v1321_v47 }
  0x67   :  { %918 = vmatpush2.bf16.msra.mxu0 %v1316_v48 }
  0x68   :  { %959 = vmatpush2.bf16.msra.mxu1 %v1319_v49  ;;  %919 = vmatprep.subr.bf16.mxu0 %v1324_v50 }
  0x69   :  { %960 = vmatprep.subr.bf16.mxu1 %v1327_v51 }
  0x6b   :  { %920 = vmatpush2.bf16.msra.mxu0 %v1322_v52 }
  0x6c   :  { %961 = vmatpush2.bf16.msra.mxu1 %v1325_v53  ;;  %921 = vmatprep.subr.bf16.mxu0 %v1330_v54 }
  0x6d   :  { %962 = vmatprep.subr.bf16.mxu1 %v1333_v55 }
  0x6f   :  { %922 = vmatpush2.bf16.msra.mxu0 %v1328_v56 }
  0x70   :  { %963 = vmatpush2.bf16.msra.mxu1 %v1331_v57  ;;  %923 = vmatprep.subr.bf16.mxu0 %v1336_v58 }
  0x71   :  { %964 = vmatprep.subr.bf16.mxu1 %v1339_v59 }
  0x73   :  { %924 = vmatpush2.bf16.msra.mxu0 %v1334_v60 }
  0x74   :  { %965 = vmatpush2.bf16.msra.mxu1 %v1337_v61  ;;  %925 = vmatprep.subr.bf16.mxu0 %v1342_v62 }
  0x75   :  { %966 = vmatprep.subr.bf16.mxu1 %v1345_v63 }
  0x77   :  { %926 = vmatpush2.bf16.msra.mxu0 %v1340_v0 }
  0x78   :  { %967 = vmatpush2.bf16.msra.mxu1 %v1343_v1  ;;  %927 = vmatprep.subr.bf16.mxu0 %v1348_v2 }
  0x79   :  { %968 = vmatprep.subr.bf16.mxu1 %v1351_v3 }
  0x7b   :  { %928 = vmatpush2.bf16.msra.mxu0 %v1346_v4 }
  0x7c   :  { %969 = vmatpush2.bf16.msra.mxu1 %v1349_v5  ;;  %929 = vmatprep.subr.bf16.mxu0 %v1354_v6 }
  0x7d   :  { %970 = vmatprep.subr.bf16.mxu1 %v1357_v7 }
  0x7f   :  { %930 = vmatpush2.bf16.msra.mxu0 %v1352_v8 }
  0x80   :  { %971 = vmatpush2.bf16.msra.mxu1 %v1355_v9 }
  0x82   :  { %932 = vmatmul.mubr.bf16.vlgmr.msra.gmra.mxu0 %v1028_v10 }
  0x83   :  { %973 = vmatmul.mubr.bf16.vlgmr.msra.gmra.mxu1 %v1030_v11 }
 0x102   :  { %v851_v12 = vpop.f32.mrf.mxu0 }
 0x103   :  { %v892_v13 = vpop.f32.mrf.mxu1 }
 0x104   :  { %v893_v14 = vadd.f32 %v892_v13, %v851_v12  ;;  %v853_v15 = vpop.f32.mrf.mxu0 }
 0x105   :  { %v894_v16 = vpop.f32.mrf.mxu1 }
 0x106   :  { %v855_v17 = vpop.f32.mrf.mxu0  ;;  %v895_v29 = vadd.f32 %v894_v16, %v853_v15 }
 0x107   :  { %v896_v18 = vpop.f32.mrf.mxu1 }
 0x108   :  { %v856_v19 = vpop.f32.mrf.mxu0 }
 0x109   :  { %v897_v20 = vpop.f32.mrf.mxu1 }
 0x142   :  { %v933_v26 = vpop.f32.mrf.mxu0 }
 0x143   :  { %v974_v27 = vpop.f32.mrf.mxu1  ;;  %v934_v30 = vadd.f32 %v933_v26, %v893_v14 }
 0x144   :  { %v935_v32 = vpop.f32.mrf.mxu0 }
 0x145   :  { %v976_v33 = vpop.f32.mrf.mxu1  ;;  %v975_v34 = vadd.f32 %v974_v27, %v934_v30  ;;  %v936_v36 = vadd.f32 %v935_v32, %v895_v29 }
 0x146   :  { %v937_v38 = vpop.f32.mrf.mxu0 }
 0x147   :  { %v978_v39 = vpop.f32.mrf.mxu1  ;;  %v993_v40 = vmul.f32 %v986_v31, %v975_v34  ;;  %v977_v41 = vadd.f32 %v976_v33, %v936_v36 }
 0x148   :  { %v938_v43 = vpop.f32.mrf.mxu0 }
 0x149   :  { %v979_v44 = vpop.f32.mrf.mxu1  ;;  %v1007_v45 = vadd.f32 %v1000_v35, %v993_v40  ;;  %v994_v46 = vmul.f32 %v990_v37, %v977_v41 }
 0x14b   :  { %v1008_v47 = vadd.f32 %v1004_v42, %v994_v46  ;;  %v1009_v48 = vmax.f32 %v1007_v45, 0.0 }
 0x14d   :  { %v1010_v49 = vmax.f32 %v1008_v47, 0.0 }
 0x14f   :  { %v1161_v50 = vpack.c.bf16 %v1010_v49, %v1009_v48 }
 0x151   :  { %1019 = vst [vmem:[%s1808_s4] sm:$0xff] %v1161_v50 }

</bundles_post_ra>
